<compile_context>
chip_gen: v5e
topology: v5e:2x2
jax: 0.10.0
libtpu: 0.0.40
codegen_flags: <defaults>
</compile_context>

<pallas_src>
import jax
import jax.numpy as jnp
from jax import lax
from jax.experimental import pallas as pl
from jax.experimental.pallas import tpu as pltpu

PAD = 0  # lib.Constants.PAD
BOS = 2  # lib.Constants.BOS


def _round_up(x, m):
    return ((x + m - 1) // m) * m


# ----------------------------------------------------------------------------
# Fused decoder kernel (whole sequence, single invocation)
# ----------------------------------------------------------------------------
def _build_decoder_kernel(num_layers, has_attn, input_feed, seq_len, unroll_full):
    L = num_layers
    T = seq_len
    f32, bf16 = jnp.float32, jnp.bfloat16

    def kernel(*refs):
        it = iter(refs)
        dec_in_ref = next(it)                      # (T*Bp, E)     bf16
        out0_ref = next(it)                        # (Bp, H)       f32
        h0_ref = next(it)                          # (L, 2, Bp, H) f32
        c0_ref = next(it)                          # (L, 2, Bp, H) f32
        if has_attn:
            ctx_tr_ref = next(it)                  # (Bp, S, H)    bf16
            ctx_tx_ref = next(it)                  # (Bp, S, H)    bf16
            sbias_ref = next(it)                   # (2Bp, 1, S)   f32 length mask
        w_emb_ref = next(it)                       # (E, 4H)       bf16
        w_prev_ref = next(it) if input_feed else None   # (H, 4H)  bf16
        whh0_ref = next(it)                        # (H, 4H)       bf16
        b0_ref = next(it)                          # (1, 4H)       f32
        w_fused_refs = [next(it) for _ in range(L - 1)]  # (2H, 4H) bf16
        b_refs = [next(it) for _ in range(L - 1)]        # (1, 4H)  f32
        if has_attn:
            waT_tr_ref = next(it)                  # (H, H) bf16  (wa_tree^T)
            waT_tx_ref = next(it)                  # (H, H) bf16  (wa_txt^T)
            wout_ref = next(it)                    # (4H, H) bf16
        else:
            wlin_ref = next(it)                    # (2H, H) bf16
        out_ref = next(it)                         # (T, Bp, H)    f32 output
        xg_ref = next(it)                          # (T, Bp, 4H)   f32 scratch

        Bp, H = out0_ref.shape

        def mm(a, w):
            # bf16 MXU operands, f32 accumulation.
            return jnp.dot(a.astype(bf16), w, preferred_element_type=f32)

        def mm2(a3, w):
            # (2, Bp, K) @ (K, N) -> (2, Bp, N) via a free 2-D reshape.
            g, b, k = a3.shape
            return mm(a3.reshape(g * b, k), w).reshape(g, b, -1)

        # ------------------ hoist block: runs exactly once -------------------
        w_prev = w_prev_ref[...] if input_feed else None
        whh0 = whh0_ref[...]
        w_fused = [r[...] for r in w_fused_refs]
        # pre-broadcast layer>=1 biases once (no per-iteration broadcast_in_dim)
        bias_b = [jnp.broadcast_to(r[...], (2, Bp, 4 * H)) for r in b_refs]

        # embedding half of the layer-0 gates for the WHOLE sequence, bias folded
        xg_all = mm(dec_in_ref[...], w_emb_ref[...]) + b0_ref[...]      # (T*Bp,4H)
        xg_ref[...] = xg_all.reshape(T, Bp, 4 * H)

        if has_attn:
            ctx_tr = ctx_tr_ref[...]
            ctx_tx = ctx_tx_ref[...]
            S = ctx_tr.shape[1]
            ctx_cat = jnp.concatenate([ctx_tr, ctx_tx], axis=0)         # (2Bp,S,H)
            # fold W_a into the context once: score_t = h_t . (ctx @ W_a^T)
            proj_tr = mm(ctx_tr.reshape(Bp * S, H), waT_tr_ref[...])
            proj_tx = mm(ctx_tx.reshape(Bp * S, H), waT_tx_ref[...])
            ctx_proj = jnp.concatenate([proj_tr, proj_tx], axis=0)
            ctx_proj = ctx_proj.astype(bf16).reshape(2 * Bp, S, H)
            sbias = sbias_ref[...]                                       # (2Bp,1,S)
            wout = wout_ref[...]
        else:
            wlin = wlin_ref[...]

        h0 = tuple(h0_ref[l] for l in range(L))    # each (2, Bp, H) f32
        c0 = tuple(c0_ref[l] for l in range(L))
        prev0 = out0_ref[...]                      # (Bp, H) f32

        # ------------------------ one decoder timestep ------------------------
        def step(xg_t, h_prev, c_prev, prev):
            xg = xg_t                                               # (Bp, 4H) f32
            if input_feed:
                xg = xg + mm(prev, w_prev)                          # input-feed half
            new_h, new_c = [], []
            # layer 0: shared input transform broadcast over both branches
            gates = mm2(h_prev[0], whh0) + xg                       # (2, Bp, 4H)
            for l in range(L):
                # lane-dense activations on the packed 4H=128 gates, then slice
                sig = jax.nn.sigmoid(gates)
                tnh = jnp.tanh(gates)
                i_g = sig[..., 0 * H:1 * H]
                f_g = sig[..., 1 * H:2 * H]
                g_g = tnh[..., 2 * H:3 * H]
                o_g = sig[..., 3 * H:4 * H]
                c_n = f_g * c_prev[l] + i_g * g_g
                h_n = o_g * jnp.tanh(c_n)
                new_h.append(h_n)
                new_c.append(c_n)
                if l + 1 < L:
                    # fused [W_ih; W_hh]: one matmul per upper layer per step
                    # (inter-layer dropout is identity in eval mode)
                    x_in = jnp.concatenate([h_n, h_prev[l + 1]], axis=-1)  # (2,Bp,2H)
                    gates = mm2(x_in, w_fused[l]) + bias_b[l]
            h_top = new_h[-1]                                       # (2, Bp, H)

            if has_attn:
                # TODO(synk): lib.HybridAttention internals are external to the
                # spec; modelled as Luong-"general" attention per branch plus
                # tanh(W [attn_tree; h_tree; attn_txt; h_txt]).
                hq = h_top.reshape(2 * Bp, 1, H).astype(bf16)
                s = jnp.einsum("bqh,bsh->bqs", hq, ctx_proj,
                               preferred_element_type=f32) + sbias   # (2Bp,1,S)
                m = jnp.max(s, axis=-1, keepdims=True)
                e = jnp.exp(s - m)
                p = e * pl.reciprocal(jnp.sum(e, axis=-1, keepdims=True), approx=True)
                attn = jnp.einsum("bqs,bsh->bqh", p.astype(bf16), ctx_cat,
                                  preferred_element_type=f32).reshape(2, Bp, H)
                comb = jnp.concatenate([attn[0], h_top[0], attn[1], h_top[1]],
                                       axis=-1)                      # (Bp, 4H)
                out = jnp.tanh(mm(comb, wout))                       # (Bp, H)
            else:
                out = mm(jnp.concatenate([h_top[0], h_top[1]], axis=-1), wlin)
            # output dropout is identity in eval mode
            return tuple(new_h), tuple(new_c), out

        if unroll_full:
            # Short sequences: fully unrolled, one bulk output store at the end.
            h, c, prev = h0, c0, prev0
            outs = []
            for t in range(T):
                h, c, prev = step(xg_ref[t], h, c, prev)
                outs.append(prev)
            out_ref[...] = jnp.stack(outs, axis=0)
        else:
            def body(t, carry):
                h, c, prev = carry
                h, c, out = step(xg_ref[t], h, c, prev)
                out_ref[t] = out
                return (h, c, out)
            unroll = 4 if T % 4 == 0 else (2 if T % 2 == 0 else 1)
            lax.fori_loop(0, T, body, (h0, c0, prev0), unroll=unroll)

    return kernel


# ----------------------------------------------------------------------------
# Wrapper: batch/seq padding, bf16 casts, weight fusion + single pallas_call
# ----------------------------------------------------------------------------
def hybrid_decoder_apply(dec_in, out0, hidden_tree, hidden_txt,
                         ctx_tree, ctx_txt, params, *,
                         num_layers, has_attn, input_feed):
    """dec_in: (T, B, E) time-major decoder-input embeddings (already shifted).
    hidden_*: (h, c) each (L, B, H); ctx_*: (B, S, H). Returns (T, B, H) f32."""
    T, B, E = dec_in.shape
    H = out0.shape[-1]
    L = num_layers
    f32, bf16 = jnp.float32, jnp.bfloat16

    Bp = max(8, _round_up(B, 8))       # 8-sublane granule

    def pad_to(x, axis, new):
        extra = new - x.shape[axis]
        if extra == 0:
            return x
        widths = [(0, 0)] * x.ndim
        widths[axis] = (0, extra)
        return jnp.pad(x, widths)

    h_tr, c_tr = hidden_tree
    h_tx, c_tx = hidden_txt
    h0 = jnp.stack([pad_to(h_tr, 1, Bp), pad_to(h_tx, 1, Bp)], axis=1).astype(f32)
    c0 = jnp.stack([pad_to(c_tr, 1, Bp), pad_to(c_tx, 1, Bp)], axis=1).astype(f32)

    dec_in_p = pad_to(dec_in, 1, Bp).reshape(T * Bp, E).astype(bf16)
    out0_p = pad_to(out0, 0, Bp).astype(f32)

    args = [dec_in_p, out0_p, h0, c0]

    if has_attn:
        S_tr, S_tx = ctx_tree.shape[1], ctx_txt.shape[1]
        S = max(8, _round_up(max(S_tr, S_tx), 8))
        ctx_tr_p = pad_to(pad_to(ctx_tree, 0, Bp), 1, S).astype(bf16)
        ctx_tx_p = pad_to(pad_to(ctx_txt, 0, Bp), 1, S).astype(bf16)
        pos = jnp.arange(S)
        sbias = jnp.concatenate(
            [jnp.broadcast_to(jnp.where(pos < S_tr, 0.0, -1e30)[None, None, :],
                              (Bp, 1, S)),
             jnp.broadcast_to(jnp.where(pos < S_tx, 0.0, -1e30)[None, None, :],
                              (Bp, 1, S))], axis=0).astype(f32)
        args += [ctx_tr_p, ctx_tx_p, sbias]

    # ---- weights: split / fuse once in the wrapper, pass as bf16 ------------
    wih0 = params["wih"][0]
    args.append(wih0[:E].astype(bf16))                    # W_emb (E,4H)
    if input_feed:
        args.append(wih0[E:].astype(bf16))                # W_prev (H,4H)
    args.append(params["whh"][0].astype(bf16))            # W_hh layer 0
    args.append(params["b"][0].astype(f32))               # b layer 0 (folded into xg)
    for l in range(1, L):                                 # fused [W_ih;W_hh] (2H,4H)
        args.append(jnp.concatenate([params["wih"][l], params["whh"][l]],
                                    axis=0).astype(bf16))
    for l in range(1, L):
        args.append(params["b"][l].astype(f32))
    if has_attn:
        args += [params["wa_tree"].T.astype(bf16),
                 params["wa_txt"].T.astype(bf16),
                 params["wout"].astype(bf16)]
    else:
        args.append(params["w_linear_out"].astype(bf16))

    unroll_full = T <= 16
    kernel = _build_decoder_kernel(L, has_attn, input_feed, T, unroll_full)

    # Gridless call: every operand lands in VMEM exactly once and the whole
    # recurrence runs in a single invocation (no per-step pipeline overhead).
    # For production shapes: on v5e/v6e raise vmem_limit_bytes (128 MiB
    # physical); on v7x (64 MiB VMEM, 2 TensorCores) switch to a grid=(T,)
    # streaming layout and split the batch across cores.
    # TODO(synk): dual-TensorCore batch split + T-streaming variant for v7x.
    out = pl.pallas_call(
        kernel,
        out_shape=jax.ShapeDtypeStruct((T, Bp, H), f32),
        scratch_shapes=[pltpu.VMEM((T, Bp, 4 * H), f32)],
    )(*args)
    return out[:, :B, :]


# ----------------------------------------------------------------------------
# Module: parameters + forward() mirroring HybridDecoder.forward (eval mode)
# ----------------------------------------------------------------------------
class HybridDecoderPallas:
    def __init__(self, key, *, dict_size=50, word_vec_size=32, rnn_size=32,
                 layers=2, input_feed=True, has_attn=True):
        self.layers = layers
        self.input_feed = input_feed
        self.has_attn = has_attn
        self.hidden_size = rnn_size
        E, H = word_vec_size, rnn_size

        keys = iter(jax.random.split(key, 8 + 3 * layers))

        def nrm(shape):
            return 0.1 * jax.random.normal(next(keys), shape, jnp.float32)

        # word_lut (nn.Embedding, padding_idx=PAD -> zero row)
        self.word_lut = nrm((dict_size, E)).at[PAD].set(0.0)

        # StackedLSTM: one set of cell weights per layer, SHARED by the tree
        # and text branches (the reference calls the same self.rnn for both).
        wih, whh, b = [], [], []
        in_dim = E + (H if input_feed else 0)
        for _ in range(layers):
            wih.append(nrm((in_dim, 4 * H)))   # gate order i, f, g, o
            whh.append(nrm((H, 4 * H)))
            b.append(nrm((1, 4 * H)))          # b_ih + b_hh combined
            in_dim = H
        self.params = {"wih": wih, "whh": whh, "b": b}
        if has_attn:
            self.params["wa_tree"] = nrm((H, H))
            self.params["wa_txt"] = nrm((H, H))
            self.params["wout"] = nrm((4 * H, H))
        else:
            self.params["w_linear_out"] = nrm((2 * H, H))  # Linear(2H, H, bias=False)

    def forward(self, inputs, init_states):
        """inputs: (T, B) int32 target token ids.
        init_states = (emb, output, hidden_tree, context_tree,
                       hidden_txt, context_txt) as in the reference."""
        emb0, output0, hidden_tree, context_tree, hidden_txt, context_txt = init_states
        embs = jnp.take(self.word_lut, inputs, axis=0)             # (T, B, E)
        # step i consumes the embedding produced at step i-1 (emb0 at i=0),
        # matching the reference loop's post-step `emb = embs[i]`.
        dec_in = jnp.concatenate([emb0[None], embs[:-1]], axis=0)  # (T, B, E)
        return hybrid_decoder_apply(
            dec_in, output0, hidden_tree, hidden_txt, context_tree, context_txt,
            self.params, num_layers=self.layers, has_attn=self.has_attn,
            input_feed=self.input_feed)


# ----------------------------------------------------------------------------
if __name__ == "__main__":
    key = jax.random.PRNGKey(0)
    k_model, k_model2, k_data = jax.random.split(key, 3)

    B, T, S_TREE, S_TXT = 2, 8, 6, 8
    VOCAB, E, H, L = 50, 32, 32, 2

    ks = jax.random.split(k_data, 7)
    inputs = jax.random.randint(ks[0], (T, B), 4, VOCAB, dtype=jnp.int32)

    model = HybridDecoderPallas(k_model, dict_size=VOCAB, word_vec_size=E,
                                rnn_size=H, layers=L,
                                input_feed=True, has_attn=True)

    # init_states as produced upstream (Hybrid2SeqModel.initialize):
    emb0 = jnp.broadcast_to(model.word_lut[BOS], (B, E))          # BOS embedding
    output0 = jnp.zeros((B, H), jnp.float32)                      # init decoder output
    hidden_tree = (0.1 * jax.random.normal(ks[1], (L, B, H), jnp.float32),
                   0.1 * jax.random.normal(ks[2], (L, B, H), jnp.float32))
    hidden_txt = (0.1 * jax.random.normal(ks[3], (L, B, H), jnp.float32),
                  0.1 * jax.random.normal(ks[4], (L, B, H), jnp.float32))
    context_tree = 0.1 * jax.random.normal(ks[5], (B, S_TREE, H), jnp.float32)
    context_txt = 0.1 * jax.random.normal(ks[6], (B, S_TXT, H), jnp.float32)

    init_states = (emb0, output0, hidden_tree, context_tree, hidden_txt, context_txt)

    # attention path (opt.has_attn = True)
    outputs = model.forward(inputs, init_states)                  # (T, B, H)
    outputs = jax.block_until_ready(outputs)
    assert outputs.shape == (T, B, H)
    assert bool(jnp.all(jnp.isfinite(outputs)))

    # linear_out path (opt.has_attn = False)
    model_na = HybridDecoderPallas(k_model2, dict_size=VOCAB, word_vec_size=E,
                                   rnn_size=H, layers=L,
                                   input_feed=True, has_attn=False)
    emb0_na = jnp.broadcast_to(model_na.word_lut[BOS], (B, E))
    init_states_na = (emb0_na, output0, hidden_tree, context_tree,
                      hidden_txt, context_txt)
    outputs_na = model_na.forward(inputs, init_states_na)
    outputs_na = jax.block_until_ready(outputs_na)
    assert outputs_na.shape == (T, B, H)
    assert bool(jnp.all(jnp.isfinite(outputs_na)))

    print("KERNEL_OK")
</pallas_src>

<mosaic_0001>
module attributes {stable_mosaic.version = 11 : i64} {
  func.func @kernel(%arg0: memref<64x32xbf16, #tpu.memory_space<vmem>>, %arg1: memref<8x32xf32, #tpu.memory_space<vmem>>, %arg2: memref<2x2x8x32xf32, #tpu.memory_space<vmem>>, %arg3: memref<2x2x8x32xf32, #tpu.memory_space<vmem>>, %arg4: memref<8x8x32xbf16, #tpu.memory_space<vmem>>, %arg5: memref<8x8x32xbf16, #tpu.memory_space<vmem>>, %arg6: memref<16x1x8xf32, #tpu.memory_space<vmem>>, %arg7: memref<32x128xbf16, #tpu.memory_space<vmem>>, %arg8: memref<32x128xbf16, #tpu.memory_space<vmem>>, %arg9: memref<32x128xbf16, #tpu.memory_space<vmem>>, %arg10: memref<1x128xf32, #tpu.memory_space<vmem>>, %arg11: memref<64x128xbf16, #tpu.memory_space<vmem>>, %arg12: memref<1x128xf32, #tpu.memory_space<vmem>>, %arg13: memref<32x32xbf16, #tpu.memory_space<vmem>>, %arg14: memref<32x32xbf16, #tpu.memory_space<vmem>>, %arg15: memref<128x32xbf16, #tpu.memory_space<vmem>>, %arg16: memref<8x8x32xf32, #tpu.memory_space<vmem>>, %arg17: memref<8x8x128xf32, #tpu.memory_space<vmem>>) attributes {dimension_semantics = [], scalar_prefetch = 0 : i64, scratch_operands = 1 : i64, tpu.core_type = #tpu.core_type<tc>} {
    %c0 = arith.constant 0 : index
    %c0_0 = arith.constant 0 : index
    %0 = vector.load %arg8[%c0, %c0_0] : memref<32x128xbf16, #tpu.memory_space<vmem>>, vector<32x128xbf16>
    %c0_1 = arith.constant 0 : index
    %c0_2 = arith.constant 0 : index
    %1 = vector.load %arg9[%c0_1, %c0_2] : memref<32x128xbf16, #tpu.memory_space<vmem>>, vector<32x128xbf16>
    %c0_3 = arith.constant 0 : index
    %c0_4 = arith.constant 0 : index
    %2 = vector.load %arg11[%c0_3, %c0_4] : memref<64x128xbf16, #tpu.memory_space<vmem>>, vector<64x128xbf16>
    %c0_5 = arith.constant 0 : index
    %c0_6 = arith.constant 0 : index
    %3 = vector.load %arg12[%c0_5, %c0_6] : memref<1x128xf32, #tpu.memory_space<vmem>>, vector<1x128xf32>
    %4 = vector.shape_cast %3 : vector<1x128xf32> to vector<1x1x128xf32>
    %5 = vector.broadcast %4 : vector<1x1x128xf32> to vector<2x8x128xf32>
    %c0_7 = arith.constant 0 : index
    %c0_8 = arith.constant 0 : index
    %6 = vector.load %arg0[%c0_7, %c0_8] : memref<64x32xbf16, #tpu.memory_space<vmem>>, vector<64x32xbf16>
    %c0_9 = arith.constant 0 : index
    %c0_10 = arith.constant 0 : index
    %7 = vector.load %arg7[%c0_9, %c0_10] : memref<32x128xbf16, #tpu.memory_space<vmem>>, vector<32x128xbf16>
    %cst = arith.constant dense<0.000000e+00> : vector<64x128xf32>
    %8 = tpu.matmul %6, %7, %cst {dimension_numbers = #tpu.dot_dimension_numbers<[1], [0], [0], [1], [0, 0, 1, 1], [], []>} : vector<64x32xbf16>, vector<32x128xbf16>, vector<64x128xf32> -> vector<64x128xf32>
    %c0_11 = arith.constant 0 : index
    %c0_12 = arith.constant 0 : index
    %9 = vector.load %arg10[%c0_11, %c0_12] : memref<1x128xf32, #tpu.memory_space<vmem>>, vector<1x128xf32>
    %10 = vector.broadcast %9 : vector<1x128xf32> to vector<64x128xf32>
    %11 = arith.addf %8, %10 : vector<64x128xf32>
    %12 = vector.shape_cast %11 : vector<64x128xf32> to vector<8x8x128xf32>
    %c0_13 = arith.constant 0 : index
    %c0_14 = arith.constant 0 : index
    %c0_15 = arith.constant 0 : index
    %13 = vector.load %arg17[%c0_13, %c0_14, %c0_15] : memref<8x8x128xf32, #tpu.memory_space<vmem>>, vector<8x8x128xf32>
    tpu.vector_store %arg17[%c0_13, %c0_14, %c0_15], %12 {strides = array<i32>} : memref<8x8x128xf32, #tpu.memory_space<vmem>>, vector<8x8x128xf32>,
    %c0_16 = arith.constant 0 : index
    %c0_17 = arith.constant 0 : index
    %c0_18 = arith.constant 0 : index
    %14 = vector.load %arg4[%c0_16, %c0_17, %c0_18] : memref<8x8x32xbf16, #tpu.memory_space<vmem>>, vector<8x8x32xbf16>
    %c0_19 = arith.constant 0 : index
    %c0_20 = arith.constant 0 : index
    %c0_21 = arith.constant 0 : index
    %15 = vector.load %arg5[%c0_19, %c0_20, %c0_21] : memref<8x8x32xbf16, #tpu.memory_space<vmem>>, vector<8x8x32xbf16>
    %16 = tpu.concatenate %14, %15 in 0 : vector<8x8x32xbf16>, vector<8x8x32xbf16> -> vector<16x8x32xbf16>
    %17 = vector.shape_cast %14 : vector<8x8x32xbf16> to vector<64x32xbf16>
    %c0_22 = arith.constant 0 : index
    %c0_23 = arith.constant 0 : index
    %18 = vector.load %arg13[%c0_22, %c0_23] : memref<32x32xbf16, #tpu.memory_space<vmem>>, vector<32x32xbf16>
    %cst_24 = arith.constant dense<0.000000e+00> : vector<64x32xf32>
    %19 = tpu.matmul %17, %18, %cst_24 {dimension_numbers = #tpu.dot_dimension_numbers<[1], [0], [0], [1], [0, 0, 1, 1], [], []>} : vector<64x32xbf16>, vector<32x32xbf16>, vector<64x32xf32> -> vector<64x32xf32>
    %20 = vector.shape_cast %15 : vector<8x8x32xbf16> to vector<64x32xbf16>
    %c0_25 = arith.constant 0 : index
    %c0_26 = arith.constant 0 : index
    %21 = vector.load %arg14[%c0_25, %c0_26] : memref<32x32xbf16, #tpu.memory_space<vmem>>, vector<32x32xbf16>
    %cst_27 = arith.constant dense<0.000000e+00> : vector<64x32xf32>
    %22 = tpu.matmul %20, %21, %cst_27 {dimension_numbers = #tpu.dot_dimension_numbers<[1], [0], [0], [1], [0, 0, 1, 1], [], []>} : vector<64x32xbf16>, vector<32x32xbf16>, vector<64x32xf32> -> vector<64x32xf32>
    %23 = tpu.concatenate %19, %22 in 0 : vector<64x32xf32>, vector<64x32xf32> -> vector<128x32xf32>
    %24 = arith.truncf %23 : vector<128x32xf32> to vector<128x32xbf16>
    %25 = vector.shape_cast %24 : vector<128x32xbf16> to vector<16x8x32xbf16>
    %c0_28 = arith.constant 0 : index
    %c0_29 = arith.constant 0 : index
    %c0_30 = arith.constant 0 : index
    %26 = vector.load %arg6[%c0_28, %c0_29, %c0_30] : memref<16x1x8xf32, #tpu.memory_space<vmem>>, vector<16x1x8xf32>
    %c0_31 = arith.constant 0 : index
    %c0_32 = arith.constant 0 : index
    %27 = vector.load %arg15[%c0_31, %c0_32] : memref<128x32xbf16, #tpu.memory_space<vmem>>, vector<128x32xbf16>
    %c0_33 = arith.constant 0 : index
    %c0_34 = arith.constant 0 : index
    %c0_35 = arith.constant 0 : index
    %c0_36 = arith.constant 0 : index
    %28 = vector.load %arg2[%c0_33, %c0_34, %c0_35, %c0_36] : memref<2x2x8x32xf32, #tpu.memory_space<vmem>>, vector<1x2x8x32xf32>
    %29 = vector.shape_cast %28 : vector<1x2x8x32xf32> to vector<2x8x32xf32>
    %c1 = arith.constant 1 : index
    %c0_37 = arith.constant 0 : index
    %c0_38 = arith.constant 0 : index
    %c0_39 = arith.constant 0 : index
    %30 = vector.load %arg2[%c1, %c0_37, %c0_38, %c0_39] : memref<2x2x8x32xf32, #tpu.memory_space<vmem>>, vector<1x2x8x32xf32>
    %31 = vector.shape_cast %30 : vector<1x2x8x32xf32> to vector<2x8x32xf32>
    %c0_40 = arith.constant 0 : index
    %c0_41 = arith.constant 0 : index
    %c0_42 = arith.constant 0 : index
    %c0_43 = arith.constant 0 : index
    %32 = vector.load %arg3[%c0_40, %c0_41, %c0_42, %c0_43] : memref<2x2x8x32xf32, #tpu.memory_space<vmem>>, vector<1x2x8x32xf32>
    %33 = vector.shape_cast %32 : vector<1x2x8x32xf32> to vector<2x8x32xf32>
    %c1_44 = arith.constant 1 : index
    %c0_45 = arith.constant 0 : index
    %c0_46 = arith.constant 0 : index
    %c0_47 = arith.constant 0 : index
    %34 = vector.load %arg3[%c1_44, %c0_45, %c0_46, %c0_47] : memref<2x2x8x32xf32, #tpu.memory_space<vmem>>, vector<1x2x8x32xf32>
    %35 = vector.shape_cast %34 : vector<1x2x8x32xf32> to vector<2x8x32xf32>
    %c0_48 = arith.constant 0 : index
    %c0_49 = arith.constant 0 : index
    %36 = vector.load %arg1[%c0_48, %c0_49] : memref<8x32xf32, #tpu.memory_space<vmem>>, vector<8x32xf32>
    %c0_50 = arith.constant 0 : index
    %c0_51 = arith.constant 0 : index
    %c0_52 = arith.constant 0 : index
    %37 = vector.load %arg17[%c0_50, %c0_51, %c0_52] : memref<8x8x128xf32, #tpu.memory_space<vmem>>, vector<1x8x128xf32>
    %38 = vector.shape_cast %37 : vector<1x8x128xf32> to vector<8x128xf32>
    %39 = arith.truncf %36 : vector<8x32xf32> to vector<8x32xbf16>
    %cst_53 = arith.constant dense<0.000000e+00> : vector<8x128xf32>
    %40 = tpu.matmul %39, %0, %cst_53 {dimension_numbers = #tpu.dot_dimension_numbers<[1], [0], [0], [1], [0, 0, 1, 1], [], []>} : vector<8x32xbf16>, vector<32x128xbf16>, vector<8x128xf32> -> vector<8x128xf32>
    %41 = arith.addf %38, %40 : vector<8x128xf32>
    %42 = vector.shape_cast %29 : vector<2x8x32xf32> to vector<16x32xf32>
    %43 = arith.truncf %42 : vector<16x32xf32> to vector<16x32xbf16>
    %cst_54 = arith.constant dense<0.000000e+00> : vector<16x128xf32>
    %44 = tpu.matmul %43, %1, %cst_54 {dimension_numbers = #tpu.dot_dimension_numbers<[1], [0], [0], [1], [0, 0, 1, 1], [], []>} : vector<16x32xbf16>, vector<32x128xbf16>, vector<16x128xf32> -> vector<16x128xf32>
    %45 = vector.shape_cast %44 : vector<16x128xf32> to vector<2x8x128xf32>
    %46 = vector.shape_cast %41 : vector<8x128xf32> to vector<1x8x128xf32>
    %47 = vector.broadcast %46 : vector<1x8x128xf32> to vector<2x8x128xf32>
    %48 = arith.addf %45, %47 : vector<2x8x128xf32>
    %49 = arith.negf %48 : vector<2x8x128xf32>
    %50 = math.exp %49 : vector<2x8x128xf32>
    %cst_55 = arith.constant 1.000000e+00 : f32
    %51 = vector.broadcast %cst_55 : f32 to vector<2x8x128xf32>
    %52 = arith.addf %51, %50 : vector<2x8x128xf32>
    %53 = arith.divf %51, %52 : vector<2x8x128xf32>
    %54 = math.tanh %48 : vector<2x8x128xf32>
    %55 = vector.extract_strided_slice %53 {offsets = [0, 0, 0], sizes = [2, 8, 32], strides = [1, 1, 1]} : vector<2x8x128xf32> to vector<2x8x32xf32>
    %56 = vector.extract_strided_slice %53 {offsets = [0, 0, 32], sizes = [2, 8, 32], strides = [1, 1, 1]} : vector<2x8x128xf32> to vector<2x8x32xf32>
    %57 = vector.extract_strided_slice %54 {offsets = [0, 0, 64], sizes = [2, 8, 32], strides = [1, 1, 1]} : vector<2x8x128xf32> to vector<2x8x32xf32>
    %58 = vector.extract_strided_slice %53 {offsets = [0, 0, 96], sizes = [2, 8, 32], strides = [1, 1, 1]} : vector<2x8x128xf32> to vector<2x8x32xf32>
    %59 = arith.mulf %56, %33 : vector<2x8x32xf32>
    %60 = arith.mulf %55, %57 : vector<2x8x32xf32>
    %61 = arith.addf %59, %60 : vector<2x8x32xf32>
    %62 = math.tanh %61 : vector<2x8x32xf32>
    %63 = arith.mulf %58, %62 : vector<2x8x32xf32>
    %64 = tpu.concatenate %63, %31 in 2 : vector<2x8x32xf32>, vector<2x8x32xf32> -> vector<2x8x64xf32>
    %65 = vector.shape_cast %64 : vector<2x8x64xf32> to vector<16x64xf32>
    %66 = arith.truncf %65 : vector<16x64xf32> to vector<16x64xbf16>
    %cst_56 = arith.constant dense<0.000000e+00> : vector<16x128xf32>
    %67 = tpu.matmul %66, %2, %cst_56 {dimension_numbers = #tpu.dot_dimension_numbers<[1], [0], [0], [1], [0, 0, 1, 1], [], []>} : vector<16x64xbf16>, vector<64x128xbf16>, vector<16x128xf32> -> vector<16x128xf32>
    %68 = vector.shape_cast %67 : vector<16x128xf32> to vector<2x8x128xf32>
    %69 = arith.addf %68, %5 : vector<2x8x128xf32>
    %70 = arith.negf %69 : vector<2x8x128xf32>
    %71 = math.exp %70 : vector<2x8x128xf32>
    %cst_57 = arith.constant 1.000000e+00 : f32
    %72 = vector.broadcast %cst_57 : f32 to vector<2x8x128xf32>
    %73 = arith.addf %72, %71 : vector<2x8x128xf32>
    %74 = arith.divf %72, %73 : vector<2x8x128xf32>
    %75 = math.tanh %69 : vector<2x8x128xf32>
    %76 = vector.extract_strided_slice %74 {offsets = [0, 0, 0], sizes = [2, 8, 32], strides = [1, 1, 1]} : vector<2x8x128xf32> to vector<2x8x32xf32>
    %77 = vector.extract_strided_slice %74 {offsets = [0, 0, 32], sizes = [2, 8, 32], strides = [1, 1, 1]} : vector<2x8x128xf32> to vector<2x8x32xf32>
    %78 = vector.extract_strided_slice %75 {offsets = [0, 0, 64], sizes = [2, 8, 32], strides = [1, 1, 1]} : vector<2x8x128xf32> to vector<2x8x32xf32>
    %79 = vector.extract_strided_slice %74 {offsets = [0, 0, 96], sizes = [2, 8, 32], strides = [1, 1, 1]} : vector<2x8x128xf32> to vector<2x8x32xf32>
    %80 = arith.mulf %77, %35 : vector<2x8x32xf32>
    %81 = arith.mulf %76, %78 : vector<2x8x32xf32>
    %82 = arith.addf %80, %81 : vector<2x8x32xf32>
    %83 = math.tanh %82 : vector<2x8x32xf32>
    %84 = arith.mulf %79, %83 : vector<2x8x32xf32>
    %85 = vector.shape_cast %84 : vector<2x8x32xf32> to vector<16x1x32xf32>
    %86 = arith.truncf %85 : vector<16x1x32xf32> to vector<16x1x32xbf16>
    "tpu.trace_start"() <{level = 10 : i32, message = "bqh,bsh->bqs"}> : () -> ()
    %cst_58 = arith.constant dense<0.000000e+00> : vector<16x1x8xf32>
    %87 = tpu.matmul %86, %25, %cst_58 {dimension_numbers = #tpu.dot_dimension_numbers<[2], [2], [1], [1], [0, 0, 0, 1, 1, 1], [0], [0]>} : vector<16x1x32xbf16>, vector<16x8x32xbf16>, vector<16x1x8xf32> -> vector<16x1x8xf32>
    "tpu.trace_stop"() : () -> ()
    %88 = arith.addf %87, %26 : vector<16x1x8xf32>
    %cst_59 = arith.constant dense<0xFF800000> : vector<16x1xf32>
    %89 = vector.multi_reduction <maximumf>, %88, %cst_59 [2] : vector<16x1x8xf32> to vector<16x1xf32>
    %90 = vector.shape_cast %89 : vector<16x1xf32> to vector<16x1x1xf32>
    %91 = vector.broadcast %90 : vector<16x1x1xf32> to vector<16x1x8xf32>
    %92 = arith.subf %88, %91 : vector<16x1x8xf32>
    %93 = math.exp %92 : vector<16x1x8xf32>
    %cst_60 = arith.constant dense<0.000000e+00> : vector<16x1xf32>
    %94 = vector.multi_reduction <add>, %93, %cst_60 [2] : vector<16x1x8xf32> to vector<16x1xf32>
    %95 = vector.shape_cast %94 : vector<16x1xf32> to vector<16x1x1xf32>
    %96 = tpu.reciprocal %95 {approx = true} : vector<16x1x1xf32> -> vector<16x1x1xf32>
    %97 = vector.broadcast %96 : vector<16x1x1xf32> to vector<16x1x8xf32>
    %98 = arith.mulf %93, %97 : vector<16x1x8xf32>
    %99 = arith.truncf %98 : vector<16x1x8xf32> to vector<16x1x8xbf16>
    "tpu.trace_start"() <{level = 10 : i32, message = "bqs,bsh->bqh"}> : () -> ()
    %cst_61 = arith.constant dense<0.000000e+00> : vector<16x1x32xf32>
    %100 = tpu.matmul %99, %16, %cst_61 {dimension_numbers = #tpu.dot_dimension_numbers<[2], [1], [1], [2], [0, 0, 0, 1, 1, 2], [0], [0]>} : vector<16x1x8xbf16>, vector<16x8x32xbf16>, vector<16x1x32xf32> -> vector<16x1x32xf32>
    "tpu.trace_stop"() : () -> ()
    %101 = vector.shape_cast %100 : vector<16x1x32xf32> to vector<2x8x32xf32>
    %102 = vector.extract_strided_slice %101 {offsets = [0, 0, 0], sizes = [1, 8, 32], strides = [1, 1, 1]} : vector<2x8x32xf32> to vector<1x8x32xf32>
    %103 = vector.shape_cast %102 : vector<1x8x32xf32> to vector<8x32xf32>
    %104 = vector.extract_strided_slice %84 {offsets = [0, 0, 0], sizes = [1, 8, 32], strides = [1, 1, 1]} : vector<2x8x32xf32> to vector<1x8x32xf32>
    %105 = vector.shape_cast %104 : vector<1x8x32xf32> to vector<8x32xf32>
    %106 = vector.extract_strided_slice %101 {offsets = [1, 0, 0], sizes = [1, 8, 32], strides = [1, 1, 1]} : vector<2x8x32xf32> to vector<1x8x32xf32>
    %107 = vector.shape_cast %106 : vector<1x8x32xf32> to vector<8x32xf32>
    %108 = vector.extract_strided_slice %84 {offsets = [1, 0, 0], sizes = [1, 8, 32], strides = [1, 1, 1]} : vector<2x8x32xf32> to vector<1x8x32xf32>
    %109 = vector.shape_cast %108 : vector<1x8x32xf32> to vector<8x32xf32>
    %110 = tpu.concatenate %103, %105, %107, %109 in 1 : vector<8x32xf32>, vector<8x32xf32>, vector<8x32xf32>, vector<8x32xf32> -> vector<8x128xf32>
    %111 = arith.truncf %110 : vector<8x128xf32> to vector<8x128xbf16>
    %cst_62 = arith.constant dense<0.000000e+00> : vector<8x32xf32>
    %112 = tpu.matmul %111, %27, %cst_62 {dimension_numbers = #tpu.dot_dimension_numbers<[1], [0], [0], [1], [0, 0, 1, 1], [], []>} : vector<8x128xbf16>, vector<128x32xbf16>, vector<8x32xf32> -> vector<8x32xf32>
    %113 = math.tanh %112 : vector<8x32xf32>
    %c1_63 = arith.constant 1 : index
    %c0_64 = arith.constant 0 : index
    %c0_65 = arith.constant 0 : index
    %114 = vector.load %arg17[%c1_63, %c0_64, %c0_65] : memref<8x8x128xf32, #tpu.memory_space<vmem>>, vector<1x8x128xf32>
    %115 = vector.shape_cast %114 : vector<1x8x128xf32> to vector<8x128xf32>
    %116 = arith.truncf %113 : vector<8x32xf32> to vector<8x32xbf16>
    %cst_66 = arith.constant dense<0.000000e+00> : vector<8x128xf32>
    %117 = tpu.matmul %116, %0, %cst_66 {dimension_numbers = #tpu.dot_dimension_numbers<[1], [0], [0], [1], [0, 0, 1, 1], [], []>} : vector<8x32xbf16>, vector<32x128xbf16>, vector<8x128xf32> -> vector<8x128xf32>
    %118 = arith.addf %115, %117 : vector<8x128xf32>
    %119 = vector.shape_cast %63 : vector<2x8x32xf32> to vector<16x32xf32>
    %120 = arith.truncf %119 : vector<16x32xf32> to vector<16x32xbf16>
    %cst_67 = arith.constant dense<0.000000e+00> : vector<16x128xf32>
    %121 = tpu.matmul %120, %1, %cst_67 {dimension_numbers = #tpu.dot_dimension_numbers<[1], [0], [0], [1], [0, 0, 1, 1], [], []>} : vector<16x32xbf16>, vector<32x128xbf16>, vector<16x128xf32> -> vector<16x128xf32>
    %122 = vector.shape_cast %121 : vector<16x128xf32> to vector<2x8x128xf32>
    %123 = vector.shape_cast %118 : vector<8x128xf32> to vector<1x8x128xf32>
    %124 = vector.broadcast %123 : vector<1x8x128xf32> to vector<2x8x128xf32>
    %125 = arith.addf %122, %124 : vector<2x8x128xf32>
    %126 = arith.negf %125 : vector<2x8x128xf32>
    %127 = math.exp %126 : vector<2x8x128xf32>
    %cst_68 = arith.constant 1.000000e+00 : f32
    %128 = vector.broadcast %cst_68 : f32 to vector<2x8x128xf32>
    %129 = arith.addf %128, %127 : vector<2x8x128xf32>
    %130 = arith.divf %128, %129 : vector<2x8x128xf32>
    %131 = math.tanh %125 : vector<2x8x128xf32>
    %132 = vector.extract_strided_slice %130 {offsets = [0, 0, 0], sizes = [2, 8, 32], strides = [1, 1, 1]} : vector<2x8x128xf32> to vector<2x8x32xf32>
    %133 = vector.extract_strided_slice %130 {offsets = [0, 0, 32], sizes = [2, 8, 32], strides = [1, 1, 1]} : vector<2x8x128xf32> to vector<2x8x32xf32>
    %134 = vector.extract_strided_slice %131 {offsets = [0, 0, 64], sizes = [2, 8, 32], strides = [1, 1, 1]} : vector<2x8x128xf32> to vector<2x8x32xf32>
    %135 = vector.extract_strided_slice %130 {offsets = [0, 0, 96], sizes = [2, 8, 32], strides = [1, 1, 1]} : vector<2x8x128xf32> to vector<2x8x32xf32>
    %136 = arith.mulf %133, %61 : vector<2x8x32xf32>
    %137 = arith.mulf %132, %134 : vector<2x8x32xf32>
    %138 = arith.addf %136, %137 : vector<2x8x32xf32>
    %139 = math.tanh %138 : vector<2x8x32xf32>
    %140 = arith.mulf %135, %139 : vector<2x8x32xf32>
    %141 = tpu.concatenate %140, %84 in 2 : vector<2x8x32xf32>, vector<2x8x32xf32> -> vector<2x8x64xf32>
    %142 = vector.shape_cast %141 : vector<2x8x64xf32> to vector<16x64xf32>
    %143 = arith.truncf %142 : vector<16x64xf32> to vector<16x64xbf16>
    %cst_69 = arith.constant dense<0.000000e+00> : vector<16x128xf32>
    %144 = tpu.matmul %143, %2, %cst_69 {dimension_numbers = #tpu.dot_dimension_numbers<[1], [0], [0], [1], [0, 0, 1, 1], [], []>} : vector<16x64xbf16>, vector<64x128xbf16>, vector<16x128xf32> -> vector<16x128xf32>
    %145 = vector.shape_cast %144 : vector<16x128xf32> to vector<2x8x128xf32>
    %146 = arith.addf %145, %5 : vector<2x8x128xf32>
    %147 = arith.negf %146 : vector<2x8x128xf32>
    %148 = math.exp %147 : vector<2x8x128xf32>
    %cst_70 = arith.constant 1.000000e+00 : f32
    %149 = vector.broadcast %cst_70 : f32 to vector<2x8x128xf32>
    %150 = arith.addf %149, %148 : vector<2x8x128xf32>
    %151 = arith.divf %149, %150 : vector<2x8x128xf32>
    %152 = math.tanh %146 : vector<2x8x128xf32>
    %153 = vector.extract_strided_slice %151 {offsets = [0, 0, 0], sizes = [2, 8, 32], strides = [1, 1, 1]} : vector<2x8x128xf32> to vector<2x8x32xf32>
    %154 = vector.extract_strided_slice %151 {offsets = [0, 0, 32], sizes = [2, 8, 32], strides = [1, 1, 1]} : vector<2x8x128xf32> to vector<2x8x32xf32>
    %155 = vector.extract_strided_slice %152 {offsets = [0, 0, 64], sizes = [2, 8, 32], strides = [1, 1, 1]} : vector<2x8x128xf32> to vector<2x8x32xf32>
    %156 = vector.extract_strided_slice %151 {offsets = [0, 0, 96], sizes = [2, 8, 32], strides = [1, 1, 1]} : vector<2x8x128xf32> to vector<2x8x32xf32>
    %157 = arith.mulf %154, %82 : vector<2x8x32xf32>
    %158 = arith.mulf %153, %155 : vector<2x8x32xf32>
    %159 = arith.addf %157, %158 : vector<2x8x32xf32>
    %160 = math.tanh %159 : vector<2x8x32xf32>
    %161 = arith.mulf %156, %160 : vector<2x8x32xf32>
    %162 = vector.shape_cast %161 : vector<2x8x32xf32> to vector<16x1x32xf32>
    %163 = arith.truncf %162 : vector<16x1x32xf32> to vector<16x1x32xbf16>
    "tpu.trace_start"() <{level = 10 : i32, message = "bqh,bsh->bqs"}> : () -> ()
    %cst_71 = arith.constant dense<0.000000e+00> : vector<16x1x8xf32>
    %164 = tpu.matmul %163, %25, %cst_71 {dimension_numbers = #tpu.dot_dimension_numbers<[2], [2], [1], [1], [0, 0, 0, 1, 1, 1], [0], [0]>} : vector<16x1x32xbf16>, vector<16x8x32xbf16>, vector<16x1x8xf32> -> vector<16x1x8xf32>
    "tpu.trace_stop"() : () -> ()
    %165 = arith.addf %164, %26 : vector<16x1x8xf32>
    %cst_72 = arith.constant dense<0xFF800000> : vector<16x1xf32>
    %166 = vector.multi_reduction <maximumf>, %165, %cst_72 [2] : vector<16x1x8xf32> to vector<16x1xf32>
    %167 = vector.shape_cast %166 : vector<16x1xf32> to vector<16x1x1xf32>
    %168 = vector.broadcast %167 : vector<16x1x1xf32> to vector<16x1x8xf32>
    %169 = arith.subf %165, %168 : vector<16x1x8xf32>
    %170 = math.exp %169 : vector<16x1x8xf32>
    %cst_73 = arith.constant dense<0.000000e+00> : vector<16x1xf32>
    %171 = vector.multi_reduction <add>, %170, %cst_73 [2] : vector<16x1x8xf32> to vector<16x1xf32>
    %172 = vector.shape_cast %171 : vector<16x1xf32> to vector<16x1x1xf32>
    %173 = tpu.reciprocal %172 {approx = true} : vector<16x1x1xf32> -> vector<16x1x1xf32>
    %174 = vector.broadcast %173 : vector<16x1x1xf32> to vector<16x1x8xf32>
    %175 = arith.mulf %170, %174 : vector<16x1x8xf32>
    %176 = arith.truncf %175 : vector<16x1x8xf32> to vector<16x1x8xbf16>
    "tpu.trace_start"() <{level = 10 : i32, message = "bqs,bsh->bqh"}> : () -> ()
    %cst_74 = arith.constant dense<0.000000e+00> : vector<16x1x32xf32>
    %177 = tpu.matmul %176, %16, %cst_74 {dimension_numbers = #tpu.dot_dimension_numbers<[2], [1], [1], [2], [0, 0, 0, 1, 1, 2], [0], [0]>} : vector<16x1x8xbf16>, vector<16x8x32xbf16>, vector<16x1x32xf32> -> vector<16x1x32xf32>
    "tpu.trace_stop"() : () -> ()
    %178 = vector.shape_cast %177 : vector<16x1x32xf32> to vector<2x8x32xf32>
    %179 = vector.extract_strided_slice %178 {offsets = [0, 0, 0], sizes = [1, 8, 32], strides = [1, 1, 1]} : vector<2x8x32xf32> to vector<1x8x32xf32>
    %180 = vector.shape_cast %179 : vector<1x8x32xf32> to vector<8x32xf32>
    %181 = vector.extract_strided_slice %161 {offsets = [0, 0, 0], sizes = [1, 8, 32], strides = [1, 1, 1]} : vector<2x8x32xf32> to vector<1x8x32xf32>
    %182 = vector.shape_cast %181 : vector<1x8x32xf32> to vector<8x32xf32>
    %183 = vector.extract_strided_slice %178 {offsets = [1, 0, 0], sizes = [1, 8, 32], strides = [1, 1, 1]} : vector<2x8x32xf32> to vector<1x8x32xf32>
    %184 = vector.shape_cast %183 : vector<1x8x32xf32> to vector<8x32xf32>
    %185 = vector.extract_strided_slice %161 {offsets = [1, 0, 0], sizes = [1, 8, 32], strides = [1, 1, 1]} : vector<2x8x32xf32> to vector<1x8x32xf32>
    %186 = vector.shape_cast %185 : vector<1x8x32xf32> to vector<8x32xf32>
    %187 = tpu.concatenate %180, %182, %184, %186 in 1 : vector<8x32xf32>, vector<8x32xf32>, vector<8x32xf32>, vector<8x32xf32> -> vector<8x128xf32>
    %188 = arith.truncf %187 : vector<8x128xf32> to vector<8x128xbf16>
    %cst_75 = arith.constant dense<0.000000e+00> : vector<8x32xf32>
    %189 = tpu.matmul %188, %27, %cst_75 {dimension_numbers = #tpu.dot_dimension_numbers<[1], [0], [0], [1], [0, 0, 1, 1], [], []>} : vector<8x128xbf16>, vector<128x32xbf16>, vector<8x32xf32> -> vector<8x32xf32>
    %190 = math.tanh %189 : vector<8x32xf32>
    %c2 = arith.constant 2 : index
    %c0_76 = arith.constant 0 : index
    %c0_77 = arith.constant 0 : index
    %191 = vector.load %arg17[%c2, %c0_76, %c0_77] : memref<8x8x128xf32, #tpu.memory_space<vmem>>, vector<1x8x128xf32>
    %192 = vector.shape_cast %191 : vector<1x8x128xf32> to vector<8x128xf32>
    %193 = arith.truncf %190 : vector<8x32xf32> to vector<8x32xbf16>
    %cst_78 = arith.constant dense<0.000000e+00> : vector<8x128xf32>
    %194 = tpu.matmul %193, %0, %cst_78 {dimension_numbers = #tpu.dot_dimension_numbers<[1], [0], [0], [1], [0, 0, 1, 1], [], []>} : vector<8x32xbf16>, vector<32x128xbf16>, vector<8x128xf32> -> vector<8x128xf32>
    %195 = arith.addf %192, %194 : vector<8x128xf32>
    %196 = vector.shape_cast %140 : vector<2x8x32xf32> to vector<16x32xf32>
    %197 = arith.truncf %196 : vector<16x32xf32> to vector<16x32xbf16>
    %cst_79 = arith.constant dense<0.000000e+00> : vector<16x128xf32>
    %198 = tpu.matmul %197, %1, %cst_79 {dimension_numbers = #tpu.dot_dimension_numbers<[1], [0], [0], [1], [0, 0, 1, 1], [], []>} : vector<16x32xbf16>, vector<32x128xbf16>, vector<16x128xf32> -> vector<16x128xf32>
    %199 = vector.shape_cast %198 : vector<16x128xf32> to vector<2x8x128xf32>
    %200 = vector.shape_cast %195 : vector<8x128xf32> to vector<1x8x128xf32>
    %201 = vector.broadcast %200 : vector<1x8x128xf32> to vector<2x8x128xf32>
    %202 = arith.addf %199, %201 : vector<2x8x128xf32>
    %203 = arith.negf %202 : vector<2x8x128xf32>
    %204 = math.exp %203 : vector<2x8x128xf32>
    %cst_80 = arith.constant 1.000000e+00 : f32
    %205 = vector.broadcast %cst_80 : f32 to vector<2x8x128xf32>
    %206 = arith.addf %205, %204 : vector<2x8x128xf32>
    %207 = arith.divf %205, %206 : vector<2x8x128xf32>
    %208 = math.tanh %202 : vector<2x8x128xf32>
    %209 = vector.extract_strided_slice %207 {offsets = [0, 0, 0], sizes = [2, 8, 32], strides = [1, 1, 1]} : vector<2x8x128xf32> to vector<2x8x32xf32>
    %210 = vector.extract_strided_slice %207 {offsets = [0, 0, 32], sizes = [2, 8, 32], strides = [1, 1, 1]} : vector<2x8x128xf32> to vector<2x8x32xf32>
    %211 = vector.extract_strided_slice %208 {offsets = [0, 0, 64], sizes = [2, 8, 32], strides = [1, 1, 1]} : vector<2x8x128xf32> to vector<2x8x32xf32>
    %212 = vector.extract_strided_slice %207 {offsets = [0, 0, 96], sizes = [2, 8, 32], strides = [1, 1, 1]} : vector<2x8x128xf32> to vector<2x8x32xf32>
    %213 = arith.mulf %210, %138 : vector<2x8x32xf32>
    %214 = arith.mulf %209, %211 : vector<2x8x32xf32>
    %215 = arith.addf %213, %214 : vector<2x8x32xf32>
    %216 = math.tanh %215 : vector<2x8x32xf32>
    %217 = arith.mulf %212, %216 : vector<2x8x32xf32>
    %218 = tpu.concatenate %217, %161 in 2 : vector<2x8x32xf32>, vector<2x8x32xf32> -> vector<2x8x64xf32>
    %219 = vector.shape_cast %218 : vector<2x8x64xf32> to vector<16x64xf32>
    %220 = arith.truncf %219 : vector<16x64xf32> to vector<16x64xbf16>
    %cst_81 = arith.constant dense<0.000000e+00> : vector<16x128xf32>
    %221 = tpu.matmul %220, %2, %cst_81 {dimension_numbers = #tpu.dot_dimension_numbers<[1], [0], [0], [1], [0, 0, 1, 1], [], []>} : vector<16x64xbf16>, vector<64x128xbf16>, vector<16x128xf32> -> vector<16x128xf32>
    %222 = vector.shape_cast %221 : vector<16x128xf32> to vector<2x8x128xf32>
    %223 = arith.addf %222, %5 : vector<2x8x128xf32>
    %224 = arith.negf %223 : vector<2x8x128xf32>
    %225 = math.exp %224 : vector<2x8x128xf32>
    %cst_82 = arith.constant 1.000000e+00 : f32
    %226 = vector.broadcast %cst_82 : f32 to vector<2x8x128xf32>
    %227 = arith.addf %226, %225 : vector<2x8x128xf32>
    %228 = arith.divf %226, %227 : vector<2x8x128xf32>
    %229 = math.tanh %223 : vector<2x8x128xf32>
    %230 = vector.extract_strided_slice %228 {offsets = [0, 0, 0], sizes = [2, 8, 32], strides = [1, 1, 1]} : vector<2x8x128xf32> to vector<2x8x32xf32>
    %231 = vector.extract_strided_slice %228 {offsets = [0, 0, 32], sizes = [2, 8, 32], strides = [1, 1, 1]} : vector<2x8x128xf32> to vector<2x8x32xf32>
    %232 = vector.extract_strided_slice %229 {offsets = [0, 0, 64], sizes = [2, 8, 32], strides = [1, 1, 1]} : vector<2x8x128xf32> to vector<2x8x32xf32>
    %233 = vector.extract_strided_slice %228 {offsets = [0, 0, 96], sizes = [2, 8, 32], strides = [1, 1, 1]} : vector<2x8x128xf32> to vector<2x8x32xf32>
    %234 = arith.mulf %231, %159 : vector<2x8x32xf32>
    %235 = arith.mulf %230, %232 : vector<2x8x32xf32>
    %236 = arith.addf %234, %235 : vector<2x8x32xf32>
    %237 = math.tanh %236 : vector<2x8x32xf32>
    %238 = arith.mulf %233, %237 : vector<2x8x32xf32>
    %239 = vector.shape_cast %238 : vector<2x8x32xf32> to vector<16x1x32xf32>
    %240 = arith.truncf %239 : vector<16x1x32xf32> to vector<16x1x32xbf16>
    "tpu.trace_start"() <{level = 10 : i32, message = "bqh,bsh->bqs"}> : () -> ()
    %cst_83 = arith.constant dense<0.000000e+00> : vector<16x1x8xf32>
    %241 = tpu.matmul %240, %25, %cst_83 {dimension_numbers = #tpu.dot_dimension_numbers<[2], [2], [1], [1], [0, 0, 0, 1, 1, 1], [0], [0]>} : vector<16x1x32xbf16>, vector<16x8x32xbf16>, vector<16x1x8xf32> -> vector<16x1x8xf32>
    "tpu.trace_stop"() : () -> ()
    %242 = arith.addf %241, %26 : vector<16x1x8xf32>
    %cst_84 = arith.constant dense<0xFF800000> : vector<16x1xf32>
    %243 = vector.multi_reduction <maximumf>, %242, %cst_84 [2] : vector<16x1x8xf32> to vector<16x1xf32>
    %244 = vector.shape_cast %243 : vector<16x1xf32> to vector<16x1x1xf32>
    %245 = vector.broadcast %244 : vector<16x1x1xf32> to vector<16x1x8xf32>
    %246 = arith.subf %242, %245 : vector<16x1x8xf32>
    %247 = math.exp %246 : vector<16x1x8xf32>
    %cst_85 = arith.constant dense<0.000000e+00> : vector<16x1xf32>
    %248 = vector.multi_reduction <add>, %247, %cst_85 [2] : vector<16x1x8xf32> to vector<16x1xf32>
    %249 = vector.shape_cast %248 : vector<16x1xf32> to vector<16x1x1xf32>
    %250 = tpu.reciprocal %249 {approx = true} : vector<16x1x1xf32> -> vector<16x1x1xf32>
    %251 = vector.broadcast %250 : vector<16x1x1xf32> to vector<16x1x8xf32>
    %252 = arith.mulf %247, %251 : vector<16x1x8xf32>
    %253 = arith.truncf %252 : vector<16x1x8xf32> to vector<16x1x8xbf16>
    "tpu.trace_start"() <{level = 10 : i32, message = "bqs,bsh->bqh"}> : () -> ()
    %cst_86 = arith.constant dense<0.000000e+00> : vector<16x1x32xf32>
    %254 = tpu.matmul %253, %16, %cst_86 {dimension_numbers = #tpu.dot_dimension_numbers<[2], [1], [1], [2], [0, 0, 0, 1, 1, 2], [0], [0]>} : vector<16x1x8xbf16>, vector<16x8x32xbf16>, vector<16x1x32xf32> -> vector<16x1x32xf32>
    "tpu.trace_stop"() : () -> ()
    %255 = vector.shape_cast %254 : vector<16x1x32xf32> to vector<2x8x32xf32>
    %256 = vector.extract_strided_slice %255 {offsets = [0, 0, 0], sizes = [1, 8, 32], strides = [1, 1, 1]} : vector<2x8x32xf32> to vector<1x8x32xf32>
    %257 = vector.shape_cast %256 : vector<1x8x32xf32> to vector<8x32xf32>
    %258 = vector.extract_strided_slice %238 {offsets = [0, 0, 0], sizes = [1, 8, 32], strides = [1, 1, 1]} : vector<2x8x32xf32> to vector<1x8x32xf32>
    %259 = vector.shape_cast %258 : vector<1x8x32xf32> to vector<8x32xf32>
    %260 = vector.extract_strided_slice %255 {offsets = [1, 0, 0], sizes = [1, 8, 32], strides = [1, 1, 1]} : vector<2x8x32xf32> to vector<1x8x32xf32>
    %261 = vector.shape_cast %260 : vector<1x8x32xf32> to vector<8x32xf32>
    %262 = vector.extract_strided_slice %238 {offsets = [1, 0, 0], sizes = [1, 8, 32], strides = [1, 1, 1]} : vector<2x8x32xf32> to vector<1x8x32xf32>
    %263 = vector.shape_cast %262 : vector<1x8x32xf32> to vector<8x32xf32>
    %264 = tpu.concatenate %257, %259, %261, %263 in 1 : vector<8x32xf32>, vector<8x32xf32>, vector<8x32xf32>, vector<8x32xf32> -> vector<8x128xf32>
    %265 = arith.truncf %264 : vector<8x128xf32> to vector<8x128xbf16>
    %cst_87 = arith.constant dense<0.000000e+00> : vector<8x32xf32>
    %266 = tpu.matmul %265, %27, %cst_87 {dimension_numbers = #tpu.dot_dimension_numbers<[1], [0], [0], [1], [0, 0, 1, 1], [], []>} : vector<8x128xbf16>, vector<128x32xbf16>, vector<8x32xf32> -> vector<8x32xf32>
    %267 = math.tanh %266 : vector<8x32xf32>
    %c3 = arith.constant 3 : index
    %c0_88 = arith.constant 0 : index
    %c0_89 = arith.constant 0 : index
    %268 = vector.load %arg17[%c3, %c0_88, %c0_89] : memref<8x8x128xf32, #tpu.memory_space<vmem>>, vector<1x8x128xf32>
    %269 = vector.shape_cast %268 : vector<1x8x128xf32> to vector<8x128xf32>
    %270 = arith.truncf %267 : vector<8x32xf32> to vector<8x32xbf16>
    %cst_90 = arith.constant dense<0.000000e+00> : vector<8x128xf32>
    %271 = tpu.matmul %270, %0, %cst_90 {dimension_numbers = #tpu.dot_dimension_numbers<[1], [0], [0], [1], [0, 0, 1, 1], [], []>} : vector<8x32xbf16>, vector<32x128xbf16>, vector<8x128xf32> -> vector<8x128xf32>
    %272 = arith.addf %269, %271 : vector<8x128xf32>
    %273 = vector.shape_cast %217 : vector<2x8x32xf32> to vector<16x32xf32>
    %274 = arith.truncf %273 : vector<16x32xf32> to vector<16x32xbf16>
    %cst_91 = arith.constant dense<0.000000e+00> : vector<16x128xf32>
    %275 = tpu.matmul %274, %1, %cst_91 {dimension_numbers = #tpu.dot_dimension_numbers<[1], [0], [0], [1], [0, 0, 1, 1], [], []>} : vector<16x32xbf16>, vector<32x128xbf16>, vector<16x128xf32> -> vector<16x128xf32>
    %276 = vector.shape_cast %275 : vector<16x128xf32> to vector<2x8x128xf32>
    %277 = vector.shape_cast %272 : vector<8x128xf32> to vector<1x8x128xf32>
    %278 = vector.broadcast %277 : vector<1x8x128xf32> to vector<2x8x128xf32>
    %279 = arith.addf %276, %278 : vector<2x8x128xf32>
    %280 = arith.negf %279 : vector<2x8x128xf32>
    %281 = math.exp %280 : vector<2x8x128xf32>
    %cst_92 = arith.constant 1.000000e+00 : f32
    %282 = vector.broadcast %cst_92 : f32 to vector<2x8x128xf32>
    %283 = arith.addf %282, %281 : vector<2x8x128xf32>
    %284 = arith.divf %282, %283 : vector<2x8x128xf32>
    %285 = math.tanh %279 : vector<2x8x128xf32>
    %286 = vector.extract_strided_slice %284 {offsets = [0, 0, 0], sizes = [2, 8, 32], strides = [1, 1, 1]} : vector<2x8x128xf32> to vector<2x8x32xf32>
    %287 = vector.extract_strided_slice %284 {offsets = [0, 0, 32], sizes = [2, 8, 32], strides = [1, 1, 1]} : vector<2x8x128xf32> to vector<2x8x32xf32>
    %288 = vector.extract_strided_slice %285 {offsets = [0, 0, 64], sizes = [2, 8, 32], strides = [1, 1, 1]} : vector<2x8x128xf32> to vector<2x8x32xf32>
    %289 = vector.extract_strided_slice %284 {offsets = [0, 0, 96], sizes = [2, 8, 32], strides = [1, 1, 1]} : vector<2x8x128xf32> to vector<2x8x32xf32>
    %290 = arith.mulf %287, %215 : vector<2x8x32xf32>
    %291 = arith.mulf %286, %288 : vector<2x8x32xf32>
    %292 = arith.addf %290, %291 : vector<2x8x32xf32>
    %293 = math.tanh %292 : vector<2x8x32xf32>
    %294 = arith.mulf %289, %293 : vector<2x8x32xf32>
    %295 = tpu.concatenate %294, %238 in 2 : vector<2x8x32xf32>, vector<2x8x32xf32> -> vector<2x8x64xf32>
    %296 = vector.shape_cast %295 : vector<2x8x64xf32> to vector<16x64xf32>
    %297 = arith.truncf %296 : vector<16x64xf32> to vector<16x64xbf16>
    %cst_93 = arith.constant dense<0.000000e+00> : vector<16x128xf32>
    %298 = tpu.matmul %297, %2, %cst_93 {dimension_numbers = #tpu.dot_dimension_numbers<[1], [0], [0], [1], [0, 0, 1, 1], [], []>} : vector<16x64xbf16>, vector<64x128xbf16>, vector<16x128xf32> -> vector<16x128xf32>
    %299 = vector.shape_cast %298 : vector<16x128xf32> to vector<2x8x128xf32>
    %300 = arith.addf %299, %5 : vector<2x8x128xf32>
    %301 = arith.negf %300 : vector<2x8x128xf32>
    %302 = math.exp %301 : vector<2x8x128xf32>
    %cst_94 = arith.constant 1.000000e+00 : f32
    %303 = vector.broadcast %cst_94 : f32 to vector<2x8x128xf32>
    %304 = arith.addf %303, %302 : vector<2x8x128xf32>
    %305 = arith.divf %303, %304 : vector<2x8x128xf32>
    %306 = math.tanh %300 : vector<2x8x128xf32>
    %307 = vector.extract_strided_slice %305 {offsets = [0, 0, 0], sizes = [2, 8, 32], strides = [1, 1, 1]} : vector<2x8x128xf32> to vector<2x8x32xf32>
    %308 = vector.extract_strided_slice %305 {offsets = [0, 0, 32], sizes = [2, 8, 32], strides = [1, 1, 1]} : vector<2x8x128xf32> to vector<2x8x32xf32>
    %309 = vector.extract_strided_slice %306 {offsets = [0, 0, 64], sizes = [2, 8, 32], strides = [1, 1, 1]} : vector<2x8x128xf32> to vector<2x8x32xf32>
    %310 = vector.extract_strided_slice %305 {offsets = [0, 0, 96], sizes = [2, 8, 32], strides = [1, 1, 1]} : vector<2x8x128xf32> to vector<2x8x32xf32>
    %311 = arith.mulf %308, %236 : vector<2x8x32xf32>
    %312 = arith.mulf %307, %309 : vector<2x8x32xf32>
    %313 = arith.addf %311, %312 : vector<2x8x32xf32>
    %314 = math.tanh %313 : vector<2x8x32xf32>
    %315 = arith.mulf %310, %314 : vector<2x8x32xf32>
    %316 = vector.shape_cast %315 : vector<2x8x32xf32> to vector<16x1x32xf32>
    %317 = arith.truncf %316 : vector<16x1x32xf32> to vector<16x1x32xbf16>
    "tpu.trace_start"() <{level = 10 : i32, message = "bqh,bsh->bqs"}> : () -> ()
    %cst_95 = arith.constant dense<0.000000e+00> : vector<16x1x8xf32>
    %318 = tpu.matmul %317, %25, %cst_95 {dimension_numbers = #tpu.dot_dimension_numbers<[2], [2], [1], [1], [0, 0, 0, 1, 1, 1], [0], [0]>} : vector<16x1x32xbf16>, vector<16x8x32xbf16>, vector<16x1x8xf32> -> vector<16x1x8xf32>
    "tpu.trace_stop"() : () -> ()
    %319 = arith.addf %318, %26 : vector<16x1x8xf32>
    %cst_96 = arith.constant dense<0xFF800000> : vector<16x1xf32>
    %320 = vector.multi_reduction <maximumf>, %319, %cst_96 [2] : vector<16x1x8xf32> to vector<16x1xf32>
    %321 = vector.shape_cast %320 : vector<16x1xf32> to vector<16x1x1xf32>
    %322 = vector.broadcast %321 : vector<16x1x1xf32> to vector<16x1x8xf32>
    %323 = arith.subf %319, %322 : vector<16x1x8xf32>
    %324 = math.exp %323 : vector<16x1x8xf32>
    %cst_97 = arith.constant dense<0.000000e+00> : vector<16x1xf32>
    %325 = vector.multi_reduction <add>, %324, %cst_97 [2] : vector<16x1x8xf32> to vector<16x1xf32>
    %326 = vector.shape_cast %325 : vector<16x1xf32> to vector<16x1x1xf32>
    %327 = tpu.reciprocal %326 {approx = true} : vector<16x1x1xf32> -> vector<16x1x1xf32>
    %328 = vector.broadcast %327 : vector<16x1x1xf32> to vector<16x1x8xf32>
    %329 = arith.mulf %324, %328 : vector<16x1x8xf32>
    %330 = arith.truncf %329 : vector<16x1x8xf32> to vector<16x1x8xbf16>
    "tpu.trace_start"() <{level = 10 : i32, message = "bqs,bsh->bqh"}> : () -> ()
    %cst_98 = arith.constant dense<0.000000e+00> : vector<16x1x32xf32>
    %331 = tpu.matmul %330, %16, %cst_98 {dimension_numbers = #tpu.dot_dimension_numbers<[2], [1], [1], [2], [0, 0, 0, 1, 1, 2], [0], [0]>} : vector<16x1x8xbf16>, vector<16x8x32xbf16>, vector<16x1x32xf32> -> vector<16x1x32xf32>
    "tpu.trace_stop"() : () -> ()
    %332 = vector.shape_cast %331 : vector<16x1x32xf32> to vector<2x8x32xf32>
    %333 = vector.extract_strided_slice %332 {offsets = [0, 0, 0], sizes = [1, 8, 32], strides = [1, 1, 1]} : vector<2x8x32xf32> to vector<1x8x32xf32>
    %334 = vector.shape_cast %333 : vector<1x8x32xf32> to vector<8x32xf32>
    %335 = vector.extract_strided_slice %315 {offsets = [0, 0, 0], sizes = [1, 8, 32], strides = [1, 1, 1]} : vector<2x8x32xf32> to vector<1x8x32xf32>
    %336 = vector.shape_cast %335 : vector<1x8x32xf32> to vector<8x32xf32>
    %337 = vector.extract_strided_slice %332 {offsets = [1, 0, 0], sizes = [1, 8, 32], strides = [1, 1, 1]} : vector<2x8x32xf32> to vector<1x8x32xf32>
    %338 = vector.shape_cast %337 : vector<1x8x32xf32> to vector<8x32xf32>
    %339 = vector.extract_strided_slice %315 {offsets = [1, 0, 0], sizes = [1, 8, 32], strides = [1, 1, 1]} : vector<2x8x32xf32> to vector<1x8x32xf32>
    %340 = vector.shape_cast %339 : vector<1x8x32xf32> to vector<8x32xf32>
    %341 = tpu.concatenate %334, %336, %338, %340 in 1 : vector<8x32xf32>, vector<8x32xf32>, vector<8x32xf32>, vector<8x32xf32> -> vector<8x128xf32>
    %342 = arith.truncf %341 : vector<8x128xf32> to vector<8x128xbf16>
    %cst_99 = arith.constant dense<0.000000e+00> : vector<8x32xf32>
    %343 = tpu.matmul %342, %27, %cst_99 {dimension_numbers = #tpu.dot_dimension_numbers<[1], [0], [0], [1], [0, 0, 1, 1], [], []>} : vector<8x128xbf16>, vector<128x32xbf16>, vector<8x32xf32> -> vector<8x32xf32>
    %344 = math.tanh %343 : vector<8x32xf32>
    %c4 = arith.constant 4 : index
    %c0_100 = arith.constant 0 : index
    %c0_101 = arith.constant 0 : index
    %345 = vector.load %arg17[%c4, %c0_100, %c0_101] : memref<8x8x128xf32, #tpu.memory_space<vmem>>, vector<1x8x128xf32>
    %346 = vector.shape_cast %345 : vector<1x8x128xf32> to vector<8x128xf32>
    %347 = arith.truncf %344 : vector<8x32xf32> to vector<8x32xbf16>
    %cst_102 = arith.constant dense<0.000000e+00> : vector<8x128xf32>
    %348 = tpu.matmul %347, %0, %cst_102 {dimension_numbers = #tpu.dot_dimension_numbers<[1], [0], [0], [1], [0, 0, 1, 1], [], []>} : vector<8x32xbf16>, vector<32x128xbf16>, vector<8x128xf32> -> vector<8x128xf32>
    %349 = arith.addf %346, %348 : vector<8x128xf32>
    %350 = vector.shape_cast %294 : vector<2x8x32xf32> to vector<16x32xf32>
    %351 = arith.truncf %350 : vector<16x32xf32> to vector<16x32xbf16>
    %cst_103 = arith.constant dense<0.000000e+00> : vector<16x128xf32>
    %352 = tpu.matmul %351, %1, %cst_103 {dimension_numbers = #tpu.dot_dimension_numbers<[1], [0], [0], [1], [0, 0, 1, 1], [], []>} : vector<16x32xbf16>, vector<32x128xbf16>, vector<16x128xf32> -> vector<16x128xf32>
    %353 = vector.shape_cast %352 : vector<16x128xf32> to vector<2x8x128xf32>
    %354 = vector.shape_cast %349 : vector<8x128xf32> to vector<1x8x128xf32>
    %355 = vector.broadcast %354 : vector<1x8x128xf32> to vector<2x8x128xf32>
    %356 = arith.addf %353, %355 : vector<2x8x128xf32>
    %357 = arith.negf %356 : vector<2x8x128xf32>
    %358 = math.exp %357 : vector<2x8x128xf32>
    %cst_104 = arith.constant 1.000000e+00 : f32
    %359 = vector.broadcast %cst_104 : f32 to vector<2x8x128xf32>
    %360 = arith.addf %359, %358 : vector<2x8x128xf32>
    %361 = arith.divf %359, %360 : vector<2x8x128xf32>
    %362 = math.tanh %356 : vector<2x8x128xf32>
    %363 = vector.extract_strided_slice %361 {offsets = [0, 0, 0], sizes = [2, 8, 32], strides = [1, 1, 1]} : vector<2x8x128xf32> to vector<2x8x32xf32>
    %364 = vector.extract_strided_slice %361 {offsets = [0, 0, 32], sizes = [2, 8, 32], strides = [1, 1, 1]} : vector<2x8x128xf32> to vector<2x8x32xf32>
    %365 = vector.extract_strided_slice %362 {offsets = [0, 0, 64], sizes = [2, 8, 32], strides = [1, 1, 1]} : vector<2x8x128xf32> to vector<2x8x32xf32>
    %366 = vector.extract_strided_slice %361 {offsets = [0, 0, 96], sizes = [2, 8, 32], strides = [1, 1, 1]} : vector<2x8x128xf32> to vector<2x8x32xf32>
    %367 = arith.mulf %364, %292 : vector<2x8x32xf32>
    %368 = arith.mulf %363, %365 : vector<2x8x32xf32>
    %369 = arith.addf %367, %368 : vector<2x8x32xf32>
    %370 = math.tanh %369 : vector<2x8x32xf32>
    %371 = arith.mulf %366, %370 : vector<2x8x32xf32>
    %372 = tpu.concatenate %371, %315 in 2 : vector<2x8x32xf32>, vector<2x8x32xf32> -> vector<2x8x64xf32>
    %373 = vector.shape_cast %372 : vector<2x8x64xf32> to vector<16x64xf32>
    %374 = arith.truncf %373 : vector<16x64xf32> to vector<16x64xbf16>
    %cst_105 = arith.constant dense<0.000000e+00> : vector<16x128xf32>
    %375 = tpu.matmul %374, %2, %cst_105 {dimension_numbers = #tpu.dot_dimension_numbers<[1], [0], [0], [1], [0, 0, 1, 1], [], []>} : vector<16x64xbf16>, vector<64x128xbf16>, vector<16x128xf32> -> vector<16x128xf32>
    %376 = vector.shape_cast %375 : vector<16x128xf32> to vector<2x8x128xf32>
    %377 = arith.addf %376, %5 : vector<2x8x128xf32>
    %378 = arith.negf %377 : vector<2x8x128xf32>
    %379 = math.exp %378 : vector<2x8x128xf32>
    %cst_106 = arith.constant 1.000000e+00 : f32
    %380 = vector.broadcast %cst_106 : f32 to vector<2x8x128xf32>
    %381 = arith.addf %380, %379 : vector<2x8x128xf32>
    %382 = arith.divf %380, %381 : vector<2x8x128xf32>
    %383 = math.tanh %377 : vector<2x8x128xf32>
    %384 = vector.extract_strided_slice %382 {offsets = [0, 0, 0], sizes = [2, 8, 32], strides = [1, 1, 1]} : vector<2x8x128xf32> to vector<2x8x32xf32>
    %385 = vector.extract_strided_slice %382 {offsets = [0, 0, 32], sizes = [2, 8, 32], strides = [1, 1, 1]} : vector<2x8x128xf32> to vector<2x8x32xf32>
    %386 = vector.extract_strided_slice %383 {offsets = [0, 0, 64], sizes = [2, 8, 32], strides = [1, 1, 1]} : vector<2x8x128xf32> to vector<2x8x32xf32>
    %387 = vector.extract_strided_slice %382 {offsets = [0, 0, 96], sizes = [2, 8, 32], strides = [1, 1, 1]} : vector<2x8x128xf32> to vector<2x8x32xf32>
    %388 = arith.mulf %385, %313 : vector<2x8x32xf32>
    %389 = arith.mulf %384, %386 : vector<2x8x32xf32>
    %390 = arith.addf %388, %389 : vector<2x8x32xf32>
    %391 = math.tanh %390 : vector<2x8x32xf32>
    %392 = arith.mulf %387, %391 : vector<2x8x32xf32>
    %393 = vector.shape_cast %392 : vector<2x8x32xf32> to vector<16x1x32xf32>
    %394 = arith.truncf %393 : vector<16x1x32xf32> to vector<16x1x32xbf16>
    "tpu.trace_start"() <{level = 10 : i32, message = "bqh,bsh->bqs"}> : () -> ()
    %cst_107 = arith.constant dense<0.000000e+00> : vector<16x1x8xf32>
    %395 = tpu.matmul %394, %25, %cst_107 {dimension_numbers = #tpu.dot_dimension_numbers<[2], [2], [1], [1], [0, 0, 0, 1, 1, 1], [0], [0]>} : vector<16x1x32xbf16>, vector<16x8x32xbf16>, vector<16x1x8xf32> -> vector<16x1x8xf32>
    "tpu.trace_stop"() : () -> ()
    %396 = arith.addf %395, %26 : vector<16x1x8xf32>
    %cst_108 = arith.constant dense<0xFF800000> : vector<16x1xf32>
    %397 = vector.multi_reduction <maximumf>, %396, %cst_108 [2] : vector<16x1x8xf32> to vector<16x1xf32>
    %398 = vector.shape_cast %397 : vector<16x1xf32> to vector<16x1x1xf32>
    %399 = vector.broadcast %398 : vector<16x1x1xf32> to vector<16x1x8xf32>
    %400 = arith.subf %396, %399 : vector<16x1x8xf32>
    %401 = math.exp %400 : vector<16x1x8xf32>
    %cst_109 = arith.constant dense<0.000000e+00> : vector<16x1xf32>
    %402 = vector.multi_reduction <add>, %401, %cst_109 [2] : vector<16x1x8xf32> to vector<16x1xf32>
    %403 = vector.shape_cast %402 : vector<16x1xf32> to vector<16x1x1xf32>
    %404 = tpu.reciprocal %403 {approx = true} : vector<16x1x1xf32> -> vector<16x1x1xf32>
    %405 = vector.broadcast %404 : vector<16x1x1xf32> to vector<16x1x8xf32>
    %406 = arith.mulf %401, %405 : vector<16x1x8xf32>
    %407 = arith.truncf %406 : vector<16x1x8xf32> to vector<16x1x8xbf16>
    "tpu.trace_start"() <{level = 10 : i32, message = "bqs,bsh->bqh"}> : () -> ()
    %cst_110 = arith.constant dense<0.000000e+00> : vector<16x1x32xf32>
    %408 = tpu.matmul %407, %16, %cst_110 {dimension_numbers = #tpu.dot_dimension_numbers<[2], [1], [1], [2], [0, 0, 0, 1, 1, 2], [0], [0]>} : vector<16x1x8xbf16>, vector<16x8x32xbf16>, vector<16x1x32xf32> -> vector<16x1x32xf32>
    "tpu.trace_stop"() : () -> ()
    %409 = vector.shape_cast %408 : vector<16x1x32xf32> to vector<2x8x32xf32>
    %410 = vector.extract_strided_slice %409 {offsets = [0, 0, 0], sizes = [1, 8, 32], strides = [1, 1, 1]} : vector<2x8x32xf32> to vector<1x8x32xf32>
    %411 = vector.shape_cast %410 : vector<1x8x32xf32> to vector<8x32xf32>
    %412 = vector.extract_strided_slice %392 {offsets = [0, 0, 0], sizes = [1, 8, 32], strides = [1, 1, 1]} : vector<2x8x32xf32> to vector<1x8x32xf32>
    %413 = vector.shape_cast %412 : vector<1x8x32xf32> to vector<8x32xf32>
    %414 = vector.extract_strided_slice %409 {offsets = [1, 0, 0], sizes = [1, 8, 32], strides = [1, 1, 1]} : vector<2x8x32xf32> to vector<1x8x32xf32>
    %415 = vector.shape_cast %414 : vector<1x8x32xf32> to vector<8x32xf32>
    %416 = vector.extract_strided_slice %392 {offsets = [1, 0, 0], sizes = [1, 8, 32], strides = [1, 1, 1]} : vector<2x8x32xf32> to vector<1x8x32xf32>
    %417 = vector.shape_cast %416 : vector<1x8x32xf32> to vector<8x32xf32>
    %418 = tpu.concatenate %411, %413, %415, %417 in 1 : vector<8x32xf32>, vector<8x32xf32>, vector<8x32xf32>, vector<8x32xf32> -> vector<8x128xf32>
    %419 = arith.truncf %418 : vector<8x128xf32> to vector<8x128xbf16>
    %cst_111 = arith.constant dense<0.000000e+00> : vector<8x32xf32>
    %420 = tpu.matmul %419, %27, %cst_111 {dimension_numbers = #tpu.dot_dimension_numbers<[1], [0], [0], [1], [0, 0, 1, 1], [], []>} : vector<8x128xbf16>, vector<128x32xbf16>, vector<8x32xf32> -> vector<8x32xf32>
    %421 = math.tanh %420 : vector<8x32xf32>
    %c5 = arith.constant 5 : index
    %c0_112 = arith.constant 0 : index
    %c0_113 = arith.constant 0 : index
    %422 = vector.load %arg17[%c5, %c0_112, %c0_113] : memref<8x8x128xf32, #tpu.memory_space<vmem>>, vector<1x8x128xf32>
    %423 = vector.shape_cast %422 : vector<1x8x128xf32> to vector<8x128xf32>
    %424 = arith.truncf %421 : vector<8x32xf32> to vector<8x32xbf16>
    %cst_114 = arith.constant dense<0.000000e+00> : vector<8x128xf32>
    %425 = tpu.matmul %424, %0, %cst_114 {dimension_numbers = #tpu.dot_dimension_numbers<[1], [0], [0], [1], [0, 0, 1, 1], [], []>} : vector<8x32xbf16>, vector<32x128xbf16>, vector<8x128xf32> -> vector<8x128xf32>
    %426 = arith.addf %423, %425 : vector<8x128xf32>
    %427 = vector.shape_cast %371 : vector<2x8x32xf32> to vector<16x32xf32>
    %428 = arith.truncf %427 : vector<16x32xf32> to vector<16x32xbf16>
    %cst_115 = arith.constant dense<0.000000e+00> : vector<16x128xf32>
    %429 = tpu.matmul %428, %1, %cst_115 {dimension_numbers = #tpu.dot_dimension_numbers<[1], [0], [0], [1], [0, 0, 1, 1], [], []>} : vector<16x32xbf16>, vector<32x128xbf16>, vector<16x128xf32> -> vector<16x128xf32>
    %430 = vector.shape_cast %429 : vector<16x128xf32> to vector<2x8x128xf32>
    %431 = vector.shape_cast %426 : vector<8x128xf32> to vector<1x8x128xf32>
    %432 = vector.broadcast %431 : vector<1x8x128xf32> to vector<2x8x128xf32>
    %433 = arith.addf %430, %432 : vector<2x8x128xf32>
    %434 = arith.negf %433 : vector<2x8x128xf32>
    %435 = math.exp %434 : vector<2x8x128xf32>
    %cst_116 = arith.constant 1.000000e+00 : f32
    %436 = vector.broadcast %cst_116 : f32 to vector<2x8x128xf32>
    %437 = arith.addf %436, %435 : vector<2x8x128xf32>
    %438 = arith.divf %436, %437 : vector<2x8x128xf32>
    %439 = math.tanh %433 : vector<2x8x128xf32>
    %440 = vector.extract_strided_slice %438 {offsets = [0, 0, 0], sizes = [2, 8, 32], strides = [1, 1, 1]} : vector<2x8x128xf32> to vector<2x8x32xf32>
    %441 = vector.extract_strided_slice %438 {offsets = [0, 0, 32], sizes = [2, 8, 32], strides = [1, 1, 1]} : vector<2x8x128xf32> to vector<2x8x32xf32>
    %442 = vector.extract_strided_slice %439 {offsets = [0, 0, 64], sizes = [2, 8, 32], strides = [1, 1, 1]} : vector<2x8x128xf32> to vector<2x8x32xf32>
    %443 = vector.extract_strided_slice %438 {offsets = [0, 0, 96], sizes = [2, 8, 32], strides = [1, 1, 1]} : vector<2x8x128xf32> to vector<2x8x32xf32>
    %444 = arith.mulf %441, %369 : vector<2x8x32xf32>
    %445 = arith.mulf %440, %442 : vector<2x8x32xf32>
    %446 = arith.addf %444, %445 : vector<2x8x32xf32>
    %447 = math.tanh %446 : vector<2x8x32xf32>
    %448 = arith.mulf %443, %447 : vector<2x8x32xf32>
    %449 = tpu.concatenate %448, %392 in 2 : vector<2x8x32xf32>, vector<2x8x32xf32> -> vector<2x8x64xf32>
    %450 = vector.shape_cast %449 : vector<2x8x64xf32> to vector<16x64xf32>
    %451 = arith.truncf %450 : vector<16x64xf32> to vector<16x64xbf16>
    %cst_117 = arith.constant dense<0.000000e+00> : vector<16x128xf32>
    %452 = tpu.matmul %451, %2, %cst_117 {dimension_numbers = #tpu.dot_dimension_numbers<[1], [0], [0], [1], [0, 0, 1, 1], [], []>} : vector<16x64xbf16>, vector<64x128xbf16>, vector<16x128xf32> -> vector<16x128xf32>
    %453 = vector.shape_cast %452 : vector<16x128xf32> to vector<2x8x128xf32>
    %454 = arith.addf %453, %5 : vector<2x8x128xf32>
    %455 = arith.negf %454 : vector<2x8x128xf32>
    %456 = math.exp %455 : vector<2x8x128xf32>
    %cst_118 = arith.constant 1.000000e+00 : f32
    %457 = vector.broadcast %cst_118 : f32 to vector<2x8x128xf32>
    %458 = arith.addf %457, %456 : vector<2x8x128xf32>
    %459 = arith.divf %457, %458 : vector<2x8x128xf32>
    %460 = math.tanh %454 : vector<2x8x128xf32>
    %461 = vector.extract_strided_slice %459 {offsets = [0, 0, 0], sizes = [2, 8, 32], strides = [1, 1, 1]} : vector<2x8x128xf32> to vector<2x8x32xf32>
    %462 = vector.extract_strided_slice %459 {offsets = [0, 0, 32], sizes = [2, 8, 32], strides = [1, 1, 1]} : vector<2x8x128xf32> to vector<2x8x32xf32>
    %463 = vector.extract_strided_slice %460 {offsets = [0, 0, 64], sizes = [2, 8, 32], strides = [1, 1, 1]} : vector<2x8x128xf32> to vector<2x8x32xf32>
    %464 = vector.extract_strided_slice %459 {offsets = [0, 0, 96], sizes = [2, 8, 32], strides = [1, 1, 1]} : vector<2x8x128xf32> to vector<2x8x32xf32>
    %465 = arith.mulf %462, %390 : vector<2x8x32xf32>
    %466 = arith.mulf %461, %463 : vector<2x8x32xf32>
    %467 = arith.addf %465, %466 : vector<2x8x32xf32>
    %468 = math.tanh %467 : vector<2x8x32xf32>
    %469 = arith.mulf %464, %468 : vector<2x8x32xf32>
    %470 = vector.shape_cast %469 : vector<2x8x32xf32> to vector<16x1x32xf32>
    %471 = arith.truncf %470 : vector<16x1x32xf32> to vector<16x1x32xbf16>
    "tpu.trace_start"() <{level = 10 : i32, message = "bqh,bsh->bqs"}> : () -> ()
    %cst_119 = arith.constant dense<0.000000e+00> : vector<16x1x8xf32>
    %472 = tpu.matmul %471, %25, %cst_119 {dimension_numbers = #tpu.dot_dimension_numbers<[2], [2], [1], [1], [0, 0, 0, 1, 1, 1], [0], [0]>} : vector<16x1x32xbf16>, vector<16x8x32xbf16>, vector<16x1x8xf32> -> vector<16x1x8xf32>
    "tpu.trace_stop"() : () -> ()
    %473 = arith.addf %472, %26 : vector<16x1x8xf32>
    %cst_120 = arith.constant dense<0xFF800000> : vector<16x1xf32>
    %474 = vector.multi_reduction <maximumf>, %473, %cst_120 [2] : vector<16x1x8xf32> to vector<16x1xf32>
    %475 = vector.shape_cast %474 : vector<16x1xf32> to vector<16x1x1xf32>
    %476 = vector.broadcast %475 : vector<16x1x1xf32> to vector<16x1x8xf32>
    %477 = arith.subf %473, %476 : vector<16x1x8xf32>
    %478 = math.exp %477 : vector<16x1x8xf32>
    %cst_121 = arith.constant dense<0.000000e+00> : vector<16x1xf32>
    %479 = vector.multi_reduction <add>, %478, %cst_121 [2] : vector<16x1x8xf32> to vector<16x1xf32>
    %480 = vector.shape_cast %479 : vector<16x1xf32> to vector<16x1x1xf32>
    %481 = tpu.reciprocal %480 {approx = true} : vector<16x1x1xf32> -> vector<16x1x1xf32>
    %482 = vector.broadcast %481 : vector<16x1x1xf32> to vector<16x1x8xf32>
    %483 = arith.mulf %478, %482 : vector<16x1x8xf32>
    %484 = arith.truncf %483 : vector<16x1x8xf32> to vector<16x1x8xbf16>
    "tpu.trace_start"() <{level = 10 : i32, message = "bqs,bsh->bqh"}> : () -> ()
    %cst_122 = arith.constant dense<0.000000e+00> : vector<16x1x32xf32>
    %485 = tpu.matmul %484, %16, %cst_122 {dimension_numbers = #tpu.dot_dimension_numbers<[2], [1], [1], [2], [0, 0, 0, 1, 1, 2], [0], [0]>} : vector<16x1x8xbf16>, vector<16x8x32xbf16>, vector<16x1x32xf32> -> vector<16x1x32xf32>
    "tpu.trace_stop"() : () -> ()
    %486 = vector.shape_cast %485 : vector<16x1x32xf32> to vector<2x8x32xf32>
    %487 = vector.extract_strided_slice %486 {offsets = [0, 0, 0], sizes = [1, 8, 32], strides = [1, 1, 1]} : vector<2x8x32xf32> to vector<1x8x32xf32>
    %488 = vector.shape_cast %487 : vector<1x8x32xf32> to vector<8x32xf32>
    %489 = vector.extract_strided_slice %469 {offsets = [0, 0, 0], sizes = [1, 8, 32], strides = [1, 1, 1]} : vector<2x8x32xf32> to vector<1x8x32xf32>
    %490 = vector.shape_cast %489 : vector<1x8x32xf32> to vector<8x32xf32>
    %491 = vector.extract_strided_slice %486 {offsets = [1, 0, 0], sizes = [1, 8, 32], strides = [1, 1, 1]} : vector<2x8x32xf32> to vector<1x8x32xf32>
    %492 = vector.shape_cast %491 : vector<1x8x32xf32> to vector<8x32xf32>
    %493 = vector.extract_strided_slice %469 {offsets = [1, 0, 0], sizes = [1, 8, 32], strides = [1, 1, 1]} : vector<2x8x32xf32> to vector<1x8x32xf32>
    %494 = vector.shape_cast %493 : vector<1x8x32xf32> to vector<8x32xf32>
    %495 = tpu.concatenate %488, %490, %492, %494 in 1 : vector<8x32xf32>, vector<8x32xf32>, vector<8x32xf32>, vector<8x32xf32> -> vector<8x128xf32>
    %496 = arith.truncf %495 : vector<8x128xf32> to vector<8x128xbf16>
    %cst_123 = arith.constant dense<0.000000e+00> : vector<8x32xf32>
    %497 = tpu.matmul %496, %27, %cst_123 {dimension_numbers = #tpu.dot_dimension_numbers<[1], [0], [0], [1], [0, 0, 1, 1], [], []>} : vector<8x128xbf16>, vector<128x32xbf16>, vector<8x32xf32> -> vector<8x32xf32>
    %498 = math.tanh %497 : vector<8x32xf32>
    %c6 = arith.constant 6 : index
    %c0_124 = arith.constant 0 : index
    %c0_125 = arith.constant 0 : index
    %499 = vector.load %arg17[%c6, %c0_124, %c0_125] : memref<8x8x128xf32, #tpu.memory_space<vmem>>, vector<1x8x128xf32>
    %500 = vector.shape_cast %499 : vector<1x8x128xf32> to vector<8x128xf32>
    %501 = arith.truncf %498 : vector<8x32xf32> to vector<8x32xbf16>
    %cst_126 = arith.constant dense<0.000000e+00> : vector<8x128xf32>
    %502 = tpu.matmul %501, %0, %cst_126 {dimension_numbers = #tpu.dot_dimension_numbers<[1], [0], [0], [1], [0, 0, 1, 1], [], []>} : vector<8x32xbf16>, vector<32x128xbf16>, vector<8x128xf32> -> vector<8x128xf32>
    %503 = arith.addf %500, %502 : vector<8x128xf32>
    %504 = vector.shape_cast %448 : vector<2x8x32xf32> to vector<16x32xf32>
    %505 = arith.truncf %504 : vector<16x32xf32> to vector<16x32xbf16>
    %cst_127 = arith.constant dense<0.000000e+00> : vector<16x128xf32>
    %506 = tpu.matmul %505, %1, %cst_127 {dimension_numbers = #tpu.dot_dimension_numbers<[1], [0], [0], [1], [0, 0, 1, 1], [], []>} : vector<16x32xbf16>, vector<32x128xbf16>, vector<16x128xf32> -> vector<16x128xf32>
    %507 = vector.shape_cast %506 : vector<16x128xf32> to vector<2x8x128xf32>
    %508 = vector.shape_cast %503 : vector<8x128xf32> to vector<1x8x128xf32>
    %509 = vector.broadcast %508 : vector<1x8x128xf32> to vector<2x8x128xf32>
    %510 = arith.addf %507, %509 : vector<2x8x128xf32>
    %511 = arith.negf %510 : vector<2x8x128xf32>
    %512 = math.exp %511 : vector<2x8x128xf32>
    %cst_128 = arith.constant 1.000000e+00 : f32
    %513 = vector.broadcast %cst_128 : f32 to vector<2x8x128xf32>
    %514 = arith.addf %513, %512 : vector<2x8x128xf32>
    %515 = arith.divf %513, %514 : vector<2x8x128xf32>
    %516 = math.tanh %510 : vector<2x8x128xf32>
    %517 = vector.extract_strided_slice %515 {offsets = [0, 0, 0], sizes = [2, 8, 32], strides = [1, 1, 1]} : vector<2x8x128xf32> to vector<2x8x32xf32>
    %518 = vector.extract_strided_slice %515 {offsets = [0, 0, 32], sizes = [2, 8, 32], strides = [1, 1, 1]} : vector<2x8x128xf32> to vector<2x8x32xf32>
    %519 = vector.extract_strided_slice %516 {offsets = [0, 0, 64], sizes = [2, 8, 32], strides = [1, 1, 1]} : vector<2x8x128xf32> to vector<2x8x32xf32>
    %520 = vector.extract_strided_slice %515 {offsets = [0, 0, 96], sizes = [2, 8, 32], strides = [1, 1, 1]} : vector<2x8x128xf32> to vector<2x8x32xf32>
    %521 = arith.mulf %518, %446 : vector<2x8x32xf32>
    %522 = arith.mulf %517, %519 : vector<2x8x32xf32>
    %523 = arith.addf %521, %522 : vector<2x8x32xf32>
    %524 = math.tanh %523 : vector<2x8x32xf32>
    %525 = arith.mulf %520, %524 : vector<2x8x32xf32>
    %526 = tpu.concatenate %525, %469 in 2 : vector<2x8x32xf32>, vector<2x8x32xf32> -> vector<2x8x64xf32>
    %527 = vector.shape_cast %526 : vector<2x8x64xf32> to vector<16x64xf32>
    %528 = arith.truncf %527 : vector<16x64xf32> to vector<16x64xbf16>
    %cst_129 = arith.constant dense<0.000000e+00> : vector<16x128xf32>
    %529 = tpu.matmul %528, %2, %cst_129 {dimension_numbers = #tpu.dot_dimension_numbers<[1], [0], [0], [1], [0, 0, 1, 1], [], []>} : vector<16x64xbf16>, vector<64x128xbf16>, vector<16x128xf32> -> vector<16x128xf32>
    %530 = vector.shape_cast %529 : vector<16x128xf32> to vector<2x8x128xf32>
    %531 = arith.addf %530, %5 : vector<2x8x128xf32>
    %532 = arith.negf %531 : vector<2x8x128xf32>
    %533 = math.exp %532 : vector<2x8x128xf32>
    %cst_130 = arith.constant 1.000000e+00 : f32
    %534 = vector.broadcast %cst_130 : f32 to vector<2x8x128xf32>
    %535 = arith.addf %534, %533 : vector<2x8x128xf32>
    %536 = arith.divf %534, %535 : vector<2x8x128xf32>
    %537 = math.tanh %531 : vector<2x8x128xf32>
    %538 = vector.extract_strided_slice %536 {offsets = [0, 0, 0], sizes = [2, 8, 32], strides = [1, 1, 1]} : vector<2x8x128xf32> to vector<2x8x32xf32>
    %539 = vector.extract_strided_slice %536 {offsets = [0, 0, 32], sizes = [2, 8, 32], strides = [1, 1, 1]} : vector<2x8x128xf32> to vector<2x8x32xf32>
    %540 = vector.extract_strided_slice %537 {offsets = [0, 0, 64], sizes = [2, 8, 32], strides = [1, 1, 1]} : vector<2x8x128xf32> to vector<2x8x32xf32>
    %541 = vector.extract_strided_slice %536 {offsets = [0, 0, 96], sizes = [2, 8, 32], strides = [1, 1, 1]} : vector<2x8x128xf32> to vector<2x8x32xf32>
    %542 = arith.mulf %539, %467 : vector<2x8x32xf32>
    %543 = arith.mulf %538, %540 : vector<2x8x32xf32>
    %544 = arith.addf %542, %543 : vector<2x8x32xf32>
    %545 = math.tanh %544 : vector<2x8x32xf32>
    %546 = arith.mulf %541, %545 : vector<2x8x32xf32>
    %547 = vector.shape_cast %546 : vector<2x8x32xf32> to vector<16x1x32xf32>
    %548 = arith.truncf %547 : vector<16x1x32xf32> to vector<16x1x32xbf16>
    "tpu.trace_start"() <{level = 10 : i32, message = "bqh,bsh->bqs"}> : () -> ()
    %cst_131 = arith.constant dense<0.000000e+00> : vector<16x1x8xf32>
    %549 = tpu.matmul %548, %25, %cst_131 {dimension_numbers = #tpu.dot_dimension_numbers<[2], [2], [1], [1], [0, 0, 0, 1, 1, 1], [0], [0]>} : vector<16x1x32xbf16>, vector<16x8x32xbf16>, vector<16x1x8xf32> -> vector<16x1x8xf32>
    "tpu.trace_stop"() : () -> ()
    %550 = arith.addf %549, %26 : vector<16x1x8xf32>
    %cst_132 = arith.constant dense<0xFF800000> : vector<16x1xf32>
    %551 = vector.multi_reduction <maximumf>, %550, %cst_132 [2] : vector<16x1x8xf32> to vector<16x1xf32>
    %552 = vector.shape_cast %551 : vector<16x1xf32> to vector<16x1x1xf32>
    %553 = vector.broadcast %552 : vector<16x1x1xf32> to vector<16x1x8xf32>
    %554 = arith.subf %550, %553 : vector<16x1x8xf32>
    %555 = math.exp %554 : vector<16x1x8xf32>
    %cst_133 = arith.constant dense<0.000000e+00> : vector<16x1xf32>
    %556 = vector.multi_reduction <add>, %555, %cst_133 [2] : vector<16x1x8xf32> to vector<16x1xf32>
    %557 = vector.shape_cast %556 : vector<16x1xf32> to vector<16x1x1xf32>
    %558 = tpu.reciprocal %557 {approx = true} : vector<16x1x1xf32> -> vector<16x1x1xf32>
    %559 = vector.broadcast %558 : vector<16x1x1xf32> to vector<16x1x8xf32>
    %560 = arith.mulf %555, %559 : vector<16x1x8xf32>
    %561 = arith.truncf %560 : vector<16x1x8xf32> to vector<16x1x8xbf16>
    "tpu.trace_start"() <{level = 10 : i32, message = "bqs,bsh->bqh"}> : () -> ()
    %cst_134 = arith.constant dense<0.000000e+00> : vector<16x1x32xf32>
    %562 = tpu.matmul %561, %16, %cst_134 {dimension_numbers = #tpu.dot_dimension_numbers<[2], [1], [1], [2], [0, 0, 0, 1, 1, 2], [0], [0]>} : vector<16x1x8xbf16>, vector<16x8x32xbf16>, vector<16x1x32xf32> -> vector<16x1x32xf32>
    "tpu.trace_stop"() : () -> ()
    %563 = vector.shape_cast %562 : vector<16x1x32xf32> to vector<2x8x32xf32>
    %564 = vector.extract_strided_slice %563 {offsets = [0, 0, 0], sizes = [1, 8, 32], strides = [1, 1, 1]} : vector<2x8x32xf32> to vector<1x8x32xf32>
    %565 = vector.shape_cast %564 : vector<1x8x32xf32> to vector<8x32xf32>
    %566 = vector.extract_strided_slice %546 {offsets = [0, 0, 0], sizes = [1, 8, 32], strides = [1, 1, 1]} : vector<2x8x32xf32> to vector<1x8x32xf32>
    %567 = vector.shape_cast %566 : vector<1x8x32xf32> to vector<8x32xf32>
    %568 = vector.extract_strided_slice %563 {offsets = [1, 0, 0], sizes = [1, 8, 32], strides = [1, 1, 1]} : vector<2x8x32xf32> to vector<1x8x32xf32>
    %569 = vector.shape_cast %568 : vector<1x8x32xf32> to vector<8x32xf32>
    %570 = vector.extract_strided_slice %546 {offsets = [1, 0, 0], sizes = [1, 8, 32], strides = [1, 1, 1]} : vector<2x8x32xf32> to vector<1x8x32xf32>
    %571 = vector.shape_cast %570 : vector<1x8x32xf32> to vector<8x32xf32>
    %572 = tpu.concatenate %565, %567, %569, %571 in 1 : vector<8x32xf32>, vector<8x32xf32>, vector<8x32xf32>, vector<8x32xf32> -> vector<8x128xf32>
    %573 = arith.truncf %572 : vector<8x128xf32> to vector<8x128xbf16>
    %cst_135 = arith.constant dense<0.000000e+00> : vector<8x32xf32>
    %574 = tpu.matmul %573, %27, %cst_135 {dimension_numbers = #tpu.dot_dimension_numbers<[1], [0], [0], [1], [0, 0, 1, 1], [], []>} : vector<8x128xbf16>, vector<128x32xbf16>, vector<8x32xf32> -> vector<8x32xf32>
    %575 = math.tanh %574 : vector<8x32xf32>
    %c7 = arith.constant 7 : index
    %c0_136 = arith.constant 0 : index
    %c0_137 = arith.constant 0 : index
    %576 = vector.load %arg17[%c7, %c0_136, %c0_137] : memref<8x8x128xf32, #tpu.memory_space<vmem>>, vector<1x8x128xf32>
    %577 = vector.shape_cast %576 : vector<1x8x128xf32> to vector<8x128xf32>
    %578 = arith.truncf %575 : vector<8x32xf32> to vector<8x32xbf16>
    %cst_138 = arith.constant dense<0.000000e+00> : vector<8x128xf32>
    %579 = tpu.matmul %578, %0, %cst_138 {dimension_numbers = #tpu.dot_dimension_numbers<[1], [0], [0], [1], [0, 0, 1, 1], [], []>} : vector<8x32xbf16>, vector<32x128xbf16>, vector<8x128xf32> -> vector<8x128xf32>
    %580 = arith.addf %577, %579 : vector<8x128xf32>
    %581 = vector.shape_cast %525 : vector<2x8x32xf32> to vector<16x32xf32>
    %582 = arith.truncf %581 : vector<16x32xf32> to vector<16x32xbf16>
    %cst_139 = arith.constant dense<0.000000e+00> : vector<16x128xf32>
    %583 = tpu.matmul %582, %1, %cst_139 {dimension_numbers = #tpu.dot_dimension_numbers<[1], [0], [0], [1], [0, 0, 1, 1], [], []>} : vector<16x32xbf16>, vector<32x128xbf16>, vector<16x128xf32> -> vector<16x128xf32>
    %584 = vector.shape_cast %583 : vector<16x128xf32> to vector<2x8x128xf32>
    %585 = vector.shape_cast %580 : vector<8x128xf32> to vector<1x8x128xf32>
    %586 = vector.broadcast %585 : vector<1x8x128xf32> to vector<2x8x128xf32>
    %587 = arith.addf %584, %586 : vector<2x8x128xf32>
    %588 = arith.negf %587 : vector<2x8x128xf32>
    %589 = math.exp %588 : vector<2x8x128xf32>
    %cst_140 = arith.constant 1.000000e+00 : f32
    %590 = vector.broadcast %cst_140 : f32 to vector<2x8x128xf32>
    %591 = arith.addf %590, %589 : vector<2x8x128xf32>
    %592 = arith.divf %590, %591 : vector<2x8x128xf32>
    %593 = math.tanh %587 : vector<2x8x128xf32>
    %594 = vector.extract_strided_slice %592 {offsets = [0, 0, 0], sizes = [2, 8, 32], strides = [1, 1, 1]} : vector<2x8x128xf32> to vector<2x8x32xf32>
    %595 = vector.extract_strided_slice %592 {offsets = [0, 0, 32], sizes = [2, 8, 32], strides = [1, 1, 1]} : vector<2x8x128xf32> to vector<2x8x32xf32>
    %596 = vector.extract_strided_slice %593 {offsets = [0, 0, 64], sizes = [2, 8, 32], strides = [1, 1, 1]} : vector<2x8x128xf32> to vector<2x8x32xf32>
    %597 = vector.extract_strided_slice %592 {offsets = [0, 0, 96], sizes = [2, 8, 32], strides = [1, 1, 1]} : vector<2x8x128xf32> to vector<2x8x32xf32>
    %598 = arith.mulf %595, %523 : vector<2x8x32xf32>
    %599 = arith.mulf %594, %596 : vector<2x8x32xf32>
    %600 = arith.addf %598, %599 : vector<2x8x32xf32>
    %601 = math.tanh %600 : vector<2x8x32xf32>
    %602 = arith.mulf %597, %601 : vector<2x8x32xf32>
    %603 = tpu.concatenate %602, %546 in 2 : vector<2x8x32xf32>, vector<2x8x32xf32> -> vector<2x8x64xf32>
    %604 = vector.shape_cast %603 : vector<2x8x64xf32> to vector<16x64xf32>
    %605 = arith.truncf %604 : vector<16x64xf32> to vector<16x64xbf16>
    %cst_141 = arith.constant dense<0.000000e+00> : vector<16x128xf32>
    %606 = tpu.matmul %605, %2, %cst_141 {dimension_numbers = #tpu.dot_dimension_numbers<[1], [0], [0], [1], [0, 0, 1, 1], [], []>} : vector<16x64xbf16>, vector<64x128xbf16>, vector<16x128xf32> -> vector<16x128xf32>
    %607 = vector.shape_cast %606 : vector<16x128xf32> to vector<2x8x128xf32>
    %608 = arith.addf %607, %5 : vector<2x8x128xf32>
    %609 = arith.negf %608 : vector<2x8x128xf32>
    %610 = math.exp %609 : vector<2x8x128xf32>
    %cst_142 = arith.constant 1.000000e+00 : f32
    %611 = vector.broadcast %cst_142 : f32 to vector<2x8x128xf32>
    %612 = arith.addf %611, %610 : vector<2x8x128xf32>
    %613 = arith.divf %611, %612 : vector<2x8x128xf32>
    %614 = math.tanh %608 : vector<2x8x128xf32>
    %615 = vector.extract_strided_slice %613 {offsets = [0, 0, 0], sizes = [2, 8, 32], strides = [1, 1, 1]} : vector<2x8x128xf32> to vector<2x8x32xf32>
    %616 = vector.extract_strided_slice %613 {offsets = [0, 0, 32], sizes = [2, 8, 32], strides = [1, 1, 1]} : vector<2x8x128xf32> to vector<2x8x32xf32>
    %617 = vector.extract_strided_slice %614 {offsets = [0, 0, 64], sizes = [2, 8, 32], strides = [1, 1, 1]} : vector<2x8x128xf32> to vector<2x8x32xf32>
    %618 = vector.extract_strided_slice %613 {offsets = [0, 0, 96], sizes = [2, 8, 32], strides = [1, 1, 1]} : vector<2x8x128xf32> to vector<2x8x32xf32>
    %619 = arith.mulf %616, %544 : vector<2x8x32xf32>
    %620 = arith.mulf %615, %617 : vector<2x8x32xf32>
    %621 = arith.addf %619, %620 : vector<2x8x32xf32>
    %622 = math.tanh %621 : vector<2x8x32xf32>
    %623 = arith.mulf %618, %622 : vector<2x8x32xf32>
    %624 = vector.shape_cast %623 : vector<2x8x32xf32> to vector<16x1x32xf32>
    %625 = arith.truncf %624 : vector<16x1x32xf32> to vector<16x1x32xbf16>
    "tpu.trace_start"() <{level = 10 : i32, message = "bqh,bsh->bqs"}> : () -> ()
    %cst_143 = arith.constant dense<0.000000e+00> : vector<16x1x8xf32>
    %626 = tpu.matmul %625, %25, %cst_143 {dimension_numbers = #tpu.dot_dimension_numbers<[2], [2], [1], [1], [0, 0, 0, 1, 1, 1], [0], [0]>} : vector<16x1x32xbf16>, vector<16x8x32xbf16>, vector<16x1x8xf32> -> vector<16x1x8xf32>
    "tpu.trace_stop"() : () -> ()
    %627 = arith.addf %626, %26 : vector<16x1x8xf32>
    %cst_144 = arith.constant dense<0xFF800000> : vector<16x1xf32>
    %628 = vector.multi_reduction <maximumf>, %627, %cst_144 [2] : vector<16x1x8xf32> to vector<16x1xf32>
    %629 = vector.shape_cast %628 : vector<16x1xf32> to vector<16x1x1xf32>
    %630 = vector.broadcast %629 : vector<16x1x1xf32> to vector<16x1x8xf32>
    %631 = arith.subf %627, %630 : vector<16x1x8xf32>
    %632 = math.exp %631 : vector<16x1x8xf32>
    %cst_145 = arith.constant dense<0.000000e+00> : vector<16x1xf32>
    %633 = vector.multi_reduction <add>, %632, %cst_145 [2] : vector<16x1x8xf32> to vector<16x1xf32>
    %634 = vector.shape_cast %633 : vector<16x1xf32> to vector<16x1x1xf32>
    %635 = tpu.reciprocal %634 {approx = true} : vector<16x1x1xf32> -> vector<16x1x1xf32>
    %636 = vector.broadcast %635 : vector<16x1x1xf32> to vector<16x1x8xf32>
    %637 = arith.mulf %632, %636 : vector<16x1x8xf32>
    %638 = arith.truncf %637 : vector<16x1x8xf32> to vector<16x1x8xbf16>
    "tpu.trace_start"() <{level = 10 : i32, message = "bqs,bsh->bqh"}> : () -> ()
    %cst_146 = arith.constant dense<0.000000e+00> : vector<16x1x32xf32>
    %639 = tpu.matmul %638, %16, %cst_146 {dimension_numbers = #tpu.dot_dimension_numbers<[2], [1], [1], [2], [0, 0, 0, 1, 1, 2], [0], [0]>} : vector<16x1x8xbf16>, vector<16x8x32xbf16>, vector<16x1x32xf32> -> vector<16x1x32xf32>
    "tpu.trace_stop"() : () -> ()
    %640 = vector.shape_cast %639 : vector<16x1x32xf32> to vector<2x8x32xf32>
    %641 = vector.extract_strided_slice %640 {offsets = [0, 0, 0], sizes = [1, 8, 32], strides = [1, 1, 1]} : vector<2x8x32xf32> to vector<1x8x32xf32>
    %642 = vector.shape_cast %641 : vector<1x8x32xf32> to vector<8x32xf32>
    %643 = vector.extract_strided_slice %623 {offsets = [0, 0, 0], sizes = [1, 8, 32], strides = [1, 1, 1]} : vector<2x8x32xf32> to vector<1x8x32xf32>
    %644 = vector.shape_cast %643 : vector<1x8x32xf32> to vector<8x32xf32>
    %645 = vector.extract_strided_slice %640 {offsets = [1, 0, 0], sizes = [1, 8, 32], strides = [1, 1, 1]} : vector<2x8x32xf32> to vector<1x8x32xf32>
    %646 = vector.shape_cast %645 : vector<1x8x32xf32> to vector<8x32xf32>
    %647 = vector.extract_strided_slice %623 {offsets = [1, 0, 0], sizes = [1, 8, 32], strides = [1, 1, 1]} : vector<2x8x32xf32> to vector<1x8x32xf32>
    %648 = vector.shape_cast %647 : vector<1x8x32xf32> to vector<8x32xf32>
    %649 = tpu.concatenate %642, %644, %646, %648 in 1 : vector<8x32xf32>, vector<8x32xf32>, vector<8x32xf32>, vector<8x32xf32> -> vector<8x128xf32>
    %650 = arith.truncf %649 : vector<8x128xf32> to vector<8x128xbf16>
    %cst_147 = arith.constant dense<0.000000e+00> : vector<8x32xf32>
    %651 = tpu.matmul %650, %27, %cst_147 {dimension_numbers = #tpu.dot_dimension_numbers<[1], [0], [0], [1], [0, 0, 1, 1], [], []>} : vector<8x128xbf16>, vector<128x32xbf16>, vector<8x32xf32> -> vector<8x32xf32>
    %652 = math.tanh %651 : vector<8x32xf32>
    %653 = vector.shape_cast %113 : vector<8x32xf32> to vector<1x8x32xf32>
    %654 = vector.shape_cast %190 : vector<8x32xf32> to vector<1x8x32xf32>
    %655 = vector.shape_cast %267 : vector<8x32xf32> to vector<1x8x32xf32>
    %656 = vector.shape_cast %344 : vector<8x32xf32> to vector<1x8x32xf32>
    %657 = vector.shape_cast %421 : vector<8x32xf32> to vector<1x8x32xf32>
    %658 = vector.shape_cast %498 : vector<8x32xf32> to vector<1x8x32xf32>
    %659 = vector.shape_cast %575 : vector<8x32xf32> to vector<1x8x32xf32>
    %660 = vector.shape_cast %652 : vector<8x32xf32> to vector<1x8x32xf32>
    %661 = tpu.concatenate %653, %654, %655, %656, %657, %658, %659, %660 in 0 : vector<1x8x32xf32>, vector<1x8x32xf32>, vector<1x8x32xf32>, vector<1x8x32xf32>, vector<1x8x32xf32>, vector<1x8x32xf32>, vector<1x8x32xf32>, vector<1x8x32xf32> -> vector<8x8x32xf32>
    %c0_148 = arith.constant 0 : index
    %c0_149 = arith.constant 0 : index
    %c0_150 = arith.constant 0 : index
    %662 = vector.load %arg16[%c0_148, %c0_149, %c0_150] : memref<8x8x32xf32, #tpu.memory_space<vmem>>, vector<8x8x32xf32>
    tpu.vector_store %arg16[%c0_148, %c0_149, %c0_150], %661 {strides = array<i32>} : memref<8x8x32xf32, #tpu.memory_space<vmem>>, vector<8x8x32xf32>,
    return
  }
}

</mosaic_0001>

<bundles_post_ra>
// kernel: tpu_custom_call.1
= control target key start
LH: loop header
LB: loop body
LE: loop exit
PB: predicated region body
PF: predicated region fallthrough
CT: control target
= control target key end

     0   :  { %s15190_s0 = inlined_call_operand.vmem [shape: bf16[64,32], index: 0, kind: input, shape index: {}]   ;;  %s15191_s1 = inlined_call_operand.hbm [shape: f32[8,32], index: 1, kind: input, shape index: {}]   ;;  %s15192_s2 = inlined_call_operand.vmem [shape: f32[2,2,8,32], index: 2, kind: input, shape index: {}]   ;;  %s15193_s3 = inlined_call_operand.vmem [shape: f32[2,2,8,32], index: 3, kind: input, shape index: {}]   ;;  %s15194_s4 = inlined_call_operand.vmem [shape: bf16[8,8,32], index: 4, kind: input, shape index: {}]   ;;  %s15195_s5 = inlined_call_operand.hbm [shape: bf16[8,8,32], index: 5, kind: input, shape index: {}]   ;;  %s15196_s6 = inlined_call_operand.vmem [shape: f32[16,1,8], index: 6, kind: input, shape index: {}]   ;;  %s15197_s7 = inlined_call_operand.vmem [shape: bf16[32,128], index: 7, kind: input, shape index: {}]   ;;  %s15198_s8 = inlined_call_operand.hbm [shape: bf16[32,128], index: 8, kind: input, shape index: {}]   ;;  %s15199_s9 = inlined_call_operand.hbm [shape: bf16[32,128], index: 9, kind: input, shape index: {}]   ;;  %s15200_s10 = inlined_call_operand.vmem [shape: f32[1,128], index: 10, kind: input, shape index: {}]   ;;  %s15201_s11 = inlined_call_operand.hbm [shape: bf16[64,128], index: 11, kind: input, shape index: {}]   ;;  %s15202_s12 = inlined_call_operand.vmem [shape: f32[1,128], index: 12, kind: input, shape index: {}]   ;;  %s15203_s13 = inlined_call_operand.vmem [shape: bf16[32,32], index: 13, kind: input, shape index: {}]   ;;  %s15204_s14 = inlined_call_operand.hbm [shape: bf16[32,32], index: 14, kind: input, shape index: {}]   ;;  %s15205_s15 = inlined_call_operand.vmem [shape: bf16[128,32], index: 15, kind: input, shape index: {}]   ;;  %s15206_s16 = inlined_call_operand.hbm [shape: f32[8,8,32], index: 16, kind: output, shape index: {}]  }
   0x1   :  { %15226 = sst [smem:[#allocation31_spill]] %s15190_s0 }
   0x2   :  { %21 = vsyncpa [#allocation4], 0 }
   0x3   :  { %22 = vsyncpa [#allocation7], 0 }
   0x4   :  { %23 = vsyncpa [#allocation10], 0 }
   0x5   :  { %24 = vsyncpa [#allocation13], 0  ;;  %s49_s23 = sshll.u32 %s15195_s5, 4  ;;  %s50_s23 = int_to_ptr.hbm [resolvable:$true] %s49_s23 }
   0x6   :  { %25 = vsyncpa [#allocation5], 0  ;;  %s11528_s24 = smov [#allocation6]   ;;  %s79_s28 = sshll.u32 %s15199_s9, 4  ;;  %s80_s28 = int_to_ptr.hbm [resolvable:$true] %s79_s28 }
   0x7   :  { %s51_s25 = sshll.u32 %s11528_s24, 4  ;;  %s11529_s29 = smov 64   ;;  %s52_s25 = int_to_ptr.vmem [resolvable:$true] %s51_s25 }
   0x8   :  { %s11530_s30 = smov 4   ;;  %s11531_s0 = smov [#allocation9]  }
   0x9   :  { %57 = dma.hbm_to_vmem [thread:$0]  %s50_s23, 512, %s52_s25, [#allocation7], %s11529_s29, %s11529_s29, %s11530_s30  }
   0xa   :  { %s81_s17 = sshll.u32 %s11531_s0, 4  ;;  %s33_s19 = sshll.u32 %s15191_s1, 4  ;;  %s82_s17 = int_to_ptr.vmem [resolvable:$true] %s81_s17  ;;  %s34_s19 = int_to_ptr.hbm [resolvable:$true] %s33_s19 }
   0xb   :  { %87 = dma.hbm_to_vmem [thread:$0]  %s80_s28, 256, %s82_s17, [#allocation10], %s11529_s29, %s11529_s29, %s11530_s30  }
   0xc   :  { %s66_s21 = sshll.u32 %s15198_s8, 4  ;;  %s11532_s22 = smov [#allocation3]   ;;  %s67_s21 = int_to_ptr.hbm [resolvable:$true] %s66_s21 }
   0xd   :  { %s35_s24 = sshll.u32 %s11532_s22, 4  ;;  %s11533_s23 = smov [#allocation8]   ;;  %s36_s24 = int_to_ptr.vmem [resolvable:$true] %s35_s24 }
   0xe   :  { %38 = dma.hbm_to_vmem [thread:$0]  %s34_s19, 128, %s36_s24, [#allocation4]  }
   0xf   :  { %s68_s25 = sshll.u32 %s11533_s23, 4  ;;  %s94_s1 = sshll.u32 %s15201_s11, 4  ;;  %s69_s25 = int_to_ptr.vmem [resolvable:$true] %s68_s25  ;;  %s95_s1 = int_to_ptr.hbm [resolvable:$true] %s94_s1 }
  0x10   :  { %74 = dma.hbm_to_vmem [thread:$0]  %s67_s21, 256, %s69_s25, [#allocation7], %s11529_s29, %s11529_s29, %s11530_s30  }
  0x11   :  { %s111_s8 = sshll.u32 %s15204_s14, 4  ;;  %s11534_s17 = smov [#allocation11]   ;;  %s112_s8 = int_to_ptr.hbm [resolvable:$true] %s111_s8 }
  0x12   :  { %s96_s18 = sshll.u32 %s11534_s17, 4  ;;  %s11535_s5 = smov [#allocation12]   ;;  %s97_s18 = int_to_ptr.vmem [resolvable:$true] %s96_s18 }
  0x13   :  { %102 = dma.hbm_to_vmem [thread:$0]  %s95_s1, 512, %s97_s18, [#allocation10], %s11529_s29, %s11529_s29, %s11530_s30  }
  0x14   :  { %s113_s11 = sshll.u32 %s11535_s5, 4  ;;  %s114_s11 = int_to_ptr.vmem [resolvable:$true] %s113_s11 }
  0x15   :  { %119 = dma.hbm_to_vmem [thread:$0]  %s112_s8, 256, %s114_s11, [#allocation13], %s11529_s29, %s11529_s29, %s11530_s30  }
  0x16   :  { %11518 = dma.done.wait [#allocation4], 128  }
  0x17   :  { %11519 = vsyncadd [#allocation4], 4294967168 }
  0x18   :  { %11520 = dma.done.wait [#allocation7], 768  }
  0x19   :  { %11521 = vsyncadd [#allocation7], 4294966528 }
  0x1a   :  { %11522 = dma.done.wait [#allocation10], 768  }
  0x1b   :  { %11523 = vsyncadd [#allocation10], 4294966528 }
  0x1c   :  { %11524 = dma.done.wait [#allocation13], 256  }
  0x1d   :  { %11525 = vsyncadd [#allocation13], 4294967040  ;;  %v10218_v0 = vld [vmem:[#allocation12 + $0x8] sm:$0xff]  ;;  %v10206_v1 = vld [vmem:[%s15197_s7 + $0x8] sm:$0xff]  ;;  %vm215_vm0 = vcmask 261120   ;;  %s15227_s22 = sld [smem:[#allocation31_spill]] }
  0x1e   :  { %10227 = vmatpush.bf16.msra.mxu3 %v10218_v0  ;;  %v10217_v2 = vld [vmem:[#allocation12] sm:$0xff]  ;;  %412 = vmatpush.bf16.msra.mxu2 %v10218_v0  ;;  %v10194_v3 = vld [vmem:[#allocation8 + $0x8] sm:$0xff]  ;;  %v10205_v4 = vld [vmem:[%s15197_s7] sm:$0xff]  ;;  %s11536_s7 = smov 32   ;;  %vm682_vm9 = vcmask 523264   ;;  %s11538_s18 = smov 128  }
  0x1f   :  { %234 = vmatpush.bf16.msra.mxu0 %v10206_v1  ;;  %v10214_v5 = vld [vmem:[#allocation6 + $0x18] sm:$0xff]  ;;  %v10193_v7 = vld [vmem:[#allocation8] sm:$0xff]  ;;  %v10195_v10 = vld [vmem:[#allocation9] sm:$0xff]  ;;  %s11539_s5 = smov 8  }
  0x20   :  { %v10196_v8 = vld [vmem:[#allocation9 + $0x8] sm:$0xff]  ;;  %v489_v11 = vld [vmem:[%s15193_s3 + $0x8] sm:$0xff] }
  0x21   :  { %v488_v9 = vld [vmem:[%s15193_s3] sm:$0xff]  ;;  %v484_v15 = vld [vmem:[%s15192_s2 + $0x8] sm:$0xff] }
  0x22   :  { %10228 = vmatpush.bf16.msra.mxu3 %v10217_v2  ;;  %413 = vmatpush.bf16.msra.mxu2 %v10217_v2  ;;  %v493_v12 = vld [vmem:[#allocation3] sm:$0xff] }
  0x23   :  { %v10201_v6 = vld [vmem:[%s15227_s22] sm:$0xff]  ;;  %235 = vmatpush.bf16.msra.mxu0 %v10205_v4  ;;  %599 = vrot.lane.b32.xlu1 %v488_v9, %s11536_s7  ;;  %v495_v13 = vpack.c.bf16 %v493_v12, %v493_v12  ;;  %v10198_v12 = vld [vmem:[#allocation11 + $0x8] sm:$0xff] }
  0x24   :  { %v483_v14 = vld [vmem:[%s15192_s2] sm:$0xff] }
  0x25   :  { %9812 = vmatmul.msk.bf16.vlgmr.msra.gmra.mxu3 %vm215_vm0, %v10214_v5  ;;  %v525_v16 = vpack.c.bf16 %v484_v15, %v483_v14  ;;  %v10326_v20 = vld [vmem:[%s15200_s10] ss:$0 sm:$0xff] }
  0x26   :  { %517 = vmatpush.bf16.msrb.mxu3 %v10194_v3  ;;  %9753 = vmatmul.msk.bf16.vlgmr.msra.gmra.mxu0 %vm215_vm0, %v10201_v6  ;;  %v9813_v6 = vld [vmem:[%s15192_s2 + $0x10] sm:$0xff] }
  0x2a   :  { %518 = vmatpush.bf16.msrb.mxu3 %v10193_v7  ;;  %v9814_v7 = vld [vmem:[%s15192_s2 + $0x18] sm:$0xff] }
  0x2b   :  { %601 = vrot.lane.b32.xlu1 %v489_v11, %s11536_s7  ;;  %v10199_v11 = vld [vmem:[#allocation11 + $0x10] sm:$0xff] }
  0x2e   :  { %547 = vmatpush.bf16.msra.mxu3 %v10196_v8  ;;  %v10246_v8 = vpack.i.bf16 %v9814_v7, %v9813_v6 }
  0x32   :  { %548 = vmatpush.bf16.msra.mxu3 %v10195_v10  ;;  %v10200_v10 = vld [vmem:[#allocation11 + $0x18] sm:$0xff] }
  0x35   :  { %9825 = vmatmul.msk.bf16.vlgmr.msrb.gmra.mxu3 %vm215_vm0, %v495_v13 }
  0x36   :  { %690 = vmatpush.bf16.msrb.mxu3 %v10200_v10 }
  0x3a   :  { %691 = vmatpush.bf16.msrb.mxu3 %v10199_v11  ;;  %v10215_v11 = vld [vmem:[%s15203_s13] sm:$0xff] }
  0x3e   :  { %692 = vmatpush.bf16.msrb.mxu3 %v10198_v12 }
  0x45   :  { %9834 = vmatmul.msk.bf16.vlgmr.msra.gmra.mxu3 %vm215_vm0, %v525_v16 }
  0x95   :  { %v600_v61 = vpop.permute.xlu1 %599 }
  0x9d   :  { %v602_v1 = vpop.permute.xlu1 %601 }
  0xa3   :  { %v237_v21 = vpop.f32.mrf.mxu0 }
  0xa4   :  { %v238_v23 = vadd.f32 %v10326_v20, %v237_v21  ;;  %v10197_v21 = vld [vmem:[#allocation11] sm:$0xff] }
  0xa5   :  { %693 = vmatpush.bf16.msrb.mxu3 %v10197_v21 }
  0xa8   :  { %v11685_v17 = vpop.f32.mrf.mxu3 }
  0xb0   :  { %v11687_v18 = vpop.f32.mrf.mxu3 }
  0xb8   :  { %v520_v19 = vpop.f32.mrf.mxu3 }
  0xb9   :  { %v524_v24 = vadd.f32 %v520_v19, %v238_v23 }
  0xc0   :  { %v522_v22 = vpop.f32.mrf.mxu3 }
  0xc1   :  { %v9815_v22 = vld [vmem:[%s15193_s3 + $0x10] sm:$0xff] }
  0xc8   :  { %v550_v25 = vpop.f32.mrf.mxu3 }
  0xc9   :  { %v555_v26 = vadd.f32 %v550_v25, %v524_v24 }
  0xcb   :  { %10328 = vtanh.f32 %v555_v26  ;;  %v9835_v31 = vmul.f32 -1.442695, %v555_v26 }
  0xd0   :  { %v552_v27 = vpop.f32.mrf.mxu3 }
  0xd1   :  { %v10329_v28 = vpop.eup %10328  ;;  %v556_v29 = vadd.f32 %v552_v27, %v524_v24 }
  0xd2   :  { %609 = vrot.lane.b32.xlu0 %v10329_v28, %s11529_s29 }
  0xd3   :  { %10330 = vtanh.f32 %v556_v29  ;;  %v9836_v32 = vmul.f32 -1.442695, %v556_v29 }
  0xd4   :  { %10332 = vpow2.f32 %v9835_v31 }
  0xd5   :  { %10334 = vpow2.f32 %v9836_v32  ;;  %v10327_v32 = vld [vmem:[%s15202_s12] ss:$0 sm:$0xff] }
  0xd9   :  { %v10331_v30 = vpop.eup %10330 }
  0xda   :  { %611 = vrot.lane.b32.xlu0 %v10331_v30, %s11529_s29  ;;  %v10333_v33 = vpop.eup %10332 }
  0xdb   :  { %v563_v34 = vadd.f32 1.0, %v10333_v33  ;;  %v10335_v35 = vpop.eup %10334 }
  0xdc   :  { %v564_v36 = vadd.f32 1.0, %v10335_v35 }
  0xdd   :  { %10336 = vrcp.f32 %v563_v34  ;;  %v576_v45 = vand.u32 2147483648, %v563_v34  ;;  %vm570_vm2 = vweird.f32 %v563_v34  ;;  %v574_v46 = vand.u32 2147483647, %v563_v34 }
  0xde   :  { %10338 = vrcp.f32 %v564_v36  ;;  %v591_v54 = vand.u32 2147483648, %v564_v36  ;;  %vm585_vm6 = vweird.f32 %v564_v36  ;;  %v589_v55 = vand.u32 2147483647, %v564_v36 }
  0xdf   :  { %v577_v49 = vor.u32 1.1754944e-38, %v576_v45  ;;  %vm575_vm4 = vcmp.eq.f32.partialorder %v574_v46, 8.507059e+37 }
  0xe0   :  { %v592_v57 = vor.u32 1.1754944e-38, %v591_v54  ;;  %vm590_vm8 = vcmp.eq.f32.partialorder %v589_v55, 8.507059e+37 }
  0xe3   :  { %v10337_v37 = vpop.eup %10336 }
  0xe4   :  { %v566_v38 = vmul.f32 %v10337_v37, %v563_v34  ;;  %v10339_v40 = vpop.eup %10338  ;;  %vm571_vm1 = vweird.f32 %v10337_v37 }
  0xe5   :  { %v581_v42 = vmul.f32 %v10339_v40, %v564_v36  ;;  %vm572_vm3 = vmor %vm570_vm2, %vm571_vm1  ;;  %vm586_vm5 = vweird.f32 %v10339_v40 }
  0xe6   :  { %v567_v39 = vsub.f32 1.0, %v566_v38  ;;  %vm587_vm7 = vmor %vm585_vm6, %vm586_vm5  ;;  %vm1407_vm5 = vcmask 64512   ;;  %vm1722_vm6 = vcmask 1041409  }
  0xe7   :  { %v582_v44 = vsub.f32 1.0, %v581_v42 }
  0xe8   :  { %v568_v41 = vmul.f32 %v10337_v37, %v567_v39  ;;  %v9816_v39 = vld [vmem:[%s15193_s3 + $0x18] sm:$0xff] }
  0xe9   :  { %v583_v48 = vmul.f32 %v10339_v40, %v582_v44 }
  0xea   :  { %v569_v43 = vadd.f32 %v10337_v37, %v568_v41 }
  0xeb   :  { %v584_v52 = vadd.f32 %v10339_v40, %v583_v48 }
  0xec   :  { %v573_v47 = vsel %vm572_vm3, %v10337_v37, %v569_v43  ;;  %vm1214_vm3 = vcmask 57344  }
  0xed   :  { %v578_v50 = vsel %vm575_vm4, %v577_v49, %v573_v47  ;;  %v588_v56 = vsel %vm587_vm7, %v10339_v40, %v584_v52  ;;  %vm1411_vm4 = vcmask 1043456   ;;  %vm1725_vm7 = vcmask 1042434  }
  0xee   :  { %v593_v58 = vsel %vm590_vm8, %v592_v57, %v588_v56  ;;  %v605_v62 = vmul.f32 %v600_v61, %v578_v50  ;;  %vm1728_vm8 = vcmask 1043459  }
  0xef   :  { %v606_v2 = vmul.f32 %v602_v1, %v593_v58 }
 0x144   :  { %v610_v51 = vpop.permute.xlu0 %609 }
 0x145   :  { %v615_v53 = vmul.f32 %v610_v51, %v578_v50 }
 0x147   :  { %619 = vrot.lane.b32.xlu2 %v615_v53, %s11536_s7 }
 0x14c   :  { %v612_v59 = vpop.permute.xlu0 %611 }
 0x14d   :  { %v616_v60 = vmul.f32 %v612_v59, %v593_v58 }
 0x14f   :  { %621 = vrot.lane.b32.xlu2 %v616_v60, %s11536_s7 }
 0x1a1   :  { %v620_v63 = vpop.permute.xlu2 %619 }
 0x1a2   :  { %v11696_v0 = vadd.f32 %v620_v63, %v605_v62 }
 0x1a4   :  { %10340 = vtanh.f32 %v11696_v0 }
 0x1a9   :  { %v622_v3 = vpop.permute.xlu2 %621 }
 0x1aa   :  { %v10341_v4 = vpop.eup %10340  ;;  %v11699_v5 = vadd.f32 %v622_v3, %v606_v2 }
 0x1ab   :  { %631 = vrot.lane.b32.xlu0 %v10341_v4, %s11529_s29 }
 0x1ac   :  { %10342 = vtanh.f32 %v11699_v5 }
 0x1b2   :  { %v10343_v9 = vpop.eup %10342 }
 0x1b3   :  { %633 = vrot.lane.b32.xlu1 %v10343_v9, %s11529_s29  ;;  %10247 = vrot.lane.b32.xlu0 %v10246_v8, %s11536_s7  ;;  %v10216_v9 = vld [vmem:[%s15203_s13 + $0x8] sm:$0xff] }
 0x1b4   :  { %335 = vmatpush.bf16.msra.mxu1 %v10216_v9 }
 0x1b8   :  { %336 = vmatpush.bf16.msra.mxu1 %v10215_v11 }
 0x1bb   :  { %744 = vrot.lane.b32.xlu0 %v9815_v22, %s11536_s7 }
 0x21d   :  { %v632_v13 = vpop.permute.xlu0 %631 }
 0x21e   :  { %v11711_v15 = vmul.f32 %v632_v13, %v578_v50  ;;  %v10207_v13 = vld [vmem:[%s15194_s4] sm:$0xff] }
 0x21f   :  { %9781 = vmatmul.msk.bf16.vlgmr.msra.gmra.mxu1 %vm215_vm0, %v10207_v13 }
 0x225   :  { %v634_v14 = vpop.permute.xlu1 %633  ;;  %v10248_v23 = vpop.permute.xlu0 %10247 }
 0x226   :  { %v11713_v16 = vmul.f32 %v634_v14, %v593_v58  ;;  %v10250_v24 = vunpack.i.h.bf16 %v10248_v23  ;;  %v10249_v25 = vunpack.i.l.bf16 %v10248_v23 }
 0x228   :  { %v10241_v19 = vpack.i.bf16 %v11713_v16, %v11711_v15  ;;  %v1858_v20 = vpack.c.bf16 %v11713_v16, %v11711_v15 }
 0x22a   :  { %10242 = vrot.lane.b32.xlu2 %v10241_v19, %s11536_s7 }
 0x22d   :  { %v745_v8 = vpop.permute.xlu0 %744 }
 0x284   :  { %v10243_v26 = vpop.permute.xlu2 %10242 }
 0x285   :  { %v10245_v27 = vunpack.i.h.bf16 %v10243_v26  ;;  %v10244_v28 = vunpack.i.l.bf16 %v10243_v26  ;;  %v10208_v26 = vld [vmem:[%s15194_s4 + $0x8] sm:$0xff] }
 0x286   :  { %9782 = vmatmul.msk.bf16.gmra.mxu1 %vm215_vm0, %v10208_v26 }
 0x287   :  { %v656_v29 = vsel %vm215_vm0, %v10245_v27, %v10250_v24  ;;  %v655_v30 = vsel %vm215_vm0, %v10244_v28, %v10249_v25  ;;  %v10211_v27 = vld [vmem:[#allocation6] sm:$0xff]  ;;  %v10209_v28 = vld [vmem:[%s15194_s4 + $0x10] sm:$0xff] }
 0x288   :  { %v657_v31 = vpack.c.bf16 %v656_v29, %v655_v30  ;;  %9809 = vmatmul.msk.bf16.vlgmr.msra.gmra.mxu2 %vm215_vm0, %v10211_v27  ;;  %v10212_v29 = vld [vmem:[#allocation6 + $0x8] sm:$0xff]  ;;  %v10210_v30 = vld [vmem:[%s15194_s4 + $0x18] sm:$0xff] }
 0x28a   :  { %9853 = vmatmul.msk.bf16.vlgmr.msrb.gmra.mxu3 %vm682_vm9, %v657_v31  ;;  %v10213_v31 = vld [vmem:[#allocation6 + $0x10] sm:$0xff] }
 0x296   :  { %9783 = vmatmul.msk.bf16.gmra.mxu1 %vm215_vm0, %v10209_v28 }
 0x298   :  { %9810 = vmatmul.msk.bf16.gmra.mxu2 %vm215_vm0, %v10212_v29 }
 0x2a6   :  { %9784 = vmatmul.msk.bf16.gmra.mxu1 %vm215_vm0, %v10210_v30 }
 0x2a8   :  { %9811 = vmatmul.msk.bf16.gmra.mxu2 %vm215_vm0, %v10213_v31 }
 0x30d   :  { %v695_v33 = vpop.f32.mrf.mxu3 }
 0x30e   :  { %v700_v34 = vadd.f32 %v10327_v32, %v695_v33 }
 0x310   :  { %10344 = vtanh.f32 %v700_v34  ;;  %v9854_v43 = vmul.f32 -1.442695, %v700_v34 }
 0x315   :  { %v697_v35 = vpop.f32.mrf.mxu3 }
 0x316   :  { %v10345_v36 = vpop.eup %10344  ;;  %v701_v37 = vadd.f32 %v10327_v32, %v697_v35 }
 0x317   :  { %754 = vrot.lane.b32.xlu1 %v10345_v36, %s11529_s29 }
 0x318   :  { %10346 = vtanh.f32 %v701_v37  ;;  %v9855_v40 = vmul.f32 -1.442695, %v701_v37 }
 0x31a   :  { %10348 = vpow2.f32 %v9855_v40 }
 0x31e   :  { %v10347_v38 = vpop.eup %10346 }
 0x31f   :  { %756 = vrot.lane.b32.xlu2 %v10347_v38, %s11529_s29 }
 0x320   :  { %v10349_v41 = vpop.eup %10348 }
 0x321   :  { %v709_v42 = vadd.f32 1.0, %v10349_v41 }
 0x323   :  { %10350 = vrcp.f32 %v709_v42  ;;  %v736_v52 = vand.u32 2147483648, %v709_v42  ;;  %vm730_vm11 = vweird.f32 %v709_v42  ;;  %v734_v53 = vand.u32 2147483647, %v709_v42 }
 0x324   :  { %10352 = vpow2.f32 %v9854_v43 }
 0x325   :  { %v737_v56 = vor.u32 1.1754944e-38, %v736_v52  ;;  %vm735_vm13 = vcmp.eq.f32.partialorder %v734_v53, 8.507059e+37 }
 0x327   :  { %746 = vrot.lane.b32.xlu2 %v9816_v39, %s11536_s7 }
 0x329   :  { %v10351_v44 = vpop.eup %10350 }
 0x32a   :  { %v10353_v45 = vpop.eup %10352  ;;  %v726_v46 = vmul.f32 %v10351_v44, %v709_v42  ;;  %vm731_vm10 = vweird.f32 %v10351_v44 }
 0x32b   :  { %v708_v47 = vadd.f32 1.0, %v10353_v45  ;;  %vm732_vm12 = vmor %vm730_vm11, %vm731_vm10  ;;  %vm1731_vm10 = vcmask 1044484   ;;  %vm15211_vm11 = vcmask 1045509  }
 0x32c   :  { %v727_v48 = vsub.f32 1.0, %v726_v46 }
 0x32d   :  { %10354 = vrcp.f32 %v708_v47  ;;  %v721_v63 = vand.u32 2147483648, %v708_v47  ;;  %vm715_vm15 = vweird.f32 %v708_v47  ;;  %v719_v1 = vand.u32 2147483647, %v708_v47 }
 0x32e   :  { %v728_v49 = vmul.f32 %v10351_v44, %v727_v48 }
 0x32f   :  { %v722_v3 = vor.u32 1.1754944e-38, %v721_v63  ;;  %vm720_vm2 = vcmp.eq.f32.partialorder %v719_v1, 8.507059e+37 }
 0x330   :  { %v729_v50 = vadd.f32 %v10351_v44, %v728_v49 }
 0x332   :  { %v733_v55 = vsel %vm732_vm12, %v10351_v44, %v729_v50  ;;  %vm15210_vm12 = vcmask 1046534  }
 0x333   :  { %v10355_v51 = vpop.eup %10354  ;;  %v11736_v58 = vsel %vm735_vm13, %v737_v56, %v733_v55  ;;  %vm15209_vm13 = vcmask 1047559  }
 0x334   :  { %v711_v54 = vmul.f32 %v10355_v51, %v708_v47  ;;  %vm716_vm14 = vweird.f32 %v10355_v51 }
 0x335   :  { %vm717_vm1 = vmor %vm715_vm15, %vm716_vm14  ;;  %vm15208_vm14 = vcmask 785408  }
 0x336   :  { %v712_v59 = vsub.f32 1.0, %v711_v54 }
 0x338   :  { %v713_v61 = vmul.f32 %v10355_v51, %v712_v59 }
 0x33a   :  { %v714_v62 = vadd.f32 %v10355_v51, %v713_v61 }
 0x33c   :  { %v718_v2 = vsel %vm717_vm1, %v10355_v51, %v714_v62 }
 0x33d   :  { %v723_v4 = vsel %vm720_vm2, %v722_v3, %v718_v2  ;;  %v10202_v2 = vld [vmem:[%s15227_s22 + $0x8] sm:$0xff] }
 0x33e   :  { %v750_v22 = vmul.f32 %v745_v8, %v723_v4  ;;  %9754 = vmatmul.msk.bf16.gmra.mxu0 %vm215_vm0, %v10202_v2 }
 0x379   :  { %v757_v57 = vpop.permute.xlu2 %756 }
 0x37a   :  { %v761_v60 = vmul.f32 %v757_v57, %v11736_v58 }
 0x37c   :  { %766 = vrot.lane.b32.xlu0 %v761_v60, %s11536_s7 }
 0x381   :  { %v747_v10 = vpop.permute.xlu2 %746 }
 0x382   :  { %v751_v12 = vmul.f32 %v747_v10, %v11736_v58 }
 0x389   :  { %v755_v6 = vpop.permute.xlu1 %754 }
 0x38a   :  { %v760_v7 = vmul.f32 %v755_v6, %v723_v4 }
 0x38c   :  { %764 = vrot.lane.b32.xlu1 %v760_v7, %s11536_s7 }
 0x3ee   :  { %v767_v14 = vpop.permute.xlu0 %766 }
 0x3ef   :  { %v11751_v19 = vadd.f32 %v767_v14, %v751_v12 }
 0x3f1   :  { %10356 = vtanh.f32 %v11751_v19 }
 0x3f7   :  { %v10357_v21 = vpop.eup %10356 }
 0x3f8   :  { %778 = vrot.lane.b32.xlu2 %v10357_v21, %s11529_s29 }
 0x3fe   :  { %v765_v23 = vpop.permute.xlu1 %764 }
 0x3ff   :  { %v11756_v24 = vadd.f32 %v765_v23, %v750_v22 }
 0x401   :  { %10358 = vtanh.f32 %v11756_v24 }
 0x407   :  { %v10359_v25 = vpop.eup %10358 }
 0x408   :  { %776 = vrot.lane.b32.xlu1 %v10359_v25, %s11529_s29 }
 0x452   :  { %v779_v51 = vpop.permute.xlu2 %778 }
 0x453   :  { %v11789_v54 = vmul.f32 %v779_v51, %v11736_v58  ;;  %v338_v58 = vpop.f32.mrf.mxu1 }
 0x454   :  { %v435_v3 = vpack.c.bf16 %v338_v58, %v338_v58  ;;  %v415_v58 = vpop.f32.mrf.mxu2 }
 0x455   :  { %v822_v1 = vpack.c.bf16 %v11789_v54, %v11789_v54  ;;  %v795_v6 = vrot.slane %v11789_v54, 3  ;;  %v794_v10 = vrot.slane %v11789_v54, 2  ;;  %v793_v11 = vrot.slane %v11789_v54, 1 }
 0x456   :  { %v11803_v7 = vsel %vm215_vm0, %v435_v3, 0  ;;  %v796_v28 = vrot.slane %v11789_v54, 4 }
 0x457   :  { %v1023_v9 = vunpack.c.l.b16 %v822_v1  ;;  %848 = vmatpush.bf16.xpose.msra.mxu3 %v11803_v7  ;;  %v825_v13 = vpack.c.bf16 %v795_v6, %v795_v6  ;;  %v824_v22 = vpack.c.bf16 %v794_v10, %v794_v10  ;;  %v823_v23 = vpack.c.bf16 %v793_v11, %v793_v11 }
 0x459   :  { %v1024_v21 = vpack.c.b16 %v1023_v9, %v1023_v9  ;;  %v1095_v27 = vunpack.c.l.b16 %v825_v13  ;;  %v1071_v30 = vunpack.c.l.b16 %v824_v22  ;;  %v1047_v31 = vunpack.c.l.b16 %v823_v23 }
 0x45b   :  { %v340_v25 = vpop.f32.mrf.mxu1 }
 0x45c   :  { %v436_v26 = vpack.c.bf16 %v340_v25, %v340_v25  ;;  %v417_v9 = vpop.f32.mrf.mxu2  ;;  %v443_v25 = vpack.c.bf16 %v415_v58, %v415_v58 }
 0x45d   :  { %v444_v10 = vpack.c.bf16 %v417_v9, %v417_v9 }
 0x45e   :  { %v11813_v29 = vsel %vm215_vm0, %v436_v26, 0 }
 0x45f   :  { %872 = vmatpush.bf16.xpose.msrb.mxu0 %v11813_v29 }
 0x464   :  { %v420_v22 = vpop.f32.mrf.mxu2 }
 0x46c   :  { %v422_v23 = vpop.f32.mrf.mxu2 }
 0x46d   :  { %v446_v26 = vpack.c.bf16 %v422_v23, %v422_v23  ;;  %v454_v23 = vld [vmem:[%s15196_s6 + $0x3] sm:$0x1] }
 0x47a   :  { %v777_v32 = vpop.permute.xlu1 %776 }
 0x47b   :  { %v11775_v33 = vmul.f32 %v777_v32, %v723_v4  ;;  %v797_v32 = vrot.slane %v11789_v54, 5 }
 0x47d   :  { %v814_v34 = vpack.c.bf16 %v11775_v33, %v11775_v33  ;;  %v788_v35 = vrot.slane %v11775_v33, 3  ;;  %v786_v36 = vrot.slane %v11775_v33, 1  ;;  %v787_v37 = vrot.slane %v11775_v33, 2 }
 0x47e   :  { %v789_v38 = vrot.slane %v11775_v33, 4  ;;  %v792_v42 = vrot.slane %v11775_v33, 7  ;;  %v790_v53 = vrot.slane %v11775_v33, 5  ;;  %v791_v57 = vrot.slane %v11775_v33, 6 }
 0x47f   :  { %v831_v39 = vunpack.c.l.b16 %v814_v34  ;;  %v817_v40 = vpack.c.bf16 %v788_v35, %v788_v35  ;;  %v815_v41 = vpack.c.bf16 %v786_v36, %v786_v36  ;;  %v816_v46 = vpack.c.bf16 %v787_v37, %v787_v37  ;;  %v10203_v37 = vld [vmem:[%s15227_s22 + $0x10] sm:$0xff] }
 0x480   :  { %v818_v49 = vpack.c.bf16 %v789_v38, %v789_v38  ;;  %v821_v50 = vpack.c.bf16 %v792_v42, %v792_v42  ;;  %v819_v60 = vpack.c.bf16 %v790_v53, %v790_v53  ;;  %v820_v63 = vpack.c.bf16 %v791_v57, %v791_v57  ;;  %9755 = vmatmul.msk.bf16.gmra.mxu0 %vm215_vm0, %v10203_v37  ;;  %v343_v53 = vpop.f32.mrf.mxu1 }
 0x481   :  { %v832_v43 = vpack.c.b16 %v831_v39, %v831_v39  ;;  %v903_v44 = vunpack.c.l.b16 %v817_v40  ;;  %v855_v45 = vunpack.c.l.b16 %v815_v41  ;;  %v879_v52 = vunpack.c.l.b16 %v816_v46 }
 0x482   :  { %v927_v55 = vunpack.c.l.b16 %v818_v49  ;;  %v999_v56 = vunpack.c.l.b16 %v821_v50  ;;  %v951_v4 = vunpack.c.l.b16 %v819_v60  ;;  %v975_v8 = vunpack.c.l.b16 %v820_v63 }
 0x483   :  { %833 = vrot.lane.b32.xlu0 %v832_v43, %s11536_s7  ;;  %v904_v47 = vpack.c.b16 %v903_v44, %v903_v44  ;;  %v856_v48 = vpack.c.b16 %v855_v45, %v855_v45  ;;  %v880_v59 = vpack.c.b16 %v879_v52, %v879_v52  ;;  %v799_v34 = vrot.slane %v11789_v54, 7  ;;  %v10204_v52 = vld [vmem:[%s15227_s22 + $0x18] sm:$0xff] }
 0x484   :  { %v928_v61 = vpack.c.b16 %v927_v55, %v927_v55  ;;  %v1000_v62 = vpack.c.b16 %v999_v56, %v999_v56  ;;  %v952_v12 = vpack.c.b16 %v951_v4, %v951_v4  ;;  %v976_v14 = vpack.c.b16 %v975_v8, %v975_v8 }
 0x485   :  { %905 = vrot.lane.b32.xlu1 %v904_v47, %s11536_s7  ;;  %857 = vrot.lane.b32.xlu2 %v856_v48, %s11536_s7  ;;  %v1096_v35 = vpack.c.b16 %v1095_v27, %v1095_v27  ;;  %v826_v36 = vpack.c.bf16 %v796_v28, %v796_v28  ;;  %v1072_v38 = vpack.c.b16 %v1071_v30, %v1071_v30  ;;  %v798_v43 = vrot.slane %v11789_v54, 6  ;;  %v425_v27 = vpop.f32.mrf.mxu2 }
 0x486   :  { %v1048_v39 = vpack.c.b16 %v1047_v31, %v1047_v31  ;;  %v827_v40 = vpack.c.bf16 %v797_v32, %v797_v32  ;;  %v829_v41 = vpack.c.bf16 %v799_v34, %v799_v34  ;;  %v437_v55 = vpack.c.bf16 %v343_v53, %v343_v53 }
 0x487   :  { %v1119_v42 = vunpack.c.l.b16 %v826_v36  ;;  %v828_v47 = vpack.c.bf16 %v798_v43, %v798_v43  ;;  %v11864_v28 = vsel %vm215_vm0, %v443_v25, 0  ;;  %v11868_v31 = vsel %vm215_vm0, %v446_v26, 0 }
 0x488   :  { %v1143_v44 = vunpack.c.l.b16 %v827_v40  ;;  %v1191_v45 = vunpack.c.l.b16 %v829_v41  ;;  %v11835_v56 = vsel %vm215_vm0, %v437_v55, 0  ;;  %v345_v57 = vpop.f32.mrf.mxu1  ;;  %v445_v34 = vpack.c.bf16 %v420_v22, %v420_v22 }
 0x489   :  { %v1120_v46 = vpack.c.b16 %v1119_v42, %v1119_v42  ;;  %v1167_v50 = vunpack.c.l.b16 %v828_v47  ;;  %896 = vmatpush.bf16.xpose.msrb.mxu1 %v11835_v56  ;;  %v450_v41 = vpack.c.bf16 %v11687_v18, %v11687_v18  ;;  %v449_v18 = vpack.c.bf16 %v11685_v17, %v11685_v17 }
 0x48a   :  { %v1144_v48 = vpack.c.b16 %v1143_v44, %v1143_v44  ;;  %v1192_v49 = vpack.c.b16 %v1191_v45, %v1191_v45 }
 0x48b   :  { %881 = vrot.lane.b32.xlu0 %v880_v59, %s11536_s7  ;;  %v1168_v51 = vpack.c.b16 %v1167_v50, %v1167_v50  ;;  %v438_v59 = vpack.c.bf16 %v345_v57, %v345_v57 }
 0x48d   :  { %929 = vrot.lane.b32.xlu1 %v928_v61, %s11536_s7  ;;  %1001 = vrot.lane.b32.xlu2 %v1000_v62, %s11536_s7  ;;  %v11839_v60 = vsel %vm215_vm0, %v438_v59, 0  ;;  %v427_v37 = vpop.f32.mrf.mxu2 }
 0x48e   :  { %920 = vmatpush.bf16.xpose.msrb.mxu2 %v11839_v60 }
 0x490   :  { %9756 = vmatmul.msk.bf16.gmra.mxu0 %vm215_vm0, %v10204_v52  ;;  %v348_v61 = vpop.f32.mrf.mxu1  ;;  %v11905_v52 = vpop.f32.mrf.mxu0 }
 0x491   :  { %v439_v62 = vpack.c.bf16 %v348_v61, %v348_v61 }
 0x493   :  { %953 = vrot.lane.b32.xlu0 %v952_v12, %s11536_s7  ;;  %v11843_v63 = vsel %vm215_vm0, %v439_v62, 0 }
 0x494   :  { %944 = vmatpush.bf16.xpose.msrb.mxu3 %v11843_v63 }
 0x495   :  { %977 = vrot.lane.b32.xlu1 %v976_v14, %s11536_s7  ;;  %1025 = vrot.lane.b32.xlu2 %v1024_v21, %s11536_s7  ;;  %v11858_v14 = vsel %vm215_vm0, %v444_v10, 0 }
 0x498   :  { %v350_v1 = vpop.f32.mrf.mxu1  ;;  %v11908_v53 = vpop.f32.mrf.mxu0 }
 0x499   :  { %v440_v2 = vpack.c.bf16 %v350_v1, %v350_v1 }
 0x49b   :  { %1097 = vrot.lane.b32.xlu0 %v1096_v35, %s11536_s7  ;;  %v11847_v3 = vsel %vm215_vm0, %v440_v2, 0  ;;  %v11874_v35 = vsel %vm215_vm0, %v445_v34, 0 }
 0x49c   :  { %968 = vmatpush.bf16.xpose.msra.mxu0 %v11847_v3 }
 0x49d   :  { %1073 = vrot.lane.b32.xlu2 %v1072_v38, %s11536_s7  ;;  %1049 = vrot.lane.b32.xlu1 %v1048_v39, %s11536_s7  ;;  %v447_v38 = vpack.c.bf16 %v425_v27, %v425_v27  ;;  %v448_v39 = vpack.c.bf16 %v427_v37, %v427_v37 }
 0x49f   :  { %v11881_v42 = vsel %vm215_vm0, %v447_v38, 0  ;;  %v11884_v43 = vsel %vm215_vm0, %v448_v39, 0  ;;  %v456_v39 = vld [vmem:[%s15196_s6 + $0x5] sm:$0x1] }
 0x4a0   :  { %v353_v4 = vpop.f32.mrf.mxu1  ;;  %v11913_v61 = vpop.f32.mrf.mxu0 }
 0x4a1   :  { %v441_v6 = vpack.c.bf16 %v353_v4, %v353_v4  ;;  %15228 = vst [vmem:[#allocation20_spill] sm:$0xff] %v11913_v61 }
 0x4a3   :  { %1121 = vrot.lane.b32.xlu0 %v1120_v46, %s11536_s7  ;;  %v11851_v8 = vsel %vm215_vm0, %v441_v6, 0  ;;  %v11891_v46 = vsel %vm215_vm0, %v450_v41, 0  ;;  %v452_v6 = vld [vmem:[%s15196_s6 + $0x1] sm:$0x1] }
 0x4a4   :  { %992 = vmatpush.bf16.xpose.msra.mxu1 %v11851_v8 }
 0x4a5   :  { %1145 = vrot.lane.b32.xlu2 %v1144_v48, %s11536_s7  ;;  %1193 = vrot.lane.b32.xlu1 %v1192_v49, %s11536_s7  ;;  %v11898_v48 = vsel %vm215_vm0, %v449_v18, 0 }
 0x4a8   :  { %v355_v11 = vpop.f32.mrf.mxu1 }
 0x4a9   :  { %v442_v12 = vpack.c.bf16 %v355_v11, %v355_v11 }
 0x4ab   :  { %1169 = vrot.lane.b32.xlu0 %v1168_v51, %s11536_s7  ;;  %v11855_v13 = vsel %vm215_vm0, %v442_v12, 0 }
 0x4ac   :  { %1016 = vmatpush.bf16.xpose.msra.mxu2 %v11855_v13 }
 0x4df   :  { %v858_v21 = vpop.permute.xlu2 %857 }
 0x4e0   :  { %9857 = vmatmul.msk.bf16.vlgmr.msrb.gmra.mxu0 %vm215_vm0, %v858_v21  ;;  %v451_v21 = vld [vmem:[%s15196_s6] sm:$0x1] }
 0x4e1   :  { %1064 = vmatpush.bf16.xpose.msrb.mxu0 %v11858_v14 }
 0x4e7   :  { %v1002_v45 = vpop.permute.xlu2 %1001 }
 0x4ef   :  { %v1026_v49 = vpop.permute.xlu2 %1025 }
 0x4f5   :  { %v834_v30 = vpop.permute.xlu0 %833 }
 0x4f6   :  { %9856 = vmatmul.msk.bf16.vlgmr.msra.gmra.mxu3 %vm215_vm0, %v834_v30 }
 0x4f7   :  { %v906_v32 = vpop.permute.xlu1 %905  ;;  %1040 = vmatpush.bf16.xpose.msra.mxu3 %v11864_v28  ;;  %v1074_v17 = vpop.permute.xlu2 %1073 }
 0x4f8   :  { %9859 = vmatmul.msk.bf16.vlgmr.msrb.gmra.mxu2 %vm215_vm0, %v906_v32 }
 0x4f9   :  { %1112 = vmatpush.bf16.xpose.msrb.mxu2 %v11868_v31 }
 0x4fd   :  { %v882_v36 = vpop.permute.xlu0 %881  ;;  %v11916_v1 = vpop.f32.mrf.mxu0 }
 0x4fe   :  { %9858 = vmatmul.msk.bf16.vlgmr.msrb.gmra.mxu1 %vm215_vm0, %v882_v36  ;;  %15229 = vst [vmem:[#allocation21_spill] sm:$0xff] %v11916_v1  ;;  %v453_v36 = vld [vmem:[%s15196_s6 + $0x2] sm:$0x1] }
 0x4ff   :  { %1088 = vmatpush.bf16.xpose.msrb.mxu1 %v11874_v35  ;;  %v930_v40 = vpop.permute.xlu1 %929  ;;  %v1146_v57 = vpop.permute.xlu2 %1145 }
 0x505   :  { %v954_v44 = vpop.permute.xlu0 %953  ;;  %v11918_v2 = vpop.f32.mrf.mxu0 }
 0x506   :  { %9860 = vmatmul.msk.bf16.vlgmr.msrb.gmra.mxu3 %vm215_vm0, %v930_v40  ;;  %9861 = vmatmul.msk.bf16.vlgmr.msra.gmra.mxu0 %vm215_vm0, %v954_v44  ;;  %15230 = vst [vmem:[#allocation22_spill] sm:$0xff] %v11918_v2 }
 0x507   :  { %1136 = vmatpush.bf16.xpose.msrb.mxu3 %v11881_v42  ;;  %1160 = vmatpush.bf16.xpose.msra.mxu0 %v11884_v43  ;;  %v978_v47 = vpop.permute.xlu1 %977 }
 0x508   :  { %9863 = vmatmul.msk.bf16.vlgmr.msra.gmra.mxu2 %vm215_vm0, %v1002_v45 }
 0x509   :  { %1208 = vmatpush.bf16.xpose.msra.mxu2 %v11891_v46 }
 0x50d   :  { %v1098_v51 = vpop.permute.xlu0 %1097  ;;  %v11920_v58 = vpop.f32.mrf.mxu0 }
 0x50e   :  { %9862 = vmatmul.msk.bf16.vlgmr.msra.gmra.mxu1 %vm215_vm0, %v978_v47  ;;  %15231 = vst [vmem:[#allocation23_spill] sm:$0xff] %v11920_v58 }
 0x50f   :  { %1184 = vmatpush.bf16.xpose.msra.mxu1 %v11898_v48  ;;  %v1050_v50 = vpop.permute.xlu1 %1049 }
 0x515   :  { %v1122_v55 = vpop.permute.xlu0 %1121  ;;  %v11922_v4 = vpop.f32.mrf.mxu0 }
 0x516   :  { %9864 = vmatmul.msk.bf16.vlgmr.msra.gmra.mxu3 %vm215_vm0, %v1026_v49  ;;  %9865 = vmatmul.msk.bf16.vlgmr.msrb.gmra.mxu0 %vm215_vm0, %v1050_v50  ;;  %15232 = vst [vmem:[#allocation24_spill] sm:$0xff] %v11922_v4  ;;  %v455_v49 = vld [vmem:[%s15196_s6 + $0x4] sm:$0x1] }
 0x517   :  { %v1194_v59 = vpop.permute.xlu1 %1193 }
 0x518   :  { %9867 = vmatmul.msk.bf16.vlgmr.msrb.gmra.mxu2 %vm215_vm0, %v1098_v51  ;;  %v458_v51 = vld [vmem:[%s15196_s6 + $0x7] sm:$0x1] }
 0x51d   :  { %v1170_v62 = vpop.permute.xlu0 %1169 }
 0x51e   :  { %9866 = vmatmul.msk.bf16.vlgmr.msrb.gmra.mxu1 %vm215_vm0, %v1074_v17 }
 0x526   :  { %9868 = vmatmul.msk.bf16.vlgmr.msrb.gmra.mxu3 %vm215_vm0, %v1122_v55  ;;  %9869 = vmatmul.msk.bf16.vlgmr.msra.gmra.mxu0 %vm215_vm0, %v1146_v57 }
 0x528   :  { %9871 = vmatmul.msk.bf16.vlgmr.msra.gmra.mxu2 %vm215_vm0, %v1194_v59 }
 0x52e   :  { %9870 = vmatmul.msk.bf16.vlgmr.msra.gmra.mxu1 %vm215_vm0, %v1170_v62 }
 0x55d   :  { %v874_v9 = vpop.f32.mrf.mxu0 }
 0x55e   :  { %v11927_v10 = vadd.f32 %v874_v9, %v452_v6  ;;  %v457_v9 = vld [vmem:[%s15196_s6 + $0x6] sm:$0x1] }
 0x560   :  { %v1218_v11 = vsel %vm1214_vm3, %v11927_v10, -inf }
 0x561   :  { %1219 = vmax.xlane.f32.xlu0 %v1218_v11 }
 0x565   :  { %v876_v12 = vpop.f32.mrf.mxu0 }
 0x579   :  { %v850_v22 = vpop.f32.mrf.mxu3 }
 0x57a   :  { %v11937_v25 = vadd.f32 %v850_v22, %v451_v21 }
 0x57b   :  { %v898_v26 = vpop.f32.mrf.mxu1  ;;  %v922_v27 = vpop.f32.mrf.mxu2 }
 0x57c   :  { %v11939_v30 = vadd.f32 %v922_v27, %v454_v23  ;;  %v1215_v32 = vsel %vm1214_vm3, %v11937_v25, -inf  ;;  %v11948_v38 = vadd.f32 %v898_v26, %v453_v36 }
 0x57d   :  { %1216 = vmax.xlane.f32.xlu1 %v1215_v32  ;;  %v460_v32 = vld [vmem:[%s15196_s6 + $0x9] sm:$0x1] }
 0x57e   :  { %v1224_v34 = vsel %vm1214_vm3, %v11939_v30, -inf  ;;  %v1221_v18 = vsel %vm1214_vm3, %v11948_v38, -inf }
 0x57f   :  { %1225 = vmax.xlane.f32.xlu2 %v1224_v34  ;;  %v459_v34 = vld [vmem:[%s15196_s6 + $0x8] sm:$0x1] }
 0x581   :  { %v852_v37 = vpop.f32.mrf.mxu3 }
 0x583   :  { %v900_v40 = vpop.f32.mrf.mxu1  ;;  %v924_v41 = vpop.f32.mrf.mxu2 }
 0x584   :  { %v970_v44 = vpop.f32.mrf.mxu0 }
 0x585   :  { %v11953_v45 = vadd.f32 %v970_v44, %v456_v39  ;;  %v462_v39 = vld [vmem:[%s15196_s6 + $0xb] sm:$0x1] }
 0x587   :  { %1222 = vmax.xlane.f32.xlu2 %v1221_v18  ;;  %v1230_v47 = vsel %vm1214_vm3, %v11953_v45, -inf }
 0x588   :  { %1231 = vmax.xlane.f32.xlu0 %v1230_v47 }
 0x589   :  { %v946_v50 = vpop.f32.mrf.mxu3 }
 0x58a   :  { %v11965_v17 = vadd.f32 %v946_v50, %v455_v49 }
 0x58b   :  { %v994_v55 = vpop.f32.mrf.mxu1  ;;  %v1018_v57 = vpop.f32.mrf.mxu2 }
 0x58c   :  { %v972_v59 = vpop.f32.mrf.mxu0  ;;  %v11967_v62 = vadd.f32 %v1018_v57, %v458_v51  ;;  %v1227_v6 = vsel %vm1214_vm3, %v11965_v17, -inf  ;;  %v11976_v12 = vadd.f32 %v994_v55, %v457_v9  ;;  %v461_v51 = vld [vmem:[%s15196_s6 + $0xa] sm:$0x1] }
 0x58d   :  { %1228 = vmax.xlane.f32.xlu1 %v1227_v6 }
 0x58e   :  { %v1236_v11 = vsel %vm1214_vm3, %v11967_v62, -inf  ;;  %v1233_v27 = vsel %vm1214_vm3, %v11976_v12, -inf }
 0x58f   :  { %1237 = vmax.xlane.f32.xlu2 %v1236_v11 }
 0x591   :  { %v948_v21 = vpop.f32.mrf.mxu3 }
 0x593   :  { %v996_v22 = vpop.f32.mrf.mxu1  ;;  %v1020_v23 = vpop.f32.mrf.mxu2 }
 0x594   :  { %v1066_v26 = vpop.f32.mrf.mxu0  ;;  %v463_v22 = vld [vmem:[%s15196_s6 + $0xc] sm:$0x1] }
 0x595   :  { %1234 = vmax.xlane.f32.xlu1 %v1233_v27  ;;  %v11986_v36 = vadd.f32 %v1066_v26, %v460_v32  ;;  %v466_v26 = vld [vmem:[%s15196_s6 + $0xf] sm:$0x1] }
 0x597   :  { %v1242_v49 = vsel %vm1214_vm3, %v11986_v36, -inf }
 0x599   :  { %v1042_v37 = vpop.f32.mrf.mxu3 }
 0x59a   :  { %v11991_v40 = vadd.f32 %v1042_v37, %v459_v34 }
 0x59b   :  { %v1090_v41 = vpop.f32.mrf.mxu1  ;;  %v1114_v44 = vpop.f32.mrf.mxu2 }
 0x59c   :  { %v1068_v18 = vpop.f32.mrf.mxu0  ;;  %v11993_v47 = vadd.f32 %v1114_v44, %v462_v39  ;;  %v1239_v50 = vsel %vm1214_vm3, %v11991_v40, -inf  ;;  %v12004_v57 = vadd.f32 %v1090_v41, %v461_v51  ;;  %v464_v44 = vld [vmem:[%s15196_s6 + $0xd] sm:$0x1] }
 0x59d   :  { %1243 = vmax.xlane.f32.xlu1 %v1242_v49  ;;  %1240 = vmax.xlane.f32.xlu2 %v1239_v50 }
 0x59e   :  { %v1248_v55 = vsel %vm1214_vm3, %v11993_v47, -inf  ;;  %v1245_v21 = vsel %vm1214_vm3, %v12004_v57, -inf }
 0x59f   :  { %1249 = vmax.xlane.f32.xlu0 %v1248_v55 }
 0x5a1   :  { %v1044_v59 = vpop.f32.mrf.mxu3 }
 0x5a3   :  { %v1092_v6 = vpop.f32.mrf.mxu1  ;;  %v1116_v9 = vpop.f32.mrf.mxu2 }
 0x5a4   :  { %v1162_v11 = vpop.f32.mrf.mxu0 }
 0x5a5   :  { %1246 = vmax.xlane.f32.xlu2 %v1245_v21  ;;  %v12025_v49 = vadd.f32 %v1162_v11, %v464_v44 }
 0x5a7   :  { %v1254_v59 = vsel %vm1214_vm3, %v12025_v49, -inf }
 0x5a9   :  { %v1138_v23 = vpop.f32.mrf.mxu3 }
 0x5aa   :  { %v12014_v27 = vadd.f32 %v1138_v23, %v463_v22 }
 0x5ab   :  { %v1186_v32 = vpop.f32.mrf.mxu1  ;;  %v1210_v34 = vpop.f32.mrf.mxu2 }
 0x5ac   :  { %v1164_v37 = vpop.f32.mrf.mxu0  ;;  %v12016_v39 = vadd.f32 %v1210_v34, %v466_v26  ;;  %v1251_v41 = vsel %vm1214_vm3, %v12014_v27, -inf }
 0x5ad   :  { %1252 = vmax.xlane.f32.xlu0 %v1251_v41 }
 0x5ae   :  { %v1260_v18 = vsel %vm1214_vm3, %v12016_v39, -inf }
 0x5af   :  { %1261 = vmax.xlane.f32.xlu1 %v1260_v18 }
 0x5b1   :  { %v1140_v50 = vpop.f32.mrf.mxu3 }
 0x5b3   :  { %v1188_v51 = vpop.f32.mrf.mxu1  ;;  %v1212_v55 = vpop.f32.mrf.mxu2 }
 0x5b5   :  { %1255 = vmax.xlane.f32.xlu0 %v1254_v59 }
 0x5d4   :  { %v1220_v6 = vpop.xlane.xlu0 %1219 }
 0x5d5   :  { %v1264_v9 = vsub.f32 %v11927_v10, %v1220_v6 }
 0x5d7   :  { %v1281_v21 = vmul.f32 1.442695, %v1264_v9 }
 0x5d9   :  { %10360 = vpow2.f32 %v1281_v21 }
 0x5df   :  { %v12030_v22 = vpop.eup %10360 }
 0x5e0   :  { %v1314_v23 = vsel %vm1214_vm3, %v12030_v22, 0.0 }
 0x5e1   :  { %1315 = vadd.xlane.f32.xlu0 %v1314_v23 }
 0x5f0   :  { %v1217_v11 = vpop.xlane.xlu1 %1216 }
 0x5f1   :  { %v1263_v26 = vsub.f32 %v11937_v25, %v1217_v11  ;;  %v465_v25 = vld [vmem:[%s15196_s6 + $0xe] sm:$0x1] }
 0x5f2   :  { %v1226_v34 = vpop.xlane.xlu2 %1225  ;;  %v12049_v21 = vadd.f32 %v1186_v32, %v465_v25 }
 0x5f3   :  { %v1279_v37 = vmul.f32 1.442695, %v1263_v26  ;;  %v1266_v41 = vsub.f32 %v11939_v30, %v1226_v34 }
 0x5f5   :  { %10362 = vpow2.f32 %v1279_v37  ;;  %v1285_v44 = vmul.f32 1.442695, %v1266_v41  ;;  %v1257_v37 = vsel %vm1214_vm3, %v12049_v21, -inf }
 0x5f7   :  { %10364 = vpow2.f32 %v1285_v44 }
 0x5fa   :  { %v1223_v18 = vpop.xlane.xlu2 %1222 }
 0x5fb   :  { %v12036_v10 = vpop.eup %10362  ;;  %v1232_v50 = vpop.xlane.xlu0 %1231  ;;  %v1265_v51 = vsub.f32 %v11948_v38, %v1223_v18 }
 0x5fc   :  { %v1268_v55 = vsub.f32 %v11953_v45, %v1232_v50  ;;  %v1311_v59 = vsel %vm1214_vm3, %v12036_v10, 0.0 }
 0x5fd   :  { %v12042_v6 = vpop.eup %10364  ;;  %v1283_v30 = vmul.f32 1.442695, %v1265_v51  ;;  %1312 = vadd.xlane.f32.xlu2 %v1311_v59 }
 0x5fe   :  { %v1320_v9 = vsel %vm1214_vm3, %v12042_v6, 0.0  ;;  %v1289_v38 = vmul.f32 1.442695, %v1268_v55 }
 0x5ff   :  { %10366 = vpow2.f32 %v1283_v30  ;;  %1321 = vadd.xlane.f32.xlu1 %v1320_v9 }
 0x600   :  { %v1229_v45 = vpop.xlane.xlu1 %1228  ;;  %10368 = vpow2.f32 %v1289_v38 }
 0x601   :  { %v1267_v23 = vsub.f32 %v11965_v17, %v1229_v45 }
 0x602   :  { %v1238_v11 = vpop.xlane.xlu2 %1237 }
 0x603   :  { %v1287_v26 = vmul.f32 1.442695, %v1267_v23  ;;  %v1270_v34 = vsub.f32 %v11967_v62, %v1238_v11 }
 0x605   :  { %v12055_v41 = vpop.eup %10366  ;;  %10370 = vpow2.f32 %v1287_v26  ;;  %v1293_v44 = vmul.f32 1.442695, %v1270_v34  ;;  %1258 = vmax.xlane.f32.xlu2 %v1257_v37 }
 0x606   :  { %v1317_v32 = vsel %vm1214_vm3, %v12055_v41, 0.0  ;;  %v12060_v50 = vpop.eup %10368 }
 0x607   :  { %10372 = vpow2.f32 %v1293_v44  ;;  %1318 = vadd.xlane.f32.xlu1 %v1317_v32  ;;  %v1326_v25 = vsel %vm1214_vm3, %v12060_v50, 0.0 }
 0x608   :  { %v1235_v18 = vpop.xlane.xlu1 %1234 }
 0x609   :  { %v1269_v17 = vsub.f32 %v11976_v12, %v1235_v18 }
 0x60b   :  { %v12062_v62 = vpop.eup %10370  ;;  %v1291_v51 = vmul.f32 1.442695, %v1269_v17 }
 0x60c   :  { %v1323_v55 = vsel %vm1214_vm3, %v12062_v62, 0.0 }
 0x60d   :  { %v12066_v59 = vpop.eup %10372  ;;  %10374 = vpow2.f32 %v1291_v51  ;;  %1324 = vadd.xlane.f32.xlu2 %v1323_v55 }
 0x60e   :  { %v1332_v30 = vsel %vm1214_vm3, %v12066_v59, 0.0 }
 0x60f   :  { %1327 = vadd.xlane.f32.xlu1 %v1326_v25  ;;  %1333 = vadd.xlane.f32.xlu0 %v1332_v30 }
 0x610   :  { %v1244_v12 = vpop.xlane.xlu1 %1243  ;;  %v1241_v9 = vpop.xlane.xlu2 %1240 }
 0x611   :  { %v1272_v38 = vsub.f32 %v11986_v36, %v1244_v12  ;;  %v1271_v45 = vsub.f32 %v11991_v40, %v1241_v9 }
 0x612   :  { %v1250_v23 = vpop.xlane.xlu0 %1249 }
 0x613   :  { %v12074_v11 = vpop.eup %10374  ;;  %v1297_v26 = vmul.f32 1.442695, %v1272_v38  ;;  %v1295_v34 = vmul.f32 1.442695, %v1271_v45  ;;  %v1274_v37 = vsub.f32 %v11993_v47, %v1250_v23 }
 0x614   :  { %v1329_v44 = vsel %vm1214_vm3, %v12074_v11, 0.0 }
 0x615   :  { %10376 = vpow2.f32 %v1297_v26  ;;  %v1301_v32 = vmul.f32 1.442695, %v1274_v37  ;;  %1330 = vadd.xlane.f32.xlu2 %v1329_v44 }
 0x616   :  { %10378 = vpow2.f32 %v1295_v34 }
 0x617   :  { %10380 = vpow2.f32 %v1301_v32 }
 0x618   :  { %v1247_v18 = vpop.xlane.xlu2 %1246 }
 0x619   :  { %v1273_v36 = vsub.f32 %v12004_v57, %v1247_v18 }
 0x61b   :  { %v12080_v17 = vpop.eup %10376  ;;  %v1299_v40 = vmul.f32 1.442695, %v1273_v36 }
 0x61c   :  { %v12082_v51 = vpop.eup %10378  ;;  %v1338_v55 = vsel %vm1214_vm3, %v12080_v17, 0.0 }
 0x61d   :  { %v12086_v47 = vpop.eup %10380  ;;  %10382 = vpow2.f32 %v1299_v40  ;;  %1339 = vadd.xlane.f32.xlu2 %v1338_v55  ;;  %v1335_v25 = vsel %vm1214_vm3, %v12082_v51, 0.0 }
 0x61e   :  { %1336 = vadd.xlane.f32.xlu0 %v1335_v25  ;;  %v1344_v30 = vsel %vm1214_vm3, %v12086_v47, 0.0 }
 0x61f   :  { %1345 = vadd.xlane.f32.xlu1 %v1344_v30 }
 0x620   :  { %v1253_v57 = vpop.xlane.xlu0 %1252 }
 0x621   :  { %v1275_v12 = vsub.f32 %v12014_v27, %v1253_v57  ;;  %v265_v57 = vld [vmem:[%s15194_s4] sm:$0xf] }
 0x622   :  { %v1262_v9 = vpop.xlane.xlu1 %1261 }
 0x623   :  { %v12093_v38 = vpop.eup %10382  ;;  %v1303_v45 = vmul.f32 1.442695, %v1275_v12  ;;  %v1278_v23 = vsub.f32 %v12016_v39, %v1262_v9  ;;  %v12126_v12 = vsel %vm1411_vm4, %v265_v57, 0  ;;  %v268_v9 = vld [vmem:[%s15194_s4 + $0xc] sm:$0xf] }
 0x624   :  { %v1341_v26 = vsel %vm1214_vm3, %v12093_v38, 0.0  ;;  %1422 = vmatpush.bf16.msra.mxu3 %v12126_v12 }
 0x625   :  { %10384 = vpow2.f32 %v1303_v45  ;;  %v1309_v34 = vmul.f32 1.442695, %v1278_v23  ;;  %v12133_v23 = vsel %vm1411_vm4, %v268_v9, 0  ;;  %v273_v9 = vld [vmem:[#allocation6] sm:$0xf] }
 0x626   :  { %1342 = vadd.xlane.f32.xlu0 %v1341_v26  ;;  %15233 = vst [vmem:[#allocation25_spill] sm:$0xff] %v12133_v23  ;;  %1479 = vmatpush.bf16.msrb.mxu2 %v12133_v23 }
 0x627   :  { %10386 = vpow2.f32 %v1309_v34  ;;  %v269_v34 = vld [vmem:[%s15194_s4 + $0x10] sm:$0xf] }
 0x628   :  { %v1256_v37 = vpop.xlane.xlu0 %1255 }
 0x629   :  { %v1276_v44 = vsub.f32 %v12025_v49, %v1256_v37  ;;  %v266_v49 = vld [vmem:[%s15194_s4 + $0x4] sm:$0xf]  ;;  %v270_v37 = vld [vmem:[%s15194_s4 + $0x14] sm:$0xf] }
 0x62a   :  { %v12115_v25 = vsel %vm1411_vm4, %v266_v49, 0  ;;  %v271_v49 = vld [vmem:[%s15194_s4 + $0x18] sm:$0xf] }
 0x62b   :  { %v12099_v32 = vpop.eup %10384  ;;  %v1305_v18 = vmul.f32 1.442695, %v1276_v44  ;;  %1441 = vmatpush.bf16.msrb.mxu0 %v12115_v25  ;;  %v272_v44 = vld [vmem:[%s15194_s4 + $0x1c] sm:$0xf] }
 0x62c   :  { %v1347_v27 = vsel %vm1214_vm3, %v12099_v32, 0.0 }
 0x62d   :  { %v12103_v36 = vpop.eup %10386  ;;  %10388 = vpow2.f32 %v1305_v18  ;;  %1348 = vadd.xlane.f32.xlu1 %v1347_v27  ;;  %v12159_v18 = vsel %vm1411_vm4, %v270_v37, 0  ;;  %v12162_v27 = vsel %vm1411_vm4, %v272_v44, 0 }
 0x62e   :  { %v1356_v39 = vsel %vm1214_vm3, %v12103_v36, 0.0  ;;  %15236 = vst [vmem:[#allocation28_spill] sm:$0xff] %v12159_v18  ;;  %1555 = vmatpush.bf16.msra.mxu2 %v12162_v27 }
 0x62f   :  { %1357 = vadd.xlane.f32.xlu2 %v1356_v39  ;;  %15237 = vst [vmem:[#allocation29_spill] sm:$0xff] %v12162_v27  ;;  %1517 = vmatpush.bf16.msra.mxu0 %v12159_v18 }
 0x633   :  { %v12107_v40 = vpop.eup %10388 }
 0x634   :  { %v1350_v55 = vsel %vm1214_vm3, %v12107_v40, 0.0 }
 0x635   :  { %1351 = vadd.xlane.f32.xlu0 %v1350_v55 }
 0x649   :  { %1860 = vrot.lane.b32.xlu0 %v1858_v20, %s11536_s7  ;;  %v267_v20 = vld [vmem:[%s15194_s4 + $0x8] sm:$0xf] }
 0x64a   :  { %v12142_v26 = vsel %vm1411_vm4, %v267_v20, 0 }
 0x64b   :  { %15234 = vst [vmem:[#allocation26_spill] sm:$0xff] %v12142_v26  ;;  %1460 = vmatpush.bf16.msrb.mxu1 %v12142_v26 }
 0x654   :  { %v1316_v30 = vpop.xlane.xlu0 %1315 }
 0x655   :  { %10390 = vrcp.f32 %v1316_v30  ;;  %v12170_v30 = vsel %vm1411_vm4, %v271_v49, 0  ;;  %v276_v49 = vld [vmem:[#allocation6 + $0xc] sm:$0xf] }
 0x656   :  { %15238 = vst [vmem:[#allocation30_spill] sm:$0xff] %v12170_v30  ;;  %1536 = vmatpush.bf16.msra.mxu1 %v12170_v30 }
 0x65b   :  { %v10391_v45 = vpop.eup %10390 }
 0x65c   :  { %v1376_v15 = vmul.f32 %v10391_v45, %v12030_v22  ;;  %v12149_v22 = vsel %vm1411_vm4, %v269_v34, 0 }
 0x65d   :  { %15235 = vst [vmem:[#allocation27_spill] sm:$0xff] %v12149_v22  ;;  %1498 = vmatpush.bf16.msrb.mxu3 %v12149_v22 }
 0x65e   :  { %v1392_v16 = vpack.c.bf16 %v1376_v15, %v1376_v15 }
 0x660   :  { %9873 = vmatmul.msk.bf16.vlgmr.msrb.gmra.mxu0 %vm1407_vm5, %v1392_v16 }
 0x670   :  { %v1313_v39 = vpop.xlane.xlu2 %1312 }
 0x671   :  { %10392 = vrcp.f32 %v1313_v39  ;;  %v12177_v39 = vsel %vm1411_vm4, %v273_v9, 0 }
 0x672   :  { %v1322_v55 = vpop.xlane.xlu1 %1321 }
 0x673   :  { %10394 = vrcp.f32 %v1322_v55  ;;  %v274_v55 = vld [vmem:[#allocation6 + $0x4] sm:$0xf] }
 0x674   :  { %v12180_v58 = vsel %vm1411_vm4, %v274_v55, 0 }
 0x675   :  { %1593 = vmatpush.bf16.msrb.mxu0 %v12180_v58 }
 0x677   :  { %v10393_v57 = vpop.eup %10392 }
 0x678   :  { %v1375_v45 = vmul.f32 %v10393_v57, %v12036_v10  ;;  %v1259_v15 = vpop.xlane.xlu2 %1258  ;;  %v12185_v10 = vsel %vm1411_vm4, %v276_v49, 0 }
 0x679   :  { %v10395_v16 = vpop.eup %10394  ;;  %v1277_v20 = vsub.f32 %v12049_v21, %v1259_v15 }
 0x67a   :  { %v1391_v34 = vpack.c.bf16 %v1375_v45, %v1375_v45  ;;  %v1378_v37 = vmul.f32 %v10395_v16, %v12042_v6  ;;  %v1319_v44 = vpop.xlane.xlu1 %1318  ;;  %v275_v16 = vld [vmem:[#allocation6 + $0x8] sm:$0xf] }
 0x67b   :  { %v1307_v4 = vmul.f32 1.442695, %v1277_v20  ;;  %10396 = vrcp.f32 %v1319_v44 }
 0x67c   :  { %v1394_v2 = vpack.c.bf16 %v1378_v37, %v1378_v37  ;;  %9872 = vmatmul.msk.bf16.vlgmr.msra.gmra.mxu3 %vm1407_vm5, %v1391_v34  ;;  %v277_v37 = vld [vmem:[#allocation6 + $0x10] sm:$0xf] }
 0x67d   :  { %10398 = vpow2.f32 %v1307_v4  ;;  %1574 = vmatpush.bf16.msra.mxu3 %v12177_v39 }
 0x67e   :  { %9875 = vmatmul.msk.bf16.vlgmr.msrb.gmra.mxu2 %vm1407_vm5, %v1394_v2  ;;  %v12196_v2 = vsel %vm1411_vm4, %v275_v16, 0 }
 0x67f   :  { %1631 = vmatpush.bf16.msrb.mxu2 %v12185_v10 }
 0x680   :  { %v1325_v6 = vpop.xlane.xlu2 %1324 }
 0x681   :  { %v10397_v21 = vpop.eup %10396  ;;  %10400 = vrcp.f32 %v1325_v6 }
 0x682   :  { %v1377_v57 = vmul.f32 %v10397_v21, %v12055_v41  ;;  %v1328_v9 = vpop.xlane.xlu1 %1327  ;;  %v1334_v45 = vpop.xlane.xlu0 %1333 }
 0x683   :  { %v12191_v15 = vpop.eup %10398  ;;  %10402 = vrcp.f32 %v1328_v9  ;;  %v280_v9 = vld [vmem:[#allocation6 + $0x1c] sm:$0xf] }
 0x684   :  { %v1393_v20 = vpack.c.bf16 %v1377_v57, %v1377_v57  ;;  %10404 = vrcp.f32 %v1334_v45  ;;  %v1353_v4 = vsel %vm1214_vm3, %v12191_v15, 0.0  ;;  %v12203_v57 = vsel %vm1411_vm4, %v277_v37, 0 }
 0x685   :  { %1354 = vadd.xlane.f32.xlu1 %v1353_v4  ;;  %v278_v4 = vld [vmem:[#allocation6 + $0x14] sm:$0xf] }
 0x686   :  { %9874 = vmatmul.msk.bf16.vlgmr.msrb.gmra.mxu1 %vm1407_vm5, %v1393_v20 }
 0x687   :  { %v10401_v34 = vpop.eup %10400  ;;  %1612 = vmatpush.bf16.msrb.mxu1 %v12196_v2 }
 0x688   :  { %v1379_v41 = vmul.f32 %v10401_v34, %v12062_v62  ;;  %v1331_v44 = vpop.xlane.xlu2 %1330  ;;  %v12209_v62 = vsel %vm1411_vm4, %v280_v9, 0 }
 0x689   :  { %v10403_v55 = vpop.eup %10402  ;;  %10406 = vrcp.f32 %v1331_v44 }
 0x68a   :  { %v10405_v49 = vpop.eup %10404  ;;  %v1395_v6 = vpack.c.bf16 %v1379_v41, %v1379_v41  ;;  %v1380_v21 = vmul.f32 %v10403_v55, %v12060_v50  ;;  %v12214_v50 = vsel %vm1411_vm4, %v278_v4, 0 }
 0x68b   :  { %v1382_v45 = vmul.f32 %v10405_v49, %v12066_v59 }
 0x68c   :  { %v1396_v16 = vpack.c.bf16 %v1380_v21, %v1380_v21  ;;  %9876 = vmatmul.msk.bf16.vlgmr.msrb.gmra.mxu3 %vm1407_vm5, %v1395_v6 }
 0x68d   :  { %v1398_v20 = vpack.c.bf16 %v1382_v45, %v1382_v45  ;;  %1650 = vmatpush.bf16.msrb.mxu3 %v12203_v57 }
 0x68e   :  { %9877 = vmatmul.msk.bf16.vlgmr.msra.gmra.mxu0 %vm1407_vm5, %v1396_v16 }
 0x68f   :  { %v10407_v34 = vpop.eup %10406  ;;  %9879 = vmatmul.msk.bf16.vlgmr.msra.gmra.mxu2 %vm1407_vm5, %v1398_v20  ;;  %1669 = vmatpush.bf16.msra.mxu0 %v12214_v50  ;;  %v10226_v20 = vld [vmem:[%s15205_s15 + $0x38] sm:$0xff] }
 0x690   :  { %v1381_v59 = vmul.f32 %v10407_v34, %v12074_v11  ;;  %v1340_v37 = vpop.xlane.xlu2 %1339  ;;  %1707 = vmatpush.bf16.msra.mxu2 %v12209_v62 }
 0x691   :  { %v1337_v41 = vpop.xlane.xlu0 %1336  ;;  %10408 = vrcp.f32 %v1340_v37 }
 0x692   :  { %10410 = vrcp.f32 %v1337_v41  ;;  %v1346_v44 = vpop.xlane.xlu1 %1345  ;;  %v1397_v55 = vpack.c.bf16 %v1381_v59, %v1381_v59  ;;  %v11113_v41 = vld [vmem:[#allocation11 + $0x18] sm:$0xff] }
 0x693   :  { %10412 = vrcp.f32 %v1346_v44 }
 0x696   :  { %9878 = vmatmul.msk.bf16.vlgmr.msra.gmra.mxu1 %vm1407_vm5, %v1397_v55 }
 0x697   :  { %v10409_v49 = vpop.eup %10408 }
 0x698   :  { %v10411_v6 = vpop.eup %10410  ;;  %v1384_v21 = vmul.f32 %v10409_v49, %v12080_v17  ;;  %v10225_v17 = vld [vmem:[%s15205_s15 + $0x30] sm:$0xff]  ;;  %v10224_v49 = vld [vmem:[%s15205_s15 + $0x28] sm:$0xff] }
 0x699   :  { %v10413_v9 = vpop.eup %10412  ;;  %v1383_v11 = vmul.f32 %v10411_v6, %v12082_v51  ;;  %v1343_v45 = vpop.xlane.xlu0 %1342  ;;  %v11112_v51 = vld [vmem:[#allocation8 + $0x8] sm:$0xff]  ;;  %v11114_v6 = vld [vmem:[#allocation8] sm:$0xff] }
 0x69a   :  { %v1386_v16 = vmul.f32 %v10413_v9, %v12086_v47  ;;  %10414 = vrcp.f32 %v1343_v45  ;;  %v1400_v34 = vpack.c.bf16 %v1384_v21, %v1384_v21  ;;  %v11115_v9 = vld [vmem:[#allocation11 + $0x10] sm:$0xff] }
 0x69b   :  { %v1399_v4 = vpack.c.bf16 %v1383_v11, %v1383_v11 }
 0x69c   :  { %v1402_v59 = vpack.c.bf16 %v1386_v16, %v1386_v16 }
 0x69d   :  { %9880 = vmatmul.msk.bf16.vlgmr.msra.gmra.mxu3 %vm1407_vm5, %v1399_v4 }
 0x69e   :  { %1824 = vmatpush.bf16.msra.mxu3 %v10226_v20  ;;  %9881 = vmatmul.msk.bf16.vlgmr.msrb.gmra.mxu0 %vm1407_vm5, %v1400_v34  ;;  %v11116_v20 = vld [vmem:[#allocation11 + $0x8] sm:$0xff] }
 0x69f   :  { %9883 = vmatmul.msk.bf16.vlgmr.msrb.gmra.mxu2 %vm1407_vm5, %v1402_v59  ;;  %1850 = vmatpush.bf16.msrb.mxu0 %v11112_v51 }
 0x6a0   :  { %v10415_v47 = vpop.eup %10414  ;;  %v1349_v37 = vpop.xlane.xlu1 %1348  ;;  %1976 = vmatpush.bf16.msrb.mxu2 %v11113_v41 }
 0x6a1   :  { %v1385_v44 = vmul.f32 %v10415_v47, %v12093_v38  ;;  %10416 = vrcp.f32 %v1349_v37  ;;  %v10223_v38 = vld [vmem:[%s15205_s15 + $0x20] sm:$0xff]  ;;  %v11117_v47 = vld [vmem:[#allocation11] sm:$0xff] }
 0x6a2   :  { %1825 = vmatpush.bf16.msra.mxu3 %v10225_v17  ;;  %v1358_v55 = vpop.xlane.xlu2 %1357  ;;  %v10222_v17 = vld [vmem:[%s15205_s15 + $0x18] sm:$0xff] }
 0x6a3   :  { %10418 = vrcp.f32 %v1358_v55  ;;  %1851 = vmatpush.bf16.msrb.mxu0 %v11114_v6  ;;  %v1401_v21 = vpack.c.bf16 %v1385_v44, %v1385_v44  ;;  %v10220_v44 = vld [vmem:[%s15205_s15 + $0x8] sm:$0xff]  ;;  %v10219_v55 = vld [vmem:[%s15205_s15] sm:$0xff] }
 0x6a4   :  { %1977 = vmatpush.bf16.msrb.mxu2 %v11115_v9  ;;  %v11118_v6 = vld [vmem:[#allocation9 + $0x8] sm:$0xff] }
 0x6a6   :  { %1826 = vmatpush.bf16.msra.mxu3 %v10224_v49  ;;  %9882 = vmatmul.msk.bf16.vlgmr.msrb.gmra.mxu1 %vm1407_vm5, %v1401_v21  ;;  %v11119_v21 = vld [vmem:[#allocation9] sm:$0xff] }
 0x6a7   :  { %v10417_v11 = vpop.eup %10416 }
 0x6a8   :  { %v1387_v45 = vmul.f32 %v10417_v11, %v12099_v32  ;;  %v1352_v16 = vpop.xlane.xlu0 %1351  ;;  %1978 = vmatpush.bf16.msrb.mxu2 %v11116_v20  ;;  %v10221_v32 = vld [vmem:[%s15205_s15 + $0x10] sm:$0xff] }
 0x6a9   :  { %v10419_v4 = vpop.eup %10418  ;;  %10420 = vrcp.f32 %v1352_v16 }
 0x6aa   :  { %v1403_v34 = vpack.c.bf16 %v1387_v45, %v1387_v45  ;;  %v1390_v59 = vmul.f32 %v10419_v4, %v12103_v36  ;;  %1827 = vmatpush.bf16.msra.mxu3 %v10223_v38 }
 0x6ac   :  { %v1406_v51 = vpack.c.bf16 %v1390_v59, %v1390_v59  ;;  %1979 = vmatpush.bf16.msrb.mxu2 %v11117_v47 }
 0x6ad   :  { %9884 = vmatmul.msk.bf16.vlgmr.msrb.gmra.mxu3 %vm1407_vm5, %v1403_v34 }
 0x6ae   :  { %1828 = vmatpush.bf16.msra.mxu3 %v10222_v17 }
 0x6af   :  { %v10421_v37 = vpop.eup %10420  ;;  %9887 = vmatmul.msk.bf16.vlgmr.msra.gmra.mxu2 %vm1407_vm5, %v1406_v51 }
 0x6b0   :  { %v1388_v36 = vmul.f32 %v10421_v37, %v12107_v40  ;;  %2165 = vmatpush.bf16.xpose.msra.mxu2 %v11835_v56  ;;  %v279_v40 = vld [vmem:[#allocation6 + $0x18] sm:$0xf] }
 0x6b1   :  { %v12262_v49 = vsel %vm1411_vm4, %v279_v40, 0 }
 0x6b2   :  { %v1404_v41 = vpack.c.bf16 %v1388_v36, %v1388_v36  ;;  %1829 = vmatpush.bf16.msra.mxu3 %v10221_v32  ;;  %1688 = vmatpush.bf16.msra.mxu1 %v12262_v49 }
 0x6b4   :  { %9885 = vmatmul.msk.bf16.vlgmr.msra.gmra.mxu0 %vm1407_vm5, %v1404_v41 }
 0x6b5   :  { %2123 = vmatpush.bf16.xpose.msra.mxu0 %v11803_v7 }
 0x6b6   :  { %1830 = vmatpush.bf16.msra.mxu3 %v10220_v44  ;;  %1871 = vmatpush.bf16.msrb.mxu1 %v11118_v6 }
 0x6ba   :  { %1831 = vmatpush.bf16.msra.mxu3 %v10219_v55  ;;  %1872 = vmatpush.bf16.msrb.mxu1 %v11119_v21 }
 0x6be   :  { %2186 = vmatpush.bf16.xpose.msrb.mxu3 %v11839_v60 }
 0x6dd   :  { %v1443_v9 = vpop.f32.mrf.mxu0 }
 0x6de   :  { %v1721_v45 = vrot.slane %v1443_v9, 7  ;;  %v1861_v9 = vpop.permute.xlu0 %1860 }
 0x6e5   :  { %v1445_v38 = vpop.f32.mrf.mxu0 }
 0x6f8   :  { %v1355_v11 = vpop.xlane.xlu1 %1354 }
 0x6f9   :  { %10422 = vrcp.f32 %v1355_v11 }
 0x6ff   :  { %v10423_v16 = vpop.eup %10422  ;;  %v1424_v20 = vpop.f32.mrf.mxu3 }
 0x700   :  { %v1389_v4 = vmul.f32 %v10423_v16, %v12191_v15  ;;  %v1723_v34 = vsel %vm1722_vm6, %v1721_v45, %v1424_v20 }
 0x701   :  { %v1481_v59 = vpop.f32.mrf.mxu2 }
 0x702   :  { %v1405_v17 = vpack.c.bf16 %v1389_v4, %v1389_v4  ;;  %v1727_v32 = vrot.slane %v1481_v59, 5 }
 0x703   :  { %v1462_v51 = vpop.f32.mrf.mxu1 }
 0x704   :  { %v1724_v47 = vrot.slane %v1462_v51, 6  ;;  %9886 = vmatmul.msk.bf16.vlgmr.msra.gmra.mxu1 %vm1407_vm5, %v1405_v17 }
 0x705   :  { %2144 = vmatpush.bf16.xpose.msra.mxu1 %v11813_v29 }
 0x706   :  { %v1726_v37 = vsel %vm1725_vm7, %v1724_v47, %v1723_v34 }
 0x707   :  { %v1426_v36 = vpop.f32.mrf.mxu3  ;;  %v1729_v41 = vsel %vm1728_vm8, %v1727_v32, %v1726_v37 }
 0x709   :  { %v1483_v44 = vpop.f32.mrf.mxu2 }
 0x70b   :  { %v1464_v15 = vpop.f32.mrf.mxu1  ;;  %v1519_v55 = vpop.f32.mrf.mxu0 }
 0x70c   :  { %v1733_v21 = vrot.slane %v1519_v55, 3 }
 0x70f   :  { %v1500_v40 = vpop.f32.mrf.mxu3 }
 0x710   :  { %v1730_v6 = vrot.slane %v1500_v40, 4 }
 0x712   :  { %v1732_v38 = vsel %vm1731_vm10, %v1730_v6, %v1729_v41  ;;  %v1557_v11 = vpop.f32.mrf.mxu2 }
 0x713   :  { %v1521_v45 = vpop.f32.mrf.mxu0  ;;  %v1538_v16 = vpop.f32.mrf.mxu1  ;;  %v1735_v20 = vsel %vm15211_vm11, %v1733_v21, %v1732_v38  ;;  %v1739_v34 = vrot.slane %v1557_v11, 1 }
 0x714   :  { %v1736_v4 = vrot.slane %v1538_v16, 2  ;;  %9921 = vmatmul.msk.bf16.vlgmr.msrb.gmra.mxu1 %vm215_vm0, %v1861_v9 }
 0x715   :  { %2228 = vmatpush.bf16.xpose.msrb.mxu1 %v11847_v3 }
 0x716   :  { %v1738_v59 = vsel %vm15210_vm12, %v1736_v4, %v1735_v20 }
 0x717   :  { %v1741_v17 = vsel %vm15209_vm13, %v1739_v34, %v1738_v59  ;;  %v1502_v51 = vpop.f32.mrf.mxu3 }
 0x71a   :  { %v1559_v47 = vpop.f32.mrf.mxu2 }
 0x71b   :  { %v1540_v32 = vpop.f32.mrf.mxu1  ;;  %v1595_v37 = vpop.f32.mrf.mxu0 }
 0x71c   :  { %v1754_v36 = vrot.slane %v1595_v37, 7 }
 0x720   :  { %v1576_v41 = vpop.f32.mrf.mxu3 }
 0x721   :  { %v1755_v44 = vsel %vm1722_vm6, %v1754_v36, %v1576_v41 }
 0x722   :  { %v1633_v15 = vpop.f32.mrf.mxu2 }
 0x723   :  { %v1597_v55 = vpop.f32.mrf.mxu0  ;;  %v1614_v40 = vpop.f32.mrf.mxu1  ;;  %v1758_v21 = vrot.slane %v1633_v15, 5 }
 0x724   :  { %v1756_v6 = vrot.slane %v1614_v40, 6 }
 0x726   :  { %v1757_v9 = vsel %vm1725_vm7, %v1756_v6, %v1755_v44 }
 0x727   :  { %v1759_v38 = vsel %vm1728_vm8, %v1758_v21, %v1757_v9 }
 0x728   :  { %v1578_v11 = vpop.f32.mrf.mxu3 }
 0x72a   :  { %v1635_v45 = vpop.f32.mrf.mxu2 }
 0x72b   :  { %v1616_v16 = vpop.f32.mrf.mxu1 }
 0x730   :  { %v1652_v20 = vpop.f32.mrf.mxu3 }
 0x731   :  { %v1760_v4 = vrot.slane %v1652_v20, 4  ;;  %v1671_v34 = vpop.f32.mrf.mxu0 }
 0x732   :  { %v1762_v59 = vrot.slane %v1671_v34, 3  ;;  %v1709_v51 = vpop.f32.mrf.mxu2 }
 0x733   :  { %v1761_v47 = vsel %vm1731_vm10, %v1760_v4, %v1759_v38  ;;  %v1766_v44 = vrot.slane %v1709_v51, 1 }
 0x734   :  { %v1763_v32 = vsel %vm15211_vm11, %v1762_v59, %v1761_v47 }
 0x738   :  { %v1654_v37 = vpop.f32.mrf.mxu3 }
 0x739   :  { %v1673_v36 = vpop.f32.mrf.mxu0 }
 0x73a   :  { %v1711_v41 = vpop.f32.mrf.mxu2 }
 0x781   :  { %v1690_v15 = vpop.f32.mrf.mxu1 }
 0x782   :  { %v1764_v55 = vrot.slane %v1690_v15, 2 }
 0x784   :  { %v1765_v40 = vsel %vm15210_vm12, %v1764_v55, %v1763_v32  ;;  %v11120_v32 = vld [vmem:[%s15200_s10] ss:$0 sm:$0xff] }
 0x785   :  { %v1767_v6 = vsel %vm15209_vm13, %v1766_v44, %v1765_v40  ;;  %v240_v37 = vadd.f32 %v11120_v32, %v11905_v52 }
 0x786   :  { %v10251_v21 = vpack.i.bf16 %v1767_v6, %v11775_v33 }
 0x788   :  { %10252 = vrot.lane.b32.xlu2 %v10251_v21, %s11529_s29 }
 0x789   :  { %v1692_v9 = vpop.f32.mrf.mxu1 }
 0x7e2   :  { %v12286_v11 = vpop.permute.xlu2 %10252 }
 0x7e3   :  { %v10255_v38 = vunpack.i.h.bf16 %v12286_v11  ;;  %v10254_v45 = vunpack.i.l.bf16 %v12286_v11 }
 0x7e5   :  { %v1771_v16 = vsel %vm215_vm0, %v1741_v17, %v10254_v45  ;;  %v1874_v17 = vpop.f32.mrf.mxu1 }
 0x7e6   :  { %v1772_v20 = vsel %vm682_vm9, %v1771_v16, %v10255_v38 }
 0x7e7   :  { %v1774_v4 = vsel %vm15208_vm14, %v1772_v20, %v11789_v54 }
 0x7e8   :  { %v1775_v33 = vpack.c.bf16 %v1774_v4, %v1774_v4 }
 0x7ea   :  { %1832 = vmatmul.bf16.vlgmr.msra.gmra.mxu3 %v1775_v33 }
 0x7eb   :  { %2270 = vmatpush.bf16.xpose.msra.mxu3 %v11855_v13 }
 0x7ed   :  { %v1876_v15 = vpop.f32.mrf.mxu1 }
 0x86d   :  { %v1833_v34 = vpop.f32.mrf.mxu3 }
 0x86e   :  { %10424 = vtanh.f32 %v1833_v34 }
 0x874   :  { %v10425_v59 = vpop.eup %10424 }
 0x875   :  { %v1840_v51 = vpack.c.bf16 %v10425_v59, %v10425_v59  ;;  %9699 = vst.msk [vmem:[#allocation14] sm:$0xff] %vm215_vm0, %v10425_v59  ;;  %v1835_v47 = vpop.f32.mrf.mxu3 }
 0x877   :  { %9920 = vmatmul.msk.bf16.vlgmr.msrb.gmra.mxu0 %vm215_vm0, %v1840_v51 }
 0x878   :  { %2207 = vmatpush.bf16.xpose.msrb.mxu0 %v11843_v63 }
 0x8f4   :  { %v1853_v36 = vpop.f32.mrf.mxu0 }
 0x8f5   :  { %v1857_v41 = vadd.f32 %v1853_v36, %v240_v37 }
 0x8f7   :  { %v1879_v55 = vadd.f32 %v1874_v17, %v1857_v41  ;;  %v1880_v44 = vadd.f32 %v1876_v15, %v1857_v41 }
 0x8f9   :  { %10426 = vtanh.f32 %v1879_v55  ;;  %v9922_v9 = vmul.f32 -1.442695, %v1879_v55  ;;  %v9923_v38 = vmul.f32 -1.442695, %v1880_v44 }
 0x8fa   :  { %10428 = vtanh.f32 %v1880_v44 }
 0x8fb   :  { %10430 = vpow2.f32 %v9922_v9 }
 0x8fc   :  { %v1855_v40 = vpop.f32.mrf.mxu0  ;;  %10432 = vpow2.f32 %v9923_v38 }
 0x8ff   :  { %v10427_v6 = vpop.eup %10426 }
 0x900   :  { %v10429_v21 = vpop.eup %10428  ;;  %1925 = vrot.lane.b32.xlu1 %v10427_v6, %s11529_s29 }
 0x901   :  { %1927 = vrot.lane.b32.xlu0 %v10429_v21, %s11529_s29  ;;  %v10431_v16 = vpop.eup %10430 }
 0x902   :  { %v10433_v52 = vpop.eup %10432  ;;  %v1887_v20 = vadd.f32 1.0, %v10431_v16 }
 0x903   :  { %v1888_v4 = vadd.f32 1.0, %v10433_v52 }
 0x904   :  { %10434 = vrcp.f32 %v1887_v20  ;;  %v1900_v41 = vand.u32 2147483648, %v1887_v20  ;;  %vm1894_vm2 = vweird.f32 %v1887_v20  ;;  %v1898_v55 = vand.u32 2147483647, %v1887_v20 }
 0x905   :  { %10436 = vrcp.f32 %v1888_v4  ;;  %v1915_v44 = vand.u32 2147483648, %v1888_v4  ;;  %vm1909_vm14 = vweird.f32 %v1888_v4  ;;  %v1913_v40 = vand.u32 2147483647, %v1888_v4 }
 0x906   :  { %v1901_v21 = vor.u32 1.1754944e-38, %v1900_v41  ;;  %vm1899_vm12 = vcmp.eq.f32.partialorder %v1898_v55, 8.507059e+37 }
 0x907   :  { %v1916_v38 = vor.u32 1.1754944e-38, %v1915_v44  ;;  %vm1914_vm11 = vcmp.eq.f32.partialorder %v1913_v40, 8.507059e+37 }
 0x90a   :  { %v10435_v33 = vpop.eup %10434 }
 0x90b   :  { %v10437_v34 = vpop.eup %10436  ;;  %v1890_v59 = vmul.f32 %v10435_v33, %v1887_v20  ;;  %vm1895_vm15 = vweird.f32 %v10435_v33 }
 0x90c   :  { %v1905_v51 = vmul.f32 %v10437_v34, %v1888_v4  ;;  %vm1910_vm1 = vweird.f32 %v10437_v34  ;;  %vm1896_vm4 = vmor %vm1894_vm2, %vm1895_vm15 }
 0x90d   :  { %v1891_v47 = vsub.f32 1.0, %v1890_v59  ;;  %vm1911_vm13 = vmor %vm1909_vm14, %vm1910_vm1 }
 0x90e   :  { %v1906_v17 = vsub.f32 1.0, %v1905_v51 }
 0x90f   :  { %v1892_v32 = vmul.f32 %v10435_v33, %v1891_v47 }
 0x910   :  { %v1907_v37 = vmul.f32 %v10437_v34, %v1906_v17 }
 0x911   :  { %v1893_v36 = vadd.f32 %v10435_v33, %v1892_v32 }
 0x912   :  { %v1908_v15 = vadd.f32 %v10437_v34, %v1907_v37 }
 0x913   :  { %v1897_v6 = vsel %vm1896_vm4, %v10435_v33, %v1893_v36 }
 0x914   :  { %v1912_v9 = vsel %vm1911_vm13, %v10437_v34, %v1908_v15  ;;  %v1902_v52 = vsel %vm1899_vm12, %v1901_v21, %v1897_v6 }
 0x915   :  { %v1917_v47 = vsel %vm1914_vm11, %v1916_v38, %v1912_v9  ;;  %v1921_v20 = vmul.f32 %v1902_v52, %v11696_v0 }
 0x916   :  { %v1922_v32 = vmul.f32 %v1917_v47, %v11699_v5 }
 0x972   :  { %v1926_v16 = vpop.permute.xlu1 %1925 }
 0x973   :  { %v1931_v59 = vmul.f32 %v1926_v16, %v1902_v52  ;;  %v1928_v51 = vpop.permute.xlu0 %1927 }
 0x974   :  { %v1932_v17 = vmul.f32 %v1928_v51, %v1917_v47  ;;  %v11121_v51 = vld [vmem:[%s15202_s12] ss:$0 sm:$0xff] }
 0x975   :  { %1935 = vrot.lane.b32.xlu2 %v1931_v59, %s11536_s7 }
 0x976   :  { %1937 = vrot.lane.b32.xlu1 %v1932_v17, %s11536_s7 }
 0x9cf   :  { %v1936_v4 = vpop.permute.xlu2 %1935 }
 0x9d0   :  { %v12309_v33 = vadd.f32 %v1936_v4, %v1921_v20 }
 0x9d2   :  { %10438 = vtanh.f32 %v12309_v33 }
 0x9d8   :  { %v10439_v34 = vpop.eup %10438 }
 0x9d9   :  { %1947 = vrot.lane.b32.xlu0 %v10439_v34, %s11529_s29 }
 0x9e1   :  { %1963 = vrot.lane.b32.xlu0 %v11789_v54, %s11529_s29 }
 0x9e8   :  { %v1938_v37 = vpop.permute.xlu1 %1937 }
 0x9e9   :  { %v12316_v36 = vadd.f32 %v1938_v37, %v1922_v32 }
 0x9eb   :  { %10440 = vtanh.f32 %v12316_v36 }
 0x9f1   :  { %v10441_v41 = vpop.eup %10440 }
 0x9f2   :  { %1949 = vrot.lane.b32.xlu2 %v10441_v41, %s11529_s29 }
 0xa4b   :  { %v1948_v0 = vpop.permute.xlu0 %1947 }
 0xa4c   :  { %v12320_v15 = vmul.f32 %v1948_v0, %v1902_v52  ;;  %v1950_v55 = vpop.permute.xlu2 %1949 }
 0xa4d   :  { %v12322_v44 = vmul.f32 %v1950_v55, %v1917_v47 }
 0xa4f   :  { %v10256_v40 = vpack.i.bf16 %v12322_v44, %v12320_v15 }
 0xa51   :  { %10257 = vrot.lane.b32.xlu1 %v10256_v40, %s11536_s7 }
 0xa53   :  { %v1964_v9 = vpop.permute.xlu0 %1963 }
 0xac3   :  { %v10258_v54 = vpop.permute.xlu1 %10257 }
 0xac4   :  { %v10260_v6 = vunpack.i.h.bf16 %v10258_v54  ;;  %v10259_v21 = vunpack.i.l.bf16 %v10258_v54 }
 0xac6   :  { %v1967_v38 = vsel %vm215_vm0, %v10260_v6, %v1964_v9  ;;  %v1966_v16 = vsel %vm215_vm0, %v10259_v21, %v10254_v45 }
 0xac7   :  { %v1968_v52 = vpack.c.bf16 %v1967_v38, %v1966_v16 }
 0xac9   :  { %9924 = vmatmul.msk.bf16.vlgmr.msrb.gmra.mxu2 %vm682_vm9, %v1968_v52 }
 0xaca   :  { %2249 = vmatpush.bf16.xpose.msrb.mxu2 %v11851_v8 }
 0xb4c   :  { %v1981_v59 = vpop.f32.mrf.mxu2 }
 0xb4d   :  { %v1986_v47 = vadd.f32 %v11121_v51, %v1981_v59 }
 0xb4f   :  { %10442 = vtanh.f32 %v1986_v47  ;;  %v9925_v45 = vmul.f32 -1.442695, %v1986_v47 }
 0xb54   :  { %v1983_v17 = vpop.f32.mrf.mxu2 }
 0xb55   :  { %v10443_v20 = vpop.eup %10442  ;;  %v1987_v4 = vadd.f32 %v11121_v51, %v1983_v17 }
 0xb56   :  { %2032 = vrot.lane.b32.xlu2 %v10443_v20, %s11529_s29 }
 0xb57   :  { %10444 = vtanh.f32 %v1987_v4  ;;  %v9926_v55 = vmul.f32 -1.442695, %v1987_v4 }
 0xb58   :  { %10446 = vpow2.f32 %v9925_v45 }
 0xb5d   :  { %v10445_v11 = vpop.eup %10444 }
 0xb5e   :  { %2034 = vrot.lane.b32.xlu1 %v10445_v11, %s11529_s29  ;;  %v10447_v34 = vpop.eup %10446 }
 0xb5f   :  { %v1994_v32 = vadd.f32 1.0, %v10447_v34 }
 0xb61   :  { %10448 = vrcp.f32 %v1994_v32  ;;  %v2007_v6 = vand.u32 2147483648, %v1994_v32  ;;  %vm2001_vm12 = vweird.f32 %v1994_v32  ;;  %v2005_v21 = vand.u32 2147483647, %v1994_v32 }
 0xb62   :  { %10450 = vpow2.f32 %v9926_v55 }
 0xb63   :  { %v2008_v16 = vor.u32 1.1754944e-38, %v2007_v6  ;;  %vm2006_vm14 = vcmp.eq.f32.partialorder %v2005_v21, 8.507059e+37 }
 0xb67   :  { %v10449_v37 = vpop.eup %10448 }
 0xb68   :  { %v1997_v41 = vmul.f32 %v10449_v37, %v1994_v32  ;;  %vm2002_vm11 = vweird.f32 %v10449_v37  ;;  %v10451_v9 = vpop.eup %10450 }
 0xb69   :  { %vm2003_vm13 = vmor %vm2001_vm12, %vm2002_vm11  ;;  %v1995_v52 = vadd.f32 1.0, %v10451_v9  ;;  %vm15240_vm11 = vcmask 1045509   ;;  %vm15241_vm12 = vcmask 1046534  }
 0xb6a   :  { %v1998_v0 = vsub.f32 1.0, %v1997_v41 }
 0xb6b   :  { %10452 = vrcp.f32 %v1995_v52  ;;  %v2022_v34 = vand.u32 2147483648, %v1995_v52  ;;  %vm2016_vm1 = vweird.f32 %v1995_v52  ;;  %v2020_v32 = vand.u32 2147483647, %v1995_v52 }
 0xb6c   :  { %v1999_v40 = vmul.f32 %v10449_v37, %v1998_v0 }
 0xb6d   :  { %v2023_v41 = vor.u32 1.1754944e-38, %v2022_v34  ;;  %vm2021_vm4 = vcmp.eq.f32.partialorder %v2020_v32, 8.507059e+37 }
 0xb6e   :  { %v2000_v54 = vadd.f32 %v10449_v37, %v1999_v40 }
 0xb70   :  { %v2004_v38 = vsel %vm2003_vm13, %v10449_v37, %v2000_v54  ;;  %vm15242_vm13 = vcmask 1047559  }
 0xb71   :  { %v2009_v51 = vsel %vm2006_vm14, %v2008_v16, %v2004_v38  ;;  %v10453_v17 = vpop.eup %10452  ;;  %vm15243_vm14 = vmmov %vm15240_vm11 }
 0xb72   :  { %v2012_v20 = vmul.f32 %v10453_v17, %v1995_v52  ;;  %vm2017_vm15 = vweird.f32 %v10453_v17  ;;  %v2028_v54 = vmul.f32 %v2009_v51, %v11756_v24 }
 0xb73   :  { %vm2018_vm2 = vmor %vm2016_vm1, %vm2017_vm15 }
 0xb74   :  { %v2013_v4 = vsub.f32 1.0, %v2012_v20  ;;  %vm15244_vm15 = vmmov %vm15241_vm12 }
 0xb75   :  { %vm15245_vm1 = vmmov %vm15242_vm13 }
 0xb76   :  { %v2014_v11 = vmul.f32 %v10453_v17, %v2013_v4 }
 0xb78   :  { %v2015_v45 = vadd.f32 %v10453_v17, %v2014_v11 }
 0xb7a   :  { %v2019_v37 = vsel %vm2018_vm2, %v10453_v17, %v2015_v45  ;;  %vm15246_vm2 = vcmask 785408  }
 0xb7b   :  { %v2024_v55 = vsel %vm2021_vm4, %v2023_v41, %v2019_v37 }
 0xb7c   :  { %v2029_v9 = vmul.f32 %v2024_v55, %v11751_v19 }
 0xbb0   :  { %v2033_v59 = vpop.permute.xlu2 %2032 }
 0xbb1   :  { %v2038_v47 = vmul.f32 %v2033_v59, %v2009_v51 }
 0xbb3   :  { %2042 = vrot.lane.b32.xlu0 %v2038_v47, %s11536_s7 }
 0xbd0   :  { %v2035_v0 = vpop.permute.xlu1 %2034 }
 0xbd1   :  { %v2039_v40 = vmul.f32 %v2035_v0, %v2024_v55 }
 0xbd3   :  { %2044 = vrot.lane.b32.xlu2 %v2039_v40, %s11536_s7 }
 0xc25   :  { %v2043_v6 = vpop.permute.xlu0 %2042 }
 0xc26   :  { %v12343_v21 = vadd.f32 %v2043_v6, %v2028_v54 }
 0xc28   :  { %10454 = vtanh.f32 %v12343_v21 }
 0xc2d   :  { %v2045_v38 = vpop.permute.xlu2 %2044 }
 0xc2e   :  { %v10455_v16 = vpop.eup %10454  ;;  %v12347_v52 = vadd.f32 %v2045_v38, %v2029_v9 }
 0xc2f   :  { %2054 = vrot.lane.b32.xlu1 %v10455_v16, %s11529_s29 }
 0xc30   :  { %10456 = vtanh.f32 %v12347_v52 }
 0xc36   :  { %v10457_v59 = vpop.eup %10456 }
 0xc37   :  { %2056 = vrot.lane.b32.xlu0 %v10457_v59, %s11529_s29 }
 0xca1   :  { %v2055_v47 = vpop.permute.xlu1 %2054 }
 0xca2   :  { %v12352_v24 = vmul.f32 %v2055_v47, %v2009_v51 }
 0xca4   :  { %v2092_v17 = vpack.c.bf16 %v12352_v24, %v12352_v24  ;;  %v2066_v20 = vrot.slane %v12352_v24, 3  ;;  %v2065_v19 = vrot.slane %v12352_v24, 2  ;;  %v2070_v4 = vrot.slane %v12352_v24, 7 }
 0xca5   :  { %v2069_v11 = vrot.slane %v12352_v24, 6  ;;  %v2064_v37 = vrot.slane %v12352_v24, 1 }
 0xca6   :  { %v2109_v45 = vunpack.c.l.b16 %v2092_v17  ;;  %v2095_v34 = vpack.c.bf16 %v2066_v20, %v2066_v20  ;;  %v2094_v32 = vpack.c.bf16 %v2065_v19, %v2065_v19  ;;  %v2099_v40 = vpack.c.bf16 %v2070_v4, %v2070_v4 }
 0xca7   :  { %v2098_v6 = vpack.c.bf16 %v2069_v11, %v2069_v11  ;;  %v2093_v59 = vpack.c.bf16 %v2064_v37, %v2064_v37  ;;  %v2068_v4 = vrot.slane %v12352_v24, 5  ;;  %v2067_v11 = vrot.slane %v12352_v24, 4 }
 0xca8   :  { %v2110_v41 = vpack.c.b16 %v2109_v45, %v2109_v45  ;;  %v2172_v0 = vunpack.c.l.b16 %v2095_v34  ;;  %v2151_v51 = vunpack.c.l.b16 %v2094_v32  ;;  %v2256_v47 = vunpack.c.l.b16 %v2099_v40 }
 0xca9   :  { %v2057_v54 = vpop.permute.xlu0 %2056  ;;  %v2235_v20 = vunpack.c.l.b16 %v2098_v6  ;;  %v2130_v19 = vunpack.c.l.b16 %v2093_v59  ;;  %v2097_v37 = vpack.c.bf16 %v2068_v4, %v2068_v4 }
 0xcaa   :  { %v12361_v9 = vmul.f32 %v2057_v54, %v2024_v55  ;;  %2111 = vrot.lane.b32.xlu0 %v2110_v41, %s11536_s7  ;;  %v2173_v38 = vpack.c.b16 %v2172_v0, %v2172_v0  ;;  %v2152_v16 = vpack.c.b16 %v2151_v51, %v2151_v51  ;;  %v2257_v55 = vpack.c.b16 %v2256_v47, %v2256_v47 }
 0xcab   :  { %v2236_v34 = vpack.c.b16 %v2235_v20, %v2235_v20  ;;  %v2131_v32 = vpack.c.b16 %v2130_v19, %v2130_v19  ;;  %v2096_v41 = vpack.c.bf16 %v2067_v11, %v2067_v11  ;;  %v2214_v40 = vunpack.c.l.b16 %v2097_v37 }
 0xcac   :  { %2174 = vrot.lane.b32.xlu1 %v2173_v38, %s11536_s7  ;;  %2153 = vrot.lane.b32.xlu2 %v2152_v16, %s11536_s7  ;;  %v2072_v17 = vrot.slane %v12361_v9, 2  ;;  %v2071_v51 = vrot.slane %v12361_v9, 1  ;;  %v2073_v6 = vrot.slane %v12361_v9, 3  ;;  %v2074_v4 = vrot.slane %v12361_v9, 4 }
 0xcad   :  { %v2193_v54 = vunpack.c.l.b16 %v2096_v41  ;;  %v2215_v59 = vpack.c.b16 %v2214_v40, %v2214_v40 }
 0xcae   :  { %v2102_v45 = vpack.c.bf16 %v2072_v17, %v2072_v17  ;;  %v2101_v16 = vpack.c.bf16 %v2071_v51, %v2071_v51  ;;  %v2100_v17 = vpack.c.bf16 %v12361_v9, %v12361_v9  ;;  %v2103_v20 = vpack.c.bf16 %v2073_v6, %v2073_v6 }
 0xcaf   :  { %v2194_v47 = vpack.c.b16 %v2193_v54, %v2193_v54  ;;  %v2104_v37 = vpack.c.bf16 %v2074_v4, %v2074_v4 }
 0xcb0   :  { %v2319_v0 = vunpack.c.l.b16 %v2102_v45  ;;  %v2298_v19 = vunpack.c.l.b16 %v2101_v16  ;;  %v2277_v11 = vunpack.c.l.b16 %v2100_v17  ;;  %v2077_v45 = vrot.slane %v12361_v9, 7 }
 0xcb1   :  { %v2361_v54 = vunpack.c.l.b16 %v2104_v37  ;;  %v2075_v16 = vrot.slane %v12361_v9, 5 }
 0xcb2   :  { %2258 = vrot.lane.b32.xlu0 %v2257_v55, %s11536_s7  ;;  %v2320_v38 = vpack.c.b16 %v2319_v0, %v2319_v0  ;;  %v2340_v55 = vunpack.c.l.b16 %v2103_v20  ;;  %v2278_v41 = vpack.c.b16 %v2277_v11, %v2277_v11  ;;  %v2107_v51 = vpack.c.bf16 %v2077_v45, %v2077_v45 }
 0xcb3   :  { %v2105_v20 = vpack.c.bf16 %v2075_v16, %v2075_v16 }
 0xcb4   :  { %2237 = vrot.lane.b32.xlu1 %v2236_v34, %s11536_s7  ;;  %2132 = vrot.lane.b32.xlu2 %v2131_v32, %s11536_s7  ;;  %v2076_v34 = vrot.slane %v12361_v9, 6  ;;  %v2299_v32 = vpack.c.b16 %v2298_v19, %v2298_v19  ;;  %v2341_v0 = vpack.c.b16 %v2340_v55, %v2340_v55  ;;  %v2424_v6 = vunpack.c.l.b16 %v2107_v51 }
 0xcb5   :  { %v2382_v19 = vunpack.c.l.b16 %v2105_v20  ;;  %v11122_v20 = vld [vmem:[%s15196_s6 + $0x2] sm:$0x1] }
 0xcb6   :  { %v2106_v40 = vpack.c.bf16 %v2076_v34, %v2076_v34 }
 0xcb7   :  { %v2383_v4 = vpack.c.b16 %v2382_v19, %v2382_v19 }
 0xcba   :  { %2321 = vrot.lane.b32.xlu0 %v2320_v38, %s11536_s7  ;;  %v2403_v38 = vunpack.c.l.b16 %v2106_v40 }
 0xcbc   :  { %2216 = vrot.lane.b32.xlu1 %v2215_v59, %s11536_s7  ;;  %2195 = vrot.lane.b32.xlu2 %v2194_v47, %s11536_s7  ;;  %v2362_v59 = vpack.c.b16 %v2361_v54, %v2361_v54  ;;  %v2425_v47 = vpack.c.b16 %v2424_v6, %v2424_v6  ;;  %v2404_v17 = vpack.c.b16 %v2403_v38, %v2403_v38 }
 0xcc2   :  { %2300 = vrot.lane.b32.xlu0 %v2299_v32, %s11536_s7 }
 0xcc4   :  { %2279 = vrot.lane.b32.xlu1 %v2278_v41, %s11536_s7  ;;  %2342 = vrot.lane.b32.xlu2 %v2341_v0, %s11536_s7 }
 0xcca   :  { %2363 = vrot.lane.b32.xlu0 %v2362_v59, %s11536_s7 }
 0xccc   :  { %2426 = vrot.lane.b32.xlu1 %v2425_v47, %s11536_s7  ;;  %2405 = vrot.lane.b32.xlu2 %v2404_v17, %s11536_s7 }
 0xcd4   :  { %2384 = vrot.lane.b32.xlu2 %v2383_v4, %s11536_s7 }
 0xd06   :  { %v2154_v11 = vpop.permute.xlu2 %2153 }
 0xd07   :  { %9929 = vmatmul.msk.bf16.vlgmr.msra.gmra.mxu2 %vm215_vm0, %v2154_v11 }
 0xd08   :  { %2333 = vmatpush.bf16.xpose.msra.mxu2 %v11874_v35 }
 0xd0e   :  { %v2133_v55 = vpop.permute.xlu2 %2132 }
 0xd0f   :  { %9928 = vmatmul.msk.bf16.vlgmr.msra.gmra.mxu1 %vm215_vm0, %v2133_v55  ;;  %v11123_v55 = vld [vmem:[%s15196_s6 + $0x1] sm:$0x1] }
 0xd10   :  { %2312 = vmatpush.bf16.xpose.msra.mxu1 %v11858_v14 }
 0xd16   :  { %v2196_v41 = vpop.permute.xlu2 %2195 }
 0xd1c   :  { %v2112_v45 = vpop.permute.xlu0 %2111 }
 0xd1d   :  { %9927 = vmatmul.msk.bf16.vlgmr.msra.gmra.mxu0 %vm215_vm0, %v2112_v45 }
 0xd1e   :  { %2291 = vmatpush.bf16.xpose.msra.mxu0 %v11864_v28  ;;  %v2175_v34 = vpop.permute.xlu1 %2174  ;;  %v2343_v40 = vpop.permute.xlu2 %2342 }
 0xd1f   :  { %9930 = vmatmul.msk.bf16.vlgmr.msrb.gmra.mxu3 %vm215_vm0, %v2175_v34 }
 0xd20   :  { %2354 = vmatpush.bf16.xpose.msrb.mxu3 %v11868_v31 }
 0xd24   :  { %v2259_v37 = vpop.permute.xlu0 %2258 }
 0xd26   :  { %v2238_v32 = vpop.permute.xlu1 %2237  ;;  %v2406_v38 = vpop.permute.xlu2 %2405 }
 0xd27   :  { %9933 = vmatmul.msk.bf16.vlgmr.msrb.gmra.mxu2 %vm215_vm0, %v2238_v32 }
 0xd28   :  { %2417 = vmatpush.bf16.xpose.msrb.mxu2 %v11898_v48 }
 0xd2c   :  { %v2322_v51 = vpop.permute.xlu0 %2321 }
 0xd2d   :  { %9931 = vmatmul.msk.bf16.vlgmr.msrb.gmra.mxu0 %vm215_vm0, %v2196_v41 }
 0xd2e   :  { %2375 = vmatpush.bf16.xpose.msrb.mxu0 %v11881_v42  ;;  %v2217_v0 = vpop.permute.xlu1 %2216  ;;  %v2385_v59 = vpop.permute.xlu2 %2384 }
 0xd2f   :  { %9932 = vmatmul.msk.bf16.vlgmr.msrb.gmra.mxu1 %vm215_vm0, %v2217_v0  ;;  %9934 = vmatmul.msk.bf16.vlgmr.msra.gmra.mxu3 %vm215_vm0, %v2259_v37  ;;  %v11124_v0 = vld [vmem:[%s15196_s6] sm:$0x1] }
 0xd30   :  { %2396 = vmatpush.bf16.xpose.msrb.mxu1 %v11884_v43  ;;  %2438 = vmatpush.bf16.xpose.msra.mxu3 %v11891_v46 }
 0xd34   :  { %v2301_v6 = vpop.permute.xlu0 %2300 }
 0xd36   :  { %v2280_v54 = vpop.permute.xlu1 %2279 }
 0xd37   :  { %9937 = vmatmul.msk.bf16.vlgmr.msra.gmra.mxu2 %vm215_vm0, %v2322_v51 }
 0xd38   :  { %2678 = vmatpush.bf16.msra.mxu2 %v12142_v26 }
 0xd3c   :  { %v2364_v16 = vpop.permute.xlu0 %2363 }
 0xd3d   :  { %9935 = vmatmul.msk.bf16.vlgmr.msra.gmra.mxu0 %vm215_vm0, %v2280_v54 }
 0xd3e   :  { %2646 = vmatpush.bf16.msra.mxu0 %v12126_v12  ;;  %v2427_v47 = vpop.permute.xlu1 %2426 }
 0xd3f   :  { %9936 = vmatmul.msk.bf16.vlgmr.msra.gmra.mxu1 %vm215_vm0, %v2301_v6  ;;  %9938 = vmatmul.msk.bf16.vlgmr.msrb.gmra.mxu3 %vm215_vm0, %v2343_v40 }
 0xd40   :  { %2662 = vmatpush.bf16.msra.mxu1 %v12115_v25  ;;  %2694 = vmatpush.bf16.msrb.mxu3 %v12133_v23 }
 0xd47   :  { %9941 = vmatmul.msk.bf16.vlgmr.msrb.gmra.mxu2 %vm215_vm0, %v2406_v38  ;;  %v11125_v38 = vld [vmem:[%s15196_s6 + $0x3] sm:$0x1] }
 0xd48   :  { %2742 = vmatpush.bf16.msrb.mxu2 %v12170_v30 }
 0xd4d   :  { %9939 = vmatmul.msk.bf16.vlgmr.msrb.gmra.mxu0 %vm215_vm0, %v2364_v16 }
 0xd4e   :  { %2710 = vmatpush.bf16.msrb.mxu0 %v12149_v22 }
 0xd4f   :  { %9940 = vmatmul.msk.bf16.vlgmr.msrb.gmra.mxu1 %vm215_vm0, %v2385_v59  ;;  %9942 = vmatmul.msk.bf16.vlgmr.msra.gmra.mxu3 %vm215_vm0, %v2427_v47 }
 0xd50   :  { %2758 = vmatpush.bf16.msra.mxu3 %v12162_v27  ;;  %2726 = vmatpush.bf16.msrb.mxu1 %v12159_v18 }
 0xd8a   :  { %v2167_v17 = vpop.f32.mrf.mxu2 }
 0xd8b   :  { %v12425_v19 = vadd.f32 %v11122_v20, %v2167_v17  ;;  %v11126_v20 = vld [vmem:[%s15196_s6 + $0x4] sm:$0x1] }
 0xd8c   :  { %v2146_v4 = vpop.f32.mrf.mxu1 }
 0xd8d   :  { %v2450_v11 = vsel %vm1214_vm3, %v12425_v19, -inf  ;;  %v12432_v45 = vadd.f32 %v11123_v55, %v2146_v4  ;;  %v11127_v55 = vld [vmem:[%s15196_s6 + $0x6] sm:$0x1] }
 0xd8e   :  { %2451 = vmax.xlane.f32.xlu1 %v2450_v11 }
 0xd8f   :  { %v2447_v37 = vsel %vm1214_vm3, %v12432_v45, -inf }
 0xd92   :  { %v2169_v34 = vpop.f32.mrf.mxu2 }
 0xd94   :  { %v2148_v32 = vpop.f32.mrf.mxu1 }
 0xd96   :  { %2448 = vmax.xlane.f32.xlu1 %v2447_v37 }
 0xd9a   :  { %v2125_v41 = vpop.f32.mrf.mxu0 }
 0xd9b   :  { %v12439_v51 = vadd.f32 %v11124_v0, %v2125_v41  ;;  %v11128_v0 = vld [vmem:[%s15196_s6 + $0x5] sm:$0x1] }
 0xd9d   :  { %v2444_v40 = vsel %vm1214_vm3, %v12439_v51, -inf }
 0xd9e   :  { %2445 = vmax.xlane.f32.xlu2 %v2444_v40 }
 0xda2   :  { %v2127_v54 = vpop.f32.mrf.mxu0  ;;  %v2188_v6 = vpop.f32.mrf.mxu3 }
 0xda3   :  { %v12446_v16 = vadd.f32 %v11125_v38, %v2188_v6 }
 0xda5   :  { %v2453_v59 = vsel %vm1214_vm3, %v12446_v16, -inf }
 0xda6   :  { %2454 = vmax.xlane.f32.xlu0 %v2453_v59  ;;  %v11129_v59 = vld [vmem:[%s15196_s6 + $0x7] sm:$0x1] }
 0xdaa   :  { %v2190_v47 = vpop.f32.mrf.mxu3  ;;  %v2209_v17 = vpop.f32.mrf.mxu0 }
 0xdab   :  { %v12453_v4 = vadd.f32 %v11126_v20, %v2209_v17  ;;  %v2251_v11 = vpop.f32.mrf.mxu2 }
 0xdac   :  { %v12458_v34 = vadd.f32 %v11127_v55, %v2251_v11  ;;  %v2230_v32 = vpop.f32.mrf.mxu1 }
 0xdad   :  { %v2456_v37 = vsel %vm1214_vm3, %v12453_v4, -inf  ;;  %v12467_v40 = vadd.f32 %v11128_v0, %v2230_v32 }
 0xdae   :  { %v2462_v41 = vsel %vm1214_vm3, %v12458_v34, -inf  ;;  %2457 = vmax.xlane.f32.xlu1 %v2456_v37  ;;  %v11130_v37 = vld [vmem:[%s15196_s6 + $0x8] sm:$0x1] }
 0xdaf   :  { %2463 = vmax.xlane.f32.xlu0 %v2462_v41  ;;  %v2459_v11 = vsel %vm1214_vm3, %v12467_v40, -inf }
 0xdb2   :  { %v2211_v54 = vpop.f32.mrf.mxu0  ;;  %v2272_v6 = vpop.f32.mrf.mxu3 }
 0xdb3   :  { %v2253_v38 = vpop.f32.mrf.mxu2  ;;  %v12472_v47 = vadd.f32 %v11129_v59, %v2272_v6  ;;  %v11131_v54 = vld [vmem:[%s15196_s6 + $0xa] sm:$0x1] }
 0xdb4   :  { %v2232_v17 = vpop.f32.mrf.mxu1 }
 0xdb5   :  { %v2465_v20 = vsel %vm1214_vm3, %v12472_v47, -inf }
 0xdb6   :  { %2466 = vmax.xlane.f32.xlu2 %v2465_v20  ;;  %v11132_v20 = vld [vmem:[%s15196_s6 + $0x9] sm:$0x1] }
 0xdb7   :  { %2460 = vmax.xlane.f32.xlu0 %v2459_v11 }
 0xdba   :  { %v2274_v55 = vpop.f32.mrf.mxu3  ;;  %v2293_v32 = vpop.f32.mrf.mxu0 }
 0xdbb   :  { %v12481_v41 = vadd.f32 %v11130_v37, %v2293_v32  ;;  %v2335_v0 = vpop.f32.mrf.mxu2 }
 0xdbc   :  { %v12486_v6 = vadd.f32 %v11131_v54, %v2335_v0  ;;  %v2314_v38 = vpop.f32.mrf.mxu1  ;;  %v11133_v0 = vld [vmem:[%s15196_s6 + $0xb] sm:$0x1] }
 0xdbd   :  { %v2468_v59 = vsel %vm1214_vm3, %v12481_v41, -inf  ;;  %v12495_v11 = vadd.f32 %v11132_v20, %v2314_v38 }
 0xdbe   :  { %v2474_v17 = vsel %vm1214_vm3, %v12486_v6, -inf }
 0xdbf   :  { %2469 = vmax.xlane.f32.xlu0 %v2468_v59  ;;  %2475 = vmax.xlane.f32.xlu2 %v2474_v17  ;;  %v2471_v17 = vsel %vm1214_vm3, %v12495_v11, -inf }
 0xdc2   :  { %v2295_v55 = vpop.f32.mrf.mxu0  ;;  %v2356_v32 = vpop.f32.mrf.mxu3 }
 0xdc3   :  { %v2337_v37 = vpop.f32.mrf.mxu2  ;;  %v12500_v54 = vadd.f32 %v11133_v0, %v2356_v32  ;;  %v11134_v55 = vld [vmem:[%s15196_s6 + $0xc] sm:$0x1] }
 0xdc4   :  { %v2316_v5 = vpop.f32.mrf.mxu1 }
 0xdc5   :  { %v2477_v59 = vsel %vm1214_vm3, %v12500_v54, -inf  ;;  %v11135_v5 = vld [vmem:[%s15196_s6 + $0xe] sm:$0x1] }
 0xdc6   :  { %2478 = vmax.xlane.f32.xlu1 %v2477_v59  ;;  %v11136_v59 = vld [vmem:[%s15196_s6 + $0xd] sm:$0x1] }
 0xdc7   :  { %2472 = vmax.xlane.f32.xlu2 %v2471_v17 }
 0xdca   :  { %v2358_v38 = vpop.f32.mrf.mxu3  ;;  %v2377_v20 = vpop.f32.mrf.mxu0 }
 0xdcb   :  { %v12509_v37 = vadd.f32 %v11134_v55, %v2377_v20  ;;  %v2419_v1 = vpop.f32.mrf.mxu2 }
 0xdcc   :  { %v12514_v32 = vadd.f32 %v11135_v5, %v2419_v1  ;;  %v2398_v0 = vpop.f32.mrf.mxu1 }
 0xdcd   :  { %v12519_v17 = vadd.f32 %v11136_v59, %v2398_v0  ;;  %v2480_v38 = vsel %vm1214_vm3, %v12509_v37, -inf  ;;  %v11137_v0 = vld [vmem:[%s15196_s6 + $0xf] sm:$0x1] }
 0xdce   :  { %v2486_v20 = vsel %vm1214_vm3, %v12514_v32, -inf }
 0xdcf   :  { %2487 = vmax.xlane.f32.xlu1 %v2486_v20  ;;  %2481 = vmax.xlane.f32.xlu2 %v2480_v38  ;;  %v2483_v55 = vsel %vm1214_vm3, %v12519_v17, -inf }
 0xdd0   :  { %2484 = vmax.xlane.f32.xlu0 %v2483_v55 }
 0xdd2   :  { %v2379_v1 = vpop.f32.mrf.mxu0  ;;  %v2440_v5 = vpop.f32.mrf.mxu3 }
 0xdd3   :  { %v2421_v61 = vpop.f32.mrf.mxu2  ;;  %v12530_v59 = vadd.f32 %v11137_v0, %v2440_v5 }
 0xdd4   :  { %v2400_v27 = vpop.f32.mrf.mxu1 }
 0xdd5   :  { %v2489_v30 = vsel %vm1214_vm3, %v12530_v59, -inf }
 0xdd8   :  { %2490 = vmax.xlane.f32.xlu0 %v2489_v30 }
 0xdda   :  { %v2442_v20 = vpop.f32.mrf.mxu3 }
 0xe01   :  { %v2452_v38 = vpop.xlane.xlu1 %2451 }
 0xe02   :  { %v2494_v18 = vsub.f32 %v12425_v19, %v2452_v38 }
 0xe04   :  { %v2512_v22 = vmul.f32 1.442695, %v2494_v18 }
 0xe06   :  { %10458 = vpow2.f32 %v2512_v22 }
 0xe09   :  { %v2449_v55 = vpop.xlane.xlu1 %2448 }
 0xe0a   :  { %v2493_v61 = vsub.f32 %v12432_v45, %v2449_v55 }
 0xe0c   :  { %v12536_v1 = vpop.eup %10458  ;;  %v2510_v23 = vmul.f32 1.442695, %v2493_v61 }
 0xe0d   :  { %v2546_v5 = vsel %vm1214_vm3, %v12536_v1, 0.0 }
 0xe0e   :  { %10460 = vpow2.f32 %v2510_v23  ;;  %2547 = vadd.xlane.f32.xlu1 %v2546_v5 }
 0xe11   :  { %v2446_v27 = vpop.xlane.xlu2 %2445 }
 0xe12   :  { %v2492_v30 = vsub.f32 %v12439_v51, %v2446_v27 }
 0xe14   :  { %v12541_v0 = vpop.eup %10460  ;;  %v2508_v20 = vmul.f32 1.442695, %v2492_v30 }
 0xe15   :  { %v2543_v22 = vsel %vm1214_vm3, %v12541_v0, 0.0 }
 0xe16   :  { %10462 = vpow2.f32 %v2508_v20  ;;  %2544 = vadd.xlane.f32.xlu0 %v2543_v22 }
 0xe19   :  { %v2455_v18 = vpop.xlane.xlu0 %2454 }
 0xe1a   :  { %v2495_v19 = vsub.f32 %v12446_v16, %v2455_v18 }
 0xe1c   :  { %v12546_v45 = vpop.eup %10462  ;;  %v2514_v38 = vmul.f32 1.442695, %v2495_v19 }
 0xe1d   :  { %v2540_v23 = vsel %vm1214_vm3, %v12546_v45, 0.0 }
 0xe1e   :  { %10464 = vpow2.f32 %v2514_v38  ;;  %2541 = vadd.xlane.f32.xlu1 %v2540_v23 }
 0xe21   :  { %v2458_v51 = vpop.xlane.xlu1 %2457 }
 0xe22   :  { %v2496_v55 = vsub.f32 %v12453_v4, %v2458_v51  ;;  %v2464_v61 = vpop.xlane.xlu0 %2463 }
 0xe23   :  { %v2498_v5 = vsub.f32 %v12458_v34, %v2464_v61 }
 0xe24   :  { %v12552_v27 = vpop.eup %10464  ;;  %v2516_v30 = vmul.f32 1.442695, %v2496_v55 }
 0xe25   :  { %v2520_v20 = vmul.f32 1.442695, %v2498_v5  ;;  %v2549_v16 = vsel %vm1214_vm3, %v12552_v27, 0.0 }
 0xe26   :  { %10466 = vpow2.f32 %v2516_v30  ;;  %2550 = vadd.xlane.f32.xlu2 %v2549_v16 }
 0xe27   :  { %10468 = vpow2.f32 %v2520_v20 }
 0xe29   :  { %v2467_v22 = vpop.xlane.xlu2 %2466 }
 0xe2a   :  { %v2499_v18 = vsub.f32 %v12472_v47, %v2467_v22  ;;  %v2461_v19 = vpop.xlane.xlu0 %2460 }
 0xe2b   :  { %v2497_v38 = vsub.f32 %v12467_v40, %v2461_v19 }
 0xe2c   :  { %v12558_v4 = vpop.eup %10466  ;;  %v2522_v23 = vmul.f32 1.442695, %v2499_v18 }
 0xe2d   :  { %v12560_v34 = vpop.eup %10468  ;;  %v2518_v51 = vmul.f32 1.442695, %v2497_v38  ;;  %v2552_v55 = vsel %vm1214_vm3, %v12558_v4, 0.0 }
 0xe2e   :  { %10470 = vpow2.f32 %v2522_v23  ;;  %2553 = vadd.xlane.f32.xlu0 %v2552_v55  ;;  %v2558_v61 = vsel %vm1214_vm3, %v12560_v34, 0.0 }
 0xe2f   :  { %10472 = vpow2.f32 %v2518_v51  ;;  %2559 = vadd.xlane.f32.xlu2 %v2558_v61 }
 0xe32   :  { %v2476_v47 = vpop.xlane.xlu2 %2475  ;;  %v2470_v5 = vpop.xlane.xlu0 %2469 }
 0xe33   :  { %v2502_v40 = vsub.f32 %v12486_v6, %v2476_v47  ;;  %v2500_v30 = vsub.f32 %v12481_v41, %v2470_v5 }
 0xe34   :  { %v12568_v20 = vpop.eup %10470 }
 0xe35   :  { %v12570_v16 = vpop.eup %10472  ;;  %v2528_v22 = vmul.f32 1.442695, %v2502_v40  ;;  %v2524_v18 = vmul.f32 1.442695, %v2500_v30  ;;  %v2561_v19 = vsel %vm1214_vm3, %v12568_v20, 0.0 }
 0xe36   :  { %2562 = vadd.xlane.f32.xlu1 %v2561_v19  ;;  %v2555_v38 = vsel %vm1214_vm3, %v12570_v16, 0.0 }
 0xe37   :  { %10474 = vpow2.f32 %v2528_v22  ;;  %2556 = vadd.xlane.f32.xlu2 %v2555_v38 }
 0xe38   :  { %10476 = vpow2.f32 %v2524_v18 }
 0xe39   :  { %v2479_v23 = vpop.xlane.xlu1 %2478 }
 0xe3a   :  { %v2503_v6 = vsub.f32 %v12500_v54, %v2479_v23  ;;  %v2473_v41 = vpop.xlane.xlu2 %2472 }
 0xe3b   :  { %v2501_v51 = vsub.f32 %v12495_v11, %v2473_v41 }
 0xe3c   :  { %v2530_v55 = vmul.f32 1.442695, %v2503_v6 }
 0xe3d   :  { %v12578_v61 = vpop.eup %10474  ;;  %v2526_v47 = vmul.f32 1.442695, %v2501_v51 }
 0xe3e   :  { %v12580_v5 = vpop.eup %10476  ;;  %10478 = vpow2.f32 %v2530_v55  ;;  %v2570_v40 = vsel %vm1214_vm3, %v12578_v61, 0.0 }
 0xe3f   :  { %10480 = vpow2.f32 %v2526_v47  ;;  %2571 = vadd.xlane.f32.xlu1 %v2570_v40  ;;  %v2564_v30 = vsel %vm1214_vm3, %v12580_v5, 0.0 }
 0xe40   :  { %2565 = vadd.xlane.f32.xlu2 %v2564_v30 }
 0xe42   :  { %v2488_v54 = vpop.xlane.xlu1 %2487  ;;  %v2482_v22 = vpop.xlane.xlu2 %2481 }
 0xe43   :  { %v2506_v11 = vsub.f32 %v12514_v32, %v2488_v54  ;;  %v2504_v18 = vsub.f32 %v12509_v37, %v2482_v22  ;;  %v2485_v19 = vpop.xlane.xlu0 %2484 }
 0xe44   :  { %v12588_v38 = vpop.eup %10478  ;;  %v2505_v51 = vsub.f32 %v12519_v17, %v2485_v19 }
 0xe45   :  { %v12590_v23 = vpop.eup %10480  ;;  %v2536_v6 = vmul.f32 1.442695, %v2506_v11  ;;  %v2532_v41 = vmul.f32 1.442695, %v2504_v18  ;;  %v2573_v55 = vsel %vm1214_vm3, %v12588_v38, 0.0 }
 0xe46   :  { %2574 = vadd.xlane.f32.xlu0 %v2573_v55  ;;  %v2567_v47 = vsel %vm1214_vm3, %v12590_v23, 0.0  ;;  %v2534_v37 = vmul.f32 1.442695, %v2505_v51 }
 0xe47   :  { %10482 = vpow2.f32 %v2536_v6  ;;  %2568 = vadd.xlane.f32.xlu1 %v2567_v47 }
 0xe48   :  { %10484 = vpow2.f32 %v2532_v41  ;;  %v15239_v41 = vpack.c.bf16 %v12322_v44, %v12320_v15 }
 0xe49   :  { %10486 = vpow2.f32 %v2534_v37 }
 0xe4b   :  { %v2491_v32 = vpop.xlane.xlu0 %2490 }
 0xe4c   :  { %v2507_v40 = vsub.f32 %v12530_v59, %v2491_v32 }
 0xe4d   :  { %v12598_v30 = vpop.eup %10482 }
 0xe4e   :  { %v12600_v54 = vpop.eup %10484  ;;  %v2538_v17 = vmul.f32 1.442695, %v2507_v40  ;;  %v2582_v22 = vsel %vm1214_vm3, %v12598_v30, 0.0 }
 0xe4f   :  { %2583 = vadd.xlane.f32.xlu0 %v2582_v22  ;;  %v2576_v11 = vsel %vm1214_vm3, %v12600_v54, 0.0  ;;  %v12606_v18 = vpop.eup %10486 }
 0xe50   :  { %10488 = vpow2.f32 %v2538_v17  ;;  %2577 = vadd.xlane.f32.xlu1 %v2576_v11  ;;  %v2579_v59 = vsel %vm1214_vm3, %v12606_v18, 0.0 }
 0xe56   :  { %v12608_v19 = vpop.eup %10488 }
 0xe57   :  { %2580 = vadd.xlane.f32.xlu0 %v2579_v59  ;;  %v2585_v6 = vsel %vm1214_vm3, %v12608_v19, 0.0 }
 0xe58   :  { %2586 = vadd.xlane.f32.xlu2 %v2585_v6 }
 0xe69   :  { %2983 = vrot.lane.b32.xlu1 %v15239_v41, %s11536_s7 }
 0xe81   :  { %v2548_v51 = vpop.xlane.xlu1 %2547 }
 0xe82   :  { %10490 = vrcp.f32 %v2548_v51 }
 0xe88   :  { %v10491_v55 = vpop.eup %10490 }
 0xe89   :  { %v2606_v47 = vmul.f32 %v10491_v55, %v12536_v1  ;;  %v2545_v37 = vpop.xlane.xlu0 %2544 }
 0xe8a   :  { %10492 = vrcp.f32 %v2545_v37 }
 0xe8b   :  { %v2622_v32 = vpack.c.bf16 %v2606_v47, %v2606_v47 }
 0xe8d   :  { %9945 = vmatmul.msk.bf16.vlgmr.msra.gmra.mxu2 %vm1407_vm5, %v2622_v32 }
 0xe8e   :  { %2806 = vmatpush.bf16.msra.mxu2 %v12196_v2 }
 0xe90   :  { %v10493_v40 = vpop.eup %10492 }
 0xe91   :  { %v2605_v17 = vmul.f32 %v10493_v40, %v12541_v0  ;;  %v2542_v22 = vpop.xlane.xlu1 %2541 }
 0xe92   :  { %10494 = vrcp.f32 %v2542_v22 }
 0xe93   :  { %v2621_v11 = vpack.c.bf16 %v2605_v17, %v2605_v17 }
 0xe95   :  { %9944 = vmatmul.msk.bf16.vlgmr.msra.gmra.mxu1 %vm1407_vm5, %v2621_v11 }
 0xe96   :  { %2790 = vmatpush.bf16.msra.mxu1 %v12180_v58 }
 0xe98   :  { %v10495_v15 = vpop.eup %10494 }
 0xe99   :  { %v2604_v44 = vmul.f32 %v10495_v15, %v12546_v45  ;;  %v2551_v1 = vpop.xlane.xlu2 %2550 }
 0xe9a   :  { %10496 = vrcp.f32 %v2551_v1 }
 0xe9b   :  { %v2620_v59 = vpack.c.bf16 %v2604_v44, %v2604_v44 }
 0xe9d   :  { %9943 = vmatmul.msk.bf16.vlgmr.msra.gmra.mxu0 %vm1407_vm5, %v2620_v59 }
 0xe9e   :  { %2774 = vmatpush.bf16.msra.mxu0 %v12177_v39 }
 0xea0   :  { %v10497_v6 = vpop.eup %10496 }
 0xea1   :  { %v2607_v0 = vmul.f32 %v10497_v6, %v12552_v27  ;;  %v2554_v41 = vpop.xlane.xlu0 %2553 }
 0xea2   :  { %v2560_v51 = vpop.xlane.xlu2 %2559  ;;  %10498 = vrcp.f32 %v2554_v41 }
 0xea3   :  { %v2623_v55 = vpack.c.bf16 %v2607_v0, %v2607_v0  ;;  %10500 = vrcp.f32 %v2560_v51 }
 0xea5   :  { %9946 = vmatmul.msk.bf16.vlgmr.msrb.gmra.mxu3 %vm1407_vm5, %v2623_v55 }
 0xea6   :  { %2822 = vmatpush.bf16.msrb.mxu3 %v12185_v10 }
 0xea8   :  { %v10499_v45 = vpop.eup %10498 }
 0xea9   :  { %v10501_v47 = vpop.eup %10500  ;;  %v2608_v37 = vmul.f32 %v10499_v45, %v12558_v4  ;;  %v2563_v32 = vpop.xlane.xlu1 %2562 }
 0xeaa   :  { %v2610_v40 = vmul.f32 %v10501_v47, %v12560_v34  ;;  %10502 = vrcp.f32 %v2563_v32  ;;  %v2557_v17 = vpop.xlane.xlu2 %2556 }
 0xeab   :  { %v2624_v22 = vpack.c.bf16 %v2608_v37, %v2608_v37  ;;  %10504 = vrcp.f32 %v2557_v17  ;;  %v11138_v37 = vld [vmem:[#allocation9 + $0x8] sm:$0xff] }
 0xeac   :  { %v2626_v27 = vpack.c.bf16 %v2610_v40, %v2610_v40  ;;  %v11139_v40 = vld [vmem:[%s15205_s15 + $0x38] sm:$0xff] }
 0xead   :  { %9947 = vmatmul.msk.bf16.vlgmr.msrb.gmra.mxu0 %vm1407_vm5, %v2624_v22 }
 0xeae   :  { %9949 = vmatmul.msk.bf16.vlgmr.msrb.gmra.mxu2 %vm1407_vm5, %v2626_v27  ;;  %2838 = vmatpush.bf16.msrb.mxu0 %v12203_v57 }
 0xeaf   :  { %2870 = vmatpush.bf16.msrb.mxu2 %v12262_v49 }
 0xeb0   :  { %v10503_v11 = vpop.eup %10502 }
 0xeb1   :  { %v10505_v15 = vpop.eup %10504  ;;  %v2611_v4 = vmul.f32 %v10503_v11, %v12568_v20 }
 0xeb2   :  { %v2609_v44 = vmul.f32 %v10505_v15, %v12570_v16  ;;  %v2572_v34 = vpop.xlane.xlu1 %2571  ;;  %v11140_v15 = vld [vmem:[#allocation9] sm:$0xff] }
 0xeb3   :  { %v2627_v1 = vpack.c.bf16 %v2611_v4, %v2611_v4  ;;  %10506 = vrcp.f32 %v2572_v34  ;;  %v2566_v59 = vpop.xlane.xlu2 %2565  ;;  %v11144_v34 = vld [vmem:[%s15205_s15 + $0x28] sm:$0xff] }
 0xeb4   :  { %v2625_v6 = vpack.c.bf16 %v2609_v44, %v2609_v44  ;;  %10508 = vrcp.f32 %v2566_v59  ;;  %v11141_v44 = vld [vmem:[%s15205_s15 + $0x30] sm:$0xff] }
 0xeb5   :  { %9950 = vmatmul.msk.bf16.vlgmr.msra.gmra.mxu3 %vm1407_vm5, %v2627_v1 }
 0xeb6   :  { %9948 = vmatmul.msk.bf16.vlgmr.msrb.gmra.mxu1 %vm1407_vm5, %v2625_v6  ;;  %2886 = vmatpush.bf16.msra.mxu3 %v12209_v62 }
 0xeb7   :  { %2854 = vmatpush.bf16.msrb.mxu1 %v12214_v50 }
 0xeb9   :  { %v10507_v0 = vpop.eup %10506  ;;  %v2575_v41 = vpop.xlane.xlu0 %2574 }
 0xeba   :  { %v10509_v51 = vpop.eup %10508  ;;  %v2614_v20 = vmul.f32 %v10507_v0, %v12578_v61  ;;  %v2569_v16 = vpop.xlane.xlu1 %2568  ;;  %10510 = vrcp.f32 %v2575_v41  ;;  %v11145_v41 = vld [vmem:[#allocation11 + $0x10] sm:$0xff] }
 0xebb   :  { %v2612_v55 = vmul.f32 %v10509_v51, %v12580_v5  ;;  %10512 = vrcp.f32 %v2569_v16  ;;  %v11146_v16 = vld [vmem:[#allocation8] sm:$0xff] }
 0xebc   :  { %v2630_v45 = vpack.c.bf16 %v2614_v20, %v2614_v20 }
 0xebd   :  { %v2628_v47 = vpack.c.bf16 %v2612_v55, %v2612_v55 }
 0xebe   :  { %9953 = vmatmul.msk.bf16.vlgmr.msra.gmra.mxu2 %vm1407_vm5, %v2630_v45  ;;  %v11147_v45 = vld [vmem:[%s15205_s15 + $0x20] sm:$0xff] }
 0xebf   :  { %9951 = vmatmul.msk.bf16.vlgmr.msra.gmra.mxu0 %vm1407_vm5, %v2628_v47  ;;  %2994 = vmatpush.bf16.msra.mxu2 %v11138_v37 }
 0xec0   :  { %v10511_v32 = vpop.eup %10510  ;;  %2947 = vmatpush.bf16.msra.mxu0 %v11139_v40 }
 0xec1   :  { %v10513_v61 = vpop.eup %10512  ;;  %v2615_v17 = vmul.f32 %v10511_v32, %v12588_v38  ;;  %v11142_v38 = vld [vmem:[#allocation11 + $0x18] sm:$0xff] }
 0xec2   :  { %v2613_v5 = vmul.f32 %v10513_v61, %v12590_v23  ;;  %v2584_v22 = vpop.xlane.xlu0 %2583  ;;  %v11143_v23 = vld [vmem:[#allocation8 + $0x8] sm:$0xff]  ;;  %v11150_v61 = vld [vmem:[#allocation11] sm:$0xff] }
 0xec3   :  { %v2631_v27 = vpack.c.bf16 %v2615_v17, %v2615_v17  ;;  %v2578_v11 = vpop.xlane.xlu1 %2577  ;;  %10514 = vrcp.f32 %v2584_v22  ;;  %2995 = vmatpush.bf16.msra.mxu2 %v11140_v15  ;;  %v11151_v22 = vld [vmem:[%s15205_s15 + $0x10] sm:$0xff] }
 0xec4   :  { %v2629_v4 = vpack.c.bf16 %v2613_v5, %v2613_v5  ;;  %10516 = vrcp.f32 %v2578_v11  ;;  %2948 = vmatpush.bf16.msra.mxu0 %v11141_v44 }
 0xec5   :  { %9954 = vmatmul.msk.bf16.vlgmr.msrb.gmra.mxu3 %vm1407_vm5, %v2631_v27 }
 0xec6   :  { %9952 = vmatmul.msk.bf16.vlgmr.msra.gmra.mxu1 %vm1407_vm5, %v2629_v4  ;;  %3099 = vmatpush.bf16.msrb.mxu3 %v11142_v38 }
 0xec7   :  { %2973 = vmatpush.bf16.msra.mxu1 %v11143_v23 }
 0xec8   :  { %2949 = vmatpush.bf16.msra.mxu0 %v11144_v34 }
 0xec9   :  { %v10515_v1 = vpop.eup %10514 }
 0xeca   :  { %v10517_v59 = vpop.eup %10516  ;;  %v2618_v6 = vmul.f32 %v10515_v1, %v12598_v30  ;;  %v2581_v0 = vpop.xlane.xlu0 %2580  ;;  %3100 = vmatpush.bf16.msrb.mxu3 %v11145_v41  ;;  %v11148_v30 = vld [vmem:[#allocation11 + $0x8] sm:$0xff] }
 0xecb   :  { %v2616_v51 = vmul.f32 %v10517_v59, %v12600_v54  ;;  %10518 = vrcp.f32 %v2581_v0  ;;  %v2587_v20 = vpop.xlane.xlu2 %2586  ;;  %2974 = vmatpush.bf16.msra.mxu1 %v11146_v16  ;;  %v11149_v54 = vld [vmem:[%s15205_s15 + $0x18] sm:$0xff] }
 0xecc   :  { %v2634_v55 = vpack.c.bf16 %v2618_v6, %v2618_v6  ;;  %2950 = vmatpush.bf16.msra.mxu0 %v11147_v45  ;;  %10520 = vrcp.f32 %v2587_v20 }
 0xecd   :  { %v2632_v47 = vpack.c.bf16 %v2616_v51, %v2616_v51 }
 0xece   :  { %9957 = vmatmul.msk.bf16.vlgmr.msrb.gmra.mxu2 %vm1407_vm5, %v2634_v55  ;;  %3101 = vmatpush.bf16.msrb.mxu3 %v11148_v30 }
 0xecf   :  { %9955 = vmatmul.msk.bf16.vlgmr.msrb.gmra.mxu0 %vm1407_vm5, %v2632_v47  ;;  %3267 = vmatpush.bf16.xpose.msrb.mxu2 %v11813_v29 }
 0xed0   :  { %2951 = vmatpush.bf16.msra.mxu0 %v11149_v54 }
 0xed1   :  { %v10519_v37 = vpop.eup %10518 }
 0xed2   :  { %v10521_v32 = vpop.eup %10520  ;;  %v2617_v40 = vmul.f32 %v10519_v37, %v12606_v18  ;;  %3102 = vmatpush.bf16.msrb.mxu3 %v11150_v61  ;;  %v11152_v18 = vld [vmem:[%s15205_s15 + $0x8] sm:$0xff] }
 0xed3   :  { %v2619_v17 = vmul.f32 %v10521_v32, %v12608_v19  ;;  %v11153_v19 = vld [vmem:[%s15205_s15] sm:$0xff] }
 0xed4   :  { %v2633_v5 = vpack.c.bf16 %v2617_v40, %v2617_v40  ;;  %2952 = vmatpush.bf16.msra.mxu0 %v11151_v22 }
 0xed5   :  { %v2635_v27 = vpack.c.bf16 %v2619_v17, %v2619_v17 }
 0xed6   :  { %9956 = vmatmul.msk.bf16.vlgmr.msrb.gmra.mxu1 %vm1407_vm5, %v2633_v5 }
 0xed7   :  { %3246 = vmatpush.bf16.xpose.msrb.mxu1 %v11803_v7  ;;  %9958 = vmatmul.msk.bf16.vlgmr.msra.gmra.mxu3 %vm1407_vm5, %v2635_v27 }
 0xed8   :  { %2953 = vmatpush.bf16.msra.mxu0 %v11152_v18  ;;  %3288 = vmatpush.bf16.xpose.msra.mxu3 %v11835_v56 }
 0xedb   :  { %v2984_v11 = vpop.permute.xlu1 %2983 }
 0xedc   :  { %2954 = vmatpush.bf16.msra.mxu0 %v11153_v19 }
 0xede   :  { %9960 = vmatmul.msk.bf16.vlgmr.msra.gmra.mxu2 %vm215_vm0, %v2984_v11 }
 0xedf   :  { %3351 = vmatpush.bf16.xpose.msra.mxu2 %v11847_v3 }
 0xee0   :  { %3309 = vmatpush.bf16.xpose.msrb.mxu0 %v11839_v60 }
 0xf10   :  { %v2680_v15 = vpop.f32.mrf.mxu2 }
 0xf11   :  { %v2902_v23 = vrot.slane %v2680_v15, 6 }
 0xf12   :  { %v2664_v4 = vpop.f32.mrf.mxu1 }
 0xf13   :  { %v2900_v38 = vrot.slane %v2664_v4, 7 }
 0xf18   :  { %v2682_v44 = vpop.f32.mrf.mxu2 }
 0xf1a   :  { %v2648_v34 = vpop.f32.mrf.mxu0  ;;  %v2666_v1 = vpop.f32.mrf.mxu1 }
 0xf1b   :  { %v2901_v59 = vsel %vm1722_vm6, %v2900_v38, %v2648_v34 }
 0xf1c   :  { %v2903_v6 = vsel %vm1725_vm7, %v2902_v23, %v2901_v59 }
 0xf22   :  { %v2650_v0 = vpop.f32.mrf.mxu0 }
 0xf28   :  { %v2696_v41 = vpop.f32.mrf.mxu3 }
 0xf29   :  { %v2904_v51 = vrot.slane %v2696_v41, 5 }
 0xf2a   :  { %v2712_v20 = vpop.f32.mrf.mxu0 }
 0xf2b   :  { %v2905_v16 = vsel %vm1728_vm8, %v2904_v51, %v2903_v6  ;;  %v2906_v55 = vrot.slane %v2712_v20, 4 }
 0xf2d   :  { %v2907_v45 = vsel %vm1731_vm10, %v2906_v55, %v2905_v16 }
 0xf30   :  { %v2698_v47 = vpop.f32.mrf.mxu3 }
 0xf31   :  { %v2744_v30 = vpop.f32.mrf.mxu2 }
 0xf32   :  { %v2714_v54 = vpop.f32.mrf.mxu0  ;;  %v2910_v40 = vrot.slane %v2744_v30, 2 }
 0xf33   :  { %v2728_v37 = vpop.f32.mrf.mxu1 }
 0xf34   :  { %v2908_v32 = vrot.slane %v2728_v37, 3 }
 0xf36   :  { %v2909_v61 = vsel %vm15240_vm11, %v2908_v32, %v2907_v45 }
 0xf37   :  { %v2911_v17 = vsel %vm15241_vm12, %v2910_v40, %v2909_v61 }
 0xf38   :  { %v2760_v5 = vpop.f32.mrf.mxu3 }
 0xf39   :  { %v2746_v22 = vpop.f32.mrf.mxu2  ;;  %v2912_v27 = vrot.slane %v2760_v5, 1 }
 0xf3b   :  { %v2913_v18 = vsel %vm15242_vm13, %v2912_v27, %v2911_v17  ;;  %v2730_v19 = vpop.f32.mrf.mxu1 }
 0xf3c   :  { %v2776_v11 = vpop.f32.mrf.mxu0 }
 0xf40   :  { %v2762_v15 = vpop.f32.mrf.mxu3 }
 0xf41   :  { %v2808_v4 = vpop.f32.mrf.mxu2 }
 0xf42   :  { %v2928_v16 = vrot.slane %v2808_v4, 6 }
 0xf43   :  { %v2792_v44 = vpop.f32.mrf.mxu1 }
 0xf44   :  { %v2778_v38 = vpop.f32.mrf.mxu0  ;;  %v2926_v6 = vrot.slane %v2792_v44, 7 }
 0xf46   :  { %v2927_v41 = vsel %vm1722_vm6, %v2926_v6, %v2776_v11 }
 0xf47   :  { %v2929_v45 = vsel %vm1725_vm7, %v2928_v16, %v2927_v41 }
 0xf48   :  { %v2824_v23 = vpop.f32.mrf.mxu3 }
 0xf49   :  { %v2810_v34 = vpop.f32.mrf.mxu2  ;;  %v2930_v51 = vrot.slane %v2824_v23, 5 }
 0xf4b   :  { %v2794_v1 = vpop.f32.mrf.mxu1  ;;  %v2931_v54 = vsel %vm1728_vm8, %v2930_v51, %v2929_v45 }
 0xf4c   :  { %v2840_v59 = vpop.f32.mrf.mxu0 }
 0xf4d   :  { %v2932_v47 = vrot.slane %v2840_v59, 4 }
 0xf4f   :  { %v2933_v32 = vsel %vm1731_vm10, %v2932_v47, %v2931_v54 }
 0xf50   :  { %v2826_v0 = vpop.f32.mrf.mxu3 }
 0xf51   :  { %v2872_v20 = vpop.f32.mrf.mxu2 }
 0xf52   :  { %v2936_v17 = vrot.slane %v2872_v20, 2  ;;  %v11154_v20 = vld [vmem:[%s15200_s10] ss:$0 sm:$0xff] }
 0xf53   :  { %v2856_v55 = vpop.f32.mrf.mxu1  ;;  %v243_v16 = vadd.f32 %v11154_v20, %v11908_v53 }
 0xf54   :  { %v2842_v30 = vpop.f32.mrf.mxu0  ;;  %v2934_v37 = vrot.slane %v2856_v55, 3 }
 0xf56   :  { %v2935_v40 = vsel %vm15243_vm14, %v2934_v37, %v2933_v32 }
 0xf57   :  { %v2937_v19 = vsel %vm15244_vm15, %v2936_v17, %v2935_v40 }
 0xf59   :  { %v2874_v61 = vpop.f32.mrf.mxu2 }
 0xf5a   :  { %v2888_v5 = vpop.f32.mrf.mxu3 }
 0xf5b   :  { %v2858_v22 = vpop.f32.mrf.mxu1  ;;  %v2938_v27 = vrot.slane %v2888_v5, 1 }
 0xf5d   :  { %v2939_v11 = vsel %vm15245_vm1, %v2938_v27, %v2937_v19 }
 0xf5e   :  { %v10261_v15 = vpack.i.bf16 %v2939_v11, %v12352_v24 }
 0xf60   :  { %10262 = vrot.lane.b32.xlu2 %v10261_v15, %s11529_s29 }
 0xf62   :  { %v2890_v4 = vpop.f32.mrf.mxu3 }
 0xfba   :  { %v12704_v44 = vpop.permute.xlu2 %10262 }
 0xfbb   :  { %v10265_v38 = vunpack.i.h.bf16 %v12704_v44  ;;  %v10264_v23 = vunpack.i.l.bf16 %v12704_v44 }
 0xfbd   :  { %v2943_v34 = vsel %vm215_vm0, %v2913_v18, %v10264_v23  ;;  %v2997_v18 = vpop.f32.mrf.mxu2 }
 0xfbe   :  { %v2944_v1 = vsel %vm682_vm9, %v2943_v34, %v10265_v38 }
 0xfbf   :  { %v2945_v59 = vsel %vm15246_vm2, %v2944_v1, %v12361_v9 }
 0xfc0   :  { %v2946_v6 = vpack.c.bf16 %v2945_v59, %v2945_v59 }
 0xfc2   :  { %2955 = vmatmul.bf16.vlgmr.msra.gmra.mxu0 %v2946_v6 }
 0xfc3   :  { %3393 = vmatpush.bf16.xpose.msra.mxu0 %v11855_v13 }
 0xfc5   :  { %v2999_v47 = vpop.f32.mrf.mxu2 }
0x103f   :  { %v2956_v24 = vpop.f32.mrf.mxu0 }
0x1040   :  { %10522 = vtanh.f32 %v2956_v24 }
0x1046   :  { %v10523_v0 = vpop.eup %10522 }
0x1047   :  { %v2963_v41 = vpack.c.bf16 %v10523_v0, %v10523_v0  ;;  %9700 = vst.msk [vmem:[#allocation14 + $0x8] sm:$0xff] %vm215_vm0, %v10523_v0  ;;  %v2958_v51 = vpop.f32.mrf.mxu0 }
0x1049   :  { %9959 = vmatmul.msk.bf16.vlgmr.msra.gmra.mxu1 %vm215_vm0, %v2963_v41 }
0x104a   :  { %3330 = vmatpush.bf16.xpose.msra.mxu1 %v11843_v63 }
0x10c6   :  { %v2976_v55 = vpop.f32.mrf.mxu1 }
0x10c7   :  { %v2980_v45 = vadd.f32 %v2976_v55, %v243_v16 }
0x10c9   :  { %v3002_v30 = vadd.f32 %v2997_v18, %v2980_v45  ;;  %v3003_v54 = vadd.f32 %v2999_v47, %v2980_v45 }
0x10cb   :  { %10524 = vtanh.f32 %v3002_v30  ;;  %v9962_v61 = vmul.f32 -1.442695, %v3003_v54  ;;  %v9961_v22 = vmul.f32 -1.442695, %v3002_v30 }
0x10cc   :  { %10526 = vtanh.f32 %v3003_v54 }
0x10cd   :  { %10528 = vpow2.f32 %v9962_v61 }
0x10ce   :  { %v2978_v37 = vpop.f32.mrf.mxu1 }
0x10d1   :  { %v10525_v32 = vpop.eup %10524 }
0x10d2   :  { %v10527_v40 = vpop.eup %10526  ;;  %3048 = vrot.lane.b32.xlu0 %v10525_v32, %s11529_s29 }
0x10d3   :  { %3050 = vrot.lane.b32.xlu2 %v10527_v40, %s11529_s29  ;;  %v10529_v17 = vpop.eup %10528 }
0x10d4   :  { %v3011_v5 = vadd.f32 1.0, %v10529_v17 }
0x10d6   :  { %10530 = vrcp.f32 %v3011_v5  ;;  %v3038_v34 = vand.u32 2147483648, %v3011_v5  ;;  %vm3032_vm11 = vweird.f32 %v3011_v5  ;;  %v3036_v1 = vand.u32 2147483647, %v3011_v5 }
0x10d7   :  { %10532 = vpow2.f32 %v9961_v22 }
0x10d8   :  { %v3039_v6 = vor.u32 1.1754944e-38, %v3038_v34  ;;  %vm3037_vm13 = vcmp.eq.f32.partialorder %v3036_v1, 8.507059e+37 }
0x10dc   :  { %v10531_v53 = vpop.eup %10530 }
0x10dd   :  { %v3028_v27 = vmul.f32 %v10531_v53, %v3011_v5  ;;  %v10533_v11 = vpop.eup %10532  ;;  %vm3033_vm4 = vweird.f32 %v10531_v53 }
0x10de   :  { %v3010_v4 = vadd.f32 1.0, %v10533_v11  ;;  %vm3034_vm12 = vmor %vm3032_vm11, %vm3033_vm4 }
0x10df   :  { %v3029_v19 = vsub.f32 1.0, %v3028_v27 }
0x10e0   :  { %10534 = vrcp.f32 %v3010_v4  ;;  %v3023_v45 = vand.u32 2147483648, %v3010_v4  ;;  %vm3017_vm15 = vweird.f32 %v3010_v4  ;;  %v3021_v47 = vand.u32 2147483647, %v3010_v4 }
0x10e1   :  { %v3030_v15 = vmul.f32 %v10531_v53, %v3029_v19 }
0x10e2   :  { %v3024_v54 = vor.u32 1.1754944e-38, %v3023_v45  ;;  %vm3022_vm2 = vcmp.eq.f32.partialorder %v3021_v47, 8.507059e+37 }
0x10e3   :  { %v3031_v38 = vadd.f32 %v10531_v53, %v3030_v15 }
0x10e5   :  { %v3035_v59 = vsel %vm3034_vm12, %v10531_v53, %v3031_v38 }
0x10e6   :  { %v3040_v0 = vsel %vm3037_vm13, %v3039_v6, %v3035_v59  ;;  %v10535_v41 = vpop.eup %10534 }
0x10e7   :  { %v3013_v18 = vmul.f32 %v10535_v41, %v3010_v4  ;;  %vm3018_vm14 = vweird.f32 %v10535_v41  ;;  %v3045_v61 = vmul.f32 %v3040_v0, %v12316_v36 }
0x10e8   :  { %vm3019_vm1 = vmor %vm3017_vm15, %vm3018_vm14 }
0x10e9   :  { %v3014_v20 = vsub.f32 1.0, %v3013_v18  ;;  %v11155_v18 = vld [vmem:[%s15202_s12] ss:$0 sm:$0xff] }
0x10eb   :  { %v3015_v16 = vmul.f32 %v10535_v41, %v3014_v20 }
0x10ed   :  { %v3016_v55 = vadd.f32 %v10535_v41, %v3015_v16 }
0x10ef   :  { %v3020_v30 = vsel %vm3019_vm1, %v10535_v41, %v3016_v55 }
0x10f0   :  { %v3025_v32 = vsel %vm3022_vm2, %v3024_v54, %v3020_v30 }
0x10f1   :  { %v3044_v22 = vmul.f32 %v3025_v32, %v12309_v33 }
0x112d   :  { %v3051_v24 = vpop.permute.xlu2 %3050 }
0x112e   :  { %v3055_v51 = vmul.f32 %v3051_v24, %v3040_v0 }
0x1130   :  { %3060 = vrot.lane.b32.xlu1 %v3055_v51, %s11536_s7 }
0x1144   :  { %v3049_v37 = vpop.permute.xlu0 %3048 }
0x1145   :  { %v3054_v40 = vmul.f32 %v3049_v37, %v3025_v32 }
0x1147   :  { %3058 = vrot.lane.b32.xlu0 %v3054_v40, %s11536_s7 }
0x11a2   :  { %v3061_v17 = vpop.permute.xlu1 %3060 }
0x11a3   :  { %v12727_v5 = vadd.f32 %v3061_v17, %v3045_v61 }
0x11a5   :  { %10536 = vtanh.f32 %v12727_v5 }
0x11ab   :  { %v10537_v53 = vpop.eup %10536 }
0x11ac   :  { %3072 = vrot.lane.b32.xlu0 %v10537_v53, %s11529_s29 }
0x11b9   :  { %v3059_v27 = vpop.permute.xlu0 %3058 }
0x11ba   :  { %v12732_v19 = vadd.f32 %v3059_v27, %v3044_v22 }
0x11bc   :  { %10538 = vtanh.f32 %v12732_v19 }
0x11c2   :  { %v10539_v11 = vpop.eup %10538 }
0x11c3   :  { %3070 = vrot.lane.b32.xlu2 %v10539_v11, %s11529_s29 }
0x11cb   :  { %3086 = vrot.lane.b32.xlu2 %v12361_v9, %s11529_s29 }
0x121d   :  { %v3071_v36 = vpop.permute.xlu2 %3070 }
0x121e   :  { %v12738_v15 = vmul.f32 %v3071_v36, %v3025_v32  ;;  %v3073_v4 = vpop.permute.xlu0 %3072 }
0x121f   :  { %v12740_v38 = vmul.f32 %v3073_v4, %v3040_v0 }
0x1221   :  { %v10266_v33 = vpack.i.bf16 %v12740_v38, %v12738_v15 }
0x1223   :  { %10267 = vrot.lane.b32.xlu1 %v10266_v33, %s11536_s7 }
0x1225   :  { %v3087_v24 = vpop.permute.xlu2 %3086 }
0x1295   :  { %v10268_v1 = vpop.permute.xlu1 %10267 }
0x1296   :  { %v10270_v59 = vunpack.i.h.bf16 %v10268_v1  ;;  %v10269_v6 = vunpack.i.l.bf16 %v10268_v1 }
0x1298   :  { %v3090_v9 = vsel %vm215_vm0, %v10270_v59, %v3087_v24  ;;  %v3089_v41 = vsel %vm215_vm0, %v10269_v6, %v10264_v23 }
0x1299   :  { %v3091_v0 = vpack.c.bf16 %v3090_v9, %v3089_v41 }
0x129b   :  { %9963 = vmatmul.msk.bf16.vlgmr.msrb.gmra.mxu3 %vm682_vm9, %v3091_v0 }
0x129c   :  { %3372 = vmatpush.bf16.xpose.msrb.mxu3 %v11851_v8 }
0x131e   :  { %v3104_v51 = vpop.f32.mrf.mxu3 }
0x131f   :  { %v3109_v20 = vadd.f32 %v11155_v18, %v3104_v51 }
0x1321   :  { %10540 = vtanh.f32 %v3109_v20  ;;  %v9964_v23 = vmul.f32 -1.442695, %v3109_v20 }
0x1326   :  { %v3106_v16 = vpop.f32.mrf.mxu3 }
0x1327   :  { %v10541_v55 = vpop.eup %10540  ;;  %v3110_v45 = vadd.f32 %v11155_v18, %v3106_v16 }
0x1328   :  { %3155 = vrot.lane.b32.xlu0 %v10541_v55, %s11529_s29 }
0x1329   :  { %10542 = vtanh.f32 %v3110_v45  ;;  %v9965_v47 = vmul.f32 -1.442695, %v3110_v45 }
0x132a   :  { %10544 = vpow2.f32 %v9964_v23 }
0x132b   :  { %10546 = vpow2.f32 %v9965_v47 }
0x132f   :  { %v10543_v44 = vpop.eup %10542 }
0x1330   :  { %3157 = vrot.lane.b32.xlu1 %v10543_v44, %s11529_s29  ;;  %v10545_v30 = vpop.eup %10544 }
0x1331   :  { %v3117_v54 = vadd.f32 1.0, %v10545_v30  ;;  %v10547_v37 = vpop.eup %10546 }
0x1332   :  { %v3118_v32 = vadd.f32 1.0, %v10547_v37 }
0x1333   :  { %10548 = vrcp.f32 %v3117_v54  ;;  %v3130_v4 = vand.u32 2147483648, %v3117_v54  ;;  %vm3124_vm11 = vweird.f32 %v3117_v54  ;;  %v3128_v33 = vand.u32 2147483647, %v3117_v54 }
0x1334   :  { %10550 = vrcp.f32 %v3118_v32  ;;  %v3145_v51 = vand.u32 2147483648, %v3118_v32  ;;  %vm3139_vm15 = vweird.f32 %v3118_v32  ;;  %v3143_v18 = vand.u32 2147483647, %v3118_v32 }
0x1335   :  { %v3131_v6 = vor.u32 1.1754944e-38, %v3130_v4  ;;  %vm3129_vm13 = vcmp.eq.f32.partialorder %v3128_v33, 8.507059e+37 }
0x1336   :  { %v3146_v16 = vor.u32 1.1754944e-38, %v3145_v51  ;;  %vm3144_vm2 = vcmp.eq.f32.partialorder %v3143_v18, 8.507059e+37 }
0x1339   :  { %v10549_v40 = vpop.eup %10548 }
0x133a   :  { %v3120_v61 = vmul.f32 %v10549_v40, %v3117_v54  ;;  %v10551_v53 = vpop.eup %10550  ;;  %vm3125_vm4 = vweird.f32 %v10549_v40 }
0x133b   :  { %v3135_v27 = vmul.f32 %v10551_v53, %v3118_v32  ;;  %vm3126_vm12 = vmor %vm3124_vm11, %vm3125_vm4  ;;  %vm3140_vm14 = vweird.f32 %v10551_v53  ;;  %vm15253_vm4 = vcmask 1045509   ;;  %vm15254_vm11 = vcmask 1046534  }
0x133c   :  { %v3121_v17 = vsub.f32 1.0, %v3120_v61  ;;  %vm3141_vm1 = vmor %vm3139_vm15, %vm3140_vm14 }
0x133d   :  { %v3136_v36 = vsub.f32 1.0, %v3135_v27  ;;  %vm15257_vm14 = vmmov %vm15254_vm11 }
0x133e   :  { %v3122_v22 = vmul.f32 %v10549_v40, %v3121_v17 }
0x133f   :  { %v3137_v59 = vmul.f32 %v10551_v53, %v3136_v36 }
0x1340   :  { %v3123_v11 = vadd.f32 %v10549_v40, %v3122_v22 }
0x1341   :  { %v3138_v0 = vadd.f32 %v10551_v53, %v3137_v59 }
0x1342   :  { %v3127_v1 = vsel %vm3126_vm12, %v10549_v40, %v3123_v11  ;;  %vm15255_vm12 = vcmask 1047559  }
0x1343   :  { %v3132_v9 = vsel %vm3129_vm13, %v3131_v6, %v3127_v1  ;;  %v3142_v20 = vsel %vm3141_vm1, %v10551_v53, %v3138_v0  ;;  %vm15256_vm13 = vmmov %vm15253_vm4  ;;  %vm15259_vm1 = vcmask 785408  }
0x1344   :  { %v3147_v45 = vsel %vm3144_vm2, %v3146_v16, %v3142_v20  ;;  %v3151_v23 = vmul.f32 %v3132_v9, %v12343_v21  ;;  %vm15258_vm15 = vmmov %vm15255_vm12 }
0x1345   :  { %v3152_v37 = vmul.f32 %v3147_v45, %v12347_v52 }
0x139a   :  { %v3156_v24 = vpop.permute.xlu0 %3155 }
0x139b   :  { %v3161_v41 = vmul.f32 %v3156_v24, %v3132_v9 }
0x139d   :  { %3165 = vrot.lane.b32.xlu2 %v3161_v41, %s11536_s7 }
0x13a2   :  { %v3158_v55 = vpop.permute.xlu1 %3157 }
0x13a3   :  { %v3162_v44 = vmul.f32 %v3158_v55, %v3147_v45 }
0x13a5   :  { %3167 = vrot.lane.b32.xlu0 %v3162_v44, %s11536_s7 }
0x13f7   :  { %v3166_v47 = vpop.permute.xlu2 %3165 }
0x13f8   :  { %v12761_v30 = vadd.f32 %v3166_v47, %v3151_v23 }
0x13fa   :  { %10552 = vtanh.f32 %v12761_v30 }
0x1400   :  { %v10553_v54 = vpop.eup %10552 }
0x1401   :  { %3177 = vrot.lane.b32.xlu1 %v10553_v54, %s11529_s29 }
0x1417   :  { %v3168_v32 = vpop.permute.xlu0 %3167 }
0x1418   :  { %v12766_v40 = vadd.f32 %v3168_v32, %v3152_v37 }
0x141a   :  { %10554 = vtanh.f32 %v12766_v40 }
0x1420   :  { %v10555_v61 = vpop.eup %10554 }
0x1421   :  { %3179 = vrot.lane.b32.xlu2 %v10555_v61, %s11529_s29 }
0x1473   :  { %v3178_v17 = vpop.permute.xlu1 %3177 }
0x1474   :  { %v12770_v21 = vmul.f32 %v3178_v17, %v3132_v9 }
0x1476   :  { %v3215_v53 = vpack.c.bf16 %v12770_v21, %v12770_v21  ;;  %v3188_v22 = vrot.slane %v12770_v21, 2  ;;  %v3187_v27 = vrot.slane %v12770_v21, 1  ;;  %v3192_v52 = vrot.slane %v12770_v21, 6 }
0x1477   :  { %v3191_v11 = vrot.slane %v12770_v21, 5  ;;  %v3189_v1 = vrot.slane %v12770_v21, 3  ;;  %v3193_v54 = vrot.slane %v12770_v21, 7  ;;  %v3190_v37 = vrot.slane %v12770_v21, 4 }
0x1478   :  { %v3232_v36 = vunpack.c.l.b16 %v3215_v53  ;;  %v3217_v4 = vpack.c.bf16 %v3188_v22, %v3188_v22  ;;  %v3216_v33 = vpack.c.bf16 %v3187_v27, %v3187_v27  ;;  %v3221_v9 = vpack.c.bf16 %v3192_v52, %v3192_v52 }
0x1479   :  { %v3220_v0 = vpack.c.bf16 %v3191_v11, %v3191_v11  ;;  %v3218_v16 = vpack.c.bf16 %v3189_v1, %v3189_v1  ;;  %v3222_v53 = vpack.c.bf16 %v3193_v54, %v3193_v54  ;;  %v3219_v22 = vpack.c.bf16 %v3190_v37, %v3190_v37 }
0x147a   :  { %v3233_v59 = vpack.c.b16 %v3232_v36, %v3232_v36  ;;  %v3274_v6 = vunpack.c.l.b16 %v3217_v4  ;;  %v3253_v24 = vunpack.c.l.b16 %v3216_v33  ;;  %v3358_v55 = vunpack.c.l.b16 %v3221_v9 }
0x147b   :  { %v3180_v41 = vpop.permute.xlu2 %3179  ;;  %v3337_v23 = vunpack.c.l.b16 %v3220_v0  ;;  %v3295_v47 = vunpack.c.l.b16 %v3218_v16  ;;  %v3379_v11 = vunpack.c.l.b16 %v3222_v53  ;;  %v3316_v36 = vunpack.c.l.b16 %v3219_v22 }
0x147c   :  { %v12779_v51 = vmul.f32 %v3180_v41, %v3147_v45  ;;  %3234 = vrot.lane.b32.xlu2 %v3233_v59, %s11536_s7  ;;  %v3275_v18 = vpack.c.b16 %v3274_v6, %v3274_v6  ;;  %v3254_v20 = vpack.c.b16 %v3253_v24, %v3253_v24  ;;  %v3359_v45 = vpack.c.b16 %v3358_v55, %v3358_v55 }
0x147d   :  { %v3338_v61 = vpack.c.b16 %v3337_v23, %v3337_v23  ;;  %v3296_v17 = vpack.c.b16 %v3295_v47, %v3295_v47  ;;  %v3380_v59 = vpack.c.b16 %v3379_v11, %v3379_v11  ;;  %v3317_v6 = vpack.c.b16 %v3316_v36, %v3316_v36 }
0x147e   :  { %3276 = vrot.lane.b32.xlu1 %v3275_v18, %s11536_s7  ;;  %3255 = vrot.lane.b32.xlu0 %v3254_v20, %s11536_s7  ;;  %v3194_v44 = vrot.slane %v12779_v51, 1  ;;  %v3196_v52 = vrot.slane %v12779_v51, 3  ;;  %v3195_v4 = vrot.slane %v12779_v51, 2  ;;  %v3223_v24 = vpack.c.bf16 %v12779_v51, %v12779_v51 }
0x147f   :  { %v3197_v0 = vrot.slane %v12779_v51, 4  ;;  %v3199_v16 = vrot.slane %v12779_v51, 6  ;;  %v3198_v55 = vrot.slane %v12779_v51, 5  ;;  %v3200_v53 = vrot.slane %v12779_v51, 7 }
0x1480   :  { %v3224_v32 = vpack.c.bf16 %v3194_v44, %v3194_v44  ;;  %v3226_v1 = vpack.c.bf16 %v3196_v52, %v3196_v52  ;;  %v3225_v9 = vpack.c.bf16 %v3195_v4, %v3195_v4  ;;  %v3400_v18 = vunpack.c.l.b16 %v3223_v24 }
0x1481   :  { %v3227_v23 = vpack.c.bf16 %v3197_v0, %v3197_v0  ;;  %v3229_v37 = vpack.c.bf16 %v3199_v16, %v3199_v16  ;;  %v3230_v11 = vpack.c.bf16 %v3200_v53, %v3200_v53 }
0x1482   :  { %v3421_v27 = vunpack.c.l.b16 %v3224_v32  ;;  %v3463_v41 = vunpack.c.l.b16 %v3226_v1  ;;  %v3442_v20 = vunpack.c.l.b16 %v3225_v9  ;;  %v3401_v47 = vpack.c.b16 %v3400_v18, %v3400_v18 }
0x1483   :  { %v3484_v32 = vunpack.c.l.b16 %v3227_v23  ;;  %v3547_v36 = vunpack.c.l.b16 %v3230_v11 }
0x1484   :  { %3360 = vrot.lane.b32.xlu2 %v3359_v45, %s11536_s7  ;;  %v3422_v33 = vpack.c.b16 %v3421_v27, %v3421_v27  ;;  %v3464_v44 = vpack.c.b16 %v3463_v41, %v3463_v41  ;;  %v3443_v54 = vpack.c.b16 %v3442_v20, %v3442_v20  ;;  %v3228_v45 = vpack.c.bf16 %v3198_v55, %v3198_v55 }
0x1485   :  { %v3485_v22 = vpack.c.b16 %v3484_v32, %v3484_v32  ;;  %v3548_v4 = vpack.c.b16 %v3547_v36, %v3547_v36  ;;  %v15250_v32 = vld [vmem:[#allocation30_spill] sm:$0xff] }
0x1486   :  { %3339 = vrot.lane.b32.xlu1 %v3338_v61, %s11536_s7  ;;  %3297 = vrot.lane.b32.xlu0 %v3296_v17, %s11536_s7  ;;  %v3526_v61 = vunpack.c.l.b16 %v3229_v37  ;;  %v3505_v17 = vunpack.c.l.b16 %v3228_v45  ;;  %v15248_v37 = vld [vmem:[#allocation27_spill] sm:$0xff]  ;;  %v15249_v45 = vld [vmem:[#allocation28_spill] sm:$0xff] }
0x1488   :  { %v3527_v27 = vpack.c.b16 %v3526_v61, %v3526_v61  ;;  %v3506_v52 = vpack.c.b16 %v3505_v17, %v3505_v17  ;;  %v15251_v17 = vld [vmem:[#allocation29_spill] sm:$0xff] }
0x148c   :  { %3423 = vrot.lane.b32.xlu2 %v3422_v33, %s11536_s7 }
0x148e   :  { %3381 = vrot.lane.b32.xlu1 %v3380_v59, %s11536_s7  ;;  %3318 = vrot.lane.b32.xlu0 %v3317_v6, %s11536_s7 }
0x1494   :  { %3465 = vrot.lane.b32.xlu2 %v3464_v44, %s11536_s7  ;;  %v15247_v44 = vld [vmem:[#allocation25_spill] sm:$0xff] }
0x1496   :  { %3402 = vrot.lane.b32.xlu1 %v3401_v47, %s11536_s7  ;;  %3444 = vrot.lane.b32.xlu0 %v3443_v54, %s11536_s7 }
0x149c   :  { %3486 = vrot.lane.b32.xlu2 %v3485_v22, %s11536_s7  ;;  %v11156_v22 = vld [vmem:[%s15196_s6] sm:$0x1] }
0x149e   :  { %3528 = vrot.lane.b32.xlu1 %v3527_v27, %s11536_s7  ;;  %3507 = vrot.lane.b32.xlu0 %v3506_v52, %s11536_s7 }
0x14a6   :  { %3549 = vrot.lane.b32.xlu0 %v3548_v4, %s11536_s7 }
0x14d6   :  { %v3235_v33 = vpop.permute.xlu2 %3234 }
0x14d7   :  { %9966 = vmatmul.msk.bf16.vlgmr.msrb.gmra.mxu1 %vm215_vm0, %v3235_v33  ;;  %v11157_v33 = vld [vmem:[%s15196_s6 + $0x1] sm:$0x1] }
0x14d8   :  { %3414 = vmatpush.bf16.xpose.msrb.mxu1 %v11864_v28 }
0x14de   :  { %v3361_v41 = vpop.permute.xlu2 %3360 }
0x14e6   :  { %v3424_v18 = vpop.permute.xlu2 %3423 }
0x14ee   :  { %v3466_v55 = vpop.permute.xlu2 %3465 }
0x14f0   :  { %v3277_v1 = vpop.permute.xlu1 %3276  ;;  %v3256_v59 = vpop.permute.xlu0 %3255 }
0x14f1   :  { %9967 = vmatmul.msk.bf16.vlgmr.msrb.gmra.mxu2 %vm215_vm0, %v3256_v59  ;;  %9968 = vmatmul.msk.bf16.vlgmr.msra.gmra.mxu3 %vm215_vm0, %v3277_v1  ;;  %v11158_v59 = vld [vmem:[%s15196_s6 + $0x2] sm:$0x1] }
0x14f2   :  { %3435 = vmatpush.bf16.xpose.msrb.mxu2 %v11858_v14  ;;  %3456 = vmatpush.bf16.xpose.msra.mxu3 %v11874_v35 }
0x14f6   :  { %v3487_v47 = vpop.permute.xlu2 %3486 }
0x14f8   :  { %v3298_v6 = vpop.permute.xlu0 %3297  ;;  %v3340_v24 = vpop.permute.xlu1 %3339 }
0x14f9   :  { %9969 = vmatmul.msk.bf16.vlgmr.msrb.gmra.mxu0 %vm215_vm0, %v3298_v6 }
0x14fa   :  { %3477 = vmatpush.bf16.xpose.msrb.mxu0 %v11868_v31 }
0x1500   :  { %v3319_v9 = vpop.permute.xlu0 %3318  ;;  %v3382_v0 = vpop.permute.xlu1 %3381 }
0x1501   :  { %9970 = vmatmul.msk.bf16.vlgmr.msra.gmra.mxu1 %vm215_vm0, %v3319_v9  ;;  %9971 = vmatmul.msk.bf16.vlgmr.msra.gmra.mxu2 %vm215_vm0, %v3340_v24 }
0x1502   :  { %9972 = vmatmul.msk.bf16.vlgmr.msrb.gmra.mxu3 %vm215_vm0, %v3361_v41  ;;  %3498 = vmatpush.bf16.xpose.msra.mxu1 %v11881_v42 }
0x1503   :  { %3519 = vmatpush.bf16.xpose.msra.mxu2 %v11884_v43  ;;  %3540 = vmatpush.bf16.xpose.msrb.mxu3 %v11898_v48 }
0x1508   :  { %v3403_v20 = vpop.permute.xlu1 %3402  ;;  %v3445_v16 = vpop.permute.xlu0 %3444 }
0x1509   :  { %9973 = vmatmul.msk.bf16.vlgmr.msra.gmra.mxu0 %vm215_vm0, %v3382_v0  ;;  %v11159_v0 = vld [vmem:[%s15196_s6 + $0x3] sm:$0x1] }
0x150a   :  { %3561 = vmatpush.bf16.xpose.msra.mxu0 %v11891_v46 }
0x1510   :  { %v3508_v23 = vpop.permute.xlu0 %3507  ;;  %v3529_v54 = vpop.permute.xlu1 %3528 }
0x1511   :  { %9974 = vmatmul.msk.bf16.vlgmr.msrb.gmra.mxu1 %vm215_vm0, %v3403_v20  ;;  %9975 = vmatmul.msk.bf16.vlgmr.msrb.gmra.mxu2 %vm215_vm0, %v3424_v18 }
0x1512   :  { %9976 = vmatmul.msk.bf16.vlgmr.msra.gmra.mxu3 %vm215_vm0, %v3445_v16  ;;  %3769 = vmatpush.bf16.msrb.mxu1 %v12126_v12 }
0x1513   :  { %3785 = vmatpush.bf16.msrb.mxu2 %v12115_v25  ;;  %3801 = vmatpush.bf16.msra.mxu3 %v12142_v26 }
0x1518   :  { %v3550_v61 = vpop.permute.xlu0 %3549 }
0x1519   :  { %9977 = vmatmul.msk.bf16.vlgmr.msrb.gmra.mxu0 %vm215_vm0, %v3466_v55 }
0x151a   :  { %3817 = vmatpush.bf16.msrb.mxu0 %v15247_v44 }
0x1521   :  { %9978 = vmatmul.msk.bf16.vlgmr.msra.gmra.mxu1 %vm215_vm0, %v3487_v47  ;;  %9979 = vmatmul.msk.bf16.vlgmr.msra.gmra.mxu2 %vm215_vm0, %v3508_v23 }
0x1522   :  { %9980 = vmatmul.msk.bf16.vlgmr.msrb.gmra.mxu3 %vm215_vm0, %v3529_v54  ;;  %3833 = vmatpush.bf16.msra.mxu1 %v15248_v37  ;;  %v11160_v54 = vld [vmem:[%s15196_s6 + $0x4] sm:$0x1] }
0x1523   :  { %3849 = vmatpush.bf16.msra.mxu2 %v15249_v45  ;;  %3865 = vmatpush.bf16.msrb.mxu3 %v15250_v32 }
0x1529   :  { %9981 = vmatmul.msk.bf16.vlgmr.msra.gmra.mxu0 %vm215_vm0, %v3550_v61 }
0x152a   :  { %3881 = vmatpush.bf16.msra.mxu0 %v15251_v17 }
0x1554   :  { %v3248_v53 = vpop.f32.mrf.mxu1 }
0x1555   :  { %v12843_v27 = vadd.f32 %v11156_v22, %v3248_v53  ;;  %v11161_v22 = vld [vmem:[%s15196_s6 + $0x5] sm:$0x1] }
0x1557   :  { %v3567_v52 = vsel %vm1214_vm3, %v12843_v27, -inf }
0x1558   :  { %3568 = vmax.xlane.f32.xlu0 %v3567_v52 }
0x155c   :  { %v3250_v11 = vpop.f32.mrf.mxu1 }
0x1574   :  { %v3269_v36 = vpop.f32.mrf.mxu2  ;;  %v3290_v4 = vpop.f32.mrf.mxu3 }
0x1575   :  { %v12850_v1 = vadd.f32 %v11157_v33, %v3269_v36  ;;  %v12855_v6 = vadd.f32 %v11158_v59, %v3290_v4  ;;  %v11162_v36 = vld [vmem:[%s15196_s6 + $0x6] sm:$0x1] }
0x1576   :  { %v3311_v24 = vpop.f32.mrf.mxu0 }
0x1577   :  { %v3570_v9 = vsel %vm1214_vm3, %v12850_v1, -inf  ;;  %v3573_v41 = vsel %vm1214_vm3, %v12855_v6, -inf  ;;  %v12864_v18 = vadd.f32 %v11159_v0, %v3311_v24  ;;  %v11163_v0 = vld [vmem:[%s15196_s6 + $0x7] sm:$0x1] }
0x1578   :  { %3571 = vmax.xlane.f32.xlu1 %v3570_v9  ;;  %3574 = vmax.xlane.f32.xlu2 %v3573_v41 }
0x1579   :  { %v3576_v47 = vsel %vm1214_vm3, %v12864_v18, -inf }
0x157c   :  { %v3271_v20 = vpop.f32.mrf.mxu2  ;;  %v3292_v16 = vpop.f32.mrf.mxu3 }
0x157e   :  { %v3313_v55 = vpop.f32.mrf.mxu0  ;;  %v3332_v23 = vpop.f32.mrf.mxu1 }
0x157f   :  { %v12871_v61 = vadd.f32 %v11160_v54, %v3332_v23 }
0x1580   :  { %3577 = vmax.xlane.f32.xlu1 %v3576_v47 }
0x1581   :  { %v3579_v9 = vsel %vm1214_vm3, %v12871_v61, -inf }
0x1584   :  { %v3353_v53 = vpop.f32.mrf.mxu2 }
0x1585   :  { %v12876_v52 = vadd.f32 %v11161_v22, %v3353_v53  ;;  %v3374_v11 = vpop.f32.mrf.mxu3  ;;  %v11164_v53 = vld [vmem:[%s15196_s6 + $0x8] sm:$0x1] }
0x1586   :  { %v12881_v4 = vadd.f32 %v11162_v36, %v3374_v11  ;;  %v3334_v33 = vpop.f32.mrf.mxu1  ;;  %v3395_v59 = vpop.f32.mrf.mxu0  ;;  %v11165_v36 = vld [vmem:[%s15196_s6 + $0x9] sm:$0x1] }
0x1587   :  { %v3582_v24 = vsel %vm1214_vm3, %v12876_v52, -inf  ;;  %v12892_v20 = vadd.f32 %v11163_v0, %v3395_v59 }
0x1588   :  { %3583 = vmax.xlane.f32.xlu2 %v3582_v24  ;;  %3580 = vmax.xlane.f32.xlu1 %v3579_v9  ;;  %v3585_v41 = vsel %vm1214_vm3, %v12881_v4, -inf  ;;  %v11166_v24 = vld [vmem:[%s15196_s6 + $0xa] sm:$0x1] }
0x1589   :  { %3586 = vmax.xlane.f32.xlu0 %v3585_v41  ;;  %v3588_v54 = vsel %vm1214_vm3, %v12892_v20, -inf }
0x158c   :  { %v3355_v16 = vpop.f32.mrf.mxu2 }
0x158d   :  { %v3376_v55 = vpop.f32.mrf.mxu3 }
0x158e   :  { %v3397_v23 = vpop.f32.mrf.mxu0  ;;  %v3416_v47 = vpop.f32.mrf.mxu1 }
0x158f   :  { %v12899_v22 = vadd.f32 %v11164_v53, %v3416_v47  ;;  %v11167_v47 = vld [vmem:[%s15196_s6 + $0xb] sm:$0x1] }
0x1590   :  { %3589 = vmax.xlane.f32.xlu2 %v3588_v54 }
0x1591   :  { %v3591_v16 = vsel %vm1214_vm3, %v12899_v22, -inf }
0x1594   :  { %v3437_v11 = vpop.f32.mrf.mxu2 }
0x1595   :  { %v12904_v33 = vadd.f32 %v11165_v36, %v3437_v11  ;;  %v3458_v59 = vpop.f32.mrf.mxu3 }
0x1596   :  { %v12909_v9 = vadd.f32 %v11166_v24, %v3458_v59  ;;  %v3418_v41 = vpop.f32.mrf.mxu1  ;;  %v3479_v0 = vpop.f32.mrf.mxu0 }
0x1597   :  { %v3594_v55 = vsel %vm1214_vm3, %v12904_v33, -inf  ;;  %v12920_v54 = vadd.f32 %v11167_v47, %v3479_v0  ;;  %v11169_v0 = vld [vmem:[%s15196_s6 + $0xe] sm:$0x1] }
0x1598   :  { %3592 = vmax.xlane.f32.xlu2 %v3591_v16  ;;  %v3597_v23 = vsel %vm1214_vm3, %v12909_v9, -inf  ;;  %3595 = vmax.xlane.f32.xlu0 %v3594_v55  ;;  %v11168_v16 = vld [vmem:[%s15196_s6 + $0xd] sm:$0x1] }
0x1599   :  { %3598 = vmax.xlane.f32.xlu1 %v3597_v23  ;;  %v3600_v24 = vsel %vm1214_vm3, %v12920_v54, -inf }
0x159c   :  { %v3439_v53 = vpop.f32.mrf.mxu2 }
0x159d   :  { %v3460_v11 = vpop.f32.mrf.mxu3 }
0x159e   :  { %v3481_v36 = vpop.f32.mrf.mxu0  ;;  %v3500_v59 = vpop.f32.mrf.mxu1 }
0x15a0   :  { %3601 = vmax.xlane.f32.xlu0 %v3600_v24 }
0x15a4   :  { %v3521_v41 = vpop.f32.mrf.mxu2 }
0x15a5   :  { %v12927_v55 = vadd.f32 %v11168_v16, %v3521_v41  ;;  %v3542_v23 = vpop.f32.mrf.mxu3  ;;  %v11170_v41 = vld [vmem:[%s15196_s6 + $0xc] sm:$0x1] }
0x15a6   :  { %v12932_v47 = vadd.f32 %v11169_v0, %v3542_v23  ;;  %v3502_v53 = vpop.f32.mrf.mxu1  ;;  %v3563_v11 = vpop.f32.mrf.mxu0  ;;  %v12941_v16 = vadd.f32 %v11170_v41, %v3500_v59 }
0x15a7   :  { %v3606_v36 = vsel %vm1214_vm3, %v12927_v55, -inf }
0x15a8   :  { %v3609_v24 = vsel %vm1214_vm3, %v12932_v47, -inf  ;;  %3607 = vmax.xlane.f32.xlu1 %v3606_v36  ;;  %v3603_v0 = vsel %vm1214_vm3, %v12941_v16, -inf }
0x15a9   :  { %3610 = vmax.xlane.f32.xlu2 %v3609_v24 }
0x15ac   :  { %v3523_v34 = vpop.f32.mrf.mxu2 }
0x15ad   :  { %v3544_v17 = vpop.f32.mrf.mxu3 }
0x15ae   :  { %v3565_v23 = vpop.f32.mrf.mxu0 }
0x15b0   :  { %3604 = vmax.xlane.f32.xlu1 %v3603_v0 }
0x15cb   :  { %v3569_v53 = vpop.xlane.xlu0 %3568 }
0x15cc   :  { %v3615_v45 = vsub.f32 %v12843_v27, %v3569_v53 }
0x15ce   :  { %v3631_v32 = vmul.f32 1.442695, %v3615_v45 }
0x15d0   :  { %10556 = vpow2.f32 %v3631_v32 }
0x15d6   :  { %v12946_v36 = vpop.eup %10556 }
0x15d7   :  { %v3663_v24 = vsel %vm1214_vm3, %v12946_v36, 0.0 }
0x15d8   :  { %3664 = vadd.xlane.f32.xlu1 %v3663_v24 }
0x15eb   :  { %v3572_v59 = vpop.xlane.xlu1 %3571  ;;  %v3575_v41 = vpop.xlane.xlu2 %3574 }
0x15ec   :  { %v3616_v34 = vsub.f32 %v12850_v1, %v3572_v59  ;;  %v3617_v17 = vsub.f32 %v12855_v6, %v3575_v41 }
0x15ee   :  { %v3633_v23 = vmul.f32 1.442695, %v3616_v34  ;;  %v3635_v37 = vmul.f32 1.442695, %v3617_v17 }
0x15f0   :  { %10558 = vpow2.f32 %v3633_v23 }
0x15f1   :  { %10560 = vpow2.f32 %v3635_v37  ;;  %v11171_v37 = vld [vmem:[%s15196_s6 + $0xf] sm:$0x1] }
0x15f2   :  { %v12964_v6 = vadd.f32 %v11171_v37, %v3563_v11 }
0x15f3   :  { %v3578_v0 = vpop.xlane.xlu1 %3577 }
0x15f4   :  { %v3618_v45 = vsub.f32 %v12864_v18, %v3578_v0 }
0x15f6   :  { %v12953_v32 = vpop.eup %10558  ;;  %v3637_v27 = vmul.f32 1.442695, %v3618_v45 }
0x15f7   :  { %v12955_v53 = vpop.eup %10560  ;;  %v3666_v24 = vsel %vm1214_vm3, %v12953_v32, 0.0 }
0x15f8   :  { %10562 = vpow2.f32 %v3637_v27  ;;  %3667 = vadd.xlane.f32.xlu0 %v3666_v24  ;;  %v3669_v1 = vsel %vm1214_vm3, %v12955_v53, 0.0 }
0x15f9   :  { %3670 = vadd.xlane.f32.xlu2 %v3669_v1  ;;  %v3612_v1 = vsel %vm1214_vm3, %v12964_v6, -inf }
0x15fb   :  { %v3581_v18 = vpop.xlane.xlu1 %3580  ;;  %v3584_v59 = vpop.xlane.xlu2 %3583 }
0x15fc   :  { %v3619_v41 = vsub.f32 %v12871_v61, %v3581_v18  ;;  %v3587_v34 = vpop.xlane.xlu0 %3586  ;;  %v3620_v17 = vsub.f32 %v12876_v52, %v3584_v59 }
0x15fd   :  { %v3621_v23 = vsub.f32 %v12881_v4, %v3587_v34 }
0x15fe   :  { %v12969_v0 = vpop.eup %10562  ;;  %v3639_v45 = vmul.f32 1.442695, %v3619_v41  ;;  %v3641_v27 = vmul.f32 1.442695, %v3620_v17 }
0x15ff   :  { %v3643_v24 = vmul.f32 1.442695, %v3621_v23  ;;  %v3672_v11 = vsel %vm1214_vm3, %v12969_v0, 0.0 }
0x1600   :  { %10564 = vpow2.f32 %v3639_v45  ;;  %3613 = vmax.xlane.f32.xlu0 %v3612_v1 }
0x1601   :  { %10566 = vpow2.f32 %v3643_v24  ;;  %3673 = vadd.xlane.f32.xlu2 %v3672_v11 }
0x1602   :  { %10568 = vpow2.f32 %v3641_v27 }
0x1603   :  { %v3590_v61 = vpop.xlane.xlu2 %3589 }
0x1604   :  { %v3622_v52 = vsub.f32 %v12892_v20, %v3590_v61 }
0x1606   :  { %v12976_v4 = vpop.eup %10564  ;;  %v3645_v37 = vmul.f32 1.442695, %v3622_v52 }
0x1607   :  { %v12978_v18 = vpop.eup %10566  ;;  %v3675_v59 = vsel %vm1214_vm3, %v12976_v4, 0.0 }
0x1608   :  { %v12982_v41 = vpop.eup %10568  ;;  %10570 = vpow2.f32 %v3645_v37  ;;  %v3681_v34 = vsel %vm1214_vm3, %v12978_v18, 0.0 }
0x1609   :  { %3682 = vadd.xlane.f32.xlu1 %v3681_v34  ;;  %3676 = vadd.xlane.f32.xlu2 %v3675_v59  ;;  %v3678_v17 = vsel %vm1214_vm3, %v12982_v41, 0.0 }
0x160a   :  { %3679 = vadd.xlane.f32.xlu0 %v3678_v17 }
0x160b   :  { %v3596_v20 = vpop.xlane.xlu0 %3595  ;;  %v3593_v23 = vpop.xlane.xlu2 %3592 }
0x160c   :  { %v3599_v45 = vpop.xlane.xlu1 %3598  ;;  %v3624_v27 = vsub.f32 %v12904_v33, %v3596_v20  ;;  %v3623_v24 = vsub.f32 %v12899_v22, %v3593_v23 }
0x160d   :  { %v3625_v1 = vsub.f32 %v12909_v9, %v3599_v45 }
0x160e   :  { %v12991_v11 = vpop.eup %10570  ;;  %v3649_v61 = vmul.f32 1.442695, %v3624_v27  ;;  %v3647_v52 = vmul.f32 1.442695, %v3623_v24 }
0x160f   :  { %v3651_v37 = vmul.f32 1.442695, %v3625_v1  ;;  %v3684_v59 = vsel %vm1214_vm3, %v12991_v11, 0.0 }
0x1610   :  { %10572 = vpow2.f32 %v3649_v61 }
0x1611   :  { %10574 = vpow2.f32 %v3651_v37 }
0x1612   :  { %10576 = vpow2.f32 %v3647_v52  ;;  %3685 = vadd.xlane.f32.xlu0 %v3684_v59 }
0x1613   :  { %v3602_v34 = vpop.xlane.xlu0 %3601 }
0x1614   :  { %v3626_v17 = vsub.f32 %v12920_v54, %v3602_v34 }
0x1616   :  { %v12996_v33 = vpop.eup %10572  ;;  %v3653_v22 = vmul.f32 1.442695, %v3626_v17 }
0x1617   :  { %v12998_v20 = vpop.eup %10574  ;;  %v3690_v9 = vsel %vm1214_vm3, %v12996_v33, 0.0 }
0x1618   :  { %v13002_v23 = vpop.eup %10576  ;;  %10578 = vpow2.f32 %v3653_v22  ;;  %3691 = vadd.xlane.f32.xlu1 %v3690_v9  ;;  %v3693_v45 = vsel %vm1214_vm3, %v12998_v20, 0.0 }
0x1619   :  { %3694 = vadd.xlane.f32.xlu2 %v3693_v45  ;;  %v3687_v27 = vsel %vm1214_vm3, %v13002_v23, 0.0 }
0x161a   :  { %3688 = vadd.xlane.f32.xlu0 %v3687_v27 }
0x161b   :  { %v3608_v54 = vpop.xlane.xlu1 %3607 }
0x161c   :  { %v3628_v24 = vsub.f32 %v12927_v55, %v3608_v54  ;;  %v3611_v1 = vpop.xlane.xlu2 %3610 }
0x161d   :  { %v3629_v61 = vsub.f32 %v12932_v47, %v3611_v1 }
0x161e   :  { %v13010_v52 = vpop.eup %10578  ;;  %v3657_v37 = vmul.f32 1.442695, %v3628_v24 }
0x161f   :  { %v3659_v59 = vmul.f32 1.442695, %v3629_v61  ;;  %v3696_v34 = vsel %vm1214_vm3, %v13010_v52, 0.0 }
0x1620   :  { %10580 = vpow2.f32 %v3657_v37  ;;  %3697 = vadd.xlane.f32.xlu1 %v3696_v34 }
0x1621   :  { %10582 = vpow2.f32 %v3659_v59 }
0x1623   :  { %v3605_v17 = vpop.xlane.xlu1 %3604 }
0x1624   :  { %v3627_v22 = vsub.f32 %v12941_v16, %v3605_v17  ;;  %v15252_v16 = vpack.c.bf16 %v12740_v38, %v12738_v15 }
0x1626   :  { %v13015_v9 = vpop.eup %10580  ;;  %v3655_v45 = vmul.f32 1.442695, %v3627_v22 }
0x1627   :  { %v13017_v55 = vpop.eup %10582  ;;  %v3702_v47 = vsel %vm1214_vm3, %v13015_v9, 0.0 }
0x1628   :  { %10584 = vpow2.f32 %v3655_v45  ;;  %3703 = vadd.xlane.f32.xlu2 %v3702_v47  ;;  %v3705_v27 = vsel %vm1214_vm3, %v13017_v55, 0.0 }
0x1629   :  { %3706 = vadd.xlane.f32.xlu0 %v3705_v27 }
0x162e   :  { %v13023_v54 = vpop.eup %10584 }
0x162f   :  { %v3699_v24 = vsel %vm1214_vm3, %v13023_v54, 0.0 }
0x1630   :  { %3700 = vadd.xlane.f32.xlu1 %v3699_v24 }
0x1649   :  { %4106 = vrot.lane.b32.xlu1 %v15252_v16, %s11536_s7 }
0x164b   :  { %v3665_v1 = vpop.xlane.xlu1 %3664 }
0x164c   :  { %10586 = vrcp.f32 %v3665_v1 }
0x1652   :  { %v10587_v61 = vpop.eup %10586 }
0x1653   :  { %v3727_v37 = vmul.f32 %v10587_v61, %v12946_v36 }
0x1655   :  { %v3743_v59 = vpack.c.bf16 %v3727_v37, %v3727_v37 }
0x1657   :  { %9982 = vmatmul.msk.bf16.vlgmr.msrb.gmra.mxu1 %vm1407_vm5, %v3743_v59 }
0x1658   :  { %3897 = vmatpush.bf16.msrb.mxu1 %v12177_v39 }
0x166b   :  { %v3668_v34 = vpop.xlane.xlu0 %3667 }
0x166c   :  { %10588 = vrcp.f32 %v3668_v34  ;;  %v3671_v17 = vpop.xlane.xlu2 %3670 }
0x166d   :  { %10590 = vrcp.f32 %v3671_v17 }
0x1672   :  { %v10589_v22 = vpop.eup %10588 }
0x1673   :  { %v10591_v45 = vpop.eup %10590  ;;  %v3728_v47 = vmul.f32 %v10589_v22, %v12953_v32  ;;  %v3614_v15 = vpop.xlane.xlu0 %3613 }
0x1674   :  { %v3729_v38 = vmul.f32 %v10591_v45, %v12955_v53  ;;  %v3630_v27 = vsub.f32 %v12964_v6, %v3614_v15  ;;  %v3674_v24 = vpop.xlane.xlu2 %3673 }
0x1675   :  { %v3744_v36 = vpack.c.bf16 %v3728_v47, %v3728_v47  ;;  %10592 = vrcp.f32 %v3674_v24 }
0x1676   :  { %v3745_v16 = vpack.c.bf16 %v3729_v38, %v3729_v38  ;;  %v3661_v1 = vmul.f32 1.442695, %v3630_v27 }
0x1677   :  { %9983 = vmatmul.msk.bf16.vlgmr.msrb.gmra.mxu2 %vm1407_vm5, %v3744_v36 }
0x1678   :  { %10594 = vpow2.f32 %v3661_v1  ;;  %9984 = vmatmul.msk.bf16.vlgmr.msra.gmra.mxu3 %vm1407_vm5, %v3745_v16  ;;  %3913 = vmatpush.bf16.msrb.mxu2 %v12180_v58 }
0x1679   :  { %3929 = vmatpush.bf16.msra.mxu3 %v12196_v2 }
0x167b   :  { %v10593_v32 = vpop.eup %10592 }
0x167c   :  { %v3730_v61 = vmul.f32 %v10593_v32, %v12969_v0  ;;  %v3683_v53 = vpop.xlane.xlu1 %3682  ;;  %v3677_v37 = vpop.xlane.xlu2 %3676 }
0x167d   :  { %10596 = vrcp.f32 %v3683_v53  ;;  %v3680_v6 = vpop.xlane.xlu0 %3679 }
0x167e   :  { %v13042_v59 = vpop.eup %10594  ;;  %v3746_v34 = vpack.c.bf16 %v3730_v61, %v3730_v61  ;;  %10598 = vrcp.f32 %v3680_v6 }
0x167f   :  { %10600 = vrcp.f32 %v3677_v37  ;;  %v3708_v17 = vsel %vm1214_vm3, %v13042_v59, 0.0 }
0x1680   :  { %9985 = vmatmul.msk.bf16.vlgmr.msrb.gmra.mxu0 %vm1407_vm5, %v3746_v34  ;;  %3709 = vadd.xlane.f32.xlu2 %v3708_v17 }
0x1681   :  { %3945 = vmatpush.bf16.msrb.mxu0 %v12185_v10 }
0x1683   :  { %v10597_v22 = vpop.eup %10596 }
0x1684   :  { %v10599_v45 = vpop.eup %10598  ;;  %v3733_v0 = vmul.f32 %v10597_v22, %v12978_v18 }
0x1685   :  { %v10601_v47 = vpop.eup %10600  ;;  %v3732_v15 = vmul.f32 %v10599_v45, %v12982_v41  ;;  %v3686_v38 = vpop.xlane.xlu0 %3685 }
0x1686   :  { %v3749_v27 = vpack.c.bf16 %v3733_v0, %v3733_v0  ;;  %v3731_v24 = vmul.f32 %v10601_v47, %v12976_v4  ;;  %10602 = vrcp.f32 %v3686_v38 }
0x1687   :  { %v3748_v36 = vpack.c.bf16 %v3732_v15, %v3732_v15  ;;  %v11172_v15 = vld [vmem:[#allocation9 + $0x8] sm:$0xff] }
0x1688   :  { %v3747_v16 = vpack.c.bf16 %v3731_v24, %v3731_v24  ;;  %9988 = vmatmul.msk.bf16.vlgmr.msrb.gmra.mxu3 %vm1407_vm5, %v3749_v27 }
0x1689   :  { %9987 = vmatmul.msk.bf16.vlgmr.msra.gmra.mxu2 %vm1407_vm5, %v3748_v36  ;;  %3993 = vmatpush.bf16.msrb.mxu3 %v12262_v49 }
0x168a   :  { %9986 = vmatmul.msk.bf16.vlgmr.msra.gmra.mxu1 %vm1407_vm5, %v3747_v16  ;;  %3977 = vmatpush.bf16.msra.mxu2 %v12214_v50  ;;  %v11175_v16 = vld [vmem:[#allocation9] sm:$0xff] }
0x168b   :  { %v3692_v18 = vpop.xlane.xlu1 %3691  ;;  %3961 = vmatpush.bf16.msra.mxu1 %v12203_v57 }
0x168c   :  { %v10603_v41 = vpop.eup %10602  ;;  %10604 = vrcp.f32 %v3692_v18  ;;  %v3695_v1 = vpop.xlane.xlu2 %3694  ;;  %v11176_v18 = vld [vmem:[#allocation8] sm:$0xff] }
0x168d   :  { %v3734_v4 = vmul.f32 %v10603_v41, %v12991_v11  ;;  %v3689_v32 = vpop.xlane.xlu0 %3688  ;;  %10606 = vrcp.f32 %v3695_v1  ;;  %v11177_v41 = vld [vmem:[%s15205_s15 + $0x30] sm:$0xff]  ;;  %v11178_v1 = vld [vmem:[#allocation11 + $0x18] sm:$0xff] }
0x168e   :  { %10608 = vrcp.f32 %v3689_v32 }
0x168f   :  { %v3750_v61 = vpack.c.bf16 %v3734_v4, %v3734_v4 }
0x1691   :  { %9989 = vmatmul.msk.bf16.vlgmr.msra.gmra.mxu0 %vm1407_vm5, %v3750_v61  ;;  %v11179_v61 = vld [vmem:[%s15205_s15 + $0x28] sm:$0xff] }
0x1692   :  { %v10605_v53 = vpop.eup %10604  ;;  %4009 = vmatpush.bf16.msra.mxu0 %v12209_v62 }
0x1693   :  { %v10607_v37 = vpop.eup %10606  ;;  %v3736_v6 = vmul.f32 %v10605_v53, %v12996_v33  ;;  %v3698_v34 = vpop.xlane.xlu1 %3697  ;;  %v11173_v33 = vld [vmem:[#allocation8 + $0x8] sm:$0xff] }
0x1694   :  { %v10609_v17 = vpop.eup %10608  ;;  %v3737_v22 = vmul.f32 %v10607_v37, %v12998_v20  ;;  %10610 = vrcp.f32 %v3698_v34  ;;  %v11174_v20 = vld [vmem:[%s15205_s15 + $0x38] sm:$0xff] }
0x1695   :  { %v3752_v45 = vpack.c.bf16 %v3736_v6, %v3736_v6  ;;  %v3735_v11 = vmul.f32 %v10609_v17, %v13002_v23  ;;  %v11180_v17 = vld [vmem:[#allocation11 + $0x10] sm:$0xff] }
0x1696   :  { %v3753_v0 = vpack.c.bf16 %v3737_v22, %v3737_v22  ;;  %v11181_v22 = vld [vmem:[%s15205_s15 + $0x20] sm:$0xff] }
0x1697   :  { %v3751_v47 = vpack.c.bf16 %v3735_v11, %v3735_v11  ;;  %v11183_v11 = vld [vmem:[%s15205_s15 + $0x18] sm:$0xff] }
0x1698   :  { %9992 = vmatmul.msk.bf16.vlgmr.msra.gmra.mxu3 %vm1407_vm5, %v3753_v0 }
0x1699   :  { %9991 = vmatmul.msk.bf16.vlgmr.msrb.gmra.mxu2 %vm1407_vm5, %v3752_v45  ;;  %4117 = vmatpush.bf16.msra.mxu3 %v11172_v15  ;;  %v11185_v15 = vld [vmem:[%s15205_s15 + $0x10] sm:$0xff] }
0x169a   :  { %v10611_v38 = vpop.eup %10610  ;;  %9990 = vmatmul.msk.bf16.vlgmr.msrb.gmra.mxu1 %vm1407_vm5, %v3751_v47  ;;  %4096 = vmatpush.bf16.msrb.mxu2 %v11173_v33  ;;  %v11184_v47 = vld [vmem:[#allocation11] sm:$0xff] }
0x169b   :  { %v3738_v27 = vmul.f32 %v10611_v38, %v13010_v52  ;;  %4070 = vmatpush.bf16.msrb.mxu1 %v11174_v20  ;;  %v3704_v23 = vpop.xlane.xlu2 %3703  ;;  %v11186_v38 = vld [vmem:[%s15205_s15 + $0x8] sm:$0xff] }
0x169c   :  { %v3707_v24 = vpop.xlane.xlu0 %3706  ;;  %10612 = vrcp.f32 %v3704_v23 }
0x169d   :  { %v3754_v36 = vpack.c.bf16 %v3738_v27, %v3738_v27  ;;  %10614 = vrcp.f32 %v3707_v24  ;;  %4118 = vmatpush.bf16.msra.mxu3 %v11175_v16 }
0x169e   :  { %4097 = vmatpush.bf16.msrb.mxu2 %v11176_v18 }
0x169f   :  { %4071 = vmatpush.bf16.msrb.mxu1 %v11177_v41 }
0x16a1   :  { %9993 = vmatmul.msk.bf16.vlgmr.msrb.gmra.mxu0 %vm1407_vm5, %v3754_v36 }
0x16a2   :  { %v10613_v52 = vpop.eup %10612  ;;  %4222 = vmatpush.bf16.msrb.mxu0 %v11178_v1 }
0x16a3   :  { %v10615_v4 = vpop.eup %10614  ;;  %v3740_v32 = vmul.f32 %v10613_v52, %v13015_v9  ;;  %4072 = vmatpush.bf16.msrb.mxu1 %v11179_v61  ;;  %v3701_v53 = vpop.xlane.xlu1 %3700 }
0x16a4   :  { %v3741_v37 = vmul.f32 %v10615_v4, %v13017_v55  ;;  %10616 = vrcp.f32 %v3701_v53  ;;  %v11182_v55 = vld [vmem:[#allocation11 + $0x8] sm:$0xff] }
0x16a5   :  { %v3756_v6 = vpack.c.bf16 %v3740_v32, %v3740_v32 }
0x16a6   :  { %v3757_v34 = vpack.c.bf16 %v3741_v37, %v3741_v37  ;;  %4223 = vmatpush.bf16.msrb.mxu0 %v11180_v17 }
0x16a7   :  { %4073 = vmatpush.bf16.msrb.mxu1 %v11181_v22 }
0x16a8   :  { %9996 = vmatmul.msk.bf16.vlgmr.msrb.gmra.mxu3 %vm1407_vm5, %v3757_v34 }
0x16a9   :  { %9995 = vmatmul.msk.bf16.vlgmr.msra.gmra.mxu2 %vm1407_vm5, %v3756_v6  ;;  %4390 = vmatpush.bf16.xpose.msrb.mxu3 %v11813_v29 }
0x16aa   :  { %v10617_v9 = vpop.eup %10616  ;;  %4369 = vmatpush.bf16.xpose.msra.mxu2 %v11803_v7  ;;  %4224 = vmatpush.bf16.msrb.mxu0 %v11182_v55 }
0x16ab   :  { %v3739_v45 = vmul.f32 %v10617_v9, %v13023_v54  ;;  %4074 = vmatpush.bf16.msrb.mxu1 %v11183_v11  ;;  %v11187_v54 = vld [vmem:[%s15205_s15] sm:$0xff] }
0x16ad   :  { %v3755_v0 = vpack.c.bf16 %v3739_v45, %v3739_v45 }
0x16ae   :  { %4225 = vmatpush.bf16.msrb.mxu0 %v11184_v47 }
0x16af   :  { %4075 = vmatpush.bf16.msrb.mxu1 %v11185_v15 }
0x16b0   :  { %9994 = vmatmul.msk.bf16.vlgmr.msra.gmra.mxu1 %vm1407_vm5, %v3755_v0 }
0x16b3   :  { %4076 = vmatpush.bf16.msrb.mxu1 %v11186_v38 }
0x16b7   :  { %4077 = vmatpush.bf16.msrb.mxu1 %v11187_v54 }
0x16bb   :  { %4432 = vmatpush.bf16.xpose.msra.mxu1 %v11839_v60  ;;  %v4107_v33 = vpop.permute.xlu1 %4106 }
0x16bc   :  { %9999 = vmatmul.msk.bf16.vlgmr.msra.gmra.mxu3 %vm215_vm0, %v4107_v33 }
0x16bd   :  { %4474 = vmatpush.bf16.xpose.msra.mxu3 %v11847_v3 }
0x16d4   :  { %v3771_v27 = vpop.f32.mrf.mxu1 }
0x16dc   :  { %v3773_v20 = vpop.f32.mrf.mxu1 }
0x16f3   :  { %v3710_v23 = vpop.xlane.xlu2 %3709 }
0x16f4   :  { %10618 = vrcp.f32 %v3710_v23 }
0x16fa   :  { %v10619_v24 = vpop.eup %10618  ;;  %v3787_v36 = vpop.f32.mrf.mxu2 }
0x16fb   :  { %v3742_v16 = vmul.f32 %v10619_v24, %v13042_v59  ;;  %v4023_v18 = vrot.slane %v3787_v36, 7  ;;  %v3803_v41 = vpop.f32.mrf.mxu3 }
0x16fc   :  { %v4025_v52 = vrot.slane %v3803_v41, 6 }
0x16fd   :  { %v3758_v1 = vpack.c.bf16 %v3742_v16, %v3742_v16  ;;  %v4024_v4 = vsel %vm1722_vm6, %v4023_v18, %v3771_v27  ;;  %v3819_v32 = vpop.f32.mrf.mxu0 }
0x16fe   :  { %v4026_v61 = vsel %vm1725_vm7, %v4025_v52, %v4024_v4  ;;  %v4027_v53 = vrot.slane %v3819_v32, 5 }
0x16ff   :  { %9997 = vmatmul.msk.bf16.vlgmr.msra.gmra.mxu0 %vm1407_vm5, %v3758_v1 }
0x1700   :  { %v4028_v37 = vsel %vm1728_vm8, %v4027_v53, %v4026_v61  ;;  %4411 = vmatpush.bf16.xpose.msra.mxu0 %v11835_v56 }
0x1702   :  { %v3789_v6 = vpop.f32.mrf.mxu2 }
0x1703   :  { %v3805_v34 = vpop.f32.mrf.mxu3 }
0x1705   :  { %v3821_v17 = vpop.f32.mrf.mxu0 }
0x1707   :  { %v3835_v59 = vpop.f32.mrf.mxu1 }
0x1708   :  { %v4029_v22 = vrot.slane %v3835_v59, 4 }
0x170a   :  { %v4030_v9 = vsel %vm1731_vm10, %v4029_v22, %v4028_v37 }
0x170b   :  { %v3867_v55 = vpop.f32.mrf.mxu3 }
0x170c   :  { %v3851_v45 = vpop.f32.mrf.mxu2  ;;  %v4033_v11 = vrot.slane %v3867_v55, 2 }
0x170d   :  { %v4031_v0 = vrot.slane %v3851_v45, 3 }
0x170e   :  { %v3883_v47 = vpop.f32.mrf.mxu0 }
0x170f   :  { %v4032_v15 = vsel %vm15253_vm4, %v4031_v0, %v4030_v9  ;;  %v3837_v38 = vpop.f32.mrf.mxu1  ;;  %v4035_v54 = vrot.slane %v3883_v47, 1 }
0x1710   :  { %v4034_v33 = vsel %vm15254_vm11, %v4033_v11, %v4032_v15 }
0x1711   :  { %v4036_v27 = vsel %vm15255_vm12, %v4035_v54, %v4034_v33 }
0x1713   :  { %v3869_v20 = vpop.f32.mrf.mxu3 }
0x1714   :  { %v3853_v23 = vpop.f32.mrf.mxu2 }
0x1716   :  { %v3885_v24 = vpop.f32.mrf.mxu0 }
0x1717   :  { %v3899_v36 = vpop.f32.mrf.mxu1 }
0x171b   :  { %v3931_v16 = vpop.f32.mrf.mxu3 }
0x171c   :  { %v3915_v18 = vpop.f32.mrf.mxu2  ;;  %v4051_v41 = vrot.slane %v3931_v16, 6 }
0x171d   :  { %v4049_v52 = vrot.slane %v3915_v18, 7 }
0x171e   :  { %v3947_v1 = vpop.f32.mrf.mxu0 }
0x171f   :  { %v4050_v4 = vsel %vm1722_vm6, %v4049_v52, %v3899_v36  ;;  %v3901_v32 = vpop.f32.mrf.mxu1  ;;  %v4053_v61 = vrot.slane %v3947_v1, 5 }
0x1720   :  { %v4052_v53 = vsel %vm1725_vm7, %v4051_v41, %v4050_v4 }
0x1721   :  { %v4054_v37 = vsel %vm1728_vm8, %v4053_v61, %v4052_v53 }
0x1723   :  { %v3933_v6 = vpop.f32.mrf.mxu3 }
0x1724   :  { %v3917_v34 = vpop.f32.mrf.mxu2 }
0x1725   :  { %v11188_v34 = vld [vmem:[%s15200_s10] ss:$0 sm:$0xff] }
0x1726   :  { %v3949_v17 = vpop.f32.mrf.mxu0 }
0x1727   :  { %v15260_v17 = vld [vmem:[#allocation20_spill] sm:$0xff] }
0x172b   :  { %v3995_v59 = vpop.f32.mrf.mxu3 }
0x172c   :  { %v3979_v22 = vpop.f32.mrf.mxu2  ;;  %v4059_v11 = vrot.slane %v3995_v59, 2  ;;  %v245_v59 = vadd.f32 %v11188_v34, %v15260_v17 }
0x172d   :  { %v3963_v9 = vpop.f32.mrf.mxu1  ;;  %v4057_v45 = vrot.slane %v3979_v22, 3 }
0x172e   :  { %v4055_v55 = vrot.slane %v3963_v9, 4 }
0x1730   :  { %v4056_v0 = vsel %vm1731_vm10, %v4055_v55, %v4054_v37 }
0x1731   :  { %v4058_v47 = vsel %vm15256_vm13, %v4057_v45, %v4056_v0 }
0x1732   :  { %v4060_v15 = vsel %vm15257_vm14, %v4059_v11, %v4058_v47 }
0x1733   :  { %v3997_v38 = vpop.f32.mrf.mxu3 }
0x1734   :  { %v3981_v54 = vpop.f32.mrf.mxu2 }
0x1735   :  { %v3965_v33 = vpop.f32.mrf.mxu1 }
0x177c   :  { %v4011_v20 = vpop.f32.mrf.mxu0 }
0x177d   :  { %v4061_v23 = vrot.slane %v4011_v20, 1 }
0x177f   :  { %v4062_v24 = vsel %vm15258_vm15, %v4061_v23, %v4060_v15 }
0x1780   :  { %v10271_v36 = vpack.i.bf16 %v4062_v24, %v12770_v21 }
0x1782   :  { %10272 = vrot.lane.b32.xlu0 %v10271_v36, %s11529_s29 }
0x1784   :  { %v4013_v16 = vpop.f32.mrf.mxu0 }
0x17f4   :  { %v13122_v18 = vpop.permute.xlu0 %10272 }
0x17f5   :  { %v10275_v41 = vunpack.i.h.bf16 %v13122_v18  ;;  %v10274_v52 = vunpack.i.l.bf16 %v13122_v18 }
0x17f7   :  { %v4066_v1 = vsel %vm215_vm0, %v4036_v27, %v10274_v52  ;;  %v4120_v27 = vpop.f32.mrf.mxu3 }
0x17f8   :  { %v4067_v4 = vsel %vm682_vm9, %v4066_v1, %v10275_v41 }
0x17f9   :  { %v4068_v32 = vsel %vm15259_vm1, %v4067_v4, %v12779_v51 }
0x17fa   :  { %v4069_v61 = vpack.c.bf16 %v4068_v32, %v4068_v32 }
0x17fc   :  { %4078 = vmatmul.bf16.vlgmr.msrb.gmra.mxu1 %v4069_v61 }
0x17fd   :  { %4516 = vmatpush.bf16.xpose.msrb.mxu1 %v11855_v13 }
0x17ff   :  { %v4122_v55 = vpop.f32.mrf.mxu3 }
0x1879   :  { %v4079_v21 = vpop.f32.mrf.mxu1 }
0x187a   :  { %10620 = vtanh.f32 %v4079_v21 }
0x1880   :  { %v10621_v53 = vpop.eup %10620 }
0x1881   :  { %v4086_v37 = vpack.c.bf16 %v10621_v53, %v10621_v53  ;;  %9701 = vst.msk [vmem:[#allocation14 + $0x10] sm:$0xff] %vm215_vm0, %v10621_v53  ;;  %v4081_v6 = vpop.f32.mrf.mxu1 }
0x1883   :  { %9998 = vmatmul.msk.bf16.vlgmr.msrb.gmra.mxu2 %vm215_vm0, %v4086_v37 }
0x1884   :  { %4453 = vmatpush.bf16.xpose.msrb.mxu2 %v11843_v63 }
0x1906   :  { %v4099_v22 = vpop.f32.mrf.mxu2 }
0x1907   :  { %v4103_v9 = vadd.f32 %v4099_v22, %v245_v59 }
0x1909   :  { %v4125_v45 = vadd.f32 %v4120_v27, %v4103_v9  ;;  %v4126_v11 = vadd.f32 %v4122_v55, %v4103_v9 }
0x190b   :  { %10622 = vtanh.f32 %v4125_v45  ;;  %v10000_v38 = vmul.f32 -1.442695, %v4125_v45  ;;  %v10001_v23 = vmul.f32 -1.442695, %v4126_v11 }
0x190c   :  { %10624 = vtanh.f32 %v4126_v11 }
0x190d   :  { %10626 = vpow2.f32 %v10000_v38 }
0x190e   :  { %v4101_v0 = vpop.f32.mrf.mxu2 }
0x1911   :  { %v10623_v47 = vpop.eup %10622 }
0x1912   :  { %v10625_v15 = vpop.eup %10624  ;;  %4171 = vrot.lane.b32.xlu2 %v10623_v47, %s11529_s29 }
0x1913   :  { %4173 = vrot.lane.b32.xlu0 %v10625_v15, %s11529_s29  ;;  %v10627_v54 = vpop.eup %10626 }
0x1914   :  { %v4133_v33 = vadd.f32 1.0, %v10627_v54 }
0x1916   :  { %10628 = vrcp.f32 %v4133_v33  ;;  %v4146_v32 = vand.u32 2147483648, %v4133_v33  ;;  %vm4140_vm4 = vweird.f32 %v4133_v33  ;;  %v4144_v61 = vand.u32 2147483647, %v4133_v33 }
0x1917   :  { %10630 = vpow2.f32 %v10001_v23 }
0x1918   :  { %v4147_v53 = vor.u32 1.1754944e-38, %v4146_v32  ;;  %vm4145_vm12 = vcmp.eq.f32.partialorder %v4144_v61, 8.507059e+37 }
0x191c   :  { %v10629_v20 = vpop.eup %10628 }
0x191d   :  { %v4136_v24 = vmul.f32 %v10629_v20, %v4133_v33  ;;  %v10631_v41 = vpop.eup %10630  ;;  %vm4141_vm2 = vweird.f32 %v10629_v20 }
0x191e   :  { %v4134_v1 = vadd.f32 1.0, %v10631_v41  ;;  %vm4142_vm11 = vmor %vm4140_vm4, %vm4141_vm2 }
0x191f   :  { %v4137_v36 = vsub.f32 1.0, %v4136_v24 }
0x1920   :  { %10632 = vrcp.f32 %v4134_v1  ;;  %v4161_v55 = vand.u32 2147483648, %v4134_v1  ;;  %vm4155_vm14 = vweird.f32 %v4134_v1  ;;  %v4159_v45 = vand.u32 2147483647, %v4134_v1 }
0x1921   :  { %v4138_v16 = vmul.f32 %v10629_v20, %v4137_v36 }
0x1922   :  { %v4162_v0 = vor.u32 1.1754944e-38, %v4161_v55  ;;  %vm4160_vm1 = vcmp.eq.f32.partialorder %v4159_v45, 8.507059e+37 }
0x1923   :  { %v4139_v4 = vadd.f32 %v10629_v20, %v4138_v16 }
0x1925   :  { %v4143_v21 = vsel %vm4142_vm11, %v10629_v20, %v4139_v4 }
0x1926   :  { %v4148_v6 = vsel %vm4145_vm12, %v4147_v53, %v4143_v21  ;;  %v10633_v34 = vpop.eup %10632 }
0x1927   :  { %v4151_v17 = vmul.f32 %v10633_v34, %v4134_v1  ;;  %vm4156_vm13 = vweird.f32 %v10633_v34  ;;  %v4167_v54 = vmul.f32 %v4148_v6, %v12732_v19 }
0x1928   :  { %vm4157_vm15 = vmor %vm4155_vm14, %vm4156_vm13 }
0x1929   :  { %v4152_v59 = vsub.f32 1.0, %v4151_v17 }
0x192b   :  { %v4153_v22 = vmul.f32 %v10633_v34, %v4152_v59  ;;  %v11189_v59 = vld [vmem:[%s15202_s12] ss:$0 sm:$0xff] }
0x192d   :  { %v4154_v9 = vadd.f32 %v10633_v34, %v4153_v22 }
0x192f   :  { %v4158_v11 = vsel %vm4157_vm15, %v10633_v34, %v4154_v9 }
0x1930   :  { %v4163_v15 = vsel %vm4160_vm1, %v4162_v0, %v4158_v11 }
0x1931   :  { %v4168_v24 = vmul.f32 %v4163_v15, %v12727_v5 }
0x196c   :  { %v4172_v37 = vpop.permute.xlu2 %4171 }
0x196d   :  { %v4177_v27 = vmul.f32 %v4172_v37, %v4148_v6 }
0x196f   :  { %4181 = vrot.lane.b32.xlu1 %v4177_v27, %s11536_s7 }
0x1985   :  { %v4174_v47 = vpop.permute.xlu0 %4173 }
0x1986   :  { %v4178_v38 = vmul.f32 %v4174_v47, %v4163_v15 }
0x1988   :  { %4183 = vrot.lane.b32.xlu0 %v4178_v38, %s11536_s7 }
0x19e1   :  { %v4182_v33 = vpop.permute.xlu1 %4181 }
0x19e2   :  { %v13145_v20 = vadd.f32 %v4182_v33, %v4167_v54 }
0x19e4   :  { %10634 = vtanh.f32 %v13145_v20 }
0x19ea   :  { %v10635_v23 = vpop.eup %10634 }
0x19eb   :  { %4193 = vrot.lane.b32.xlu2 %v10635_v23, %s11529_s29 }
0x19f3   :  { %4209 = vrot.lane.b32.xlu2 %v12779_v51, %s11529_s29 }
0x19fa   :  { %v4184_v36 = vpop.permute.xlu0 %4183 }
0x19fb   :  { %v13152_v16 = vadd.f32 %v4184_v36, %v4168_v24 }
0x19fd   :  { %10636 = vtanh.f32 %v13152_v16 }
0x1a03   :  { %v10637_v41 = vpop.eup %10636 }
0x1a04   :  { %4195 = vrot.lane.b32.xlu1 %v10637_v41, %s11529_s29 }
0x1a45   :  { %v4194_v19 = vpop.permute.xlu2 %4193 }
0x1a46   :  { %v13156_v4 = vmul.f32 %v4194_v19, %v4148_v6 }
0x1a4d   :  { %v4210_v37 = vpop.permute.xlu2 %4209 }
0x1a76   :  { %v4196_v1 = vpop.permute.xlu1 %4195 }
0x1a77   :  { %v13158_v32 = vmul.f32 %v4196_v1, %v4163_v15 }
0x1a79   :  { %v10276_v61 = vpack.i.bf16 %v13158_v32, %v13156_v4 }
0x1a7b   :  { %10277 = vrot.lane.b32.xlu0 %v10276_v61, %s11536_s7 }
0x1aed   :  { %v10278_v51 = vpop.permute.xlu0 %10277 }
0x1aee   :  { %v10280_v21 = vunpack.i.h.bf16 %v10278_v51  ;;  %v10279_v53 = vunpack.i.l.bf16 %v10278_v51 }
0x1af0   :  { %v4213_v27 = vsel %vm215_vm0, %v10280_v21, %v4210_v37  ;;  %v4212_v6 = vsel %vm215_vm0, %v10279_v53, %v10274_v52 }
0x1af1   :  { %v4214_v34 = vpack.c.bf16 %v4213_v27, %v4212_v6 }
0x1af3   :  { %10002 = vmatmul.msk.bf16.vlgmr.msrb.gmra.mxu0 %vm682_vm9, %v4214_v34 }
0x1af4   :  { %4495 = vmatpush.bf16.xpose.msrb.mxu0 %v11851_v8 }
0x1b70   :  { %v4227_v17 = vpop.f32.mrf.mxu0 }
0x1b71   :  { %v4232_v22 = vadd.f32 %v11189_v59, %v4227_v17 }
0x1b73   :  { %10638 = vtanh.f32 %v4232_v22  ;;  %v10003_v52 = vmul.f32 -1.442695, %v4232_v22 }
0x1b78   :  { %v4229_v9 = vpop.f32.mrf.mxu0 }
0x1b79   :  { %v10639_v55 = vpop.eup %10638  ;;  %v4233_v45 = vadd.f32 %v11189_v59, %v4229_v9 }
0x1b7a   :  { %4278 = vrot.lane.b32.xlu1 %v10639_v55, %s11529_s29 }
0x1b7b   :  { %10640 = vtanh.f32 %v4233_v45  ;;  %v10004_v11 = vmul.f32 -1.442695, %v4233_v45 }
0x1b7c   :  { %10642 = vpow2.f32 %v10003_v52 }
0x1b7d   :  { %10644 = vpow2.f32 %v10004_v11 }
0x1b81   :  { %v10641_v18 = vpop.eup %10640 }
0x1b82   :  { %4280 = vrot.lane.b32.xlu0 %v10641_v18, %s11529_s29  ;;  %v10643_v0 = vpop.eup %10642 }
0x1b83   :  { %v4240_v47 = vadd.f32 1.0, %v10643_v0  ;;  %v10645_v15 = vpop.eup %10644 }
0x1b84   :  { %v4241_v38 = vadd.f32 1.0, %v10645_v15 }
0x1b85   :  { %10646 = vrcp.f32 %v4240_v47  ;;  %v4253_v61 = vand.u32 2147483648, %v4240_v47  ;;  %vm4247_vm4 = vweird.f32 %v4240_v47  ;;  %v4251_v51 = vand.u32 2147483647, %v4240_v47 }
0x1b86   :  { %10648 = vrcp.f32 %v4241_v38  ;;  %v4268_v59 = vand.u32 2147483648, %v4241_v38  ;;  %vm4262_vm14 = vweird.f32 %v4241_v38  ;;  %v4266_v22 = vand.u32 2147483647, %v4241_v38 }
0x1b87   :  { %v4254_v37 = vor.u32 1.1754944e-38, %v4253_v61  ;;  %vm4252_vm12 = vcmp.eq.f32.partialorder %v4251_v51, 8.507059e+37 }
0x1b88   :  { %v4269_v55 = vor.u32 1.1754944e-38, %v4268_v59  ;;  %vm4267_vm1 = vcmp.eq.f32.partialorder %v4266_v22, 8.507059e+37 }
0x1b8b   :  { %v10647_v54 = vpop.eup %10646 }
0x1b8c   :  { %v4243_v33 = vmul.f32 %v10647_v54, %v4240_v47  ;;  %v10649_v24 = vpop.eup %10648  ;;  %vm4248_vm2 = vweird.f32 %v10647_v54 }
0x1b8d   :  { %v4258_v41 = vmul.f32 %v10649_v24, %v4241_v38  ;;  %vm4249_vm11 = vmor %vm4247_vm4, %vm4248_vm2  ;;  %vm4263_vm13 = vweird.f32 %v10649_v24  ;;  %vm15266_vm2 = vcmask 1045509   ;;  %vm15267_vm4 = vcmask 1046534  }
0x1b8e   :  { %v4244_v23 = vsub.f32 1.0, %v4243_v33  ;;  %vm4264_vm15 = vmor %vm4262_vm14, %vm4263_vm13 }
0x1b8f   :  { %v4259_v1 = vsub.f32 1.0, %v4258_v41  ;;  %vm15270_vm13 = vmmov %vm15267_vm4 }
0x1b90   :  { %v4245_v36 = vmul.f32 %v10647_v54, %v4244_v23 }
0x1b91   :  { %v4260_v53 = vmul.f32 %v10649_v24, %v4259_v1 }
0x1b92   :  { %v4246_v19 = vadd.f32 %v10647_v54, %v4245_v36 }
0x1b93   :  { %v4261_v17 = vadd.f32 %v10649_v24, %v4260_v53 }
0x1b94   :  { %v4250_v21 = vsel %vm4249_vm11, %v10647_v54, %v4246_v19  ;;  %vm15268_vm11 = vcmask 1047559  }
0x1b95   :  { %v4255_v6 = vsel %vm4252_vm12, %v4254_v37, %v4250_v21  ;;  %v4265_v9 = vsel %vm4264_vm15, %v10649_v24, %v4261_v17  ;;  %vm15269_vm12 = vmmov %vm15266_vm2  ;;  %vm15272_vm15 = vcmask 785408  }
0x1b96   :  { %v4270_v18 = vsel %vm4267_vm1, %v4269_v55, %v4265_v9  ;;  %v4274_v11 = vmul.f32 %v4255_v6, %v12761_v30  ;;  %vm15271_vm14 = vmmov %vm15268_vm11 }
0x1b97   :  { %v4275_v38 = vmul.f32 %v4270_v18, %v12766_v40 }
0x1bec   :  { %v4279_v27 = vpop.permute.xlu1 %4278 }
0x1bed   :  { %v4284_v34 = vmul.f32 %v4279_v27, %v4255_v6 }
0x1bef   :  { %4288 = vrot.lane.b32.xlu2 %v4284_v34, %s11536_s7 }
0x1bf4   :  { %v4281_v45 = vpop.permute.xlu0 %4280 }
0x1bf5   :  { %v4285_v52 = vmul.f32 %v4281_v45, %v4270_v18 }
0x1bf7   :  { %4290 = vrot.lane.b32.xlu1 %v4285_v52, %s11536_s7 }
0x1c49   :  { %v4289_v0 = vpop.permute.xlu2 %4288 }
0x1c4a   :  { %v13179_v47 = vadd.f32 %v4289_v0, %v4274_v11 }
0x1c4c   :  { %10650 = vtanh.f32 %v13179_v47 }
0x1c52   :  { %v10651_v15 = vpop.eup %10650 }
0x1c53   :  { %4300 = vrot.lane.b32.xlu0 %v10651_v15, %s11529_s29 }
0x1c69   :  { %v4291_v54 = vpop.permute.xlu1 %4290 }
0x1c6a   :  { %v13184_v33 = vadd.f32 %v4291_v54, %v4275_v38 }
0x1c6c   :  { %10652 = vtanh.f32 %v13184_v33 }
0x1c72   :  { %v10653_v23 = vpop.eup %10652 }
0x1c73   :  { %4302 = vrot.lane.b32.xlu2 %v10653_v23, %s11529_s29 }
0x1cc5   :  { %v4301_v24 = vpop.permute.xlu0 %4300 }
0x1cc6   :  { %v13188_v30 = vmul.f32 %v4301_v24, %v4255_v6 }
0x1cc8   :  { %v4338_v36 = vpack.c.bf16 %v13188_v30, %v13188_v30  ;;  %v4310_v41 = vrot.slane %v13188_v30, 1  ;;  %v4311_v19 = vrot.slane %v13188_v30, 2  ;;  %v4312_v40 = vrot.slane %v13188_v30, 3 }
0x1cc9   :  { %v4313_v1 = vrot.slane %v13188_v30, 4  ;;  %v4314_v53 = vrot.slane %v13188_v30, 5  ;;  %v4315_v52 = vrot.slane %v13188_v30, 6  ;;  %v4316_v38 = vrot.slane %v13188_v30, 7 }
0x1cca   :  { %v4355_v61 = vunpack.c.l.b16 %v4338_v36  ;;  %v4339_v51 = vpack.c.bf16 %v4310_v41, %v4310_v41  ;;  %v4340_v21 = vpack.c.bf16 %v4311_v19, %v4311_v19  ;;  %v4341_v34 = vpack.c.bf16 %v4312_v40, %v4312_v40 }
0x1ccb   :  { %v4342_v22 = vpack.c.bf16 %v4313_v1, %v4313_v1  ;;  %v4343_v9 = vpack.c.bf16 %v4314_v53, %v4314_v53  ;;  %v4344_v23 = vpack.c.bf16 %v4315_v52, %v4315_v52  ;;  %v4345_v41 = vpack.c.bf16 %v4316_v38, %v4316_v38 }
0x1ccc   :  { %v4356_v37 = vpack.c.b16 %v4355_v61, %v4355_v61  ;;  %v4376_v27 = vunpack.c.l.b16 %v4339_v51  ;;  %v4397_v6 = vunpack.c.l.b16 %v4340_v21  ;;  %v4418_v45 = vunpack.c.l.b16 %v4341_v34 }
0x1ccd   :  { %v4303_v55 = vpop.permute.xlu2 %4302  ;;  %v4439_v0 = vunpack.c.l.b16 %v4342_v22  ;;  %v4460_v15 = vunpack.c.l.b16 %v4343_v9  ;;  %v4502_v1 = vunpack.c.l.b16 %v4345_v41 }
0x1cce   :  { %4357 = vrot.lane.b32.xlu1 %v4356_v37, %s11536_s7  ;;  %v4377_v17 = vpack.c.b16 %v4376_v27, %v4376_v27  ;;  %v4398_v59 = vpack.c.b16 %v4397_v6, %v4397_v6  ;;  %v13201_v11 = vmul.f32 %v4303_v55, %v4270_v18  ;;  %v4419_v54 = vpack.c.b16 %v4418_v45, %v4418_v45 }
0x1ccf   :  { %v4440_v24 = vpack.c.b16 %v4439_v0, %v4439_v0  ;;  %v4461_v36 = vpack.c.b16 %v4460_v15, %v4460_v15  ;;  %v4481_v18 = vunpack.c.l.b16 %v4344_v23  ;;  %v4503_v27 = vpack.c.b16 %v4502_v1, %v4502_v1 }
0x1cd0   :  { %4378 = vrot.lane.b32.xlu0 %v4377_v17, %s11536_s7  ;;  %4399 = vrot.lane.b32.xlu2 %v4398_v59, %s11536_s7  ;;  %v4346_v19 = vpack.c.bf16 %v13201_v11, %v13201_v11  ;;  %v4317_v40 = vrot.slane %v13201_v11, 1  ;;  %v4319_v51 = vrot.slane %v13201_v11, 3  ;;  %v4318_v21 = vrot.slane %v13201_v11, 2 }
0x1cd1   :  { %v4482_v53 = vpack.c.b16 %v4481_v18, %v4481_v18  ;;  %v4320_v22 = vrot.slane %v13201_v11, 4  ;;  %v4322_v45 = vrot.slane %v13201_v11, 6  ;;  %v4321_v52 = vrot.slane %v13201_v11, 5 }
0x1cd2   :  { %v4523_v61 = vunpack.c.l.b16 %v4346_v19  ;;  %v4347_v37 = vpack.c.bf16 %v4317_v40, %v4317_v40  ;;  %v4349_v34 = vpack.c.bf16 %v4319_v51, %v4319_v51  ;;  %v4348_v17 = vpack.c.bf16 %v4318_v21, %v4318_v21 }
0x1cd3   :  { %v4350_v15 = vpack.c.bf16 %v4320_v22, %v4320_v22  ;;  %v4352_v23 = vpack.c.bf16 %v4322_v45, %v4322_v45  ;;  %v4323_v41 = vrot.slane %v13201_v11, 7 }
0x1cd4   :  { %v4524_v6 = vpack.c.b16 %v4523_v61, %v4523_v61  ;;  %v4544_v59 = vunpack.c.l.b16 %v4347_v37  ;;  %v4586_v9 = vunpack.c.l.b16 %v4349_v34  ;;  %v4565_v55 = vunpack.c.l.b16 %v4348_v17 }
0x1cd5   :  { %v4649_v19 = vunpack.c.l.b16 %v4352_v23  ;;  %v4353_v1 = vpack.c.bf16 %v4323_v41, %v4323_v41  ;;  %v15261_v23 = vld [vmem:[#allocation27_spill] sm:$0xff] }
0x1cd6   :  { %4420 = vrot.lane.b32.xlu1 %v4419_v54, %s11536_s7  ;;  %v4545_v0 = vpack.c.b16 %v4544_v59, %v4544_v59  ;;  %v4587_v38 = vpack.c.b16 %v4586_v9, %v4586_v9  ;;  %v4566_v54 = vpack.c.b16 %v4565_v55, %v4565_v55 }
0x1cd7   :  { %v4650_v61 = vpack.c.b16 %v4649_v19, %v4649_v19  ;;  %v4670_v21 = vunpack.c.l.b16 %v4353_v1  ;;  %v15264_v19 = vld [vmem:[#allocation29_spill] sm:$0xff] }
0x1cd8   :  { %4441 = vrot.lane.b32.xlu0 %v4440_v24, %s11536_s7  ;;  %4462 = vrot.lane.b32.xlu2 %v4461_v36, %s11536_s7  ;;  %v4351_v24 = vpack.c.bf16 %v4321_v52, %v4321_v52  ;;  %v4607_v36 = vunpack.c.l.b16 %v4350_v15 }
0x1cda   :  { %v4628_v18 = vunpack.c.l.b16 %v4351_v24  ;;  %v4608_v40 = vpack.c.b16 %v4607_v36, %v4607_v36  ;;  %v15262_v24 = vld [vmem:[#allocation30_spill] sm:$0xff]  ;;  %v15263_v36 = vld [vmem:[#allocation28_spill] sm:$0xff] }
0x1cdc   :  { %v4629_v51 = vpack.c.b16 %v4628_v18, %v4628_v18 }
0x1cde   :  { %4483 = vrot.lane.b32.xlu1 %v4482_v53, %s11536_s7  ;;  %v4671_v53 = vpack.c.b16 %v4670_v21, %v4670_v21 }
0x1ce0   :  { %4504 = vrot.lane.b32.xlu0 %v4503_v27, %s11536_s7  ;;  %4525 = vrot.lane.b32.xlu2 %v4524_v6, %s11536_s7 }
0x1ce6   :  { %4546 = vrot.lane.b32.xlu1 %v4545_v0, %s11536_s7 }
0x1ce8   :  { %4588 = vrot.lane.b32.xlu2 %v4587_v38, %s11536_s7  ;;  %4567 = vrot.lane.b32.xlu0 %v4566_v54, %s11536_s7 }
0x1cee   :  { %4609 = vrot.lane.b32.xlu1 %v4608_v40, %s11536_s7  ;;  %v11190_v40 = vld [vmem:[%s15196_s6 + $0x2] sm:$0x1] }
0x1cf0   :  { %4651 = vrot.lane.b32.xlu2 %v4650_v61, %s11536_s7  ;;  %4630 = vrot.lane.b32.xlu0 %v4629_v51, %s11536_s7 }
0x1cf6   :  { %4672 = vrot.lane.b32.xlu1 %v4671_v53, %s11536_s7  ;;  %v11191_v53 = vld [vmem:[%s15196_s6] sm:$0x1] }
0x1d2a   :  { %v4400_v37 = vpop.permute.xlu2 %4399 }
0x1d2b   :  { %10007 = vmatmul.msk.bf16.vlgmr.msra.gmra.mxu0 %vm215_vm0, %v4400_v37 }
0x1d2c   :  { %4579 = vmatpush.bf16.xpose.msra.mxu0 %v11874_v35 }
0x1d32   :  { %v4463_v22 = vpop.permute.xlu2 %4462 }
0x1d3a   :  { %v4526_v55 = vpop.permute.xlu2 %4525 }
0x1d40   :  { %v4358_v27 = vpop.permute.xlu1 %4357 }
0x1d41   :  { %10005 = vmatmul.msk.bf16.vlgmr.msra.gmra.mxu2 %vm215_vm0, %v4358_v27 }
0x1d42   :  { %4537 = vmatpush.bf16.xpose.msra.mxu2 %v11864_v28  ;;  %v4379_v6 = vpop.permute.xlu0 %4378  ;;  %v4589_v0 = vpop.permute.xlu2 %4588 }
0x1d43   :  { %10006 = vmatmul.msk.bf16.vlgmr.msrb.gmra.mxu3 %vm215_vm0, %v4379_v6 }
0x1d44   :  { %4558 = vmatpush.bf16.xpose.msrb.mxu3 %v11858_v14 }
0x1d48   :  { %v4421_v34 = vpop.permute.xlu1 %4420 }
0x1d49   :  { %10008 = vmatmul.msk.bf16.vlgmr.msra.gmra.mxu1 %vm215_vm0, %v4421_v34  ;;  %v11192_v34 = vld [vmem:[%s15196_s6 + $0x1] sm:$0x1] }
0x1d4a   :  { %4600 = vmatpush.bf16.xpose.msra.mxu1 %v11868_v31  ;;  %v4442_v17 = vpop.permute.xlu0 %4441  ;;  %v4652_v38 = vpop.permute.xlu2 %4651 }
0x1d50   :  { %v4484_v59 = vpop.permute.xlu1 %4483 }
0x1d51   :  { %10009 = vmatmul.msk.bf16.vlgmr.msrb.gmra.mxu2 %vm215_vm0, %v4442_v17  ;;  %10011 = vmatmul.msk.bf16.vlgmr.msrb.gmra.mxu0 %vm215_vm0, %v4484_v59 }
0x1d52   :  { %4621 = vmatpush.bf16.xpose.msrb.mxu2 %v11881_v42  ;;  %4663 = vmatpush.bf16.xpose.msrb.mxu0 %v11898_v48  ;;  %v4505_v9 = vpop.permute.xlu0 %4504 }
0x1d53   :  { %10010 = vmatmul.msk.bf16.vlgmr.msra.gmra.mxu3 %vm215_vm0, %v4463_v22 }
0x1d54   :  { %4642 = vmatpush.bf16.xpose.msra.mxu3 %v11884_v43 }
0x1d58   :  { %v4547_v52 = vpop.permute.xlu1 %4546 }
0x1d59   :  { %10012 = vmatmul.msk.bf16.vlgmr.msrb.gmra.mxu1 %vm215_vm0, %v4505_v9  ;;  %v11193_v9 = vld [vmem:[%s15196_s6 + $0x3] sm:$0x1] }
0x1d5a   :  { %4684 = vmatpush.bf16.xpose.msrb.mxu1 %v11891_v46  ;;  %v4568_v45 = vpop.permute.xlu0 %4567 }
0x1d60   :  { %v4610_v15 = vpop.permute.xlu1 %4609 }
0x1d61   :  { %10013 = vmatmul.msk.bf16.vlgmr.msra.gmra.mxu2 %vm215_vm0, %v4526_v55  ;;  %10015 = vmatmul.msk.bf16.vlgmr.msra.gmra.mxu0 %vm215_vm0, %v4568_v45 }
0x1d62   :  { %4892 = vmatpush.bf16.msra.mxu2 %v12126_v12  ;;  %4924 = vmatpush.bf16.msra.mxu0 %v12142_v26  ;;  %v4631_v54 = vpop.permute.xlu0 %4630 }
0x1d63   :  { %10014 = vmatmul.msk.bf16.vlgmr.msrb.gmra.mxu3 %vm215_vm0, %v4547_v52 }
0x1d64   :  { %4908 = vmatpush.bf16.msrb.mxu3 %v12115_v25 }
0x1d68   :  { %v4673_v41 = vpop.permute.xlu1 %4672 }
0x1d69   :  { %10016 = vmatmul.msk.bf16.vlgmr.msra.gmra.mxu1 %vm215_vm0, %v4589_v0 }
0x1d6a   :  { %4940 = vmatpush.bf16.msra.mxu1 %v15247_v44 }
0x1d71   :  { %10017 = vmatmul.msk.bf16.vlgmr.msrb.gmra.mxu2 %vm215_vm0, %v4610_v15  ;;  %10019 = vmatmul.msk.bf16.vlgmr.msrb.gmra.mxu0 %vm215_vm0, %v4652_v38 }
0x1d72   :  { %4956 = vmatpush.bf16.msrb.mxu2 %v15261_v23  ;;  %4988 = vmatpush.bf16.msrb.mxu0 %v15262_v24 }
0x1d73   :  { %10018 = vmatmul.msk.bf16.vlgmr.msra.gmra.mxu3 %vm215_vm0, %v4631_v54  ;;  %v11194_v54 = vld [vmem:[%s15196_s6 + $0x6] sm:$0x1] }
0x1d74   :  { %4972 = vmatpush.bf16.msra.mxu3 %v15263_v36 }
0x1d79   :  { %10020 = vmatmul.msk.bf16.vlgmr.msrb.gmra.mxu1 %vm215_vm0, %v4673_v41 }
0x1d7a   :  { %5004 = vmatpush.bf16.msrb.mxu1 %v15264_v19 }
0x1da8   :  { %v4413_v18 = vpop.f32.mrf.mxu0 }
0x1da9   :  { %v13261_v1 = vadd.f32 %v11190_v40, %v4413_v18  ;;  %v11195_v40 = vld [vmem:[%s15196_s6 + $0x4] sm:$0x1] }
0x1dab   :  { %v4696_v61 = vsel %vm1214_vm3, %v13261_v1, -inf }
0x1dac   :  { %4697 = vmax.xlane.f32.xlu1 %v4696_v61 }
0x1db0   :  { %v4415_v51 = vpop.f32.mrf.mxu0 }
0x1dc4   :  { %v4371_v21 = vpop.f32.mrf.mxu2 }
0x1dc5   :  { %v13268_v37 = vadd.f32 %v11191_v53, %v4371_v21  ;;  %v11196_v53 = vld [vmem:[%s15196_s6 + $0x5] sm:$0x1] }
0x1dc6   :  { %v4392_v27 = vpop.f32.mrf.mxu3  ;;  %v4434_v6 = vpop.f32.mrf.mxu1 }
0x1dc7   :  { %v13273_v17 = vadd.f32 %v11192_v34, %v4392_v27  ;;  %v4690_v59 = vsel %vm1214_vm3, %v13268_v37, -inf  ;;  %v13282_v55 = vadd.f32 %v11193_v9, %v4434_v6  ;;  %v11197_v9 = vld [vmem:[%s15196_s6 + $0x7] sm:$0x1] }
0x1dc8   :  { %4691 = vmax.xlane.f32.xlu0 %v4690_v59 }
0x1dc9   :  { %v4693_v22 = vsel %vm1214_vm3, %v13273_v17, -inf  ;;  %v4699_v38 = vsel %vm1214_vm3, %v13282_v55, -inf }
0x1dca   :  { %4694 = vmax.xlane.f32.xlu2 %v4693_v22 }
0x1dcc   :  { %v4373_v45 = vpop.f32.mrf.mxu2 }
0x1dce   :  { %v4394_v52 = vpop.f32.mrf.mxu3  ;;  %v4436_v0 = vpop.f32.mrf.mxu1 }
0x1dcf   :  { %v4497_v15 = vpop.f32.mrf.mxu0 }
0x1dd0   :  { %4700 = vmax.xlane.f32.xlu0 %v4699_v38  ;;  %v13289_v41 = vadd.f32 %v11194_v54, %v4497_v15 }
0x1dd2   :  { %v4708_v59 = vsel %vm1214_vm3, %v13289_v41, -inf }
0x1dd4   :  { %v4455_v18 = vpop.f32.mrf.mxu2 }
0x1dd5   :  { %v13294_v61 = vadd.f32 %v11195_v40, %v4455_v18  ;;  %v11198_v18 = vld [vmem:[%s15196_s6 + $0xa] sm:$0x1] }
0x1dd6   :  { %v4476_v51 = vpop.f32.mrf.mxu3  ;;  %v4518_v21 = vpop.f32.mrf.mxu1 }
0x1dd7   :  { %v13299_v27 = vadd.f32 %v11196_v53, %v4476_v51  ;;  %v4499_v6 = vpop.f32.mrf.mxu0  ;;  %v4702_v34 = vsel %vm1214_vm3, %v13294_v61, -inf  ;;  %v13310_v45 = vadd.f32 %v11197_v9, %v4518_v21  ;;  %v11199_v21 = vld [vmem:[%s15196_s6 + $0x8] sm:$0x1] }
0x1dd8   :  { %4703 = vmax.xlane.f32.xlu2 %v4702_v34  ;;  %4709 = vmax.xlane.f32.xlu0 %v4708_v59  ;;  %v11200_v59 = vld [vmem:[%s15196_s6 + $0x9] sm:$0x1] }
0x1dd9   :  { %v4705_v22 = vsel %vm1214_vm3, %v13299_v27, -inf  ;;  %v4711_v54 = vsel %vm1214_vm3, %v13310_v45, -inf }
0x1dda   :  { %4706 = vmax.xlane.f32.xlu1 %v4705_v22 }
0x1ddc   :  { %v4457_v52 = vpop.f32.mrf.mxu2 }
0x1dde   :  { %v4478_v0 = vpop.f32.mrf.mxu3  ;;  %v4520_v15 = vpop.f32.mrf.mxu1 }
0x1ddf   :  { %v4581_v38 = vpop.f32.mrf.mxu0 }
0x1de0   :  { %4712 = vmax.xlane.f32.xlu2 %v4711_v54  ;;  %v13317_v40 = vadd.f32 %v11198_v18, %v4581_v38  ;;  %v11201_v38 = vld [vmem:[%s15196_s6 + $0xb] sm:$0x1] }
0x1de2   :  { %v4720_v52 = vsel %vm1214_vm3, %v13317_v40, -inf }
0x1de4   :  { %v4539_v51 = vpop.f32.mrf.mxu2 }
0x1de5   :  { %v13322_v53 = vadd.f32 %v11199_v21, %v4539_v51 }
0x1de6   :  { %v4560_v6 = vpop.f32.mrf.mxu3  ;;  %v4602_v34 = vpop.f32.mrf.mxu1 }
0x1de7   :  { %v13327_v22 = vadd.f32 %v11200_v59, %v4560_v6  ;;  %v4583_v9 = vpop.f32.mrf.mxu0  ;;  %v4714_v0 = vsel %vm1214_vm3, %v13322_v53, -inf  ;;  %v13338_v54 = vadd.f32 %v11201_v38, %v4602_v34  ;;  %v11203_v34 = vld [vmem:[%s15196_s6 + $0xd] sm:$0x1] }
0x1de8   :  { %4721 = vmax.xlane.f32.xlu2 %v4720_v52  ;;  %4715 = vmax.xlane.f32.xlu1 %v4714_v0  ;;  %v11202_v52 = vld [vmem:[%s15196_s6 + $0xc] sm:$0x1] }
0x1de9   :  { %v4717_v15 = vsel %vm1214_vm3, %v13327_v22, -inf  ;;  %v4723_v59 = vsel %vm1214_vm3, %v13338_v54, -inf }
0x1dea   :  { %4718 = vmax.xlane.f32.xlu0 %v4717_v15 }
0x1dec   :  { %v4541_v18 = vpop.f32.mrf.mxu2 }
0x1dee   :  { %v4562_v51 = vpop.f32.mrf.mxu3  ;;  %v4604_v21 = vpop.f32.mrf.mxu1 }
0x1def   :  { %v4665_v6 = vpop.f32.mrf.mxu0 }
0x1df0   :  { %4724 = vmax.xlane.f32.xlu1 %v4723_v59 }
0x1df4   :  { %v4623_v9 = vpop.f32.mrf.mxu2 }
0x1df5   :  { %v13345_v0 = vadd.f32 %v11202_v52, %v4623_v9  ;;  %v11204_v9 = vld [vmem:[%s15196_s6 + $0xe] sm:$0x1] }
0x1df6   :  { %v4644_v15 = vpop.f32.mrf.mxu3  ;;  %v4686_v5 = vpop.f32.mrf.mxu1  ;;  %v13359_v52 = vadd.f32 %v11204_v9, %v4665_v6 }
0x1df7   :  { %v13350_v38 = vadd.f32 %v11203_v34, %v4644_v15  ;;  %v4667_v18 = vpop.f32.mrf.mxu0  ;;  %v4726_v51 = vsel %vm1214_vm3, %v13345_v0, -inf }
0x1df8   :  { %4727 = vmax.xlane.f32.xlu0 %v4726_v51  ;;  %v4732_v15 = vsel %vm1214_vm3, %v13359_v52, -inf }
0x1df9   :  { %v4729_v21 = vsel %vm1214_vm3, %v13350_v38, -inf }
0x1dfa   :  { %4730 = vmax.xlane.f32.xlu2 %v4729_v21 }
0x1dfc   :  { %v4625_v59 = vpop.f32.mrf.mxu2 }
0x1dfe   :  { %v4646_v24 = vpop.f32.mrf.mxu3  ;;  %v4688_v36 = vpop.f32.mrf.mxu1 }
0x1e02   :  { %4733 = vmax.xlane.f32.xlu2 %v4732_v15 }
0x1e1f   :  { %v4698_v18 = vpop.xlane.xlu1 %4697 }
0x1e20   :  { %v4740_v59 = vsub.f32 %v13261_v1, %v4698_v18 }
0x1e22   :  { %v4758_v6 = vmul.f32 1.442695, %v4740_v59 }
0x1e3b   :  { %v4692_v34 = vpop.xlane.xlu0 %4691 }
0x1e3c   :  { %v4738_v51 = vsub.f32 %v13268_v37, %v4692_v34 }
0x1e3d   :  { %v4695_v23 = vpop.xlane.xlu2 %4694 }
0x1e3e   :  { %v4754_v19 = vmul.f32 1.442695, %v4738_v51  ;;  %v4739_v21 = vsub.f32 %v13273_v17, %v4695_v23 }
0x1e40   :  { %10654 = vpow2.f32 %v4754_v19  ;;  %v4756_v26 = vmul.f32 1.442695, %v4739_v21 }
0x1e42   :  { %10656 = vpow2.f32 %v4756_v26  ;;  %v11205_v26 = vld [vmem:[%s15196_s6 + $0xf] sm:$0x1] }
0x1e43   :  { %v4701_v24 = vpop.xlane.xlu0 %4700  ;;  %10658 = vpow2.f32 %v4758_v6  ;;  %v13378_v19 = vadd.f32 %v11205_v26, %v4686_v5 }
0x1e44   :  { %v4741_v36 = vsub.f32 %v13282_v55, %v4701_v24 }
0x1e46   :  { %v13367_v9 = vpop.eup %10654  ;;  %v4760_v15 = vmul.f32 1.442695, %v4741_v36 }
0x1e47   :  { %v4786_v37 = vsel %vm1214_vm3, %v13367_v9, 0.0 }
0x1e48   :  { %v13371_v34 = vpop.eup %10656  ;;  %10660 = vpow2.f32 %v4760_v15  ;;  %4787 = vadd.xlane.f32.xlu1 %v4786_v37  ;;  %v4735_v15 = vsel %vm1214_vm3, %v13378_v19, -inf }
0x1e49   :  { %v4789_v23 = vsel %vm1214_vm3, %v13371_v34, 0.0  ;;  %v13382_v51 = vpop.eup %10658 }
0x1e4a   :  { %4790 = vadd.xlane.f32.xlu0 %v4789_v23 }
0x1e4b   :  { %v4710_v1 = vpop.xlane.xlu0 %4709  ;;  %v4704_v17 = vpop.xlane.xlu2 %4703 }
0x1e4c   :  { %v4744_v55 = vsub.f32 %v13289_v41, %v4710_v1  ;;  %v4742_v18 = vsub.f32 %v13294_v61, %v4704_v17  ;;  %v4792_v41 = vsel %vm1214_vm3, %v13382_v51, 0.0 }
0x1e4d   :  { %v4707_v21 = vpop.xlane.xlu1 %4706 }
0x1e4e   :  { %v13384_v59 = vpop.eup %10660  ;;  %v4766_v6 = vmul.f32 1.442695, %v4744_v55  ;;  %v4762_v24 = vmul.f32 1.442695, %v4742_v18  ;;  %v4743_v36 = vsub.f32 %v13299_v27, %v4707_v21 }
0x1e4f   :  { %v4795_v5 = vsel %vm1214_vm3, %v13384_v59, 0.0 }
0x1e50   :  { %10662 = vpow2.f32 %v4766_v6  ;;  %v4764_v37 = vmul.f32 1.442695, %v4743_v36  ;;  %4736 = vmax.xlane.f32.xlu1 %v4735_v15  ;;  %4796 = vadd.xlane.f32.xlu2 %v4795_v5 }
0x1e51   :  { %10664 = vpow2.f32 %v4762_v24 }
0x1e52   :  { %10666 = vpow2.f32 %v4764_v37  ;;  %4793 = vadd.xlane.f32.xlu0 %v4792_v41 }
0x1e53   :  { %v4713_v61 = vpop.xlane.xlu2 %4712 }
0x1e54   :  { %v4745_v23 = vsub.f32 %v13310_v45, %v4713_v61 }
0x1e56   :  { %v13394_v27 = vpop.eup %10662  ;;  %v4768_v26 = vmul.f32 1.442695, %v4745_v23 }
0x1e57   :  { %v13396_v1 = vpop.eup %10664  ;;  %v4804_v17 = vsel %vm1214_vm3, %v13394_v27, 0.0 }
0x1e58   :  { %v13400_v55 = vpop.eup %10666  ;;  %10668 = vpow2.f32 %v4768_v26  ;;  %4805 = vadd.xlane.f32.xlu2 %v4804_v17  ;;  %v4798_v18 = vsel %vm1214_vm3, %v13396_v1, 0.0 }
0x1e59   :  { %4799 = vadd.xlane.f32.xlu1 %v4798_v18  ;;  %v4801_v21 = vsel %vm1214_vm3, %v13400_v55, 0.0 }
0x1e5a   :  { %4802 = vadd.xlane.f32.xlu0 %v4801_v21 }
0x1e5b   :  { %v4716_v45 = vpop.xlane.xlu1 %4715  ;;  %v4722_v6 = vpop.xlane.xlu2 %4721 }
0x1e5c   :  { %v4746_v24 = vsub.f32 %v13322_v53, %v4716_v45  ;;  %v4748_v36 = vsub.f32 %v13317_v40, %v4722_v6 }
0x1e5d   :  { %v4719_v15 = vpop.xlane.xlu0 %4718 }
0x1e5e   :  { %v13408_v5 = vpop.eup %10668  ;;  %v4770_v37 = vmul.f32 1.442695, %v4746_v24  ;;  %v4774_v41 = vmul.f32 1.442695, %v4748_v36  ;;  %v4747_v61 = vsub.f32 %v13327_v22, %v4719_v15 }
0x1e5f   :  { %v4807_v23 = vsel %vm1214_vm3, %v13408_v5, 0.0 }
0x1e60   :  { %10670 = vpow2.f32 %v4770_v37  ;;  %v4772_v26 = vmul.f32 1.442695, %v4747_v61 }
0x1e61   :  { %10672 = vpow2.f32 %v4774_v41  ;;  %4808 = vadd.xlane.f32.xlu1 %v4807_v23 }
0x1e62   :  { %10674 = vpow2.f32 %v4772_v26 }
0x1e63   :  { %v4725_v17 = vpop.xlane.xlu1 %4724 }
0x1e64   :  { %v4749_v53 = vsub.f32 %v13338_v54, %v4725_v17 }
0x1e66   :  { %v13414_v18 = vpop.eup %10670  ;;  %v4776_v40 = vmul.f32 1.442695, %v4749_v53 }
0x1e67   :  { %v13416_v21 = vpop.eup %10672  ;;  %v4810_v45 = vsel %vm1214_vm3, %v13414_v18, 0.0 }
0x1e68   :  { %v13420_v22 = vpop.eup %10674  ;;  %10676 = vpow2.f32 %v4776_v40  ;;  %4811 = vadd.xlane.f32.xlu0 %v4810_v45  ;;  %v4816_v6 = vsel %vm1214_vm3, %v13416_v21, 0.0 }
0x1e69   :  { %4817 = vadd.xlane.f32.xlu1 %v4816_v6  ;;  %v4813_v24 = vsel %vm1214_vm3, %v13420_v22, 0.0 }
0x1e6a   :  { %4814 = vadd.xlane.f32.xlu2 %v4813_v24 }
0x1e6b   :  { %v4728_v54 = vpop.xlane.xlu0 %4727 }
0x1e6c   :  { %v4750_v36 = vsub.f32 %v13345_v0, %v4728_v54 }
0x1e6d   :  { %v4731_v15 = vpop.xlane.xlu2 %4730 }
0x1e6e   :  { %v13427_v37 = vpop.eup %10676  ;;  %v4778_v41 = vmul.f32 1.442695, %v4750_v36  ;;  %v4751_v61 = vsub.f32 %v13350_v38, %v4731_v15 }
0x1e6f   :  { %v4819_v23 = vsel %vm1214_vm3, %v13427_v37, 0.0 }
0x1e70   :  { %10678 = vpow2.f32 %v4778_v41  ;;  %v4780_v26 = vmul.f32 1.442695, %v4751_v61  ;;  %4820 = vadd.xlane.f32.xlu0 %v4819_v23 }
0x1e72   :  { %10680 = vpow2.f32 %v4780_v26 }
0x1e75   :  { %v4734_v17 = vpop.xlane.xlu2 %4733 }
0x1e76   :  { %v13432_v53 = vpop.eup %10678  ;;  %v4752_v40 = vsub.f32 %v13359_v52, %v4734_v17  ;;  %v15265_v52 = vpack.c.bf16 %v13158_v32, %v13156_v4 }
0x1e77   :  { %v4822_v0 = vsel %vm1214_vm3, %v13432_v53, 0.0 }
0x1e78   :  { %v13437_v45 = vpop.eup %10680  ;;  %v4782_v6 = vmul.f32 1.442695, %v4752_v40  ;;  %4823 = vadd.xlane.f32.xlu2 %v4822_v0 }
0x1e79   :  { %v4825_v38 = vsel %vm1214_vm3, %v13437_v45, 0.0 }
0x1e7a   :  { %10682 = vpow2.f32 %v4782_v6  ;;  %4826 = vadd.xlane.f32.xlu1 %v4825_v38 }
0x1e80   :  { %v13441_v24 = vpop.eup %10682 }
0x1e81   :  { %v4828_v54 = vsel %vm1214_vm3, %v13441_v24, 0.0 }
0x1e82   :  { %4829 = vadd.xlane.f32.xlu0 %v4828_v54 }
0x1e96   :  { %5229 = vrot.lane.b32.xlu0 %v15265_v52, %s11536_s7 }
0x1ebb   :  { %v4788_v36 = vpop.xlane.xlu1 %4787 }
0x1ebc   :  { %10684 = vrcp.f32 %v4788_v36 }
0x1ebd   :  { %v4791_v15 = vpop.xlane.xlu0 %4790 }
0x1ebe   :  { %10686 = vrcp.f32 %v4791_v15 }
0x1ec2   :  { %v10685_v41 = vpop.eup %10684 }
0x1ec3   :  { %v4850_v61 = vmul.f32 %v10685_v41, %v13367_v9  ;;  %v4737_v23 = vpop.xlane.xlu1 %4736  ;;  %v4797_v26 = vpop.xlane.xlu2 %4796 }
0x1ec4   :  { %v10687_v17 = vpop.eup %10686  ;;  %v4753_v40 = vsub.f32 %v13378_v19, %v4737_v23  ;;  %10688 = vrcp.f32 %v4797_v26 }
0x1ec5   :  { %v4866_v0 = vpack.c.bf16 %v4850_v61, %v4850_v61  ;;  %v4851_v6 = vmul.f32 %v10687_v17, %v13371_v34  ;;  %v4794_v38 = vpop.xlane.xlu0 %4793 }
0x1ec6   :  { %v4784_v54 = vmul.f32 1.442695, %v4753_v40  ;;  %10690 = vrcp.f32 %v4794_v38 }
0x1ec7   :  { %v4867_v4 = vpack.c.bf16 %v4851_v6, %v4851_v6  ;;  %10021 = vmatmul.msk.bf16.vlgmr.msra.gmra.mxu2 %vm1407_vm5, %v4866_v0 }
0x1ec8   :  { %10692 = vpow2.f32 %v4784_v54  ;;  %5020 = vmatpush.bf16.msra.mxu2 %v12177_v39 }
0x1ec9   :  { %10022 = vmatmul.msk.bf16.vlgmr.msrb.gmra.mxu3 %vm1407_vm5, %v4867_v4 }
0x1eca   :  { %v10689_v32 = vpop.eup %10688  ;;  %5036 = vmatpush.bf16.msrb.mxu3 %v12180_v58 }
0x1ecb   :  { %v4853_v9 = vmul.f32 %v10689_v32, %v13384_v59  ;;  %v4806_v23 = vpop.xlane.xlu2 %4805 }
0x1ecc   :  { %v10691_v19 = vpop.eup %10690  ;;  %v4800_v52 = vpop.xlane.xlu1 %4799 }
0x1ecd   :  { %v4869_v36 = vpack.c.bf16 %v4853_v9, %v4853_v9  ;;  %v4852_v34 = vmul.f32 %v10691_v19, %v13382_v51  ;;  %10694 = vrcp.f32 %v4800_v52  ;;  %v4803_v15 = vpop.xlane.xlu0 %4802 }
0x1ece   :  { %v13458_v41 = vpop.eup %10692  ;;  %10696 = vrcp.f32 %v4803_v15 }
0x1ecf   :  { %v4868_v61 = vpack.c.bf16 %v4852_v34, %v4852_v34  ;;  %10024 = vmatmul.msk.bf16.vlgmr.msra.gmra.mxu1 %vm1407_vm5, %v4869_v36  ;;  %v4831_v26 = vsel %vm1214_vm3, %v13458_v41, 0.0  ;;  %10698 = vrcp.f32 %v4806_v23 }
0x1ed0   :  { %4832 = vadd.xlane.f32.xlu2 %v4831_v26  ;;  %5068 = vmatpush.bf16.msra.mxu1 %v12185_v10 }
0x1ed1   :  { %10023 = vmatmul.msk.bf16.vlgmr.msra.gmra.mxu0 %vm1407_vm5, %v4868_v61 }
0x1ed2   :  { %5052 = vmatpush.bf16.msra.mxu0 %v12196_v2 }
0x1ed3   :  { %v10695_v51 = vpop.eup %10694 }
0x1ed4   :  { %v10697_v59 = vpop.eup %10696  ;;  %v4854_v17 = vmul.f32 %v10695_v51, %v13396_v1  ;;  %v4809_v40 = vpop.xlane.xlu1 %4808 }
0x1ed5   :  { %v4855_v0 = vmul.f32 %v10697_v59, %v13400_v55  ;;  %10700 = vrcp.f32 %v4809_v40  ;;  %v10699_v54 = vpop.eup %10698  ;;  %v11206_v59 = vld [vmem:[%s15205_s15 + $0x38] sm:$0xff]  ;;  %v11207_v40 = vld [vmem:[#allocation8 + $0x8] sm:$0xff] }
0x1ed6   :  { %v4870_v6 = vpack.c.bf16 %v4854_v17, %v4854_v17  ;;  %v4856_v32 = vmul.f32 %v10699_v54, %v13394_v27 }
0x1ed7   :  { %v4871_v38 = vpack.c.bf16 %v4855_v0, %v4855_v0 }
0x1ed8   :  { %10025 = vmatmul.msk.bf16.vlgmr.msrb.gmra.mxu2 %vm1407_vm5, %v4870_v6  ;;  %v4872_v52 = vpack.c.bf16 %v4856_v32, %v4856_v32 }
0x1ed9   :  { %10026 = vmatmul.msk.bf16.vlgmr.msra.gmra.mxu3 %vm1407_vm5, %v4871_v38  ;;  %5084 = vmatpush.bf16.msrb.mxu2 %v12203_v57  ;;  %v11208_v38 = vld [vmem:[%s15205_s15 + $0x30] sm:$0xff] }
0x1eda   :  { %5100 = vmatpush.bf16.msra.mxu3 %v12214_v50 }
0x1edb   :  { %v10701_v4 = vpop.eup %10700  ;;  %v4812_v9 = vpop.xlane.xlu0 %4811 }
0x1edc   :  { %v4857_v1 = vmul.f32 %v10701_v4, %v13408_v5  ;;  %10702 = vrcp.f32 %v4812_v9  ;;  %v4818_v36 = vpop.xlane.xlu1 %4817  ;;  %v11209_v4 = vld [vmem:[#allocation8] sm:$0xff]  ;;  %v11211_v9 = vld [vmem:[#allocation9 + $0x8] sm:$0xff] }
0x1edd   :  { %v4815_v55 = vpop.xlane.xlu2 %4814 }
0x1ede   :  { %v4873_v19 = vpack.c.bf16 %v4857_v1, %v4857_v1  ;;  %10704 = vrcp.f32 %v4815_v55  ;;  %v11212_v1 = vld [vmem:[#allocation11 + $0x18] sm:$0xff] }
0x1edf   :  { %10706 = vrcp.f32 %v4818_v36 }
0x1ee0   :  { %10028 = vmatmul.msk.bf16.vlgmr.msrb.gmra.mxu1 %vm1407_vm5, %v4873_v19 }
0x1ee1   :  { %10027 = vmatmul.msk.bf16.vlgmr.msrb.gmra.mxu0 %vm1407_vm5, %v4872_v52  ;;  %5132 = vmatpush.bf16.msrb.mxu1 %v12209_v62 }
0x1ee2   :  { %v10703_v34 = vpop.eup %10702  ;;  %5116 = vmatpush.bf16.msrb.mxu0 %v12262_v49 }
0x1ee3   :  { %v4858_v27 = vmul.f32 %v10703_v34, %v13414_v18  ;;  %v4821_v15 = vpop.xlane.xlu0 %4820  ;;  %v11213_v34 = vld [vmem:[%s15205_s15 + $0x20] sm:$0xff] }
0x1ee4   :  { %v10705_v5 = vpop.eup %10704  ;;  %10708 = vrcp.f32 %v4821_v15  ;;  %v11214_v15 = vld [vmem:[#allocation9] sm:$0xff] }
0x1ee5   :  { %v4874_v61 = vpack.c.bf16 %v4858_v27, %v4858_v27  ;;  %v4859_v23 = vmul.f32 %v10705_v5, %v13420_v22  ;;  %v10707_v51 = vpop.eup %10706  ;;  %v11215_v5 = vld [vmem:[#allocation11 + $0x10] sm:$0xff] }
0x1ee6   :  { %v4860_v18 = vmul.f32 %v10707_v51, %v13416_v21  ;;  %v11210_v21 = vld [vmem:[%s15205_s15 + $0x28] sm:$0xff]  ;;  %v11218_v51 = vld [vmem:[%s15205_s15 + $0x10] sm:$0xff] }
0x1ee7   :  { %v4875_v26 = vpack.c.bf16 %v4859_v23, %v4859_v23 }
0x1ee8   :  { %10029 = vmatmul.msk.bf16.vlgmr.msra.gmra.mxu2 %vm1407_vm5, %v4874_v61  ;;  %v4876_v32 = vpack.c.bf16 %v4860_v18, %v4860_v18 }
0x1ee9   :  { %5193 = vmatpush.bf16.msra.mxu2 %v11206_v59  ;;  %10030 = vmatmul.msk.bf16.vlgmr.msrb.gmra.mxu3 %vm1407_vm5, %v4875_v26  ;;  %v11219_v59 = vld [vmem:[#allocation11] sm:$0xff] }
0x1eea   :  { %v10709_v17 = vpop.eup %10708  ;;  %5219 = vmatpush.bf16.msrb.mxu3 %v11207_v40  ;;  %v11220_v40 = vld [vmem:[%s15205_s15 + $0x8] sm:$0xff] }
0x1eeb   :  { %v4861_v0 = vmul.f32 %v10709_v17, %v13427_v37  ;;  %v4824_v6 = vpop.xlane.xlu2 %4823 }
0x1eec   :  { %10710 = vrcp.f32 %v4824_v6 }
0x1eed   :  { %v4877_v22 = vpack.c.bf16 %v4861_v0, %v4861_v0  ;;  %5194 = vmatpush.bf16.msra.mxu2 %v11208_v38  ;;  %v4827_v54 = vpop.xlane.xlu1 %4826 }
0x1eee   :  { %10712 = vrcp.f32 %v4827_v54  ;;  %5220 = vmatpush.bf16.msrb.mxu3 %v11209_v4 }
0x1ef0   :  { %10032 = vmatmul.msk.bf16.vlgmr.msra.gmra.mxu1 %vm1407_vm5, %v4877_v22 }
0x1ef1   :  { %5195 = vmatpush.bf16.msra.mxu2 %v11210_v21  ;;  %10031 = vmatmul.msk.bf16.vlgmr.msra.gmra.mxu0 %vm1407_vm5, %v4876_v32 }
0x1ef2   :  { %v10711_v37 = vpop.eup %10710  ;;  %5240 = vmatpush.bf16.msra.mxu0 %v11211_v9  ;;  %5345 = vmatpush.bf16.msra.mxu1 %v11212_v1 }
0x1ef3   :  { %v4862_v55 = vmul.f32 %v10711_v37, %v13432_v53  ;;  %v11216_v53 = vld [vmem:[%s15205_s15 + $0x18] sm:$0xff] }
0x1ef4   :  { %v10713_v19 = vpop.eup %10712 }
0x1ef5   :  { %v4878_v52 = vpack.c.bf16 %v4862_v55, %v4862_v55  ;;  %v4863_v36 = vmul.f32 %v10713_v19, %v13437_v45  ;;  %5196 = vmatpush.bf16.msra.mxu2 %v11213_v34  ;;  %v4830_v27 = vpop.xlane.xlu0 %4829  ;;  %v11217_v45 = vld [vmem:[#allocation11 + $0x8] sm:$0xff] }
0x1ef6   :  { %10714 = vrcp.f32 %v4830_v27  ;;  %5241 = vmatpush.bf16.msra.mxu0 %v11214_v15  ;;  %5346 = vmatpush.bf16.msra.mxu1 %v11215_v5 }
0x1ef7   :  { %v4879_v61 = vpack.c.bf16 %v4863_v36, %v4863_v36 }
0x1ef8   :  { %10033 = vmatmul.msk.bf16.vlgmr.msrb.gmra.mxu2 %vm1407_vm5, %v4878_v52 }
0x1ef9   :  { %5197 = vmatpush.bf16.msra.mxu2 %v11216_v53  ;;  %10034 = vmatmul.msk.bf16.vlgmr.msra.gmra.mxu3 %vm1407_vm5, %v4879_v61 }
0x1efa   :  { %5492 = vmatpush.bf16.xpose.msra.mxu3 %v11803_v7  ;;  %5347 = vmatpush.bf16.msra.mxu1 %v11217_v45 }
0x1efc   :  { %v10715_v23 = vpop.eup %10714 }
0x1efd   :  { %v4864_v26 = vmul.f32 %v10715_v23, %v13441_v24  ;;  %5198 = vmatpush.bf16.msra.mxu2 %v11218_v51  ;;  %v11221_v24 = vld [vmem:[%s15205_s15] sm:$0xff] }
0x1efe   :  { %5348 = vmatpush.bf16.msra.mxu1 %v11219_v59 }
0x1eff   :  { %v4880_v17 = vpack.c.bf16 %v4864_v26, %v4864_v26 }
0x1f01   :  { %5199 = vmatpush.bf16.msra.mxu2 %v11220_v40  ;;  %10035 = vmatmul.msk.bf16.vlgmr.msrb.gmra.mxu0 %vm1407_vm5, %v4880_v17 }
0x1f02   :  { %5513 = vmatpush.bf16.xpose.msrb.mxu0 %v11813_v29 }
0x1f05   :  { %5200 = vmatpush.bf16.msra.mxu2 %v11221_v24 }
0x1f08   :  { %v5230_v18 = vpop.permute.xlu0 %5229 }
0x1f09   :  { %5555 = vmatpush.bf16.xpose.msrb.mxu2 %v11839_v60 }
0x1f11   :  { %10038 = vmatmul.msk.bf16.vlgmr.msra.gmra.mxu0 %vm215_vm0, %v5230_v18 }
0x1f12   :  { %5597 = vmatpush.bf16.xpose.msra.mxu0 %v11847_v3 }
0x1f43   :  { %v4833_v0 = vpop.xlane.xlu2 %4832 }
0x1f44   :  { %10716 = vrcp.f32 %v4833_v0 }
0x1f4a   :  { %v10717_v6 = vpop.eup %10716  ;;  %v4894_v22 = vpop.f32.mrf.mxu2 }
0x1f4b   :  { %v4865_v38 = vmul.f32 %v10717_v6, %v13458_v41 }
0x1f4c   :  { %v4910_v54 = vpop.f32.mrf.mxu3  ;;  %v4942_v4 = vpop.f32.mrf.mxu1 }
0x1f4d   :  { %v4881_v32 = vpack.c.bf16 %v4865_v38, %v4865_v38  ;;  %v5146_v21 = vrot.slane %v4910_v54, 7  ;;  %v5150_v55 = vrot.slane %v4942_v4, 5 }
0x1f4e   :  { %v4926_v37 = vpop.f32.mrf.mxu0 }
0x1f4f   :  { %v5147_v9 = vsel %vm1722_vm6, %v5146_v21, %v4894_v22  ;;  %v5148_v1 = vrot.slane %v4926_v37, 6  ;;  %10036 = vmatmul.msk.bf16.vlgmr.msrb.gmra.mxu1 %vm1407_vm5, %v4881_v32 }
0x1f50   :  { %5534 = vmatpush.bf16.xpose.msrb.mxu1 %v11835_v56 }
0x1f51   :  { %v5149_v19 = vsel %vm1725_vm7, %v5148_v1, %v5147_v9 }
0x1f52   :  { %v4896_v52 = vpop.f32.mrf.mxu2  ;;  %v5151_v36 = vsel %vm1728_vm8, %v5150_v55, %v5149_v19 }
0x1f54   :  { %v4912_v34 = vpop.f32.mrf.mxu3  ;;  %v4944_v41 = vpop.f32.mrf.mxu1 }
0x1f56   :  { %v4928_v27 = vpop.f32.mrf.mxu0 }
0x1f5b   :  { %v4958_v15 = vpop.f32.mrf.mxu2 }
0x1f5c   :  { %v5152_v5 = vrot.slane %v4958_v15, 4  ;;  %v4974_v61 = vpop.f32.mrf.mxu3 }
0x1f5d   :  { %v5154_v53 = vrot.slane %v4974_v61, 3  ;;  %v5006_v45 = vpop.f32.mrf.mxu1 }
0x1f5e   :  { %v5153_v23 = vsel %vm1731_vm10, %v5152_v5, %v5151_v36  ;;  %v4990_v26 = vpop.f32.mrf.mxu0  ;;  %v5158_v17 = vrot.slane %v5006_v45, 1 }
0x1f5f   :  { %v5155_v51 = vsel %vm15266_vm2, %v5154_v53, %v5153_v23  ;;  %v5156_v59 = vrot.slane %v4990_v26, 2 }
0x1f61   :  { %v5157_v40 = vsel %vm15267_vm4, %v5156_v59, %v5155_v51 }
0x1f62   :  { %v5159_v24 = vsel %vm15268_vm11, %v5158_v17, %v5157_v40 }
0x1f63   :  { %v4960_v18 = vpop.f32.mrf.mxu2 }
0x1f64   :  { %v4976_v0 = vpop.f32.mrf.mxu3 }
0x1f65   :  { %v5008_v6 = vpop.f32.mrf.mxu1 }
0x1f66   :  { %v4992_v22 = vpop.f32.mrf.mxu0 }
0x1f6b   :  { %v5022_v38 = vpop.f32.mrf.mxu2 }
0x1f6c   :  { %v5038_v54 = vpop.f32.mrf.mxu3 }
0x1f6d   :  { %v5172_v4 = vrot.slane %v5038_v54, 7  ;;  %v5070_v32 = vpop.f32.mrf.mxu1 }
0x1f6e   :  { %v5054_v21 = vpop.f32.mrf.mxu0  ;;  %v5176_v1 = vrot.slane %v5070_v32, 5 }
0x1f6f   :  { %v5173_v37 = vsel %vm1722_vm6, %v5172_v4, %v5022_v38  ;;  %v5174_v9 = vrot.slane %v5054_v21, 6 }
0x1f71   :  { %v5175_v55 = vsel %vm1725_vm7, %v5174_v9, %v5173_v37 }
0x1f72   :  { %v5177_v19 = vsel %vm1728_vm8, %v5176_v1, %v5175_v55 }
0x1f73   :  { %v5024_v52 = vpop.f32.mrf.mxu2 }
0x1f74   :  { %v5040_v36 = vpop.f32.mrf.mxu3 }
0x1f75   :  { %v5072_v34 = vpop.f32.mrf.mxu1  ;;  %v11222_v36 = vld [vmem:[%s15200_s10] ss:$0 sm:$0xff] }
0x1f76   :  { %v5056_v41 = vpop.f32.mrf.mxu0  ;;  %v15273_v34 = vld [vmem:[#allocation21_spill] sm:$0xff] }
0x1f77   :  { %v248_v41 = vadd.f32 %v11222_v36, %v15273_v34 }
0x1f7b   :  { %v5086_v27 = vpop.f32.mrf.mxu2 }
0x1f7c   :  { %v5178_v15 = vrot.slane %v5086_v27, 4  ;;  %v5102_v5 = vpop.f32.mrf.mxu3 }
0x1f7d   :  { %v5180_v61 = vrot.slane %v5102_v5, 3 }
0x1f7e   :  { %v5179_v53 = vsel %vm1731_vm10, %v5178_v15, %v5177_v19  ;;  %v5118_v45 = vpop.f32.mrf.mxu0 }
0x1f7f   :  { %v5181_v23 = vsel %vm15269_vm12, %v5180_v61, %v5179_v53  ;;  %v5182_v26 = vrot.slane %v5118_v45, 2 }
0x1f81   :  { %v5183_v51 = vsel %vm15270_vm13, %v5182_v26, %v5181_v23 }
0x1f83   :  { %v5088_v59 = vpop.f32.mrf.mxu2 }
0x1f84   :  { %v5104_v17 = vpop.f32.mrf.mxu3 }
0x1f86   :  { %v5120_v40 = vpop.f32.mrf.mxu0 }
0x1fcc   :  { %v5134_v18 = vpop.f32.mrf.mxu1 }
0x1fcd   :  { %v5184_v0 = vrot.slane %v5134_v18, 1 }
0x1fcf   :  { %v5185_v6 = vsel %vm15271_vm14, %v5184_v0, %v5183_v51 }
0x1fd0   :  { %v10281_v22 = vpack.i.bf16 %v5185_v6, %v13188_v30 }
0x1fd2   :  { %10282 = vrot.lane.b32.xlu1 %v10281_v22, %s11529_s29 }
0x1fd4   :  { %v5136_v38 = vpop.f32.mrf.mxu1 }
0x2044   :  { %v13540_v54 = vpop.permute.xlu1 %10282 }
0x2045   :  { %v10285_v4 = vunpack.i.h.bf16 %v13540_v54  ;;  %v10284_v32 = vunpack.i.l.bf16 %v13540_v54 }
0x2047   :  { %v5189_v21 = vsel %vm215_vm0, %v5159_v24, %v10284_v32  ;;  %v5243_v24 = vpop.f32.mrf.mxu0 }
0x2048   :  { %v5190_v37 = vsel %vm682_vm9, %v5189_v21, %v10285_v4 }
0x2049   :  { %v5191_v9 = vsel %vm15272_vm15, %v5190_v37, %v13201_v11 }
0x204a   :  { %v5192_v1 = vpack.c.bf16 %v5191_v9, %v5191_v9 }
0x204c   :  { %5201 = vmatmul.bf16.vlgmr.msra.gmra.mxu2 %v5192_v1 }
0x204d   :  { %5639 = vmatpush.bf16.xpose.msra.mxu2 %v11855_v13 }
0x204f   :  { %v5245_v5 = vpop.f32.mrf.mxu0 }
0x20cf   :  { %v5202_v30 = vpop.f32.mrf.mxu2 }
0x20d0   :  { %10718 = vtanh.f32 %v5202_v30 }
0x20d6   :  { %v10719_v55 = vpop.eup %10718 }
0x20d7   :  { %v5209_v19 = vpack.c.bf16 %v10719_v55, %v10719_v55  ;;  %9702 = vst.msk [vmem:[#allocation14 + $0x18] sm:$0xff] %vm215_vm0, %v10719_v55  ;;  %v5204_v52 = vpop.f32.mrf.mxu2 }
0x20d9   :  { %10037 = vmatmul.msk.bf16.vlgmr.msrb.gmra.mxu3 %vm215_vm0, %v5209_v19 }
0x20da   :  { %5576 = vmatpush.bf16.xpose.msrb.mxu3 %v11843_v63 }
0x215c   :  { %v5222_v27 = vpop.f32.mrf.mxu3 }
0x215d   :  { %v5226_v15 = vadd.f32 %v5222_v27, %v248_v41 }
0x215f   :  { %v5248_v61 = vadd.f32 %v5243_v24, %v5226_v15  ;;  %v5249_v53 = vadd.f32 %v5245_v5, %v5226_v15 }
0x2161   :  { %10720 = vtanh.f32 %v5248_v61  ;;  %v10039_v51 = vmul.f32 -1.442695, %v5248_v61  ;;  %v10040_v18 = vmul.f32 -1.442695, %v5249_v53 }
0x2162   :  { %10722 = vtanh.f32 %v5249_v53 }
0x2163   :  { %10724 = vpow2.f32 %v10039_v51 }
0x2164   :  { %v5224_v45 = vpop.f32.mrf.mxu3 }
0x2167   :  { %v10721_v23 = vpop.eup %10720 }
0x2168   :  { %v10723_v26 = vpop.eup %10722  ;;  %5294 = vrot.lane.b32.xlu2 %v10721_v23, %s11529_s29 }
0x2169   :  { %5296 = vrot.lane.b32.xlu0 %v10723_v26, %s11529_s29  ;;  %v10725_v59 = vpop.eup %10724 }
0x216a   :  { %v5256_v17 = vadd.f32 1.0, %v10725_v59 }
0x216c   :  { %10726 = vrcp.f32 %v5256_v17  ;;  %v5269_v37 = vand.u32 2147483648, %v5256_v17  ;;  %vm5263_vm2 = vweird.f32 %v5256_v17  ;;  %v5267_v9 = vand.u32 2147483647, %v5256_v17 }
0x216d   :  { %10728 = vpow2.f32 %v10040_v18 }
0x216e   :  { %v5270_v30 = vor.u32 1.1754944e-38, %v5269_v37  ;;  %vm5268_vm11 = vcmp.eq.f32.partialorder %v5267_v9, 8.507059e+37 }
0x2172   :  { %v10727_v40 = vpop.eup %10726 }
0x2173   :  { %v5259_v0 = vmul.f32 %v10727_v40, %v5256_v17  ;;  %v10729_v38 = vpop.eup %10728  ;;  %vm5264_vm1 = vweird.f32 %v10727_v40 }
0x2174   :  { %v5257_v4 = vadd.f32 1.0, %v10729_v38  ;;  %vm5265_vm4 = vmor %vm5263_vm2, %vm5264_vm1 }
0x2175   :  { %v5260_v6 = vsub.f32 1.0, %v5259_v0 }
0x2176   :  { %10730 = vrcp.f32 %v5257_v4  ;;  %v5284_v15 = vand.u32 2147483648, %v5257_v4  ;;  %vm5278_vm13 = vweird.f32 %v5257_v4  ;;  %v5282_v5 = vand.u32 2147483647, %v5257_v4 }
0x2177   :  { %v5261_v22 = vmul.f32 %v10727_v40, %v5260_v6 }
0x2178   :  { %v5285_v53 = vor.u32 1.1754944e-38, %v5284_v15  ;;  %vm5283_vm15 = vcmp.eq.f32.partialorder %v5282_v5, 8.507059e+37 }
0x2179   :  { %v5262_v21 = vadd.f32 %v10727_v40, %v5261_v22 }
0x217b   :  { %v5266_v1 = vsel %vm5265_vm4, %v10727_v40, %v5262_v21 }
0x217c   :  { %v5271_v19 = vsel %vm5268_vm11, %v5270_v30, %v5266_v1  ;;  %v10731_v24 = vpop.eup %10730 }
0x217d   :  { %v5274_v36 = vmul.f32 %v10731_v24, %v5257_v4  ;;  %vm5279_vm12 = vweird.f32 %v10731_v24  ;;  %v5290_v51 = vmul.f32 %v5271_v19, %v13145_v20 }
0x217e   :  { %vm5280_vm14 = vmor %vm5278_vm13, %vm5279_vm12 }
0x217f   :  { %v5275_v34 = vsub.f32 1.0, %v5274_v36  ;;  %v11223_v36 = vld [vmem:[%s15202_s12] ss:$0 sm:$0xff] }
0x2181   :  { %v5276_v41 = vmul.f32 %v10731_v24, %v5275_v34 }
0x2183   :  { %v5277_v27 = vadd.f32 %v10731_v24, %v5276_v41 }
0x2185   :  { %v5281_v61 = vsel %vm5280_vm14, %v10731_v24, %v5277_v27 }
0x2186   :  { %v5286_v23 = vsel %vm5283_vm15, %v5285_v53, %v5281_v61 }
0x2187   :  { %v5291_v17 = vmul.f32 %v5286_v23, %v13152_v16 }
0x21c2   :  { %v5295_v55 = vpop.permute.xlu2 %5294 }
0x21c3   :  { %v5300_v52 = vmul.f32 %v5295_v55, %v5271_v19 }
0x21c5   :  { %5304 = vrot.lane.b32.xlu1 %v5300_v52, %s11536_s7 }
0x21db   :  { %v5297_v45 = vpop.permute.xlu0 %5296 }
0x21dc   :  { %v5301_v26 = vmul.f32 %v5297_v45, %v5286_v23 }
0x21de   :  { %5306 = vrot.lane.b32.xlu2 %v5301_v26, %s11536_s7 }
0x2237   :  { %v5305_v59 = vpop.permute.xlu1 %5304 }
0x2238   :  { %v13564_v40 = vadd.f32 %v5305_v59, %v5290_v51  ;;  %v5307_v18 = vpop.permute.xlu2 %5306 }
0x2239   :  { %v13566_v0 = vadd.f32 %v5307_v18, %v5291_v17 }
0x223a   :  { %10732 = vtanh.f32 %v13564_v40 }
0x223b   :  { %10734 = vtanh.f32 %v13566_v0 }
0x2240   :  { %v10733_v6 = vpop.eup %10732 }
0x2241   :  { %v10735_v22 = vpop.eup %10734  ;;  %5316 = vrot.lane.b32.xlu0 %v10733_v6, %s11529_s29 }
0x2242   :  { %5318 = vrot.lane.b32.xlu1 %v10735_v22, %s11529_s29 }
0x2249   :  { %5332 = vrot.lane.b32.xlu0 %v13201_v11, %s11529_s29 }
0x22b3   :  { %v5317_v20 = vpop.permute.xlu0 %5316 }
0x22b4   :  { %v13574_v16 = vmul.f32 %v5317_v20, %v5271_v19  ;;  %v5319_v38 = vpop.permute.xlu1 %5318 }
0x22b5   :  { %v13576_v4 = vmul.f32 %v5319_v38, %v5286_v23 }
0x22b7   :  { %v10286_v21 = vpack.i.bf16 %v13576_v4, %v13574_v16 }
0x22b9   :  { %10287 = vrot.lane.b32.xlu2 %v10286_v21, %s11536_s7 }
0x22bb   :  { %v5333_v55 = vpop.permute.xlu0 %5332 }
0x2313   :  { %v10288_v9 = vpop.permute.xlu2 %10287 }
0x2314   :  { %v10290_v1 = vunpack.i.h.bf16 %v10288_v9  ;;  %v10289_v30 = vunpack.i.l.bf16 %v10288_v9 }
0x2316   :  { %v5336_v11 = vsel %vm215_vm0, %v10290_v1, %v5333_v55  ;;  %v5335_v19 = vsel %vm215_vm0, %v10289_v30, %v10284_v32 }
0x2317   :  { %v5337_v52 = vpack.c.bf16 %v5336_v11, %v5335_v19 }
0x2319   :  { %10041 = vmatmul.msk.bf16.vlgmr.msra.gmra.mxu1 %vm682_vm9, %v5337_v52 }
0x231a   :  { %5618 = vmatpush.bf16.xpose.msra.mxu1 %v11851_v8 }
0x2396   :  { %v5350_v24 = vpop.f32.mrf.mxu1 }
0x2397   :  { %v5355_v34 = vadd.f32 %v11223_v36, %v5350_v24 }
0x2399   :  { %10736 = vtanh.f32 %v5355_v34  ;;  %v10042_v53 = vmul.f32 -1.442695, %v5355_v34 }
0x239e   :  { %v5352_v41 = vpop.f32.mrf.mxu1 }
0x239f   :  { %v10737_v27 = vpop.eup %10736  ;;  %v5356_v15 = vadd.f32 %v11223_v36, %v5352_v41 }
0x23a0   :  { %5401 = vrot.lane.b32.xlu1 %v10737_v27, %s11529_s29 }
0x23a1   :  { %10738 = vtanh.f32 %v5356_v15  ;;  %v10043_v32 = vmul.f32 -1.442695, %v5356_v15 }
0x23a3   :  { %10740 = vpow2.f32 %v10043_v32 }
0x23a7   :  { %v10739_v54 = vpop.eup %10738 }
0x23a8   :  { %5403 = vrot.lane.b32.xlu2 %v10739_v54, %s11529_s29 }
0x23a9   :  { %v10741_v5 = vpop.eup %10740 }
0x23aa   :  { %v5364_v61 = vadd.f32 1.0, %v10741_v5 }
0x23ac   :  { %10742 = vrcp.f32 %v5364_v61  ;;  %v5391_v22 = vand.u32 2147483648, %v5364_v61  ;;  %vm5385_vm2 = vweird.f32 %v5364_v61  ;;  %v5389_v20 = vand.u32 2147483647, %v5364_v61 }
0x23ad   :  { %10744 = vpow2.f32 %v10042_v53 }
0x23ae   :  { %v5392_v9 = vor.u32 1.1754944e-38, %v5391_v22  ;;  %vm5390_vm11 = vcmp.eq.f32.partialorder %v5389_v20, 8.507059e+37 }
0x23b2   :  { %v10743_v45 = vpop.eup %10742 }
0x23b3   :  { %v10745_v23 = vpop.eup %10744  ;;  %v5381_v26 = vmul.f32 %v10743_v45, %v5364_v61  ;;  %vm5386_vm1 = vweird.f32 %v10743_v45 }
0x23b4   :  { %v5363_v51 = vadd.f32 1.0, %v10745_v23  ;;  %vm5387_vm4 = vmor %vm5385_vm2, %vm5386_vm1  ;;  %vm15280_vm1 = vcmask 1045509   ;;  %vm15281_vm2 = vcmask 1046534  }
0x23b5   :  { %v5382_v59 = vsub.f32 1.0, %v5381_v26 }
0x23b6   :  { %10746 = vrcp.f32 %v5363_v51  ;;  %v5376_v24 = vand.u32 2147483648, %v5363_v51  ;;  %vm5370_vm13 = vweird.f32 %v5363_v51  ;;  %v5374_v36 = vand.u32 2147483647, %v5363_v51 }
0x23b7   :  { %v5383_v17 = vmul.f32 %v10743_v45, %v5382_v59 }
0x23b8   :  { %v5377_v41 = vor.u32 1.1754944e-38, %v5376_v24  ;;  %vm5375_vm15 = vcmp.eq.f32.partialorder %v5374_v36, 8.507059e+37 }
0x23b9   :  { %v5384_v18 = vadd.f32 %v10743_v45, %v5383_v17 }
0x23bb   :  { %v5388_v38 = vsel %vm5387_vm4, %v10743_v45, %v5384_v18  ;;  %vm15282_vm4 = vcmask 1047559  }
0x23bc   :  { %v10747_v6 = vpop.eup %10746  ;;  %v5393_v30 = vsel %vm5390_vm11, %v5392_v9, %v5388_v38  ;;  %vm15283_vm11 = vmmov %vm15280_vm1 }
0x23bd   :  { %v5366_v21 = vmul.f32 %v10747_v6, %v5363_v51  ;;  %vm5371_vm12 = vweird.f32 %v10747_v6  ;;  %v5398_v32 = vmul.f32 %v5393_v30, %v13184_v33 }
0x23be   :  { %vm5372_vm14 = vmor %vm5370_vm13, %vm5371_vm12 }
0x23bf   :  { %v5367_v11 = vsub.f32 1.0, %v5366_v21  ;;  %vm15284_vm12 = vmmov %vm15281_vm2 }
0x23c0   :  { %vm15285_vm13 = vmmov %vm15282_vm4 }
0x23c1   :  { %v5368_v19 = vmul.f32 %v10747_v6, %v5367_v11 }
0x23c3   :  { %v5369_v52 = vadd.f32 %v10747_v6, %v5368_v19 }
0x23c5   :  { %v5373_v34 = vsel %vm5372_vm14, %v10747_v6, %v5369_v52  ;;  %vm15286_vm14 = vcmask 785408  }
0x23c6   :  { %v5378_v15 = vsel %vm5375_vm15, %v5377_v41, %v5373_v34 }
0x23c7   :  { %v5397_v45 = vmul.f32 %v5378_v15, %v13179_v47 }
0x2402   :  { %v5404_v1 = vpop.permute.xlu2 %5403 }
0x2403   :  { %v5408_v55 = vmul.f32 %v5404_v1, %v5393_v30 }
0x2405   :  { %5413 = vrot.lane.b32.xlu1 %v5408_v55, %s11536_s7 }
0x2412   :  { %v5402_v27 = vpop.permute.xlu1 %5401 }
0x2413   :  { %v5407_v54 = vmul.f32 %v5402_v27, %v5378_v15 }
0x2415   :  { %5411 = vrot.lane.b32.xlu0 %v5407_v54, %s11536_s7 }
0x2477   :  { %v5414_v5 = vpop.permute.xlu1 %5413 }
0x2478   :  { %v13597_v61 = vadd.f32 %v5414_v5, %v5398_v32 }
0x247a   :  { %10748 = vtanh.f32 %v13597_v61 }
0x2480   :  { %v10749_v53 = vpop.eup %10748 }
0x2481   :  { %5425 = vrot.lane.b32.xlu0 %v10749_v53, %s11529_s29 }
0x2487   :  { %v5412_v23 = vpop.permute.xlu0 %5411 }
0x2488   :  { %v13602_v26 = vadd.f32 %v5412_v23, %v5397_v45 }
0x248a   :  { %10750 = vtanh.f32 %v13602_v26 }
0x2490   :  { %v10751_v51 = vpop.eup %10750 }
0x2491   :  { %5423 = vrot.lane.b32.xlu2 %v10751_v51, %s11529_s29 }
0x24eb   :  { %v5424_v59 = vpop.permute.xlu2 %5423 }
0x24ec   :  { %v13606_v33 = vmul.f32 %v5424_v59, %v5378_v15 }
0x24ee   :  { %v5461_v17 = vpack.c.bf16 %v13606_v33, %v13606_v33  ;;  %v5435_v18 = vrot.slane %v13606_v33, 3  ;;  %v5433_v6 = vrot.slane %v13606_v33, 1  ;;  %v5434_v47 = vrot.slane %v13606_v33, 2 }
0x24ef   :  { %v5436_v22 = vrot.slane %v13606_v33, 4  ;;  %v5439_v9 = vrot.slane %v13606_v33, 7  ;;  %v5437_v15 = vrot.slane %v13606_v33, 5  ;;  %v5438_v53 = vrot.slane %v13606_v33, 6 }
0x24f0   :  { %v5478_v20 = vunpack.c.l.b16 %v5461_v17  ;;  %v5464_v38 = vpack.c.bf16 %v5435_v18, %v5435_v18  ;;  %v5462_v21 = vpack.c.bf16 %v5433_v6, %v5433_v6  ;;  %v5463_v19 = vpack.c.bf16 %v5434_v47, %v5434_v47 }
0x24f1   :  { %v5465_v36 = vpack.c.bf16 %v5436_v22, %v5436_v22  ;;  %v5468_v34 = vpack.c.bf16 %v5439_v9, %v5439_v9  ;;  %v5466_v23 = vpack.c.bf16 %v5437_v15, %v5437_v15  ;;  %v5467_v17 = vpack.c.bf16 %v5438_v53, %v5438_v53 }
0x24f2   :  { %v5479_v1 = vpack.c.b16 %v5478_v20, %v5478_v20  ;;  %v5541_v55 = vunpack.c.l.b16 %v5464_v38  ;;  %v5499_v11 = vunpack.c.l.b16 %v5462_v21  ;;  %v5520_v27 = vunpack.c.l.b16 %v5463_v19 }
0x24f3   :  { %v5426_v41 = vpop.permute.xlu0 %5425  ;;  %v5562_v32 = vunpack.c.l.b16 %v5465_v36  ;;  %v5625_v5 = vunpack.c.l.b16 %v5468_v34  ;;  %v5604_v47 = vunpack.c.l.b16 %v5467_v17 }
0x24f4   :  { %5480 = vrot.lane.b32.xlu1 %v5479_v1, %s11536_s7  ;;  %v5542_v52 = vpack.c.b16 %v5541_v55, %v5541_v55  ;;  %v5500_v24 = vpack.c.b16 %v5499_v11, %v5499_v11  ;;  %v13619_v54 = vmul.f32 %v5426_v41, %v5393_v30  ;;  %v5521_v45 = vpack.c.b16 %v5520_v27, %v5520_v27 }
0x24f5   :  { %v5563_v51 = vpack.c.b16 %v5562_v32, %v5562_v32  ;;  %v5626_v59 = vpack.c.b16 %v5625_v5, %v5625_v5  ;;  %v5583_v30 = vunpack.c.l.b16 %v5466_v23  ;;  %v5605_v1 = vpack.c.b16 %v5604_v47, %v5604_v47 }
0x24f6   :  { %5543 = vrot.lane.b32.xlu2 %v5542_v52, %s11536_s7  ;;  %5501 = vrot.lane.b32.xlu0 %v5500_v24, %s11536_s7  ;;  %v5469_v18 = vpack.c.bf16 %v13619_v54, %v13619_v54  ;;  %v5442_v6 = vrot.slane %v13619_v54, 3  ;;  %v5441_v20 = vrot.slane %v13619_v54, 2  ;;  %v5440_v38 = vrot.slane %v13619_v54, 1 }
0x24f7   :  { %v5584_v21 = vpack.c.b16 %v5583_v30, %v5583_v30  ;;  %v5443_v24 = vrot.slane %v13619_v54, 4  ;;  %v5444_v41 = vrot.slane %v13619_v54, 5  ;;  %v5446_v27 = vrot.slane %v13619_v54, 7 }
0x24f8   :  { %v5646_v22 = vunpack.c.l.b16 %v5469_v18  ;;  %v5472_v9 = vpack.c.bf16 %v5442_v6, %v5442_v6  ;;  %v5471_v11 = vpack.c.bf16 %v5441_v20, %v5441_v20  ;;  %v5470_v19 = vpack.c.bf16 %v5440_v38, %v5440_v38 }
0x24f9   :  { %v5473_v32 = vpack.c.bf16 %v5443_v24, %v5443_v24  ;;  %v5476_v23 = vpack.c.bf16 %v5446_v27, %v5446_v27 }
0x24fa   :  { %v5647_v55 = vpack.c.b16 %v5646_v22, %v5646_v22  ;;  %v5709_v52 = vunpack.c.l.b16 %v5472_v9  ;;  %v5688_v36 = vunpack.c.l.b16 %v5471_v11  ;;  %v5667_v34 = vunpack.c.l.b16 %v5470_v19 }
0x24fb   :  { %v5793_v18 = vunpack.c.l.b16 %v5476_v23  ;;  %v15276_v23 = vld [vmem:[#allocation27_spill] sm:$0xff] }
0x24fc   :  { %5522 = vrot.lane.b32.xlu1 %v5521_v45, %s11536_s7  ;;  %v5710_v15 = vpack.c.b16 %v5709_v52, %v5709_v52  ;;  %v5689_v5 = vpack.c.b16 %v5688_v36, %v5688_v36  ;;  %v5668_v53 = vpack.c.b16 %v5667_v34, %v5667_v34  ;;  %v5474_v45 = vpack.c.bf16 %v5444_v41, %v5444_v41 }
0x24fd   :  { %v5794_v22 = vpack.c.b16 %v5793_v18, %v5793_v18 }
0x24fe   :  { %5564 = vrot.lane.b32.xlu2 %v5563_v51, %s11536_s7  ;;  %5627 = vrot.lane.b32.xlu0 %v5626_v59, %s11536_s7  ;;  %v5730_v51 = vunpack.c.l.b16 %v5473_v32  ;;  %v5445_v59 = vrot.slane %v13619_v54, 6  ;;  %v5751_v17 = vunpack.c.l.b16 %v5474_v45  ;;  %v15274_v32 = vld [vmem:[#allocation26_spill] sm:$0xff] }
0x2500   :  { %v5731_v30 = vpack.c.b16 %v5730_v51, %v5730_v51  ;;  %v5475_v6 = vpack.c.bf16 %v5445_v59, %v5445_v59  ;;  %v5752_v47 = vpack.c.b16 %v5751_v17, %v5751_v17  ;;  %v15277_v51 = vld [vmem:[#allocation28_spill] sm:$0xff]  ;;  %v15278_v17 = vld [vmem:[#allocation30_spill] sm:$0xff] }
0x2502   :  { %v5772_v20 = vunpack.c.l.b16 %v5475_v6 }
0x2504   :  { %5585 = vrot.lane.b32.xlu1 %v5584_v21, %s11536_s7  ;;  %v5773_v38 = vpack.c.b16 %v5772_v20, %v5772_v20 }
0x2506   :  { %5606 = vrot.lane.b32.xlu2 %v5605_v1, %s11536_s7  ;;  %5648 = vrot.lane.b32.xlu0 %v5647_v55, %s11536_s7 }
0x250c   :  { %5711 = vrot.lane.b32.xlu1 %v5710_v15, %s11536_s7 }
0x250e   :  { %5690 = vrot.lane.b32.xlu0 %v5689_v5, %s11536_s7  ;;  %5669 = vrot.lane.b32.xlu2 %v5668_v53, %s11536_s7  ;;  %v15275_v5 = vld [vmem:[#allocation29_spill] sm:$0xff] }
0x2514   :  { %5732 = vrot.lane.b32.xlu1 %v5731_v30, %s11536_s7  ;;  %v11224_v30 = vld [vmem:[%s15196_s6 + $0x3] sm:$0x1] }
0x2516   :  { %5753 = vrot.lane.b32.xlu0 %v5752_v47, %s11536_s7  ;;  %5795 = vrot.lane.b32.xlu2 %v5794_v22, %s11536_s7 }
0x251c   :  { %5774 = vrot.lane.b32.xlu1 %v5773_v38, %s11536_s7  ;;  %v11225_v38 = vld [vmem:[%s15196_s6 + $0x1] sm:$0x1] }
0x2550   :  { %v5544_v21 = vpop.permute.xlu2 %5543 }
0x2551   :  { %10047 = vmatmul.msk.bf16.vlgmr.msrb.gmra.mxu2 %vm215_vm0, %v5544_v21 }
0x2552   :  { %5723 = vmatpush.bf16.xpose.msrb.mxu2 %v11868_v31 }
0x2558   :  { %v5565_v19 = vpop.permute.xlu2 %5564 }
0x2560   :  { %v5607_v24 = vpop.permute.xlu2 %5606 }
0x2566   :  { %v5481_v9 = vpop.permute.xlu1 %5480 }
0x2567   :  { %10044 = vmatmul.msk.bf16.vlgmr.msra.gmra.mxu3 %vm215_vm0, %v5481_v9 }
0x2568   :  { %5660 = vmatpush.bf16.xpose.msra.mxu3 %v11864_v28  ;;  %v5502_v1 = vpop.permute.xlu0 %5501  ;;  %v5670_v41 = vpop.permute.xlu2 %5669 }
0x2569   :  { %10045 = vmatmul.msk.bf16.vlgmr.msrb.gmra.mxu0 %vm215_vm0, %v5502_v1 }
0x256a   :  { %5681 = vmatpush.bf16.xpose.msrb.mxu0 %v11858_v14 }
0x256e   :  { %v5523_v55 = vpop.permute.xlu1 %5522 }
0x256f   :  { %10046 = vmatmul.msk.bf16.vlgmr.msrb.gmra.mxu1 %vm215_vm0, %v5523_v55  ;;  %v11226_v55 = vld [vmem:[%s15196_s6] sm:$0x1] }
0x2570   :  { %5702 = vmatpush.bf16.xpose.msrb.mxu1 %v11874_v35  ;;  %v5628_v11 = vpop.permute.xlu0 %5627  ;;  %v5796_v15 = vpop.permute.xlu2 %5795 }
0x2571   :  { %10051 = vmatmul.msk.bf16.vlgmr.msra.gmra.mxu2 %vm215_vm0, %v5628_v11 }
0x2572   :  { %5807 = vmatpush.bf16.xpose.msra.mxu2 %v11891_v46 }
0x2576   :  { %v5586_v52 = vpop.permute.xlu1 %5585 }
0x2577   :  { %10048 = vmatmul.msk.bf16.vlgmr.msrb.gmra.mxu3 %vm215_vm0, %v5565_v19 }
0x2578   :  { %5744 = vmatpush.bf16.xpose.msrb.mxu3 %v11881_v42  ;;  %v5649_v34 = vpop.permute.xlu0 %5648 }
0x2579   :  { %10049 = vmatmul.msk.bf16.vlgmr.msra.gmra.mxu0 %vm215_vm0, %v5586_v52 }
0x257a   :  { %5765 = vmatpush.bf16.xpose.msra.mxu0 %v11884_v43 }
0x257e   :  { %v5712_v36 = vpop.permute.xlu1 %5711 }
0x257f   :  { %10050 = vmatmul.msk.bf16.vlgmr.msra.gmra.mxu1 %vm215_vm0, %v5607_v24 }
0x2580   :  { %5786 = vmatpush.bf16.xpose.msra.mxu1 %v11898_v48  ;;  %v5691_v27 = vpop.permute.xlu0 %5690 }
0x2581   :  { %10055 = vmatmul.msk.bf16.vlgmr.msrb.gmra.mxu2 %vm215_vm0, %v5712_v36  ;;  %v11227_v36 = vld [vmem:[%s15196_s6 + $0x2] sm:$0x1] }
0x2582   :  { %6063 = vmatpush.bf16.msrb.mxu2 %v15247_v44 }
0x2586   :  { %v5733_v53 = vpop.permute.xlu1 %5732 }
0x2587   :  { %10052 = vmatmul.msk.bf16.vlgmr.msra.gmra.mxu3 %vm215_vm0, %v5649_v34 }
0x2588   :  { %6015 = vmatpush.bf16.msra.mxu3 %v12126_v12  ;;  %v5754_v45 = vpop.permute.xlu0 %5753 }
0x2589   :  { %10053 = vmatmul.msk.bf16.vlgmr.msrb.gmra.mxu0 %vm215_vm0, %v5670_v41 }
0x258a   :  { %6031 = vmatpush.bf16.msrb.mxu0 %v12115_v25 }
0x258e   :  { %v5775_v59 = vpop.permute.xlu1 %5774 }
0x258f   :  { %10054 = vmatmul.msk.bf16.vlgmr.msrb.gmra.mxu1 %vm215_vm0, %v5691_v27 }
0x2590   :  { %6047 = vmatpush.bf16.msrb.mxu1 %v15274_v32 }
0x2591   :  { %10059 = vmatmul.msk.bf16.vlgmr.msra.gmra.mxu2 %vm215_vm0, %v5796_v15 }
0x2592   :  { %6127 = vmatpush.bf16.msra.mxu2 %v15275_v5 }
0x2597   :  { %10056 = vmatmul.msk.bf16.vlgmr.msrb.gmra.mxu3 %vm215_vm0, %v5733_v53 }
0x2598   :  { %6079 = vmatpush.bf16.msrb.mxu3 %v15276_v23 }
0x2599   :  { %10057 = vmatmul.msk.bf16.vlgmr.msra.gmra.mxu0 %vm215_vm0, %v5754_v45 }
0x259a   :  { %6095 = vmatpush.bf16.msra.mxu0 %v15277_v51 }
0x259f   :  { %10058 = vmatmul.msk.bf16.vlgmr.msra.gmra.mxu1 %vm215_vm0, %v5775_v59  ;;  %v11228_v59 = vld [vmem:[%s15196_s6 + $0x5] sm:$0x1] }
0x25a0   :  { %6111 = vmatpush.bf16.msra.mxu1 %v15278_v17 }
0x25d4   :  { %v5557_v18 = vpop.f32.mrf.mxu2 }
0x25d5   :  { %v13679_v6 = vadd.f32 %v11224_v30, %v5557_v18  ;;  %v11229_v30 = vld [vmem:[%s15196_s6 + $0x7] sm:$0x1] }
0x25d7   :  { %v5822_v47 = vsel %vm1214_vm3, %v13679_v6, -inf }
0x25d8   :  { %5823 = vmax.xlane.f32.xlu0 %v5822_v47 }
0x25dc   :  { %v5559_v22 = vpop.f32.mrf.mxu2 }
0x25e6   :  { %v5515_v20 = vpop.f32.mrf.mxu0 }
0x25e7   :  { %v13686_v21 = vadd.f32 %v11225_v38, %v5515_v20  ;;  %v11230_v38 = vld [vmem:[%s15196_s6 + $0x4] sm:$0x1] }
0x25e9   :  { %v5816_v9 = vsel %vm1214_vm3, %v13686_v21, -inf }
0x25ea   :  { %v5494_v1 = vpop.f32.mrf.mxu3  ;;  %5817 = vmax.xlane.f32.xlu1 %v5816_v9 }
0x25eb   :  { %v13693_v11 = vadd.f32 %v11226_v55, %v5494_v1 }
0x25ec   :  { %v5536_v19 = vpop.f32.mrf.mxu1 }
0x25ed   :  { %v5813_v52 = vsel %vm1214_vm3, %v13693_v11, -inf  ;;  %v13700_v34 = vadd.f32 %v11227_v36, %v5536_v19  ;;  %v11231_v36 = vld [vmem:[%s15196_s6 + $0x6] sm:$0x1] }
0x25ee   :  { %5814 = vmax.xlane.f32.xlu2 %v5813_v52  ;;  %v5517_v24 = vpop.f32.mrf.mxu0 }
0x25ef   :  { %v5819_v53 = vsel %vm1214_vm3, %v13700_v34, -inf }
0x25f2   :  { %v5496_v41 = vpop.f32.mrf.mxu3 }
0x25f4   :  { %v5538_v27 = vpop.f32.mrf.mxu1  ;;  %v5641_v15 = vpop.f32.mrf.mxu2 }
0x25f5   :  { %v13712_v47 = vadd.f32 %v11229_v30, %v5641_v15 }
0x25f6   :  { %5820 = vmax.xlane.f32.xlu2 %v5819_v53  ;;  %v5599_v45 = vpop.f32.mrf.mxu0 }
0x25f7   :  { %v13707_v18 = vadd.f32 %v11228_v59, %v5599_v45  ;;  %v5834_v52 = vsel %vm1214_vm3, %v13712_v47, -inf  ;;  %v11232_v45 = vld [vmem:[%s15196_s6 + $0xb] sm:$0x1] }
0x25f9   :  { %v5828_v22 = vsel %vm1214_vm3, %v13707_v18, -inf }
0x25fa   :  { %v5578_v20 = vpop.f32.mrf.mxu3  ;;  %5829 = vmax.xlane.f32.xlu1 %v5828_v22 }
0x25fb   :  { %v13719_v9 = vadd.f32 %v11230_v38, %v5578_v20  ;;  %v11233_v38 = vld [vmem:[%s15196_s6 + $0x9] sm:$0x1] }
0x25fc   :  { %v5620_v1 = vpop.f32.mrf.mxu1  ;;  %v5643_v55 = vpop.f32.mrf.mxu2 }
0x25fd   :  { %v5825_v19 = vsel %vm1214_vm3, %v13719_v9, -inf  ;;  %v13728_v41 = vadd.f32 %v11231_v36, %v5620_v1 }
0x25fe   :  { %5826 = vmax.xlane.f32.xlu0 %v5825_v19  ;;  %v5601_v24 = vpop.f32.mrf.mxu0  ;;  %5835 = vmax.xlane.f32.xlu2 %v5834_v52  ;;  %v11234_v19 = vld [vmem:[%s15196_s6 + $0x8] sm:$0x1] }
0x25ff   :  { %v5831_v30 = vsel %vm1214_vm3, %v13728_v41, -inf }
0x2602   :  { %v5580_v27 = vpop.f32.mrf.mxu3 }
0x2604   :  { %v5622_v15 = vpop.f32.mrf.mxu1  ;;  %v5725_v53 = vpop.f32.mrf.mxu2 }
0x2605   :  { %v13733_v59 = vadd.f32 %v11232_v45, %v5725_v53  ;;  %v11235_v45 = vld [vmem:[%s15196_s6 + $0xa] sm:$0x1] }
0x2606   :  { %5832 = vmax.xlane.f32.xlu0 %v5831_v30  ;;  %v5683_v22 = vpop.f32.mrf.mxu0 }
0x2607   :  { %v5846_v20 = vsel %vm1214_vm3, %v13733_v59, -inf  ;;  %v13742_v1 = vadd.f32 %v11233_v38, %v5683_v22 }
0x2608   :  { %5847 = vmax.xlane.f32.xlu1 %v5846_v20 }
0x2609   :  { %v5840_v27 = vsel %vm1214_vm3, %v13742_v1, -inf }
0x260a   :  { %v5662_v55 = vpop.f32.mrf.mxu3 }
0x260b   :  { %v13747_v52 = vadd.f32 %v11234_v19, %v5662_v55  ;;  %v11236_v55 = vld [vmem:[%s15196_s6 + $0xf] sm:$0x1] }
0x260c   :  { %v5704_v24 = vpop.f32.mrf.mxu1  ;;  %v5727_v36 = vpop.f32.mrf.mxu2 }
0x260d   :  { %v5837_v15 = vsel %vm1214_vm3, %v13747_v52, -inf  ;;  %v13756_v30 = vadd.f32 %v11235_v45, %v5704_v24 }
0x260e   :  { %v5685_v53 = vpop.f32.mrf.mxu0  ;;  %5841 = vmax.xlane.f32.xlu0 %v5840_v27  ;;  %5838 = vmax.xlane.f32.xlu2 %v5837_v15 }
0x260f   :  { %v5843_v36 = vsel %vm1214_vm3, %v13756_v30, -inf  ;;  %v11237_v53 = vld [vmem:[%s15196_s6 + $0xc] sm:$0x1] }
0x2612   :  { %v5664_v22 = vpop.f32.mrf.mxu3 }
0x2614   :  { %v5706_v20 = vpop.f32.mrf.mxu1  ;;  %v5809_v38 = vpop.f32.mrf.mxu2 }
0x2615   :  { %v13761_v19 = vadd.f32 %v11236_v55, %v5809_v38 }
0x2616   :  { %5844 = vmax.xlane.f32.xlu2 %v5843_v36  ;;  %v5767_v27 = vpop.f32.mrf.mxu0  ;;  %v11238_v36 = vld [vmem:[%s15196_s6 + $0xd] sm:$0x1] }
0x2617   :  { %v5858_v15 = vsel %vm1214_vm3, %v13761_v19, -inf  ;;  %v13777_v37 = vadd.f32 %v11238_v36, %v5767_v27 }
0x2618   :  { %5859 = vmax.xlane.f32.xlu0 %v5858_v15 }
0x2619   :  { %v5852_v23 = vsel %vm1214_vm3, %v13777_v37, -inf }
0x261a   :  { %v5746_v24 = vpop.f32.mrf.mxu3 }
0x261b   :  { %v13770_v45 = vadd.f32 %v11237_v53, %v5746_v24 }
0x261c   :  { %v5788_v22 = vpop.f32.mrf.mxu1  ;;  %v5811_v20 = vpop.f32.mrf.mxu2 }
0x261d   :  { %v5849_v38 = vsel %vm1214_vm3, %v13770_v45, -inf }
0x261e   :  { %5850 = vmax.xlane.f32.xlu1 %v5849_v38  ;;  %v5769_v55 = vpop.f32.mrf.mxu0 }
0x2622   :  { %v5748_v15 = vpop.f32.mrf.mxu3 }
0x2624   :  { %v5790_v51 = vpop.f32.mrf.mxu1 }
0x2626   :  { %5853 = vmax.xlane.f32.xlu1 %v5852_v23 }
0x264b   :  { %v5824_v24 = vpop.xlane.xlu0 %5823 }
0x264c   :  { %v5864_v53 = vsub.f32 %v13679_v6, %v5824_v24 }
0x264e   :  { %v5883_v20 = vmul.f32 1.442695, %v5864_v53 }
0x2650   :  { %10752 = vpow2.f32 %v5883_v20 }
0x2656   :  { %v13782_v5 = vpop.eup %10752 }
0x2657   :  { %v5918_v38 = vsel %vm1214_vm3, %v13782_v5, 0.0 }
0x2658   :  { %5919 = vadd.xlane.f32.xlu0 %v5918_v38 }
0x265d   :  { %v5818_v55 = vpop.xlane.xlu1 %5817 }
0x265e   :  { %v5862_v27 = vsub.f32 %v13686_v21, %v5818_v55 }
0x2660   :  { %v5879_v36 = vmul.f32 1.442695, %v5862_v27 }
0x2661   :  { %v5815_v51 = vpop.xlane.xlu2 %5814 }
0x2662   :  { %10754 = vpow2.f32 %v5879_v36  ;;  %v5861_v15 = vsub.f32 %v13693_v11, %v5815_v51  ;;  %v11239_v36 = vld [vmem:[%s15196_s6 + $0xe] sm:$0x1] }
0x2663   :  { %v13801_v51 = vadd.f32 %v11239_v36, %v5788_v22 }
0x2664   :  { %v5877_v23 = vmul.f32 1.442695, %v5861_v15 }
0x2666   :  { %10756 = vpow2.f32 %v5877_v23 }
0x2668   :  { %v13788_v17 = vpop.eup %10754 }
0x2669   :  { %v5821_v6 = vpop.xlane.xlu2 %5820  ;;  %v5912_v24 = vsel %vm1214_vm3, %v13788_v17, 0.0 }
0x266a   :  { %v5863_v53 = vsub.f32 %v13700_v34, %v5821_v6  ;;  %5913 = vadd.xlane.f32.xlu1 %v5912_v24 }
0x266c   :  { %v13793_v20 = vpop.eup %10756  ;;  %v5881_v38 = vmul.f32 1.442695, %v5863_v53 }
0x266d   :  { %v5830_v21 = vpop.xlane.xlu1 %5829  ;;  %v5909_v55 = vsel %vm1214_vm3, %v13793_v20, 0.0 }
0x266e   :  { %10758 = vpow2.f32 %v5881_v38  ;;  %v5866_v11 = vsub.f32 %v13707_v18, %v5830_v21  ;;  %5910 = vadd.xlane.f32.xlu2 %v5909_v55  ;;  %v5855_v18 = vsel %vm1214_vm3, %v13801_v51, -inf }
0x2670   :  { %v5887_v27 = vmul.f32 1.442695, %v5866_v11 }
0x2671   :  { %v5836_v34 = vpop.xlane.xlu2 %5835  ;;  %v5827_v15 = vpop.xlane.xlu0 %5826 }
0x2672   :  { %v5868_v23 = vsub.f32 %v13712_v47, %v5836_v34  ;;  %v5865_v6 = vsub.f32 %v13719_v9, %v5827_v15  ;;  %10760 = vpow2.f32 %v5887_v27 }
0x2674   :  { %v13805_v24 = vpop.eup %10758  ;;  %v5891_v53 = vmul.f32 1.442695, %v5868_v23  ;;  %v5885_v38 = vmul.f32 1.442695, %v5865_v6 }
0x2675   :  { %v5915_v21 = vsel %vm1214_vm3, %v13805_v24, 0.0 }
0x2676   :  { %10762 = vpow2.f32 %v5891_v53  ;;  %5856 = vmax.xlane.f32.xlu2 %v5855_v18  ;;  %5916 = vadd.xlane.f32.xlu0 %v5915_v21 }
0x2677   :  { %10764 = vpow2.f32 %v5885_v38 }
0x2678   :  { %v13811_v55 = vpop.eup %10760 }
0x2679   :  { %v5833_v22 = vpop.xlane.xlu0 %5832  ;;  %v5924_v23 = vsel %vm1214_vm3, %v13811_v55, 0.0 }
0x267a   :  { %v5867_v47 = vsub.f32 %v13728_v41, %v5833_v22 }
0x267b   :  { %v5848_v9 = vpop.xlane.xlu1 %5847 }
0x267c   :  { %v13814_v11 = vpop.eup %10762  ;;  %v5889_v27 = vmul.f32 1.442695, %v5867_v47  ;;  %v5872_v36 = vsub.f32 %v13733_v59, %v5848_v9 }
0x267d   :  { %v13817_v34 = vpop.eup %10764  ;;  %v5930_v15 = vsel %vm1214_vm3, %v13814_v11, 0.0 }
0x267e   :  { %10766 = vpow2.f32 %v5889_v27  ;;  %v5899_v6 = vmul.f32 1.442695, %v5872_v36  ;;  %5931 = vadd.xlane.f32.xlu1 %v5930_v15  ;;  %5925 = vadd.xlane.f32.xlu0 %v5924_v23  ;;  %v5921_v41 = vsel %vm1214_vm3, %v13817_v34, 0.0 }
0x267f   :  { %5922 = vadd.xlane.f32.xlu2 %v5921_v41 }
0x2680   :  { %10768 = vpow2.f32 %v5899_v6 }
0x2681   :  { %v5839_v53 = vpop.xlane.xlu2 %5838  ;;  %v5842_v38 = vpop.xlane.xlu0 %5841 }
0x2682   :  { %v5869_v59 = vsub.f32 %v13747_v52, %v5839_v53  ;;  %v5870_v18 = vsub.f32 %v13742_v1, %v5842_v38 }
0x2684   :  { %v13827_v21 = vpop.eup %10766  ;;  %v5893_v22 = vmul.f32 1.442695, %v5869_v59  ;;  %v5895_v47 = vmul.f32 1.442695, %v5870_v18 }
0x2685   :  { %v5927_v9 = vsel %vm1214_vm3, %v13827_v21, 0.0 }
0x2686   :  { %v13831_v27 = vpop.eup %10768  ;;  %10770 = vpow2.f32 %v5893_v22 }
0x2687   :  { %10772 = vpow2.f32 %v5895_v47  ;;  %5928 = vadd.xlane.f32.xlu2 %v5927_v9  ;;  %v5942_v36 = vsel %vm1214_vm3, %v13831_v27, 0.0 }
0x2688   :  { %5943 = vadd.xlane.f32.xlu0 %v5942_v36 }
0x2689   :  { %v5845_v15 = vpop.xlane.xlu2 %5844 }
0x268a   :  { %v5871_v52 = vsub.f32 %v13756_v30, %v5845_v15 }
0x268b   :  { %v5860_v1 = vpop.xlane.xlu0 %5859 }
0x268c   :  { %v13836_v23 = vpop.eup %10770  ;;  %v5897_v6 = vmul.f32 1.442695, %v5871_v52  ;;  %v5876_v41 = vsub.f32 %v13761_v19, %v5860_v1 }
0x268d   :  { %v13839_v53 = vpop.eup %10772  ;;  %v5933_v38 = vsel %vm1214_vm3, %v13836_v23, 0.0 }
0x268e   :  { %10774 = vpow2.f32 %v5897_v6  ;;  %v5907_v59 = vmul.f32 1.442695, %v5876_v41  ;;  %5934 = vadd.xlane.f32.xlu1 %v5933_v38  ;;  %v5936_v18 = vsel %vm1214_vm3, %v13839_v53, 0.0 }
0x268f   :  { %5937 = vadd.xlane.f32.xlu2 %v5936_v18  ;;  %v15279_v18 = vpack.c.bf16 %v13576_v4, %v13574_v16 }
0x2690   :  { %10776 = vpow2.f32 %v5907_v59 }
0x2691   :  { %v5851_v30 = vpop.xlane.xlu1 %5850 }
0x2692   :  { %v5873_v22 = vsub.f32 %v13770_v45, %v5851_v30 }
0x2694   :  { %v13846_v47 = vpop.eup %10774  ;;  %v5901_v9 = vmul.f32 1.442695, %v5873_v22 }
0x2695   :  { %v5939_v19 = vsel %vm1214_vm3, %v13846_v47, 0.0 }
0x2696   :  { %v13850_v36 = vpop.eup %10776  ;;  %10778 = vpow2.f32 %v5901_v9  ;;  %5940 = vadd.xlane.f32.xlu1 %v5939_v19 }
0x2697   :  { %v5954_v15 = vsel %vm1214_vm3, %v13850_v36, 0.0 }
0x2698   :  { %5955 = vadd.xlane.f32.xlu2 %v5954_v15 }
0x2699   :  { %v5854_v52 = vpop.xlane.xlu1 %5853 }
0x269a   :  { %v5874_v1 = vsub.f32 %v13777_v37, %v5854_v52 }
0x269c   :  { %v13855_v6 = vpop.eup %10778  ;;  %v5903_v45 = vmul.f32 1.442695, %v5874_v1 }
0x269d   :  { %v5945_v41 = vsel %vm1214_vm3, %v13855_v6, 0.0 }
0x269e   :  { %10780 = vpow2.f32 %v5903_v45  ;;  %5946 = vadd.xlane.f32.xlu0 %v5945_v41 }
0x26a4   :  { %v13859_v38 = vpop.eup %10780 }
0x26a5   :  { %v5948_v59 = vsel %vm1214_vm3, %v13859_v38, 0.0 }
0x26a6   :  { %5949 = vadd.xlane.f32.xlu1 %v5948_v59 }
0x26bf   :  { %6352 = vrot.lane.b32.xlu1 %v15279_v18, %s11536_s7 }
0x26cb   :  { %v5920_v37 = vpop.xlane.xlu0 %5919 }
0x26cc   :  { %10782 = vrcp.f32 %v5920_v37 }
0x26d2   :  { %v10783_v30 = vpop.eup %10782 }
0x26d3   :  { %v5976_v22 = vmul.f32 %v10783_v30, %v13782_v5 }
0x26d5   :  { %v5992_v9 = vpack.c.bf16 %v5976_v22, %v5976_v22 }
0x26d7   :  { %10063 = vmatmul.msk.bf16.vlgmr.msrb.gmra.mxu2 %vm1407_vm5, %v5992_v9 }
0x26d8   :  { %6191 = vmatpush.bf16.msrb.mxu2 %v12185_v10 }
0x26dd   :  { %v5914_v19 = vpop.xlane.xlu1 %5913 }
0x26de   :  { %10784 = vrcp.f32 %v5914_v19 }
0x26e1   :  { %v5911_v15 = vpop.xlane.xlu2 %5910 }
0x26e2   :  { %10786 = vrcp.f32 %v5911_v15 }
0x26e4   :  { %v10785_v52 = vpop.eup %10784 }
0x26e5   :  { %v5974_v1 = vmul.f32 %v10785_v52, %v13788_v17 }
0x26e7   :  { %v5990_v45 = vpack.c.bf16 %v5974_v1, %v5974_v1 }
0x26e8   :  { %v10787_v16 = vpop.eup %10786 }
0x26e9   :  { %v5973_v4 = vmul.f32 %v10787_v16, %v13793_v20  ;;  %v5857_v41 = vpop.xlane.xlu2 %5856  ;;  %10061 = vmatmul.msk.bf16.vlgmr.msrb.gmra.mxu0 %vm1407_vm5, %v5990_v45  ;;  %v5917_v5 = vpop.xlane.xlu0 %5916 }
0x26ea   :  { %v5875_v59 = vsub.f32 %v13801_v51, %v5857_v41  ;;  %10788 = vrcp.f32 %v5917_v5  ;;  %6159 = vmatpush.bf16.msrb.mxu0 %v12180_v58 }
0x26eb   :  { %v5989_v18 = vpack.c.bf16 %v5973_v4, %v5973_v4 }
0x26ec   :  { %v5905_v37 = vmul.f32 1.442695, %v5875_v59 }
0x26ed   :  { %10060 = vmatmul.msk.bf16.vlgmr.msra.gmra.mxu3 %vm1407_vm5, %v5989_v18 }
0x26ee   :  { %10790 = vpow2.f32 %v5905_v37  ;;  %6143 = vmatpush.bf16.msra.mxu3 %v12177_v39 }
0x26f0   :  { %v10789_v17 = vpop.eup %10788 }
0x26f1   :  { %v5975_v30 = vmul.f32 %v10789_v17, %v13805_v24  ;;  %v5932_v20 = vpop.xlane.xlu1 %5931  ;;  %v5926_v22 = vpop.xlane.xlu0 %5925 }
0x26f2   :  { %10792 = vrcp.f32 %v5932_v20  ;;  %v5923_v9 = vpop.xlane.xlu2 %5922 }
0x26f3   :  { %v5991_v19 = vpack.c.bf16 %v5975_v30, %v5975_v30  ;;  %10794 = vrcp.f32 %v5923_v9 }
0x26f4   :  { %v13878_v51 = vpop.eup %10790  ;;  %10796 = vrcp.f32 %v5926_v22 }
0x26f5   :  { %10062 = vmatmul.msk.bf16.vlgmr.msrb.gmra.mxu1 %vm1407_vm5, %v5991_v19  ;;  %v5951_v15 = vsel %vm1214_vm3, %v13878_v51, 0.0 }
0x26f6   :  { %5952 = vadd.xlane.f32.xlu0 %v5951_v15  ;;  %6175 = vmatpush.bf16.msrb.mxu1 %v12196_v2 }
0x26f8   :  { %v10793_v52 = vpop.eup %10792 }
0x26f9   :  { %v10795_v1 = vpop.eup %10794  ;;  %v5980_v24 = vmul.f32 %v10793_v52, %v13814_v11 }
0x26fa   :  { %v10797_v45 = vpop.eup %10796  ;;  %v5977_v16 = vmul.f32 %v10795_v1, %v13817_v34  ;;  %v5929_v4 = vpop.xlane.xlu2 %5928 }
0x26fb   :  { %v5996_v41 = vpack.c.bf16 %v5980_v24, %v5980_v24  ;;  %v5978_v5 = vmul.f32 %v10797_v45, %v13811_v55  ;;  %10798 = vrcp.f32 %v5929_v4  ;;  %v5944_v59 = vpop.xlane.xlu0 %5943  ;;  %v11242_v4 = vld [vmem:[#allocation8 + $0x8] sm:$0xff] }
0x26fc   :  { %v5993_v18 = vpack.c.bf16 %v5977_v16, %v5977_v16  ;;  %10800 = vrcp.f32 %v5944_v59  ;;  %v11243_v59 = vld [vmem:[#allocation11 + $0x10] sm:$0xff] }
0x26fd   :  { %v5994_v37 = vpack.c.bf16 %v5978_v5, %v5978_v5  ;;  %10067 = vmatmul.msk.bf16.vlgmr.msra.gmra.mxu2 %vm1407_vm5, %v5996_v41 }
0x26fe   :  { %10064 = vmatmul.msk.bf16.vlgmr.msrb.gmra.mxu3 %vm1407_vm5, %v5993_v18  ;;  %6255 = vmatpush.bf16.msra.mxu2 %v12209_v62 }
0x26ff   :  { %10065 = vmatmul.msk.bf16.vlgmr.msra.gmra.mxu0 %vm1407_vm5, %v5994_v37  ;;  %6207 = vmatpush.bf16.msrb.mxu3 %v12203_v57  ;;  %v11244_v37 = vld [vmem:[%s15205_s15 + $0x30] sm:$0xff] }
0x2700   :  { %6223 = vmatpush.bf16.msra.mxu0 %v12214_v50 }
0x2701   :  { %v10799_v11 = vpop.eup %10798  ;;  %v5935_v34 = vpop.xlane.xlu1 %5934 }
0x2702   :  { %v5979_v55 = vmul.f32 %v10799_v11, %v13827_v21  ;;  %10802 = vrcp.f32 %v5935_v34  ;;  %v5938_v17 = vpop.xlane.xlu2 %5937  ;;  %v10801_v30 = vpop.eup %10800  ;;  %v11245_v34 = vld [vmem:[#allocation8] sm:$0xff] }
0x2703   :  { %10804 = vrcp.f32 %v5938_v17  ;;  %v5984_v22 = vmul.f32 %v10801_v30, %v13831_v27  ;;  %v11240_v27 = vld [vmem:[#allocation11 + $0x18] sm:$0xff] }
0x2704   :  { %v5995_v20 = vpack.c.bf16 %v5979_v55, %v5979_v55  ;;  %v11246_v55 = vld [vmem:[#allocation11 + $0x8] sm:$0xff]  ;;  %v11248_v30 = vld [vmem:[#allocation9 + $0x8] sm:$0xff] }
0x2705   :  { %v6000_v21 = vpack.c.bf16 %v5984_v22, %v5984_v22 }
0x2706   :  { %10066 = vmatmul.msk.bf16.vlgmr.msra.gmra.mxu1 %vm1407_vm5, %v5995_v20 }
0x2707   :  { %6239 = vmatpush.bf16.msra.mxu1 %v12262_v49 }
0x2708   :  { %v10803_v9 = vpop.eup %10802 }
0x2709   :  { %v10805_v19 = vpop.eup %10804  ;;  %v5981_v15 = vmul.f32 %v10803_v9, %v13836_v23  ;;  %v5941_v52 = vpop.xlane.xlu1 %5940  ;;  %v11241_v23 = vld [vmem:[%s15205_s15 + $0x38] sm:$0xff] }
0x270a   :  { %v5982_v1 = vmul.f32 %v10805_v19, %v13839_v53  ;;  %10806 = vrcp.f32 %v5941_v52  ;;  %v11249_v19 = vld [vmem:[#allocation11] sm:$0xff] }
0x270b   :  { %v5997_v24 = vpack.c.bf16 %v5981_v15, %v5981_v15  ;;  %v5956_v45 = vpop.xlane.xlu2 %5955 }
0x270c   :  { %v5998_v16 = vpack.c.bf16 %v5982_v1, %v5982_v1  ;;  %10808 = vrcp.f32 %v5956_v45  ;;  %v11251_v1 = vld [vmem:[#allocation9] sm:$0xff] }
0x270d   :  { %10071 = vmatmul.msk.bf16.vlgmr.msrb.gmra.mxu2 %vm1407_vm5, %v6000_v21 }
0x270e   :  { %10068 = vmatmul.msk.bf16.vlgmr.msra.gmra.mxu3 %vm1407_vm5, %v5997_v24  ;;  %6468 = vmatpush.bf16.msrb.mxu2 %v11240_v27  ;;  %v11254_v27 = vld [vmem:[%s15205_s15 + $0x8] sm:$0xff] }
0x270f   :  { %10069 = vmatmul.msk.bf16.vlgmr.msrb.gmra.mxu0 %vm1407_vm5, %v5998_v16  ;;  %6316 = vmatpush.bf16.msra.mxu3 %v11241_v23  ;;  %v11253_v16 = vld [vmem:[%s15205_s15 + $0x10] sm:$0xff]  ;;  %v11255_v23 = vld [vmem:[%s15205_s15] sm:$0xff] }
0x2710   :  { %v10807_v53 = vpop.eup %10806  ;;  %6342 = vmatpush.bf16.msrb.mxu0 %v11242_v4 }
0x2711   :  { %v5983_v41 = vmul.f32 %v10807_v53, %v13846_v47  ;;  %v5947_v5 = vpop.xlane.xlu0 %5946  ;;  %v11247_v47 = vld [vmem:[%s15205_s15 + $0x28] sm:$0xff] }
0x2712   :  { %10810 = vrcp.f32 %v5947_v5  ;;  %6469 = vmatpush.bf16.msrb.mxu2 %v11243_v59  ;;  %v10809_v11 = vpop.eup %10808 }
0x2713   :  { %v5999_v18 = vpack.c.bf16 %v5983_v41, %v5983_v41  ;;  %6317 = vmatpush.bf16.msra.mxu3 %v11244_v37  ;;  %v5988_v17 = vmul.f32 %v10809_v11, %v13850_v36  ;;  %v11250_v36 = vld [vmem:[%s15205_s15 + $0x20] sm:$0xff] }
0x2714   :  { %6343 = vmatpush.bf16.msrb.mxu0 %v11245_v34 }
0x2715   :  { %v6004_v15 = vpack.c.bf16 %v5988_v17, %v5988_v17 }
0x2716   :  { %10070 = vmatmul.msk.bf16.vlgmr.msrb.gmra.mxu1 %vm1407_vm5, %v5999_v18  ;;  %6470 = vmatpush.bf16.msrb.mxu2 %v11246_v55 }
0x2717   :  { %6318 = vmatpush.bf16.msra.mxu3 %v11247_v47  ;;  %6363 = vmatpush.bf16.msrb.mxu1 %v11248_v30 }
0x2718   :  { %v10811_v20 = vpop.eup %10810 }
0x2719   :  { %v5985_v22 = vmul.f32 %v10811_v20, %v13855_v6  ;;  %v5950_v9 = vpop.xlane.xlu1 %5949  ;;  %v11252_v6 = vld [vmem:[%s15205_s15 + $0x18] sm:$0xff] }
0x271a   :  { %10812 = vrcp.f32 %v5950_v9  ;;  %6471 = vmatpush.bf16.msrb.mxu2 %v11249_v19 }
0x271b   :  { %v6001_v52 = vpack.c.bf16 %v5985_v22, %v5985_v22  ;;  %6319 = vmatpush.bf16.msra.mxu3 %v11250_v36  ;;  %6364 = vmatpush.bf16.msrb.mxu1 %v11251_v1 }
0x271d   :  { %10075 = vmatmul.msk.bf16.vlgmr.msra.gmra.mxu2 %vm1407_vm5, %v6004_v15 }
0x271e   :  { %10072 = vmatmul.msk.bf16.vlgmr.msrb.gmra.mxu3 %vm1407_vm5, %v6001_v52  ;;  %6657 = vmatpush.bf16.xpose.msra.mxu2 %v11835_v56 }
0x271f   :  { %6320 = vmatpush.bf16.msra.mxu3 %v11252_v6 }
0x2720   :  { %v10813_v21 = vpop.eup %10812 }
0x2721   :  { %v5986_v24 = vmul.f32 %v10813_v21, %v13859_v38 }
0x2723   :  { %v6002_v45 = vpack.c.bf16 %v5986_v24, %v5986_v24  ;;  %6321 = vmatpush.bf16.msra.mxu3 %v11253_v16 }
0x2725   :  { %10073 = vmatmul.msk.bf16.vlgmr.msra.gmra.mxu0 %vm1407_vm5, %v6002_v45 }
0x2726   :  { %6615 = vmatpush.bf16.xpose.msra.mxu0 %v11803_v7 }
0x2727   :  { %6322 = vmatpush.bf16.msra.mxu3 %v11254_v27 }
0x272b   :  { %6323 = vmatpush.bf16.msra.mxu3 %v11255_v23 }
0x272f   :  { %6678 = vmatpush.bf16.xpose.msrb.mxu3 %v11839_v60 }
0x2731   :  { %v6353_v21 = vpop.permute.xlu1 %6352 }
0x275a   :  { %v6065_v38 = vpop.f32.mrf.mxu2 }
0x275b   :  { %v6273_v30 = vrot.slane %v6065_v38, 5 }
0x2762   :  { %v6067_v53 = vpop.f32.mrf.mxu2 }
0x2766   :  { %v6033_v4 = vpop.f32.mrf.mxu0 }
0x2767   :  { %v6269_v59 = vrot.slane %v6033_v4, 7 }
0x2769   :  { %v5953_v41 = vpop.xlane.xlu0 %5952 }
0x276a   :  { %10814 = vrcp.f32 %v5953_v41 }
0x276e   :  { %v6035_v5 = vpop.f32.mrf.mxu0 }
0x2770   :  { %v10815_v18 = vpop.eup %10814  ;;  %v6017_v37 = vpop.f32.mrf.mxu3 }
0x2771   :  { %v5987_v11 = vmul.f32 %v10815_v18, %v13878_v51  ;;  %v6270_v34 = vsel %vm1722_vm6, %v6269_v59, %v6017_v37 }
0x2772   :  { %v6049_v55 = vpop.f32.mrf.mxu1 }
0x2773   :  { %v6003_v17 = vpack.c.bf16 %v5987_v11, %v5987_v11  ;;  %v6271_v47 = vrot.slane %v6049_v55, 6 }
0x2775   :  { %v6272_v20 = vsel %vm1725_vm7, %v6271_v47, %v6270_v34  ;;  %10074 = vmatmul.msk.bf16.vlgmr.msra.gmra.mxu1 %vm1407_vm5, %v6003_v17 }
0x2776   :  { %6636 = vmatpush.bf16.xpose.msra.mxu1 %v11813_v29  ;;  %v6274_v22 = vsel %vm1728_vm8, %v6273_v30, %v6272_v20 }
0x2778   :  { %v6019_v9 = vpop.f32.mrf.mxu3 }
0x277a   :  { %v6051_v19 = vpop.f32.mrf.mxu1 }
0x277c   :  { %v6097_v15 = vpop.f32.mrf.mxu0 }
0x277d   :  { %v6277_v1 = vrot.slane %v6097_v15, 3 }
0x2780   :  { %v6129_v52 = vpop.f32.mrf.mxu2 }
0x2781   :  { %v6081_v36 = vpop.f32.mrf.mxu3  ;;  %v6281_v27 = vrot.slane %v6129_v52, 1 }
0x2782   :  { %v6275_v51 = vrot.slane %v6081_v36, 4 }
0x2783   :  { %v6113_v6 = vpop.f32.mrf.mxu1 }
0x2784   :  { %v6276_v24 = vsel %vm1731_vm10, %v6275_v51, %v6274_v22  ;;  %v6099_v45 = vpop.f32.mrf.mxu0  ;;  %v6279_v16 = vrot.slane %v6113_v6, 2 }
0x2785   :  { %v6278_v23 = vsel %vm15280_vm1, %v6277_v1, %v6276_v24  ;;  %10077 = vmatmul.msk.bf16.vlgmr.msrb.gmra.mxu1 %vm215_vm0, %v6353_v21 }
0x2786   :  { %v6280_v38 = vsel %vm15281_vm2, %v6279_v16, %v6278_v23  ;;  %6720 = vmatpush.bf16.xpose.msrb.mxu1 %v11847_v3 }
0x2787   :  { %v6282_v53 = vsel %vm15282_vm4, %v6281_v27, %v6280_v38 }
0x2788   :  { %v6131_v4 = vpop.f32.mrf.mxu2 }
0x2789   :  { %v6083_v41 = vpop.f32.mrf.mxu3 }
0x278b   :  { %v6115_v5 = vpop.f32.mrf.mxu1 }
0x278c   :  { %v6161_v59 = vpop.f32.mrf.mxu0 }
0x278d   :  { %v6295_v18 = vrot.slane %v6161_v59, 7 }
0x2790   :  { %v6193_v37 = vpop.f32.mrf.mxu2 }
0x2791   :  { %v6145_v11 = vpop.f32.mrf.mxu3  ;;  %v6299_v30 = vrot.slane %v6193_v37, 5 }
0x2792   :  { %v6296_v34 = vsel %vm1722_vm6, %v6295_v18, %v6145_v11 }
0x2793   :  { %v6177_v55 = vpop.f32.mrf.mxu1 }
0x2794   :  { %v6163_v17 = vpop.f32.mrf.mxu0  ;;  %v6297_v47 = vrot.slane %v6177_v55, 6 }
0x2796   :  { %v6298_v20 = vsel %vm1725_vm7, %v6297_v47, %v6296_v34 }
0x2797   :  { %v6300_v22 = vsel %vm1728_vm8, %v6299_v30, %v6298_v20 }
0x2798   :  { %v6195_v9 = vpop.f32.mrf.mxu2 }
0x2799   :  { %v6147_v19 = vpop.f32.mrf.mxu3 }
0x279a   :  { %v11256_v19 = vld [vmem:[%s15200_s10] ss:$0 sm:$0xff] }
0x279b   :  { %v6179_v15 = vpop.f32.mrf.mxu1 }
0x279c   :  { %v15287_v15 = vld [vmem:[#allocation22_spill] sm:$0xff] }
0x27a0   :  { %v6257_v52 = vpop.f32.mrf.mxu2 }
0x27a1   :  { %v6209_v36 = vpop.f32.mrf.mxu3  ;;  %v6307_v4 = vrot.slane %v6257_v52, 1  ;;  %v250_v52 = vadd.f32 %v11256_v19, %v15287_v15 }
0x27a2   :  { %v6301_v51 = vrot.slane %v6209_v36, 4  ;;  %v6225_v1 = vpop.f32.mrf.mxu0 }
0x27a3   :  { %v6303_v6 = vrot.slane %v6225_v1, 3 }
0x27a4   :  { %v6302_v21 = vsel %vm1731_vm10, %v6301_v51, %v6300_v22 }
0x27a5   :  { %v6304_v24 = vsel %vm15283_vm11, %v6303_v6, %v6302_v21 }
0x27a8   :  { %v6259_v45 = vpop.f32.mrf.mxu2 }
0x27a9   :  { %v6211_v16 = vpop.f32.mrf.mxu3 }
0x27aa   :  { %v6227_v27 = vpop.f32.mrf.mxu0 }
0x27f2   :  { %v6241_v23 = vpop.f32.mrf.mxu1 }
0x27f3   :  { %v6305_v38 = vrot.slane %v6241_v23, 2 }
0x27f5   :  { %v6306_v41 = vsel %vm15284_vm12, %v6305_v38, %v6304_v24 }
0x27f6   :  { %v6308_v5 = vsel %vm15285_vm13, %v6307_v4, %v6306_v41 }
0x27f7   :  { %v10291_v59 = vpack.i.bf16 %v6308_v5, %v13606_v33 }
0x27f9   :  { %10292 = vrot.lane.b32.xlu2 %v10291_v59, %s11529_s29 }
0x27fa   :  { %v6243_v18 = vpop.f32.mrf.mxu1 }
0x2853   :  { %v13958_v37 = vpop.permute.xlu2 %10292 }
0x2854   :  { %v10295_v11 = vunpack.i.h.bf16 %v13958_v37  ;;  %v10294_v34 = vunpack.i.l.bf16 %v13958_v37 }
0x2856   :  { %v6312_v55 = vsel %vm215_vm0, %v6282_v53, %v10294_v34  ;;  %v6366_v53 = vpop.f32.mrf.mxu1 }
0x2857   :  { %v6313_v17 = vsel %vm682_vm9, %v6312_v55, %v10295_v11 }
0x2858   :  { %v6314_v47 = vsel %vm15286_vm14, %v6313_v17, %v13619_v54 }
0x2859   :  { %v6315_v30 = vpack.c.bf16 %v6314_v47, %v6314_v47 }
0x285b   :  { %6324 = vmatmul.bf16.vlgmr.msra.gmra.mxu3 %v6315_v30 }
0x285c   :  { %6762 = vmatpush.bf16.xpose.msra.mxu3 %v11855_v13 }
0x285e   :  { %v6368_v1 = vpop.f32.mrf.mxu1 }
0x28de   :  { %v6325_v33 = vpop.f32.mrf.mxu3 }
0x28df   :  { %10816 = vtanh.f32 %v6325_v33 }
0x28e5   :  { %v10817_v20 = vpop.eup %10816 }
0x28e6   :  { %v6332_v22 = vpack.c.bf16 %v10817_v20, %v10817_v20  ;;  %9703 = vst.msk [vmem:[#allocation14 + $0x20] sm:$0xff] %vm215_vm0, %v10817_v20  ;;  %v6327_v9 = vpop.f32.mrf.mxu3 }
0x28e8   :  { %10076 = vmatmul.msk.bf16.vlgmr.msrb.gmra.mxu0 %vm215_vm0, %v6332_v22 }
0x28e9   :  { %6699 = vmatpush.bf16.xpose.msrb.mxu0 %v11843_v63 }
0x2965   :  { %v6345_v36 = vpop.f32.mrf.mxu0 }
0x2966   :  { %v6349_v51 = vadd.f32 %v6345_v36, %v250_v52 }
0x2968   :  { %v6371_v6 = vadd.f32 %v6366_v53, %v6349_v51  ;;  %v6372_v21 = vadd.f32 %v6368_v1, %v6349_v51 }
0x296a   :  { %10818 = vtanh.f32 %v6371_v6  ;;  %v10079_v27 = vmul.f32 -1.442695, %v6372_v21  ;;  %v10078_v41 = vmul.f32 -1.442695, %v6371_v6 }
0x296b   :  { %10820 = vtanh.f32 %v6372_v21 }
0x296c   :  { %10822 = vpow2.f32 %v10079_v27 }
0x296d   :  { %v6347_v24 = vpop.f32.mrf.mxu0 }
0x2970   :  { %v10819_v45 = vpop.eup %10818 }
0x2971   :  { %v10821_v16 = vpop.eup %10820  ;;  %6417 = vrot.lane.b32.xlu0 %v10819_v45, %s11529_s29 }
0x2972   :  { %6419 = vrot.lane.b32.xlu2 %v10821_v16, %s11529_s29  ;;  %v10823_v23 = vpop.eup %10822 }
0x2973   :  { %v6380_v38 = vadd.f32 1.0, %v10823_v23 }
0x2975   :  { %10824 = vrcp.f32 %v6380_v38  ;;  %v6407_v47 = vand.u32 2147483648, %v6380_v38  ;;  %vm6401_vm1 = vweird.f32 %v6380_v38  ;;  %v6405_v30 = vand.u32 2147483647, %v6380_v38 }
0x2976   :  { %10826 = vpow2.f32 %v10078_v41 }
0x2977   :  { %v6408_v20 = vor.u32 1.1754944e-38, %v6407_v47  ;;  %vm6406_vm4 = vcmp.eq.f32.partialorder %v6405_v30, 8.507059e+37 }
0x297b   :  { %v10825_v4 = vpop.eup %10824 }
0x297c   :  { %v6397_v5 = vmul.f32 %v10825_v4, %v6380_v38  ;;  %v10827_v18 = vpop.eup %10826  ;;  %vm6402_vm15 = vweird.f32 %v10825_v4 }
0x297d   :  { %v6379_v55 = vadd.f32 1.0, %v10827_v18  ;;  %vm6403_vm2 = vmor %vm6401_vm1, %vm6402_vm15 }
0x297e   :  { %v6398_v59 = vsub.f32 1.0, %v6397_v5 }
0x297f   :  { %10828 = vrcp.f32 %v6379_v55  ;;  %v6392_v1 = vand.u32 2147483648, %v6379_v55  ;;  %vm6386_vm12 = vweird.f32 %v6379_v55  ;;  %v6390_v6 = vand.u32 2147483647, %v6379_v55 }
0x2980   :  { %v6399_v11 = vmul.f32 %v10825_v4, %v6398_v59 }
0x2981   :  { %v6393_v24 = vor.u32 1.1754944e-38, %v6392_v1  ;;  %vm6391_vm14 = vcmp.eq.f32.partialorder %v6390_v6, 8.507059e+37 }
0x2982   :  { %v6400_v17 = vadd.f32 %v10825_v4, %v6399_v11 }
0x2984   :  { %v6404_v33 = vsel %vm6403_vm2, %v10825_v4, %v6400_v17 }
0x2985   :  { %v6409_v9 = vsel %vm6406_vm4, %v6408_v20, %v6404_v33  ;;  %v10829_v53 = vpop.eup %10828 }
0x2986   :  { %v6382_v15 = vmul.f32 %v10829_v53, %v6379_v55  ;;  %vm6387_vm11 = vweird.f32 %v10829_v53  ;;  %v6414_v23 = vmul.f32 %v6409_v9, %v13566_v0 }
0x2987   :  { %vm6388_vm13 = vmor %vm6386_vm12, %vm6387_vm11 }
0x2988   :  { %v6383_v52 = vsub.f32 1.0, %v6382_v15 }
0x298a   :  { %v6384_v36 = vmul.f32 %v10829_v53, %v6383_v52  ;;  %v11257_v52 = vld [vmem:[%s15202_s12] ss:$0 sm:$0xff] }
0x298c   :  { %v6385_v51 = vadd.f32 %v10829_v53, %v6384_v36 }
0x298e   :  { %v6389_v21 = vsel %vm6388_vm13, %v10829_v53, %v6385_v51 }
0x298f   :  { %v6394_v16 = vsel %vm6391_vm14, %v6393_v24, %v6389_v21 }
0x2990   :  { %v6413_v5 = vmul.f32 %v6394_v16, %v13564_v40 }
0x29cc   :  { %v6420_v22 = vpop.permute.xlu2 %6419 }
0x29cd   :  { %v6424_v19 = vmul.f32 %v6420_v22, %v6409_v9 }
0x29cf   :  { %6429 = vrot.lane.b32.xlu1 %v6424_v19, %s11536_s7 }
0x29e3   :  { %v6418_v45 = vpop.permute.xlu0 %6417 }
0x29e4   :  { %v6423_v27 = vmul.f32 %v6418_v45, %v6394_v16 }
0x29e6   :  { %6427 = vrot.lane.b32.xlu0 %v6423_v27, %s11536_s7 }
0x2a41   :  { %v6430_v38 = vpop.permute.xlu1 %6429 }
0x2a42   :  { %v13981_v4 = vadd.f32 %v6430_v38, %v6414_v23 }
0x2a44   :  { %10830 = vtanh.f32 %v13981_v4 }
0x2a4a   :  { %v10831_v41 = vpop.eup %10830 }
0x2a4b   :  { %6441 = vrot.lane.b32.xlu0 %v10831_v41, %s11529_s29 }
0x2a58   :  { %v6428_v59 = vpop.permute.xlu0 %6427 }
0x2a59   :  { %v13986_v18 = vadd.f32 %v6428_v59, %v6413_v5 }
0x2a5b   :  { %10832 = vtanh.f32 %v13986_v18 }
0x2a61   :  { %v10833_v11 = vpop.eup %10832 }
0x2a62   :  { %6439 = vrot.lane.b32.xlu2 %v10833_v11, %s11529_s29 }
0x2a6a   :  { %6455 = vrot.lane.b32.xlu2 %v13619_v54, %s11529_s29 }
0x2abc   :  { %v6440_v0 = vpop.permute.xlu2 %6439 }
0x2abd   :  { %v13992_v55 = vmul.f32 %v6440_v0, %v6394_v16  ;;  %v6442_v17 = vpop.permute.xlu0 %6441 }
0x2abe   :  { %v13994_v47 = vmul.f32 %v6442_v17, %v6409_v9 }
0x2ac0   :  { %v10296_v40 = vpack.i.bf16 %v13994_v47, %v13992_v55 }
0x2ac2   :  { %10297 = vrot.lane.b32.xlu1 %v10296_v40, %s11536_s7 }
0x2ac4   :  { %v6456_v53 = vpop.permute.xlu2 %6455 }
0x2b34   :  { %v10298_v33 = vpop.permute.xlu1 %10297 }
0x2b35   :  { %v10300_v20 = vunpack.i.h.bf16 %v10298_v33  ;;  %v10299_v22 = vunpack.i.l.bf16 %v10298_v33 }
0x2b37   :  { %v6459_v54 = vsel %vm215_vm0, %v10300_v20, %v6456_v53  ;;  %v6458_v19 = vsel %vm215_vm0, %v10299_v22, %v10294_v34 }
0x2b38   :  { %v6460_v9 = vpack.c.bf16 %v6459_v54, %v6458_v19 }
0x2b3a   :  { %10080 = vmatmul.msk.bf16.vlgmr.msrb.gmra.mxu2 %vm682_vm9, %v6460_v9 }
0x2b3b   :  { %6741 = vmatpush.bf16.xpose.msrb.mxu2 %v11851_v8 }
0x2bbd   :  { %v6473_v15 = vpop.f32.mrf.mxu2 }
0x2bbe   :  { %v6478_v36 = vadd.f32 %v11257_v52, %v6473_v15 }
0x2bc0   :  { %10834 = vtanh.f32 %v6478_v36  ;;  %v10081_v34 = vmul.f32 -1.442695, %v6478_v36 }
0x2bc5   :  { %v6475_v51 = vpop.f32.mrf.mxu2 }
0x2bc6   :  { %v10835_v1 = vpop.eup %10834  ;;  %v6479_v6 = vadd.f32 %v11257_v52, %v6475_v51 }
0x2bc7   :  { %6524 = vrot.lane.b32.xlu0 %v10835_v1, %s11529_s29 }
0x2bc8   :  { %10836 = vtanh.f32 %v6479_v6  ;;  %v10082_v21 = vmul.f32 -1.442695, %v6479_v6 }
0x2bc9   :  { %10838 = vpow2.f32 %v10081_v34 }
0x2bca   :  { %10840 = vpow2.f32 %v10082_v21 }
0x2bce   :  { %v10837_v37 = vpop.eup %10836 }
0x2bcf   :  { %6526 = vrot.lane.b32.xlu1 %v10837_v37, %s11529_s29  ;;  %v10839_v24 = vpop.eup %10838 }
0x2bd0   :  { %v6486_v45 = vadd.f32 1.0, %v10839_v24  ;;  %v10841_v16 = vpop.eup %10840 }
0x2bd1   :  { %v6487_v27 = vadd.f32 1.0, %v10841_v16 }
0x2bd2   :  { %10842 = vrcp.f32 %v6486_v45  ;;  %v6499_v40 = vand.u32 2147483648, %v6486_v45  ;;  %vm6493_vm1 = vweird.f32 %v6486_v45  ;;  %v6497_v33 = vand.u32 2147483647, %v6486_v45 }
0x2bd3   :  { %10844 = vrcp.f32 %v6487_v27  ;;  %v6514_v52 = vand.u32 2147483648, %v6487_v27  ;;  %vm6508_vm12 = vweird.f32 %v6487_v27  ;;  %v6512_v36 = vand.u32 2147483647, %v6487_v27 }
0x2bd4   :  { %v6500_v53 = vor.u32 1.1754944e-38, %v6499_v40  ;;  %vm6498_vm4 = vcmp.eq.f32.partialorder %v6497_v33, 8.507059e+37 }
0x2bd5   :  { %v6515_v1 = vor.u32 1.1754944e-38, %v6514_v52  ;;  %vm6513_vm14 = vcmp.eq.f32.partialorder %v6512_v36, 8.507059e+37 }
0x2bd8   :  { %v10843_v23 = vpop.eup %10842 }
0x2bd9   :  { %v6489_v38 = vmul.f32 %v10843_v23, %v6486_v45  ;;  %v10845_v5 = vpop.eup %10844  ;;  %vm6494_vm15 = vweird.f32 %v10843_v23 }
0x2bda   :  { %v6504_v11 = vmul.f32 %v10845_v5, %v6487_v27  ;;  %vm6495_vm2 = vmor %vm6493_vm1, %vm6494_vm15  ;;  %vm6509_vm11 = vweird.f32 %v10845_v5  ;;  %vm15293_vm15 = vcmask 1045509   ;;  %vm15294_vm1 = vcmask 1046534  }
0x2bdb   :  { %v6490_v41 = vsub.f32 1.0, %v6489_v38  ;;  %vm6510_vm13 = vmor %vm6508_vm12, %vm6509_vm11 }
0x2bdc   :  { %v6505_v17 = vsub.f32 1.0, %v6504_v11  ;;  %vm15297_vm11 = vmmov %vm15294_vm1 }
0x2bdd   :  { %v6491_v59 = vmul.f32 %v10843_v23, %v6490_v41 }
0x2bde   :  { %v6506_v22 = vmul.f32 %v10845_v5, %v6505_v17 }
0x2bdf   :  { %v6492_v0 = vadd.f32 %v10843_v23, %v6491_v59 }
0x2be0   :  { %v6507_v15 = vadd.f32 %v10845_v5, %v6506_v22 }
0x2be1   :  { %v6496_v20 = vsel %vm6495_vm2, %v10843_v23, %v6492_v0  ;;  %vm15295_vm2 = vcmask 1047559  }
0x2be2   :  { %v6501_v19 = vsel %vm6498_vm4, %v6500_v53, %v6496_v20  ;;  %v6511_v51 = vsel %vm6510_vm13, %v10845_v5, %v6507_v15  ;;  %vm15296_vm4 = vmmov %vm15293_vm15  ;;  %vm15299_vm13 = vcmask 785408  }
0x2be3   :  { %v6516_v37 = vsel %vm6513_vm14, %v6515_v1, %v6511_v51  ;;  %v6520_v21 = vmul.f32 %v6501_v19, %v13602_v26  ;;  %vm15298_vm12 = vmmov %vm15295_vm2 }
0x2be4   :  { %v6521_v27 = vmul.f32 %v6516_v37, %v13597_v61 }
0x2c39   :  { %v6525_v54 = vpop.permute.xlu0 %6524 }
0x2c3a   :  { %v6530_v9 = vmul.f32 %v6525_v54, %v6501_v19 }
0x2c3c   :  { %6534 = vrot.lane.b32.xlu2 %v6530_v9, %s11536_s7 }
0x2c41   :  { %v6527_v6 = vpop.permute.xlu1 %6526 }
0x2c42   :  { %v6531_v34 = vmul.f32 %v6527_v6, %v6516_v37 }
0x2c44   :  { %6536 = vrot.lane.b32.xlu0 %v6531_v34, %s11536_s7 }
0x2c96   :  { %v6535_v24 = vpop.permute.xlu2 %6534 }
0x2c97   :  { %v14015_v45 = vadd.f32 %v6535_v24, %v6520_v21 }
0x2c99   :  { %10846 = vtanh.f32 %v14015_v45 }
0x2c9f   :  { %v10847_v16 = vpop.eup %10846 }
0x2ca0   :  { %6546 = vrot.lane.b32.xlu1 %v10847_v16, %s11529_s29 }
0x2cb6   :  { %v6537_v23 = vpop.permute.xlu0 %6536 }
0x2cb7   :  { %v14020_v38 = vadd.f32 %v6537_v23, %v6521_v27 }
0x2cb9   :  { %10848 = vtanh.f32 %v14020_v38 }
0x2cbf   :  { %v10849_v41 = vpop.eup %10848 }
0x2cc0   :  { %6548 = vrot.lane.b32.xlu2 %v10849_v41, %s11529_s29 }
0x2d12   :  { %v6547_v5 = vpop.permute.xlu1 %6546 }
0x2d13   :  { %v14024_v26 = vmul.f32 %v6547_v5, %v6501_v19 }
0x2d15   :  { %v6584_v59 = vpack.c.bf16 %v14024_v26, %v14024_v26  ;;  %v6558_v11 = vrot.slane %v14024_v26, 3  ;;  %v6557_v0 = vrot.slane %v14024_v26, 2  ;;  %v6562_v61 = vrot.slane %v14024_v26, 7 }
0x2d16   :  { %v6561_v17 = vrot.slane %v14024_v26, 6  ;;  %v6556_v22 = vrot.slane %v14024_v26, 1  ;;  %v6560_v27 = vrot.slane %v14024_v26, 5  ;;  %v6559_v23 = vrot.slane %v14024_v26, 4 }
0x2d17   :  { %v6601_v40 = vunpack.c.l.b16 %v6584_v59  ;;  %v6587_v33 = vpack.c.bf16 %v6558_v11, %v6558_v11  ;;  %v6586_v20 = vpack.c.bf16 %v6557_v0, %v6557_v0  ;;  %v6591_v9 = vpack.c.bf16 %v6562_v61, %v6562_v61 }
0x2d18   :  { %v6590_v52 = vpack.c.bf16 %v6561_v17, %v6561_v17  ;;  %v6585_v6 = vpack.c.bf16 %v6556_v22, %v6556_v22  ;;  %v6589_v11 = vpack.c.bf16 %v6560_v27, %v6560_v27  ;;  %v6588_v0 = vpack.c.bf16 %v6559_v23, %v6559_v23 }
0x2d19   :  { %v6602_v53 = vpack.c.b16 %v6601_v40, %v6601_v40  ;;  %v6664_v54 = vunpack.c.l.b16 %v6587_v33  ;;  %v6643_v19 = vunpack.c.l.b16 %v6586_v20  ;;  %v6748_v34 = vunpack.c.l.b16 %v6591_v9 }
0x2d1a   :  { %v6549_v15 = vpop.permute.xlu2 %6548  ;;  %v6727_v24 = vunpack.c.l.b16 %v6590_v52  ;;  %v6622_v16 = vunpack.c.l.b16 %v6585_v6  ;;  %v6706_v40 = vunpack.c.l.b16 %v6589_v11  ;;  %v6685_v33 = vunpack.c.l.b16 %v6588_v0 }
0x2d1b   :  { %v14033_v36 = vmul.f32 %v6549_v15, %v6516_v37  ;;  %6603 = vrot.lane.b32.xlu2 %v6602_v53, %s11536_s7  ;;  %v6665_v51 = vpack.c.b16 %v6664_v54, %v6664_v54  ;;  %v6644_v1 = vpack.c.b16 %v6643_v19, %v6643_v19  ;;  %v6749_v37 = vpack.c.b16 %v6748_v34, %v6748_v34 }
0x2d1c   :  { %v6728_v5 = vpack.c.b16 %v6727_v24, %v6727_v24  ;;  %v6623_v59 = vpack.c.b16 %v6622_v16, %v6622_v16  ;;  %v6707_v54 = vpack.c.b16 %v6706_v40, %v6706_v40  ;;  %v6686_v19 = vpack.c.b16 %v6685_v33, %v6685_v33 }
0x2d1d   :  { %6666 = vrot.lane.b32.xlu1 %v6665_v51, %s11536_s7  ;;  %6645 = vrot.lane.b32.xlu0 %v6644_v1, %s11536_s7  ;;  %v6564_v21 = vrot.slane %v14033_v36, 2  ;;  %v6563_v17 = vrot.slane %v14033_v36, 1  ;;  %v6565_v20 = vrot.slane %v14033_v36, 3  ;;  %v6592_v9 = vpack.c.bf16 %v14033_v36, %v14033_v36 }
0x2d1e   :  { %v6566_v51 = vrot.slane %v14033_v36, 4  ;;  %v6569_v34 = vrot.slane %v14033_v36, 7  ;;  %v6567_v0 = vrot.slane %v14033_v36, 5 }
0x2d1f   :  { %v6594_v41 = vpack.c.bf16 %v6564_v21, %v6564_v21  ;;  %v6593_v53 = vpack.c.bf16 %v6563_v17, %v6563_v17  ;;  %v6595_v15 = vpack.c.bf16 %v6565_v20, %v6565_v20  ;;  %v6769_v1 = vunpack.c.l.b16 %v6592_v9 }
0x2d20   :  { %v6568_v21 = vrot.slane %v14033_v36, 6  ;;  %v6596_v16 = vpack.c.bf16 %v6566_v51, %v6566_v51  ;;  %v6597_v33 = vpack.c.bf16 %v6567_v0, %v6567_v0 }
0x2d21   :  { %v6811_v61 = vunpack.c.l.b16 %v6594_v41  ;;  %v6790_v52 = vunpack.c.l.b16 %v6593_v53  ;;  %v6832_v6 = vunpack.c.l.b16 %v6595_v15  ;;  %v6770_v27 = vpack.c.b16 %v6769_v1, %v6769_v1 }
0x2d22   :  { %v6598_v41 = vpack.c.bf16 %v6568_v21, %v6568_v21  ;;  %v6874_v20 = vunpack.c.l.b16 %v6597_v33 }
0x2d23   :  { %6750 = vrot.lane.b32.xlu2 %v6749_v37, %s11536_s7  ;;  %v6812_v22 = vpack.c.b16 %v6811_v61, %v6811_v61  ;;  %v6791_v24 = vpack.c.b16 %v6790_v52, %v6790_v52  ;;  %v6833_v23 = vpack.c.b16 %v6832_v6, %v6832_v6  ;;  %v6599_v37 = vpack.c.bf16 %v6569_v34, %v6569_v34 }
0x2d24   :  { %v6895_v11 = vunpack.c.l.b16 %v6598_v41  ;;  %v15289_v41 = vld [vmem:[#allocation29_spill] sm:$0xff] }
0x2d25   :  { %6729 = vrot.lane.b32.xlu1 %v6728_v5, %s11536_s7  ;;  %6624 = vrot.lane.b32.xlu0 %v6623_v59, %s11536_s7  ;;  %v6853_v5 = vunpack.c.l.b16 %v6596_v16  ;;  %v6916_v59 = vunpack.c.l.b16 %v6599_v37  ;;  %v15288_v37 = vld [vmem:[#allocation30_spill] sm:$0xff] }
0x2d26   :  { %v6896_v40 = vpack.c.b16 %v6895_v11, %v6895_v11  ;;  %v15291_v11 = vld [vmem:[#allocation28_spill] sm:$0xff] }
0x2d27   :  { %v6854_v61 = vpack.c.b16 %v6853_v5, %v6853_v5  ;;  %v6917_v17 = vpack.c.b16 %v6916_v59, %v6916_v59  ;;  %v15290_v5 = vld [vmem:[#allocation27_spill] sm:$0xff] }
0x2d2b   :  { %6813 = vrot.lane.b32.xlu2 %v6812_v22, %s11536_s7  ;;  %v6875_v22 = vpack.c.b16 %v6874_v20, %v6874_v20 }
0x2d2d   :  { %6708 = vrot.lane.b32.xlu1 %v6707_v54, %s11536_s7  ;;  %6687 = vrot.lane.b32.xlu0 %v6686_v19, %s11536_s7 }
0x2d33   :  { %6792 = vrot.lane.b32.xlu2 %v6791_v24, %s11536_s7 }
0x2d35   :  { %6771 = vrot.lane.b32.xlu1 %v6770_v27, %s11536_s7  ;;  %6834 = vrot.lane.b32.xlu0 %v6833_v23, %s11536_s7 }
0x2d3b   :  { %6855 = vrot.lane.b32.xlu2 %v6854_v61, %s11536_s7  ;;  %v11258_v61 = vld [vmem:[%s15196_s6] sm:$0x1] }
0x2d3d   :  { %6918 = vrot.lane.b32.xlu1 %v6917_v17, %s11536_s7  ;;  %6897 = vrot.lane.b32.xlu0 %v6896_v40, %s11536_s7 }
0x2d45   :  { %6876 = vrot.lane.b32.xlu0 %v6875_v22, %s11536_s7 }
0x2d75   :  { %v6604_v53 = vpop.permute.xlu2 %6603 }
0x2d76   :  { %10083 = vmatmul.msk.bf16.vlgmr.msra.gmra.mxu0 %vm215_vm0, %v6604_v53  ;;  %v11259_v53 = vld [vmem:[%s15196_s6 + $0x2] sm:$0x1] }
0x2d77   :  { %6783 = vmatpush.bf16.xpose.msra.mxu0 %v11864_v28 }
0x2d7d   :  { %v6751_v51 = vpop.permute.xlu2 %6750 }
0x2d85   :  { %v6814_v6 = vpop.permute.xlu2 %6813 }
0x2d8d   :  { %v6793_v24 = vpop.permute.xlu2 %6792 }
0x2d8f   :  { %v6667_v54 = vpop.permute.xlu1 %6666  ;;  %v6646_v19 = vpop.permute.xlu0 %6645 }
0x2d90   :  { %10085 = vmatmul.msk.bf16.vlgmr.msra.gmra.mxu2 %vm215_vm0, %v6646_v19  ;;  %10086 = vmatmul.msk.bf16.vlgmr.msrb.gmra.mxu3 %vm215_vm0, %v6667_v54  ;;  %v11260_v19 = vld [vmem:[%s15196_s6 + $0x3] sm:$0x1] }
0x2d91   :  { %6825 = vmatpush.bf16.xpose.msra.mxu2 %v11874_v35  ;;  %6846 = vmatpush.bf16.xpose.msrb.mxu3 %v11868_v31 }
0x2d95   :  { %v6856_v27 = vpop.permute.xlu2 %6855 }
0x2d97   :  { %v6625_v9 = vpop.permute.xlu0 %6624  ;;  %v6730_v15 = vpop.permute.xlu1 %6729 }
0x2d98   :  { %10084 = vmatmul.msk.bf16.vlgmr.msra.gmra.mxu1 %vm215_vm0, %v6625_v9 }
0x2d99   :  { %6804 = vmatpush.bf16.xpose.msra.mxu1 %v11858_v14 }
0x2d9f   :  { %v6688_v52 = vpop.permute.xlu0 %6687  ;;  %v6709_v1 = vpop.permute.xlu1 %6708 }
0x2da0   :  { %10087 = vmatmul.msk.bf16.vlgmr.msrb.gmra.mxu0 %vm215_vm0, %v6688_v52  ;;  %10089 = vmatmul.msk.bf16.vlgmr.msrb.gmra.mxu2 %vm215_vm0, %v6730_v15 }
0x2da1   :  { %10090 = vmatmul.msk.bf16.vlgmr.msra.gmra.mxu3 %vm215_vm0, %v6751_v51  ;;  %6867 = vmatpush.bf16.xpose.msrb.mxu0 %v11881_v42 }
0x2da2   :  { %6909 = vmatpush.bf16.xpose.msrb.mxu2 %v11898_v48  ;;  %6930 = vmatpush.bf16.xpose.msra.mxu3 %v11891_v46 }
0x2da7   :  { %v6772_v34 = vpop.permute.xlu1 %6771  ;;  %v6835_v21 = vpop.permute.xlu0 %6834 }
0x2da8   :  { %10088 = vmatmul.msk.bf16.vlgmr.msrb.gmra.mxu1 %vm215_vm0, %v6709_v1  ;;  %v11261_v1 = vld [vmem:[%s15196_s6 + $0x1] sm:$0x1] }
0x2da9   :  { %6888 = vmatpush.bf16.xpose.msrb.mxu1 %v11884_v43 }
0x2daf   :  { %v6898_v16 = vpop.permute.xlu0 %6897  ;;  %v6919_v23 = vpop.permute.xlu1 %6918 }
0x2db0   :  { %10091 = vmatmul.msk.bf16.vlgmr.msra.gmra.mxu0 %vm215_vm0, %v6772_v34  ;;  %10093 = vmatmul.msk.bf16.vlgmr.msra.gmra.mxu2 %vm215_vm0, %v6814_v6 }
0x2db1   :  { %10094 = vmatmul.msk.bf16.vlgmr.msrb.gmra.mxu3 %vm215_vm0, %v6835_v21  ;;  %7170 = vmatpush.bf16.msra.mxu2 %v15274_v32 }
0x2db2   :  { %7186 = vmatpush.bf16.msrb.mxu3 %v15247_v44  ;;  %7138 = vmatpush.bf16.msra.mxu0 %v12126_v12 }
0x2db7   :  { %v6877_v59 = vpop.permute.xlu0 %6876 }
0x2db8   :  { %10092 = vmatmul.msk.bf16.vlgmr.msra.gmra.mxu1 %vm215_vm0, %v6793_v24 }
0x2db9   :  { %7154 = vmatpush.bf16.msra.mxu1 %v12115_v25 }
0x2dc0   :  { %10095 = vmatmul.msk.bf16.vlgmr.msrb.gmra.mxu0 %vm215_vm0, %v6856_v27  ;;  %10097 = vmatmul.msk.bf16.vlgmr.msrb.gmra.mxu2 %vm215_vm0, %v6898_v16 }
0x2dc1   :  { %10098 = vmatmul.msk.bf16.vlgmr.msra.gmra.mxu3 %vm215_vm0, %v6919_v23  ;;  %7234 = vmatpush.bf16.msrb.mxu2 %v15288_v37  ;;  %v11262_v23 = vld [vmem:[%s15196_s6 + $0x4] sm:$0x1] }
0x2dc2   :  { %7250 = vmatpush.bf16.msra.mxu3 %v15289_v41  ;;  %7202 = vmatpush.bf16.msrb.mxu0 %v15290_v5 }
0x2dc8   :  { %10096 = vmatmul.msk.bf16.vlgmr.msrb.gmra.mxu1 %vm215_vm0, %v6877_v59 }
0x2dc9   :  { %7218 = vmatpush.bf16.msrb.mxu1 %v15291_v11 }
0x2df3   :  { %v6617_v0 = vpop.f32.mrf.mxu0 }
0x2df4   :  { %v14097_v17 = vadd.f32 %v11258_v61, %v6617_v0  ;;  %v11263_v61 = vld [vmem:[%s15196_s6 + $0x6] sm:$0x1] }
0x2df6   :  { %v6936_v40 = vsel %vm1214_vm3, %v14097_v17, -inf }
0x2df7   :  { %6937 = vmax.xlane.f32.xlu0 %v6936_v40 }
0x2dfb   :  { %v6619_v33 = vpop.f32.mrf.mxu0 }
0x2e13   :  { %v6659_v20 = vpop.f32.mrf.mxu2  ;;  %v6680_v22 = vpop.f32.mrf.mxu3 }
0x2e14   :  { %v14104_v54 = vadd.f32 %v11259_v53, %v6659_v20  ;;  %v14109_v9 = vadd.f32 %v11260_v19, %v6680_v22  ;;  %v11264_v20 = vld [vmem:[%s15196_s6 + $0x7] sm:$0x1] }
0x2e15   :  { %v6638_v15 = vpop.f32.mrf.mxu1 }
0x2e16   :  { %v6942_v52 = vsel %vm1214_vm3, %v14104_v54, -inf  ;;  %v6945_v51 = vsel %vm1214_vm3, %v14109_v9, -inf  ;;  %v14118_v6 = vadd.f32 %v11261_v1, %v6638_v15  ;;  %v11265_v1 = vld [vmem:[%s15196_s6 + $0x5] sm:$0x1] }
0x2e17   :  { %6943 = vmax.xlane.f32.xlu1 %v6942_v52  ;;  %6946 = vmax.xlane.f32.xlu2 %v6945_v51 }
0x2e18   :  { %v6939_v27 = vsel %vm1214_vm3, %v14118_v6, -inf }
0x2e1b   :  { %v6661_v34 = vpop.f32.mrf.mxu2  ;;  %v6682_v21 = vpop.f32.mrf.mxu3 }
0x2e1d   :  { %v6640_v24 = vpop.f32.mrf.mxu1  ;;  %v6701_v16 = vpop.f32.mrf.mxu0 }
0x2e1e   :  { %v14125_v59 = vadd.f32 %v11262_v23, %v6701_v16 }
0x2e1f   :  { %6940 = vmax.xlane.f32.xlu1 %v6939_v27 }
0x2e20   :  { %v6948_v52 = vsel %vm1214_vm3, %v14125_v59, -inf }
0x2e23   :  { %v6743_v0 = vpop.f32.mrf.mxu2 }
0x2e24   :  { %v14130_v40 = vadd.f32 %v11263_v61, %v6743_v0  ;;  %v6764_v33 = vpop.f32.mrf.mxu3  ;;  %v11266_v0 = vld [vmem:[%s15196_s6 + $0x8] sm:$0x1] }
0x2e25   :  { %v14135_v22 = vadd.f32 %v11264_v20, %v6764_v33  ;;  %v6703_v53 = vpop.f32.mrf.mxu0  ;;  %v6722_v19 = vpop.f32.mrf.mxu1  ;;  %v11267_v20 = vld [vmem:[%s15196_s6 + $0xa] sm:$0x1] }
0x2e26   :  { %v6954_v15 = vsel %vm1214_vm3, %v14130_v40, -inf  ;;  %v14146_v34 = vadd.f32 %v11265_v1, %v6722_v19 }
0x2e27   :  { %6955 = vmax.xlane.f32.xlu2 %v6954_v15  ;;  %6949 = vmax.xlane.f32.xlu1 %v6948_v52  ;;  %v6957_v51 = vsel %vm1214_vm3, %v14135_v22, -inf  ;;  %v11268_v15 = vld [vmem:[%s15196_s6 + $0xb] sm:$0x1] }
0x2e28   :  { %6958 = vmax.xlane.f32.xlu0 %v6957_v51  ;;  %v6951_v23 = vsel %vm1214_vm3, %v14146_v34, -inf }
0x2e2b   :  { %v6745_v21 = vpop.f32.mrf.mxu2 }
0x2e2c   :  { %v6766_v24 = vpop.f32.mrf.mxu3 }
0x2e2d   :  { %v6724_v16 = vpop.f32.mrf.mxu1  ;;  %v6785_v27 = vpop.f32.mrf.mxu0 }
0x2e2e   :  { %v14153_v61 = vadd.f32 %v11266_v0, %v6785_v27  ;;  %v11269_v27 = vld [vmem:[%s15196_s6 + $0x9] sm:$0x1] }
0x2e2f   :  { %6952 = vmax.xlane.f32.xlu2 %v6951_v23 }
0x2e30   :  { %v6960_v21 = vsel %vm1214_vm3, %v14153_v61, -inf }
0x2e33   :  { %v6827_v33 = vpop.f32.mrf.mxu2 }
0x2e34   :  { %v14158_v53 = vadd.f32 %v11267_v20, %v6827_v33  ;;  %v6848_v19 = vpop.f32.mrf.mxu3 }
0x2e35   :  { %v14163_v52 = vadd.f32 %v11268_v15, %v6848_v19  ;;  %v6787_v51 = vpop.f32.mrf.mxu0  ;;  %v6806_v1 = vpop.f32.mrf.mxu1 }
0x2e36   :  { %v6966_v24 = vsel %vm1214_vm3, %v14158_v53, -inf  ;;  %v14174_v23 = vadd.f32 %v11269_v27, %v6806_v1  ;;  %v11270_v51 = vld [vmem:[%s15196_s6 + $0xc] sm:$0x1]  ;;  %v11271_v1 = vld [vmem:[%s15196_s6 + $0xe] sm:$0x1] }
0x2e37   :  { %6961 = vmax.xlane.f32.xlu2 %v6960_v21  ;;  %v6969_v16 = vsel %vm1214_vm3, %v14163_v52, -inf  ;;  %6967 = vmax.xlane.f32.xlu0 %v6966_v24 }
0x2e38   :  { %6970 = vmax.xlane.f32.xlu1 %v6969_v16  ;;  %v6963_v15 = vsel %vm1214_vm3, %v14174_v23, -inf }
0x2e3b   :  { %v6829_v0 = vpop.f32.mrf.mxu2 }
0x2e3c   :  { %v6850_v33 = vpop.f32.mrf.mxu3 }
0x2e3d   :  { %v6808_v20 = vpop.f32.mrf.mxu1  ;;  %v6869_v19 = vpop.f32.mrf.mxu0 }
0x2e3e   :  { %v14181_v21 = vadd.f32 %v11270_v51, %v6869_v19  ;;  %v11272_v20 = vld [vmem:[%s15196_s6 + $0xd] sm:$0x1] }
0x2e3f   :  { %6964 = vmax.xlane.f32.xlu0 %v6963_v15 }
0x2e40   :  { %v6972_v51 = vsel %vm1214_vm3, %v14181_v21, -inf }
0x2e43   :  { %v6911_v24 = vpop.f32.mrf.mxu2 }
0x2e44   :  { %v14186_v16 = vadd.f32 %v11271_v1, %v6911_v24  ;;  %v6932_v27 = vpop.f32.mrf.mxu3 }
0x2e45   :  { %v6871_v0 = vpop.f32.mrf.mxu0  ;;  %v6890_v33 = vpop.f32.mrf.mxu1 }
0x2e46   :  { %v14191_v15 = vadd.f32 %v11272_v20, %v6890_v33  ;;  %v6978_v19 = vsel %vm1214_vm3, %v14186_v16, -inf  ;;  %v11273_v0 = vld [vmem:[%s15196_s6 + $0xf] sm:$0x1] }
0x2e47   :  { %6979 = vmax.xlane.f32.xlu1 %v6978_v19  ;;  %6973 = vmax.xlane.f32.xlu0 %v6972_v51  ;;  %v14202_v30 = vadd.f32 %v11273_v0, %v6932_v27 }
0x2e48   :  { %v6975_v24 = vsel %vm1214_vm3, %v14191_v15, -inf }
0x2e49   :  { %6976 = vmax.xlane.f32.xlu2 %v6975_v24  ;;  %v6981_v41 = vsel %vm1214_vm3, %v14202_v30, -inf }
0x2e4b   :  { %v6913_v1 = vpop.f32.mrf.mxu2 }
0x2e4c   :  { %v6934_v33 = vpop.f32.mrf.mxu3 }
0x2e4d   :  { %v6892_v20 = vpop.f32.mrf.mxu1 }
0x2e51   :  { %6982 = vmax.xlane.f32.xlu2 %v6981_v41 }
0x2e6a   :  { %v6938_v37 = vpop.xlane.xlu0 %6937 }
0x2e6b   :  { %v6984_v1 = vsub.f32 %v14097_v17, %v6938_v37 }
0x2e6d   :  { %v7000_v27 = vmul.f32 1.442695, %v6984_v1 }
0x2e8a   :  { %v6944_v19 = vpop.xlane.xlu1 %6943  ;;  %v6947_v51 = vpop.xlane.xlu2 %6946 }
0x2e8b   :  { %v6986_v11 = vsub.f32 %v14104_v54, %v6944_v19  ;;  %v6987_v24 = vsub.f32 %v14109_v9, %v6947_v51 }
0x2e8d   :  { %v7004_v5 = vmul.f32 1.442695, %v6986_v11  ;;  %v7006_v44 = vmul.f32 1.442695, %v6987_v24 }
0x2e8f   :  { %10850 = vpow2.f32 %v7004_v5 }
0x2e90   :  { %10852 = vpow2.f32 %v7006_v44 }
0x2e91   :  { %10854 = vpow2.f32 %v7000_v27 }
0x2e92   :  { %v6941_v0 = vpop.xlane.xlu1 %6940 }
0x2e93   :  { %v6985_v33 = vsub.f32 %v14118_v6, %v6941_v0 }
0x2e95   :  { %v14210_v20 = vpop.eup %10850  ;;  %v7002_v41 = vmul.f32 1.442695, %v6985_v33 }
0x2e96   :  { %v14212_v32 = vpop.eup %10852  ;;  %v7038_v54 = vsel %vm1214_vm3, %v14210_v20, 0.0 }
0x2e97   :  { %10856 = vpow2.f32 %v7002_v41  ;;  %7039 = vadd.xlane.f32.xlu1 %v7038_v54  ;;  %v7041_v37 = vsel %vm1214_vm3, %v14212_v32, 0.0  ;;  %v14218_v11 = vpop.eup %10854 }
0x2e98   :  { %7042 = vadd.xlane.f32.xlu0 %v7041_v37  ;;  %v7032_v0 = vsel %vm1214_vm3, %v14218_v11, 0.0 }
0x2e9a   :  { %v6950_v44 = vpop.xlane.xlu1 %6949  ;;  %v6956_v5 = vpop.xlane.xlu2 %6955 }
0x2e9b   :  { %v6988_v17 = vsub.f32 %v14125_v59, %v6950_v44  ;;  %v6959_v9 = vpop.xlane.xlu0 %6958  ;;  %v6990_v6 = vsub.f32 %v14130_v40, %v6956_v5 }
0x2e9c   :  { %v6991_v19 = vsub.f32 %v14135_v22, %v6959_v9 }
0x2e9d   :  { %v14223_v51 = vpop.eup %10856  ;;  %v7008_v24 = vmul.f32 1.442695, %v6988_v17  ;;  %v7012_v1 = vmul.f32 1.442695, %v6990_v6 }
0x2e9e   :  { %v7014_v27 = vmul.f32 1.442695, %v6991_v19  ;;  %v7035_v33 = vsel %vm1214_vm3, %v14223_v51, 0.0 }
0x2e9f   :  { %10858 = vpow2.f32 %v7008_v24  ;;  %7033 = vadd.xlane.f32.xlu1 %v7032_v0  ;;  %7036 = vadd.xlane.f32.xlu2 %v7035_v33 }
0x2ea0   :  { %10860 = vpow2.f32 %v7014_v27 }
0x2ea1   :  { %10862 = vpow2.f32 %v7012_v1 }
0x2ea2   :  { %v6953_v59 = vpop.xlane.xlu2 %6952 }
0x2ea3   :  { %v6989_v40 = vsub.f32 %v14146_v34, %v6953_v59 }
0x2ea5   :  { %v14230_v22 = vpop.eup %10858  ;;  %v7010_v41 = vmul.f32 1.442695, %v6989_v40 }
0x2ea6   :  { %v14232_v54 = vpop.eup %10860  ;;  %v7044_v37 = vsel %vm1214_vm3, %v14230_v22, 0.0 }
0x2ea7   :  { %v14236_v44 = vpop.eup %10862  ;;  %10864 = vpow2.f32 %v7010_v41  ;;  %v7053_v5 = vsel %vm1214_vm3, %v14232_v54, 0.0  ;;  %7045 = vadd.xlane.f32.xlu2 %v7044_v37 }
0x2ea8   :  { %7054 = vadd.xlane.f32.xlu1 %v7053_v5  ;;  %v7050_v17 = vsel %vm1214_vm3, %v14236_v44, 0.0 }
0x2ea9   :  { %7051 = vadd.xlane.f32.xlu0 %v7050_v17 }
0x2eaa   :  { %v6968_v34 = vpop.xlane.xlu0 %6967  ;;  %v6962_v9 = vpop.xlane.xlu2 %6961 }
0x2eab   :  { %v6971_v6 = vpop.xlane.xlu1 %6970  ;;  %v6994_v19 = vsub.f32 %v14158_v53, %v6968_v34  ;;  %v6992_v24 = vsub.f32 %v14153_v61, %v6962_v9 }
0x2eac   :  { %v6995_v1 = vsub.f32 %v14163_v52, %v6971_v6 }
0x2ead   :  { %v14245_v27 = vpop.eup %10864  ;;  %v7020_v0 = vmul.f32 1.442695, %v6994_v19  ;;  %v7016_v33 = vmul.f32 1.442695, %v6992_v24 }
0x2eae   :  { %v7022_v59 = vmul.f32 1.442695, %v6995_v1  ;;  %v7047_v40 = vsel %vm1214_vm3, %v14245_v27, 0.0 }
0x2eaf   :  { %10866 = vpow2.f32 %v7020_v0 }
0x2eb0   :  { %10868 = vpow2.f32 %v7022_v59 }
0x2eb1   :  { %10870 = vpow2.f32 %v7016_v33  ;;  %7048 = vadd.xlane.f32.xlu0 %v7047_v40 }
0x2eb2   :  { %v6965_v41 = vpop.xlane.xlu0 %6964 }
0x2eb3   :  { %v6993_v37 = vsub.f32 %v14174_v23, %v6965_v41 }
0x2eb5   :  { %v14250_v53 = vpop.eup %10866  ;;  %v7018_v61 = vmul.f32 1.442695, %v6993_v37 }
0x2eb6   :  { %v14252_v5 = vpop.eup %10868  ;;  %v7062_v52 = vsel %vm1214_vm3, %v14250_v53, 0.0 }
0x2eb7   :  { %v14256_v17 = vpop.eup %10870  ;;  %10872 = vpow2.f32 %v7018_v61  ;;  %7063 = vadd.xlane.f32.xlu1 %v7062_v52  ;;  %v7065_v34 = vsel %vm1214_vm3, %v14252_v5, 0.0 }
0x2eb8   :  { %7066 = vadd.xlane.f32.xlu2 %v7065_v34  ;;  %v7056_v9 = vsel %vm1214_vm3, %v14256_v17, 0.0 }
0x2eb9   :  { %7057 = vadd.xlane.f32.xlu0 %v7056_v9 }
0x2eba   :  { %v6980_v23 = vpop.xlane.xlu1 %6979  ;;  %v6974_v6 = vpop.xlane.xlu0 %6973 }
0x2ebb   :  { %v6998_v19 = vsub.f32 %v14186_v16, %v6980_v23  ;;  %v6996_v24 = vsub.f32 %v14181_v21, %v6974_v6 }
0x2ebc   :  { %v6977_v1 = vpop.xlane.xlu2 %6976 }
0x2ebd   :  { %v14264_v0 = vpop.eup %10872  ;;  %v7028_v33 = vmul.f32 1.442695, %v6998_v19  ;;  %v7024_v59 = vmul.f32 1.442695, %v6996_v24  ;;  %v6997_v40 = vsub.f32 %v14191_v15, %v6977_v1  ;;  %v15292_v24 = vpack.c.bf16 %v13994_v47, %v13992_v55 }
0x2ebe   :  { %v7059_v41 = vsel %vm1214_vm3, %v14264_v0, 0.0 }
0x2ebf   :  { %10874 = vpow2.f32 %v7028_v33  ;;  %7060 = vadd.xlane.f32.xlu1 %v7059_v41  ;;  %v7026_v37 = vmul.f32 1.442695, %v6997_v40 }
0x2ec0   :  { %10876 = vpow2.f32 %v7024_v59 }
0x2ec1   :  { %10878 = vpow2.f32 %v7026_v37 }
0x2ec4   :  { %v6983_v61 = vpop.xlane.xlu2 %6982 }
0x2ec5   :  { %v14269_v52 = vpop.eup %10874  ;;  %v6999_v21 = vsub.f32 %v14202_v30, %v6983_v61 }
0x2ec6   :  { %v14272_v16 = vpop.eup %10876  ;;  %v7074_v34 = vsel %vm1214_vm3, %v14269_v52, 0.0 }
0x2ec7   :  { %v7030_v9 = vmul.f32 1.442695, %v6999_v21  ;;  %7075 = vadd.xlane.f32.xlu2 %v7074_v34  ;;  %v7068_v15 = vsel %vm1214_vm3, %v14272_v16, 0.0  ;;  %v14278_v23 = vpop.eup %10878 }
0x2ec8   :  { %7069 = vadd.xlane.f32.xlu1 %v7068_v15  ;;  %v7071_v6 = vsel %vm1214_vm3, %v14278_v23, 0.0 }
0x2ec9   :  { %10880 = vpow2.f32 %v7030_v9 }
0x2ecf   :  { %v14282_v19 = vpop.eup %10880  ;;  %7072 = vadd.xlane.f32.xlu2 %v7071_v6 }
0x2ed0   :  { %v7077_v30 = vsel %vm1214_vm3, %v14282_v19, 0.0 }
0x2ed1   :  { %7078 = vadd.xlane.f32.xlu0 %v7077_v30 }
0x2ee1   :  { %7475 = vrot.lane.b32.xlu1 %v15292_v24, %s11536_s7 }
0x2f0a   :  { %v7040_v1 = vpop.xlane.xlu1 %7039 }
0x2f0b   :  { %10882 = vrcp.f32 %v7040_v1  ;;  %v7043_v33 = vpop.xlane.xlu0 %7042 }
0x2f0c   :  { %10884 = vrcp.f32 %v7043_v33 }
0x2f11   :  { %v10883_v59 = vpop.eup %10882 }
0x2f12   :  { %v10885_v40 = vpop.eup %10884  ;;  %v7098_v41 = vmul.f32 %v10883_v59, %v14210_v20  ;;  %v7034_v37 = vpop.xlane.xlu1 %7033 }
0x2f13   :  { %v7037_v61 = vpop.xlane.xlu2 %7036  ;;  %v7099_v21 = vmul.f32 %v10885_v40, %v14212_v32  ;;  %10886 = vrcp.f32 %v7034_v37 }
0x2f14   :  { %v7114_v34 = vpack.c.bf16 %v7098_v41, %v7098_v41  ;;  %10888 = vrcp.f32 %v7037_v61 }
0x2f15   :  { %v7115_v9 = vpack.c.bf16 %v7099_v21, %v7099_v21 }
0x2f16   :  { %10101 = vmatmul.msk.bf16.vlgmr.msra.gmra.mxu2 %vm1407_vm5, %v7114_v34 }
0x2f17   :  { %10102 = vmatmul.msk.bf16.vlgmr.msrb.gmra.mxu3 %vm1407_vm5, %v7115_v9  ;;  %7298 = vmatpush.bf16.msra.mxu2 %v12196_v2 }
0x2f18   :  { %7314 = vmatpush.bf16.msrb.mxu3 %v12185_v10 }
0x2f19   :  { %v10887_v55 = vpop.eup %10886 }
0x2f1a   :  { %v10889_v47 = vpop.eup %10888  ;;  %v7096_v20 = vmul.f32 %v10887_v55, %v14218_v11 }
0x2f1b   :  { %v7097_v15 = vmul.f32 %v10889_v47, %v14223_v51  ;;  %v7055_v6 = vpop.xlane.xlu1 %7054  ;;  %v7046_v24 = vpop.xlane.xlu2 %7045 }
0x2f1c   :  { %v7112_v32 = vpack.c.bf16 %v7096_v20, %v7096_v20  ;;  %10890 = vrcp.f32 %v7055_v6  ;;  %v7052_v30 = vpop.xlane.xlu0 %7051 }
0x2f1d   :  { %v7113_v1 = vpack.c.bf16 %v7097_v15, %v7097_v15  ;;  %10892 = vrcp.f32 %v7052_v30 }
0x2f1e   :  { %10099 = vmatmul.msk.bf16.vlgmr.msra.gmra.mxu0 %vm1407_vm5, %v7112_v32  ;;  %10894 = vrcp.f32 %v7046_v24 }
0x2f1f   :  { %10100 = vmatmul.msk.bf16.vlgmr.msra.gmra.mxu1 %vm1407_vm5, %v7113_v1  ;;  %7266 = vmatpush.bf16.msra.mxu0 %v12177_v39 }
0x2f20   :  { %7282 = vmatpush.bf16.msra.mxu1 %v12180_v58 }
0x2f22   :  { %v10891_v33 = vpop.eup %10890 }
0x2f23   :  { %v10893_v11 = vpop.eup %10892  ;;  %v7103_v51 = vmul.f32 %v10891_v33, %v14232_v54 }
0x2f24   :  { %v7102_v59 = vmul.f32 %v10893_v11, %v14236_v44  ;;  %v7049_v40 = vpop.xlane.xlu0 %7048  ;;  %v10895_v41 = vpop.eup %10894  ;;  %v11274_v11 = vld [vmem:[#allocation11 + $0x18] sm:$0xff] }
0x2f25   :  { %v7119_v37 = vpack.c.bf16 %v7103_v51, %v7103_v51  ;;  %10896 = vrcp.f32 %v7049_v40  ;;  %v7100_v21 = vmul.f32 %v10895_v41, %v14230_v22 }
0x2f26   :  { %v7118_v61 = vpack.c.bf16 %v7102_v59, %v7102_v59  ;;  %v11275_v59 = vld [vmem:[#allocation9 + $0x8] sm:$0xff] }
0x2f27   :  { %10106 = vmatmul.msk.bf16.vlgmr.msra.gmra.mxu3 %vm1407_vm5, %v7119_v37  ;;  %v7116_v44 = vpack.c.bf16 %v7100_v21, %v7100_v21  ;;  %v11277_v21 = vld [vmem:[#allocation9] sm:$0xff] }
0x2f28   :  { %10105 = vmatmul.msk.bf16.vlgmr.msrb.gmra.mxu2 %vm1407_vm5, %v7118_v61  ;;  %7378 = vmatpush.bf16.msra.mxu3 %v12209_v62  ;;  %v11276_v61 = vld [vmem:[#allocation11 + $0x10] sm:$0xff] }
0x2f29   :  { %7362 = vmatpush.bf16.msrb.mxu2 %v12262_v49 }
0x2f2a   :  { %v7064_v34 = vpop.xlane.xlu1 %7063 }
0x2f2b   :  { %v10897_v9 = vpop.eup %10896  ;;  %10898 = vrcp.f32 %v7064_v34  ;;  %v7067_v54 = vpop.xlane.xlu2 %7066 }
0x2f2c   :  { %v7101_v55 = vmul.f32 %v10897_v9, %v14245_v27  ;;  %v7058_v47 = vpop.xlane.xlu0 %7057  ;;  %10900 = vrcp.f32 %v7067_v54  ;;  %v11280_v9 = vld [vmem:[#allocation8 + $0x8] sm:$0xff] }
0x2f2d   :  { %10902 = vrcp.f32 %v7058_v47 }
0x2f2e   :  { %v7117_v20 = vpack.c.bf16 %v7101_v55, %v7101_v55  ;;  %10103 = vmatmul.msk.bf16.vlgmr.msrb.gmra.mxu0 %vm1407_vm5, %v7116_v44  ;;  %v11281_v55 = vld [vmem:[%s15205_s15 + $0x30] sm:$0xff] }
0x2f2f   :  { %7330 = vmatpush.bf16.msrb.mxu0 %v12203_v57 }
0x2f30   :  { %10104 = vmatmul.msk.bf16.vlgmr.msrb.gmra.mxu1 %vm1407_vm5, %v7117_v20 }
0x2f31   :  { %v10899_v22 = vpop.eup %10898  ;;  %7346 = vmatpush.bf16.msrb.mxu1 %v12214_v50 }
0x2f32   :  { %v10901_v15 = vpop.eup %10900  ;;  %v7106_v6 = vmul.f32 %v10899_v22, %v14250_v53  ;;  %v7061_v32 = vpop.xlane.xlu1 %7060  ;;  %v11282_v22 = vld [vmem:[#allocation11] sm:$0xff] }
0x2f33   :  { %v7107_v30 = vmul.f32 %v10901_v15, %v14252_v5  ;;  %10904 = vrcp.f32 %v7061_v32  ;;  %v10903_v24 = vpop.eup %10902  ;;  %v11284_v32 = vld [vmem:[%s15205_s15 + $0x28] sm:$0xff] }
0x2f34   :  { %v7122_v27 = vpack.c.bf16 %v7106_v6, %v7106_v6  ;;  %v7104_v33 = vmul.f32 %v10903_v24, %v14256_v17  ;;  %v11278_v17 = vld [vmem:[%s15205_s15 + $0x38] sm:$0xff]  ;;  %v11283_v6 = vld [vmem:[#allocation8] sm:$0xff] }
0x2f35   :  { %v7123_v1 = vpack.c.bf16 %v7107_v30, %v7107_v30 }
0x2f36   :  { %v7120_v5 = vpack.c.bf16 %v7104_v33, %v7104_v33 }
0x2f37   :  { %10110 = vmatmul.msk.bf16.vlgmr.msrb.gmra.mxu3 %vm1407_vm5, %v7123_v1  ;;  %v11285_v1 = vld [vmem:[%s15205_s15 + $0x20] sm:$0xff] }
0x2f38   :  { %10109 = vmatmul.msk.bf16.vlgmr.msra.gmra.mxu2 %vm1407_vm5, %v7122_v27  ;;  %7591 = vmatpush.bf16.msrb.mxu3 %v11274_v11 }
0x2f39   :  { %v10905_v51 = vpop.eup %10904  ;;  %7486 = vmatpush.bf16.msra.mxu2 %v11275_v59 }
0x2f3a   :  { %v7105_v53 = vmul.f32 %v10905_v51, %v14264_v0  ;;  %v7076_v40 = vpop.xlane.xlu2 %7075  ;;  %v11279_v0 = vld [vmem:[#allocation11 + $0x8] sm:$0xff] }
0x2f3b   :  { %10906 = vrcp.f32 %v7076_v40  ;;  %v7070_v37 = vpop.xlane.xlu1 %7069  ;;  %v11289_v40 = vld [vmem:[%s15205_s15] sm:$0xff] }
0x2f3c   :  { %v7121_v41 = vpack.c.bf16 %v7105_v53, %v7105_v53  ;;  %7592 = vmatpush.bf16.msrb.mxu3 %v11276_v61  ;;  %10908 = vrcp.f32 %v7070_v37  ;;  %v11288_v53 = vld [vmem:[%s15205_s15 + $0x8] sm:$0xff] }
0x2f3d   :  { %7487 = vmatpush.bf16.msra.mxu2 %v11277_v21 }
0x2f3e   :  { %10107 = vmatmul.msk.bf16.vlgmr.msra.gmra.mxu0 %vm1407_vm5, %v7120_v5 }
0x2f3f   :  { %7439 = vmatpush.bf16.msra.mxu0 %v11278_v17 }
0x2f40   :  { %10108 = vmatmul.msk.bf16.vlgmr.msra.gmra.mxu1 %vm1407_vm5, %v7121_v41  ;;  %7593 = vmatpush.bf16.msrb.mxu3 %v11279_v0 }
0x2f41   :  { %v10907_v34 = vpop.eup %10906  ;;  %7465 = vmatpush.bf16.msra.mxu1 %v11280_v9 }
0x2f42   :  { %v7110_v54 = vmul.f32 %v10907_v34, %v14269_v52  ;;  %v7073_v44 = vpop.xlane.xlu2 %7072  ;;  %v10909_v15 = vpop.eup %10908 }
0x2f43   :  { %7440 = vmatpush.bf16.msra.mxu0 %v11281_v55  ;;  %10910 = vrcp.f32 %v7073_v44  ;;  %v7108_v52 = vmul.f32 %v10909_v15, %v14272_v16  ;;  %v11286_v16 = vld [vmem:[%s15205_s15 + $0x18] sm:$0xff] }
0x2f44   :  { %v7126_v47 = vpack.c.bf16 %v7110_v54, %v7110_v54  ;;  %v7079_v20 = vpop.xlane.xlu0 %7078  ;;  %7594 = vmatpush.bf16.msrb.mxu3 %v11282_v22 }
0x2f45   :  { %10912 = vrcp.f32 %v7079_v20  ;;  %7466 = vmatpush.bf16.msra.mxu1 %v11283_v6  ;;  %v7124_v33 = vpack.c.bf16 %v7108_v52, %v7108_v52 }
0x2f47   :  { %7441 = vmatpush.bf16.msra.mxu0 %v11284_v32 }
0x2f48   :  { %10113 = vmatmul.msk.bf16.vlgmr.msrb.gmra.mxu2 %vm1407_vm5, %v7126_v47 }
0x2f49   :  { %v10911_v30 = vpop.eup %10910  ;;  %7759 = vmatpush.bf16.xpose.msrb.mxu2 %v11813_v29 }
0x2f4a   :  { %v7109_v27 = vmul.f32 %v10911_v30, %v14278_v23  ;;  %v11287_v23 = vld [vmem:[%s15205_s15 + $0x10] sm:$0xff] }
0x2f4b   :  { %v10913_v24 = vpop.eup %10912  ;;  %7442 = vmatpush.bf16.msra.mxu0 %v11285_v1 }
0x2f4c   :  { %v7125_v11 = vpack.c.bf16 %v7109_v27, %v7109_v27  ;;  %v7111_v51 = vmul.f32 %v10913_v24, %v14282_v19 }
0x2f4e   :  { %v7127_v59 = vpack.c.bf16 %v7111_v51, %v7111_v51  ;;  %10111 = vmatmul.msk.bf16.vlgmr.msrb.gmra.mxu0 %vm1407_vm5, %v7124_v33 }
0x2f4f   :  { %7443 = vmatpush.bf16.msra.mxu0 %v11286_v16 }
0x2f50   :  { %10112 = vmatmul.msk.bf16.vlgmr.msrb.gmra.mxu1 %vm1407_vm5, %v7125_v11  ;;  %10114 = vmatmul.msk.bf16.vlgmr.msra.gmra.mxu3 %vm1407_vm5, %v7127_v59 }
0x2f51   :  { %7738 = vmatpush.bf16.xpose.msrb.mxu1 %v11803_v7  ;;  %7780 = vmatpush.bf16.xpose.msra.mxu3 %v11835_v56 }
0x2f53   :  { %7444 = vmatpush.bf16.msra.mxu0 %v11287_v23  ;;  %v7476_v19 = vpop.permute.xlu1 %7475 }
0x2f57   :  { %7445 = vmatpush.bf16.msra.mxu0 %v11288_v53 }
0x2f58   :  { %10116 = vmatmul.msk.bf16.vlgmr.msra.gmra.mxu2 %vm215_vm0, %v7476_v19 }
0x2f59   :  { %7843 = vmatpush.bf16.xpose.msra.mxu2 %v11847_v3 }
0x2f5b   :  { %7446 = vmatpush.bf16.msra.mxu0 %v11289_v40 }
0x2f5f   :  { %7801 = vmatpush.bf16.xpose.msrb.mxu0 %v11839_v60 }
0x2f99   :  { %v7172_v5 = vpop.f32.mrf.mxu2 }
0x2f9a   :  { %v7188_v41 = vpop.f32.mrf.mxu3  ;;  %v7394_v17 = vrot.slane %v7172_v5, 6 }
0x2f9b   :  { %v7140_v37 = vpop.f32.mrf.mxu0  ;;  %v7396_v0 = vrot.slane %v7188_v41, 5 }
0x2f9c   :  { %v7156_v61 = vpop.f32.mrf.mxu1 }
0x2f9d   :  { %v7392_v21 = vrot.slane %v7156_v61, 7 }
0x2f9f   :  { %v7393_v34 = vsel %vm1722_vm6, %v7392_v21, %v7140_v37 }
0x2fa0   :  { %v7395_v9 = vsel %vm1725_vm7, %v7394_v17, %v7393_v34 }
0x2fa1   :  { %v7174_v54 = vpop.f32.mrf.mxu2  ;;  %v7397_v44 = vsel %vm1728_vm8, %v7396_v0, %v7395_v9 }
0x2fa2   :  { %v7190_v55 = vpop.f32.mrf.mxu3 }
0x2fa3   :  { %v7142_v47 = vpop.f32.mrf.mxu0 }
0x2fa4   :  { %v7158_v20 = vpop.f32.mrf.mxu1 }
0x2faa   :  { %v7252_v22 = vpop.f32.mrf.mxu3 }
0x2fab   :  { %v7236_v15 = vpop.f32.mrf.mxu2  ;;  %v7204_v6 = vpop.f32.mrf.mxu0  ;;  %v7404_v1 = vrot.slane %v7252_v22, 1 }
0x2fac   :  { %v7398_v32 = vrot.slane %v7204_v6, 4  ;;  %v7402_v24 = vrot.slane %v7236_v15, 2 }
0x2fad   :  { %v7220_v52 = vpop.f32.mrf.mxu1 }
0x2fae   :  { %v7399_v30 = vsel %vm1731_vm10, %v7398_v32, %v7397_v44  ;;  %v7400_v27 = vrot.slane %v7220_v52, 3 }
0x2fb0   :  { %v7401_v33 = vsel %vm15293_vm15, %v7400_v27, %v7399_v30 }
0x2fb1   :  { %v7403_v11 = vsel %vm15294_vm1, %v7402_v24, %v7401_v33 }
0x2fb2   :  { %v7254_v51 = vpop.f32.mrf.mxu3  ;;  %v7405_v59 = vsel %vm15295_vm2, %v7404_v1, %v7403_v11 }
0x2fb3   :  { %v7238_v16 = vpop.f32.mrf.mxu2  ;;  %v7206_v23 = vpop.f32.mrf.mxu0 }
0x2fb5   :  { %v7222_v19 = vpop.f32.mrf.mxu1 }
0x2fba   :  { %v7316_v53 = vpop.f32.mrf.mxu3 }
0x2fbb   :  { %v7300_v40 = vpop.f32.mrf.mxu2  ;;  %v7268_v5 = vpop.f32.mrf.mxu0  ;;  %v7422_v20 = vrot.slane %v7316_v53, 5 }
0x2fbc   :  { %v7420_v9 = vrot.slane %v7300_v40, 6 }
0x2fbd   :  { %v7284_v41 = vpop.f32.mrf.mxu1 }
0x2fbe   :  { %v7418_v17 = vrot.slane %v7284_v41, 7 }
0x2fc0   :  { %v7419_v34 = vsel %vm1722_vm6, %v7418_v17, %v7268_v5 }
0x2fc1   :  { %v7421_v55 = vsel %vm1725_vm7, %v7420_v9, %v7419_v34  ;;  %v11290_v9 = vld [vmem:[%s15200_s10] ss:$0 sm:$0xff] }
0x2fc2   :  { %v7318_v37 = vpop.f32.mrf.mxu3  ;;  %v7423_v15 = vsel %vm1728_vm8, %v7422_v20, %v7421_v55 }
0x2fc3   :  { %v7302_v61 = vpop.f32.mrf.mxu2  ;;  %v7270_v21 = vpop.f32.mrf.mxu0 }
0x2fc5   :  { %v7286_v0 = vpop.f32.mrf.mxu1 }
0x2fcb   :  { %v7364_v54 = vpop.f32.mrf.mxu2  ;;  %v7332_v44 = vpop.f32.mrf.mxu0 }
0x2fcc   :  { %v7424_v47 = vrot.slane %v7332_v44, 4  ;;  %v7428_v24 = vrot.slane %v7364_v54, 2  ;;  %v15300_v54 = vld [vmem:[#allocation23_spill] sm:$0xff] }
0x2fcd   :  { %v7348_v22 = vpop.f32.mrf.mxu1  ;;  %v253_v44 = vadd.f32 %v11290_v9, %v15300_v54 }
0x2fce   :  { %v7426_v6 = vrot.slane %v7348_v22, 3  ;;  %v7425_v32 = vsel %vm1731_vm10, %v7424_v47, %v7423_v15 }
0x2fd0   :  { %v7427_v52 = vsel %vm15296_vm4, %v7426_v6, %v7425_v32 }
0x2fd1   :  { %v7429_v51 = vsel %vm15297_vm11, %v7428_v24, %v7427_v52 }
0x2fd3   :  { %v7366_v30 = vpop.f32.mrf.mxu2  ;;  %v7334_v27 = vpop.f32.mrf.mxu0 }
0x2fd4   :  { %v7380_v1 = vpop.f32.mrf.mxu3 }
0x2fd5   :  { %v7350_v33 = vpop.f32.mrf.mxu1  ;;  %v7430_v11 = vrot.slane %v7380_v1, 1 }
0x2fd7   :  { %v7431_v16 = vsel %vm15298_vm12, %v7430_v11, %v7429_v51 }
0x2fd8   :  { %v10301_v23 = vpack.i.bf16 %v7431_v16, %v14024_v26 }
0x2fda   :  { %10302 = vrot.lane.b32.xlu0 %v10301_v23, %s11529_s29 }
0x2fdc   :  { %v7382_v19 = vpop.f32.mrf.mxu3 }
0x304c   :  { %v14376_v53 = vpop.permute.xlu0 %10302 }
0x304d   :  { %v10305_v40 = vunpack.i.h.bf16 %v14376_v53  ;;  %v10304_v5 = vunpack.i.l.bf16 %v14376_v53 }
0x304f   :  { %v7435_v41 = vsel %vm215_vm0, %v7405_v59, %v10304_v5  ;;  %v7489_v59 = vpop.f32.mrf.mxu2 }
0x3050   :  { %v7436_v37 = vsel %vm682_vm9, %v7435_v41, %v10305_v40 }
0x3051   :  { %v7437_v61 = vsel %vm15299_vm13, %v7436_v37, %v14033_v36 }
0x3052   :  { %v7438_v21 = vpack.c.bf16 %v7437_v61, %v7437_v61 }
0x3054   :  { %7447 = vmatmul.bf16.vlgmr.msra.gmra.mxu0 %v7438_v21 }
0x3055   :  { %7885 = vmatpush.bf16.xpose.msra.mxu0 %v11855_v13 }
0x3057   :  { %v7491_v20 = vpop.f32.mrf.mxu2 }
0x30d1   :  { %v7448_v26 = vpop.f32.mrf.mxu0 }
0x30d2   :  { %10914 = vtanh.f32 %v7448_v26 }
0x30d8   :  { %v10915_v17 = vpop.eup %10914 }
0x30d9   :  { %v7455_v0 = vpack.c.bf16 %v10915_v17, %v10915_v17  ;;  %9704 = vst.msk [vmem:[#allocation14 + $0x28] sm:$0xff] %vm215_vm0, %v10915_v17  ;;  %v7450_v34 = vpop.f32.mrf.mxu0 }
0x30db   :  { %10115 = vmatmul.msk.bf16.vlgmr.msra.gmra.mxu1 %vm215_vm0, %v7455_v0 }
0x30dc   :  { %7822 = vmatpush.bf16.xpose.msra.mxu1 %v11843_v63 }
0x3158   :  { %v7468_v55 = vpop.f32.mrf.mxu1 }
0x3159   :  { %v7472_v47 = vadd.f32 %v7468_v55, %v253_v44 }
0x315b   :  { %v7494_v22 = vadd.f32 %v7489_v59, %v7472_v47  ;;  %v7495_v15 = vadd.f32 %v7491_v20, %v7472_v47 }
0x315d   :  { %10916 = vtanh.f32 %v7494_v22  ;;  %v10117_v30 = vmul.f32 -1.442695, %v7494_v22  ;;  %v10118_v33 = vmul.f32 -1.442695, %v7495_v15 }
0x315e   :  { %10918 = vtanh.f32 %v7495_v15 }
0x315f   :  { %10920 = vpow2.f32 %v10117_v30 }
0x3160   :  { %v7470_v6 = vpop.f32.mrf.mxu1 }
0x3163   :  { %v10917_v32 = vpop.eup %10916 }
0x3164   :  { %v10919_v52 = vpop.eup %10918  ;;  %7540 = vrot.lane.b32.xlu2 %v10917_v32, %s11529_s29 }
0x3165   :  { %7542 = vrot.lane.b32.xlu0 %v10919_v52, %s11529_s29  ;;  %v10921_v27 = vpop.eup %10920 }
0x3166   :  { %v7502_v24 = vadd.f32 1.0, %v10921_v27 }
0x3168   :  { %10922 = vrcp.f32 %v7502_v24  ;;  %v7515_v41 = vand.u32 2147483648, %v7502_v24  ;;  %vm7509_vm15 = vweird.f32 %v7502_v24  ;;  %v7513_v37 = vand.u32 2147483647, %v7502_v24 }
0x3169   :  { %10924 = vpow2.f32 %v10118_v33 }
0x316a   :  { %v7516_v21 = vor.u32 1.1754944e-38, %v7515_v41  ;;  %vm7514_vm2 = vcmp.eq.f32.partialorder %v7513_v37, 8.507059e+37 }
0x316e   :  { %v10923_v1 = vpop.eup %10922 }
0x316f   :  { %v7505_v11 = vmul.f32 %v10923_v1, %v7502_v24  ;;  %v10925_v23 = vpop.eup %10924  ;;  %vm7510_vm14 = vweird.f32 %v10923_v1 }
0x3170   :  { %v7503_v19 = vadd.f32 1.0, %v10925_v23  ;;  %vm7511_vm1 = vmor %vm7509_vm15, %vm7510_vm14 }
0x3171   :  { %v7506_v51 = vsub.f32 1.0, %v7505_v11 }
0x3172   :  { %10926 = vrcp.f32 %v7503_v19  ;;  %v7530_v55 = vand.u32 2147483648, %v7503_v19  ;;  %vm7524_vm11 = vweird.f32 %v7503_v19  ;;  %v7528_v47 = vand.u32 2147483647, %v7503_v19 }
0x3173   :  { %v7507_v16 = vmul.f32 %v10923_v1, %v7506_v51 }
0x3174   :  { %v7531_v22 = vor.u32 1.1754944e-38, %v7530_v55  ;;  %vm7529_vm13 = vcmp.eq.f32.partialorder %v7528_v47, 8.507059e+37 }
0x3175   :  { %v7508_v40 = vadd.f32 %v10923_v1, %v7507_v16 }
0x3177   :  { %v7512_v61 = vsel %vm7511_vm1, %v10923_v1, %v7508_v40 }
0x3178   :  { %v7517_v17 = vsel %vm7514_vm2, %v7516_v21, %v7512_v61  ;;  %v10927_v34 = vpop.eup %10926 }
0x3179   :  { %v7520_v59 = vmul.f32 %v10927_v34, %v7503_v19  ;;  %vm7525_vm4 = vweird.f32 %v10927_v34  ;;  %v7536_v52 = vmul.f32 %v7517_v17, %v13986_v18 }
0x317a   :  { %vm7526_vm12 = vmor %vm7524_vm11, %vm7525_vm4 }
0x317b   :  { %v7521_v9 = vsub.f32 1.0, %v7520_v59 }
0x317d   :  { %v7522_v54 = vmul.f32 %v10927_v34, %v7521_v9 }
0x317f   :  { %v7523_v44 = vadd.f32 %v10927_v34, %v7522_v54 }
0x3181   :  { %v7527_v20 = vsel %vm7526_vm12, %v10927_v34, %v7523_v44  ;;  %v11291_v34 = vld [vmem:[%s15202_s12] ss:$0 sm:$0xff] }
0x3182   :  { %v7532_v6 = vsel %vm7529_vm13, %v7531_v22, %v7527_v20 }
0x3183   :  { %v7537_v1 = vmul.f32 %v7532_v6, %v13981_v4 }
0x31be   :  { %v7541_v26 = vpop.permute.xlu2 %7540 }
0x31bf   :  { %v7546_v0 = vmul.f32 %v7541_v26, %v7517_v17 }
0x31c1   :  { %7550 = vrot.lane.b32.xlu1 %v7546_v0, %s11536_s7 }
0x31d7   :  { %v7543_v15 = vpop.permute.xlu0 %7542 }
0x31d8   :  { %v7547_v32 = vmul.f32 %v7543_v15, %v7532_v6 }
0x31da   :  { %7552 = vrot.lane.b32.xlu0 %v7547_v32, %s11536_s7 }
0x3233   :  { %v7551_v30 = vpop.permute.xlu1 %7550 }
0x3234   :  { %v14399_v27 = vadd.f32 %v7551_v30, %v7536_v52 }
0x3236   :  { %10928 = vtanh.f32 %v14399_v27 }
0x323c   :  { %v10929_v24 = vpop.eup %10928 }
0x323d   :  { %7562 = vrot.lane.b32.xlu2 %v10929_v24, %s11529_s29 }
0x3245   :  { %7578 = vrot.lane.b32.xlu2 %v14033_v36, %s11529_s29 }
0x324c   :  { %v7553_v33 = vpop.permute.xlu0 %7552 }
0x324d   :  { %v14406_v11 = vadd.f32 %v7553_v33, %v7537_v1 }
0x324f   :  { %10930 = vtanh.f32 %v14406_v11 }
0x3255   :  { %v10931_v51 = vpop.eup %10930 }
0x3256   :  { %7564 = vrot.lane.b32.xlu1 %v10931_v51, %s11529_s29 }
0x3297   :  { %v7563_v18 = vpop.permute.xlu2 %7562 }
0x3298   :  { %v14410_v23 = vmul.f32 %v7563_v18, %v7517_v17 }
0x329f   :  { %v7579_v61 = vpop.permute.xlu2 %7578 }
0x32c8   :  { %v7565_v16 = vpop.permute.xlu1 %7564 }
0x32c9   :  { %v14412_v19 = vmul.f32 %v7565_v16, %v7532_v6 }
0x32cb   :  { %v10306_v40 = vpack.i.bf16 %v14412_v19, %v14410_v23 }
0x32cd   :  { %10307 = vrot.lane.b32.xlu0 %v10306_v40, %s11536_s7 }
0x333f   :  { %v10308_v36 = vpop.permute.xlu0 %10307 }
0x3340   :  { %v10310_v41 = vunpack.i.h.bf16 %v10308_v36  ;;  %v10309_v37 = vunpack.i.l.bf16 %v10308_v36 }
0x3342   :  { %v7582_v21 = vsel %vm215_vm0, %v10310_v41, %v7579_v61  ;;  %v7581_v26 = vsel %vm215_vm0, %v10309_v37, %v10304_v5 }
0x3343   :  { %v7583_v17 = vpack.c.bf16 %v7582_v21, %v7581_v26 }
0x3345   :  { %10119 = vmatmul.msk.bf16.vlgmr.msrb.gmra.mxu3 %vm682_vm9, %v7583_v17 }
0x3346   :  { %7864 = vmatpush.bf16.xpose.msrb.mxu3 %v11851_v8 }
0x33c8   :  { %v7596_v0 = vpop.f32.mrf.mxu3 }
0x33c9   :  { %v7601_v59 = vadd.f32 %v11291_v34, %v7596_v0 }
0x33cb   :  { %10932 = vtanh.f32 %v7601_v59  ;;  %v10120_v5 = vmul.f32 -1.442695, %v7601_v59 }
0x33d0   :  { %v7598_v9 = vpop.f32.mrf.mxu3 }
0x33d1   :  { %v10933_v54 = vpop.eup %10932  ;;  %v7602_v44 = vadd.f32 %v11291_v34, %v7598_v9 }
0x33d2   :  { %7647 = vrot.lane.b32.xlu1 %v10933_v54, %s11529_s29 }
0x33d3   :  { %10934 = vtanh.f32 %v7602_v44  ;;  %v10121_v55 = vmul.f32 -1.442695, %v7602_v44 }
0x33d4   :  { %10936 = vpow2.f32 %v10120_v5 }
0x33d5   :  { %10938 = vpow2.f32 %v10121_v55 }
0x33d9   :  { %v10935_v53 = vpop.eup %10934 }
0x33da   :  { %7649 = vrot.lane.b32.xlu0 %v10935_v53, %s11529_s29  ;;  %v10937_v47 = vpop.eup %10936 }
0x33db   :  { %v7609_v20 = vadd.f32 1.0, %v10937_v47  ;;  %v10939_v22 = vpop.eup %10938 }
0x33dc   :  { %v7610_v15 = vadd.f32 1.0, %v10939_v22 }
0x33dd   :  { %10940 = vrcp.f32 %v7609_v20  ;;  %v7622_v18 = vand.u32 2147483648, %v7609_v20  ;;  %vm7616_vm15 = vweird.f32 %v7609_v20  ;;  %v7620_v16 = vand.u32 2147483647, %v7609_v20 }
0x33de   :  { %10942 = vrcp.f32 %v7610_v15  ;;  %v7637_v17 = vand.u32 2147483648, %v7610_v15  ;;  %vm7631_vm11 = vweird.f32 %v7610_v15  ;;  %v7635_v0 = vand.u32 2147483647, %v7610_v15 }
0x33df   :  { %v7623_v41 = vor.u32 1.1754944e-38, %v7622_v18  ;;  %vm7621_vm2 = vcmp.eq.f32.partialorder %v7620_v16, 8.507059e+37 }
0x33e0   :  { %v7638_v59 = vor.u32 1.1754944e-38, %v7637_v17  ;;  %vm7636_vm13 = vcmp.eq.f32.partialorder %v7635_v0, 8.507059e+37 }
0x33e3   :  { %v10941_v6 = vpop.eup %10940 }
0x33e4   :  { %v7612_v32 = vmul.f32 %v10941_v6, %v7609_v20  ;;  %v10943_v30 = vpop.eup %10942  ;;  %vm7617_vm14 = vweird.f32 %v10941_v6 }
0x33e5   :  { %v7627_v1 = vmul.f32 %v10943_v30, %v7610_v15  ;;  %vm7618_vm1 = vmor %vm7616_vm15, %vm7617_vm14  ;;  %vm7632_vm4 = vweird.f32 %v10943_v30  ;;  %vm15308_vm14 = vcmask 1045509   ;;  %vm15309_vm15 = vcmask 1046534  }
0x33e6   :  { %v7613_v52 = vsub.f32 1.0, %v7612_v32  ;;  %vm7633_vm12 = vmor %vm7631_vm11, %vm7632_vm4 }
0x33e7   :  { %v7628_v51 = vsub.f32 1.0, %v7627_v1  ;;  %vm15312_vm4 = vmmov %vm15309_vm15 }
0x33e8   :  { %v7614_v24 = vmul.f32 %v10941_v6, %v7613_v52 }
0x33e9   :  { %v7629_v36 = vmul.f32 %v10943_v30, %v7628_v51 }
0x33ea   :  { %v7615_v33 = vadd.f32 %v10941_v6, %v7614_v24 }
0x33eb   :  { %v7630_v26 = vadd.f32 %v10943_v30, %v7629_v36 }
0x33ec   :  { %v7619_v40 = vsel %vm7618_vm1, %v10941_v6, %v7615_v33  ;;  %vm15310_vm1 = vcmask 1047559  }
0x33ed   :  { %v7624_v61 = vsel %vm7621_vm2, %v7623_v41, %v7619_v40  ;;  %v7634_v34 = vsel %vm7633_vm12, %v10943_v30, %v7630_v26  ;;  %vm15311_vm2 = vmmov %vm15308_vm14  ;;  %vm15314_vm12 = vcmask 785408  }
0x33ee   :  { %v7639_v54 = vsel %vm7636_vm13, %v7638_v59, %v7634_v34  ;;  %v7643_v53 = vmul.f32 %v7624_v61, %v14015_v45  ;;  %vm15313_vm11 = vmmov %vm15310_vm1 }
0x33ef   :  { %v7644_v20 = vmul.f32 %v7639_v54, %v14020_v38 }
0x3444   :  { %v7648_v37 = vpop.permute.xlu1 %7647 }
0x3445   :  { %v7653_v21 = vmul.f32 %v7648_v37, %v7624_v61 }
0x3447   :  { %7657 = vrot.lane.b32.xlu2 %v7653_v21, %s11536_s7 }
0x344c   :  { %v7650_v9 = vpop.permute.xlu0 %7649 }
0x344d   :  { %v7654_v44 = vmul.f32 %v7650_v9, %v7639_v54 }
0x344f   :  { %7659 = vrot.lane.b32.xlu1 %v7654_v44, %s11536_s7 }
0x34a1   :  { %v7658_v5 = vpop.permute.xlu2 %7657 }
0x34a2   :  { %v14433_v55 = vadd.f32 %v7658_v5, %v7643_v53 }
0x34a4   :  { %10944 = vtanh.f32 %v14433_v55 }
0x34aa   :  { %v10945_v47 = vpop.eup %10944 }
0x34ab   :  { %7669 = vrot.lane.b32.xlu0 %v10945_v47, %s11529_s29 }
0x34c1   :  { %v7660_v22 = vpop.permute.xlu1 %7659 }
0x34c2   :  { %v14438_v15 = vadd.f32 %v7660_v22, %v7644_v20 }
0x34c4   :  { %10946 = vtanh.f32 %v14438_v15 }
0x34ca   :  { %v10947_v6 = vpop.eup %10946 }
0x34cb   :  { %7671 = vrot.lane.b32.xlu2 %v10947_v6, %s11529_s29 }
0x351d   :  { %v7670_v32 = vpop.permute.xlu0 %7669 }
0x351e   :  { %v14442_v45 = vmul.f32 %v7670_v32, %v7624_v61 }
0x3520   :  { %v7707_v52 = vpack.c.bf16 %v14442_v45, %v14442_v45  ;;  %v7680_v30 = vrot.slane %v14442_v45, 2  ;;  %v7679_v24 = vrot.slane %v14442_v45, 1  ;;  %v7684_v38 = vrot.slane %v14442_v45, 6 }
0x3521   :  { %v7683_v1 = vrot.slane %v14442_v45, 5  ;;  %v7681_v16 = vrot.slane %v14442_v45, 3  ;;  %v7685_v5 = vrot.slane %v14442_v45, 7  ;;  %v7682_v47 = vrot.slane %v14442_v45, 4 }
0x3522   :  { %v7724_v33 = vunpack.c.l.b16 %v7707_v52  ;;  %v7709_v51 = vpack.c.bf16 %v7680_v30, %v7680_v30  ;;  %v7708_v18 = vpack.c.bf16 %v7679_v24, %v7679_v24  ;;  %v7713_v37 = vpack.c.bf16 %v7684_v38, %v7684_v38 }
0x3523   :  { %v7712_v21 = vpack.c.bf16 %v7683_v1, %v7683_v1  ;;  %v7710_v34 = vpack.c.bf16 %v7681_v16, %v7681_v16  ;;  %v7714_v32 = vpack.c.bf16 %v7685_v5, %v7685_v5  ;;  %v7711_v52 = vpack.c.bf16 %v7682_v47, %v7682_v47 }
0x3524   :  { %v7725_v40 = vpack.c.b16 %v7724_v33, %v7724_v33  ;;  %v7766_v36 = vunpack.c.l.b16 %v7709_v51  ;;  %v7745_v41 = vunpack.c.l.b16 %v7708_v18  ;;  %v7850_v59 = vunpack.c.l.b16 %v7713_v37 }
0x3525   :  { %v7672_v61 = vpop.permute.xlu2 %7671  ;;  %v7829_v44 = vunpack.c.l.b16 %v7712_v21  ;;  %v7787_v53 = vunpack.c.l.b16 %v7710_v34  ;;  %v7871_v38 = vunpack.c.l.b16 %v7714_v32  ;;  %v7808_v1 = vunpack.c.l.b16 %v7711_v52 }
0x3526   :  { %v14451_v26 = vmul.f32 %v7672_v61, %v7639_v54  ;;  %7726 = vrot.lane.b32.xlu2 %v7725_v40, %s11536_s7  ;;  %v7767_v17 = vpack.c.b16 %v7766_v36, %v7766_v36  ;;  %v7746_v0 = vpack.c.b16 %v7745_v41, %v7745_v41  ;;  %v7851_v54 = vpack.c.b16 %v7850_v59, %v7850_v59 }
0x3527   :  { %v7830_v22 = vpack.c.b16 %v7829_v44, %v7829_v44  ;;  %v7788_v6 = vpack.c.b16 %v7787_v53, %v7787_v53  ;;  %v7872_v16 = vpack.c.b16 %v7871_v38, %v7871_v38  ;;  %v7809_v40 = vpack.c.b16 %v7808_v1, %v7808_v1 }
0x3528   :  { %7768 = vrot.lane.b32.xlu0 %v7767_v17, %s11536_s7  ;;  %7747 = vrot.lane.b32.xlu1 %v7746_v0, %s11536_s7  ;;  %v7686_v9 = vrot.slane %v14451_v26, 1  ;;  %v7688_v24 = vrot.slane %v14451_v26, 3  ;;  %v7687_v33 = vrot.slane %v14451_v26, 2  ;;  %v7715_v36 = vpack.c.bf16 %v14451_v26, %v14451_v26 }
0x3529   :  { %v7689_v61 = vrot.slane %v14451_v26, 4  ;;  %v7691_v0 = vrot.slane %v14451_v26, 6  ;;  %v7690_v34 = vrot.slane %v14451_v26, 5 }
0x352a   :  { %v7716_v20 = vpack.c.bf16 %v7686_v9, %v7686_v9  ;;  %v7718_v18 = vpack.c.bf16 %v7688_v24, %v7688_v24  ;;  %v7717_v41 = vpack.c.bf16 %v7687_v33, %v7687_v33  ;;  %v7892_v21 = vunpack.c.l.b16 %v7715_v36 }
0x352b   :  { %v7719_v9 = vpack.c.bf16 %v7689_v61, %v7689_v61  ;;  %v7721_v5 = vpack.c.bf16 %v7691_v0, %v7691_v0  ;;  %v7720_v47 = vpack.c.bf16 %v7690_v34, %v7690_v34  ;;  %v15301_v0 = vld [vmem:[#allocation26_spill] sm:$0xff] }
0x352c   :  { %v7913_v30 = vunpack.c.l.b16 %v7716_v20  ;;  %v7955_v37 = vunpack.c.l.b16 %v7718_v18  ;;  %v7934_v17 = vunpack.c.l.b16 %v7717_v41  ;;  %v7893_v44 = vpack.c.b16 %v7892_v21, %v7892_v21 }
0x352d   :  { %v8018_v20 = vunpack.c.l.b16 %v7721_v5  ;;  %v15303_v5 = vld [vmem:[#allocation27_spill] sm:$0xff] }
0x352e   :  { %7852 = vrot.lane.b32.xlu2 %v7851_v54, %s11536_s7  ;;  %v7914_v51 = vpack.c.b16 %v7913_v30, %v7913_v30  ;;  %v7956_v59 = vpack.c.b16 %v7955_v37, %v7955_v37  ;;  %v7935_v53 = vpack.c.b16 %v7934_v17, %v7934_v17  ;;  %v7976_v54 = vunpack.c.l.b16 %v7719_v9 }
0x352f   :  { %v8019_v52 = vpack.c.b16 %v8018_v20, %v8018_v20 }
0x3530   :  { %7831 = vrot.lane.b32.xlu0 %v7830_v22, %s11536_s7  ;;  %7789 = vrot.lane.b32.xlu1 %v7788_v6, %s11536_s7  ;;  %v7997_v22 = vunpack.c.l.b16 %v7720_v47  ;;  %v7692_v6 = vrot.slane %v14451_v26, 7  ;;  %v7977_v32 = vpack.c.b16 %v7976_v54, %v7976_v54  ;;  %v15304_v47 = vld [vmem:[#allocation28_spill] sm:$0xff]  ;;  %v15305_v54 = vld [vmem:[#allocation30_spill] sm:$0xff] }
0x3532   :  { %v7998_v30 = vpack.c.b16 %v7997_v22, %v7997_v22  ;;  %v7722_v24 = vpack.c.bf16 %v7692_v6, %v7692_v6  ;;  %v15306_v22 = vld [vmem:[#allocation29_spill] sm:$0xff] }
0x3534   :  { %v8039_v38 = vunpack.c.l.b16 %v7722_v24 }
0x3536   :  { %7915 = vrot.lane.b32.xlu2 %v7914_v51, %s11536_s7  ;;  %v8040_v1 = vpack.c.b16 %v8039_v38, %v8039_v38 }
0x3538   :  { %7873 = vrot.lane.b32.xlu0 %v7872_v16, %s11536_s7  ;;  %7810 = vrot.lane.b32.xlu1 %v7809_v40, %s11536_s7 }
0x353e   :  { %7957 = vrot.lane.b32.xlu2 %v7956_v59, %s11536_s7  ;;  %v15302_v59 = vld [vmem:[#allocation25_spill] sm:$0xff] }
0x3540   :  { %7894 = vrot.lane.b32.xlu0 %v7893_v44, %s11536_s7  ;;  %7936 = vrot.lane.b32.xlu1 %v7935_v53, %s11536_s7 }
0x3546   :  { %7978 = vrot.lane.b32.xlu2 %v7977_v32, %s11536_s7  ;;  %v11292_v32 = vld [vmem:[%s15196_s6] sm:$0x1] }
0x3548   :  { %8020 = vrot.lane.b32.xlu0 %v8019_v52, %s11536_s7  ;;  %7999 = vrot.lane.b32.xlu1 %v7998_v30, %s11536_s7 }
0x3550   :  { %8041 = vrot.lane.b32.xlu1 %v8040_v1, %s11536_s7 }
0x3580   :  { %v7727_v33 = vpop.permute.xlu2 %7726 }
0x3581   :  { %10122 = vmatmul.msk.bf16.vlgmr.msrb.gmra.mxu1 %vm215_vm0, %v7727_v33  ;;  %v11293_v33 = vld [vmem:[%s15196_s6 + $0x1] sm:$0x1] }
0x3582   :  { %7906 = vmatpush.bf16.xpose.msrb.mxu1 %v11864_v28 }
0x3588   :  { %v7853_v41 = vpop.permute.xlu2 %7852 }
0x3590   :  { %v7916_v61 = vpop.permute.xlu2 %7915 }
0x3598   :  { %v7958_v34 = vpop.permute.xlu2 %7957 }
0x359a   :  { %v7769_v51 = vpop.permute.xlu0 %7768  ;;  %v7748_v18 = vpop.permute.xlu1 %7747 }
0x359b   :  { %10123 = vmatmul.msk.bf16.vlgmr.msrb.gmra.mxu2 %vm215_vm0, %v7748_v18  ;;  %10124 = vmatmul.msk.bf16.vlgmr.msra.gmra.mxu3 %vm215_vm0, %v7769_v51  ;;  %v11294_v18 = vld [vmem:[%s15196_s6 + $0x2] sm:$0x1] }
0x359c   :  { %7927 = vmatpush.bf16.xpose.msrb.mxu2 %v11858_v14  ;;  %7948 = vmatpush.bf16.xpose.msra.mxu3 %v11874_v35 }
0x35a0   :  { %v7979_v44 = vpop.permute.xlu2 %7978 }
0x35a2   :  { %v7790_v16 = vpop.permute.xlu1 %7789  ;;  %v7832_v40 = vpop.permute.xlu0 %7831 }
0x35a3   :  { %10125 = vmatmul.msk.bf16.vlgmr.msrb.gmra.mxu0 %vm215_vm0, %v7790_v16 }
0x35a4   :  { %7969 = vmatpush.bf16.xpose.msrb.mxu0 %v11868_v31 }
0x35aa   :  { %v7811_v36 = vpop.permute.xlu1 %7810  ;;  %v7874_v37 = vpop.permute.xlu0 %7873 }
0x35ab   :  { %10126 = vmatmul.msk.bf16.vlgmr.msra.gmra.mxu1 %vm215_vm0, %v7811_v36  ;;  %10127 = vmatmul.msk.bf16.vlgmr.msra.gmra.mxu2 %vm215_vm0, %v7832_v40 }
0x35ac   :  { %10128 = vmatmul.msk.bf16.vlgmr.msrb.gmra.mxu3 %vm215_vm0, %v7853_v41  ;;  %7990 = vmatpush.bf16.xpose.msra.mxu1 %v11881_v42 }
0x35ad   :  { %8011 = vmatpush.bf16.xpose.msra.mxu2 %v11884_v43  ;;  %8032 = vmatpush.bf16.xpose.msrb.mxu3 %v11898_v48 }
0x35b2   :  { %v7895_v21 = vpop.permute.xlu0 %7894  ;;  %v7937_v17 = vpop.permute.xlu1 %7936 }
0x35b3   :  { %10129 = vmatmul.msk.bf16.vlgmr.msra.gmra.mxu0 %vm215_vm0, %v7874_v37  ;;  %v11295_v37 = vld [vmem:[%s15196_s6 + $0x3] sm:$0x1] }
0x35b4   :  { %8053 = vmatpush.bf16.xpose.msra.mxu0 %v11891_v46 }
0x35ba   :  { %v8000_v9 = vpop.permute.xlu1 %7999  ;;  %v8021_v53 = vpop.permute.xlu0 %8020 }
0x35bb   :  { %10130 = vmatmul.msk.bf16.vlgmr.msrb.gmra.mxu1 %vm215_vm0, %v7895_v21  ;;  %10131 = vmatmul.msk.bf16.vlgmr.msrb.gmra.mxu2 %vm215_vm0, %v7916_v61 }
0x35bc   :  { %10132 = vmatmul.msk.bf16.vlgmr.msra.gmra.mxu3 %vm215_vm0, %v7937_v17  ;;  %8261 = vmatpush.bf16.msrb.mxu1 %v12126_v12 }
0x35bd   :  { %8277 = vmatpush.bf16.msrb.mxu2 %v12115_v25  ;;  %8293 = vmatpush.bf16.msra.mxu3 %v15301_v0 }
0x35c2   :  { %v8042_v20 = vpop.permute.xlu1 %8041 }
0x35c3   :  { %10133 = vmatmul.msk.bf16.vlgmr.msrb.gmra.mxu0 %vm215_vm0, %v7958_v34 }
0x35c4   :  { %8309 = vmatpush.bf16.msrb.mxu0 %v15302_v59 }
0x35cb   :  { %10134 = vmatmul.msk.bf16.vlgmr.msra.gmra.mxu1 %vm215_vm0, %v7979_v44  ;;  %10135 = vmatmul.msk.bf16.vlgmr.msra.gmra.mxu2 %vm215_vm0, %v8000_v9 }
0x35cc   :  { %10136 = vmatmul.msk.bf16.vlgmr.msrb.gmra.mxu3 %vm215_vm0, %v8021_v53  ;;  %8325 = vmatpush.bf16.msra.mxu1 %v15303_v5  ;;  %v11296_v53 = vld [vmem:[%s15196_s6 + $0x4] sm:$0x1] }
0x35cd   :  { %8341 = vmatpush.bf16.msra.mxu2 %v15304_v47  ;;  %8357 = vmatpush.bf16.msrb.mxu3 %v15305_v54 }
0x35d3   :  { %10137 = vmatmul.msk.bf16.vlgmr.msra.gmra.mxu0 %vm215_vm0, %v8042_v20 }
0x35d4   :  { %8373 = vmatpush.bf16.msra.mxu0 %v15306_v22 }
0x35fe   :  { %v7740_v6 = vpop.f32.mrf.mxu1 }
0x35ff   :  { %v14515_v52 = vadd.f32 %v11292_v32, %v7740_v6  ;;  %v11297_v32 = vld [vmem:[%s15196_s6 + $0x5] sm:$0x1] }
0x3601   :  { %v8059_v30 = vsel %vm1214_vm3, %v14515_v52, -inf }
0x3602   :  { %8060 = vmax.xlane.f32.xlu1 %v8059_v30 }
0x3606   :  { %v7742_v24 = vpop.f32.mrf.mxu1 }
0x361e   :  { %v7761_v38 = vpop.f32.mrf.mxu2  ;;  %v7782_v1 = vpop.f32.mrf.mxu3 }
0x361f   :  { %v14522_v51 = vadd.f32 %v11293_v33, %v7761_v38  ;;  %v14527_v16 = vadd.f32 %v11294_v18, %v7782_v1  ;;  %v11298_v38 = vld [vmem:[%s15196_s6 + $0x6] sm:$0x1] }
0x3620   :  { %v7803_v40 = vpop.f32.mrf.mxu0 }
0x3621   :  { %v8062_v36 = vsel %vm1214_vm3, %v14522_v51, -inf  ;;  %v8065_v41 = vsel %vm1214_vm3, %v14527_v16, -inf  ;;  %v14536_v61 = vadd.f32 %v11295_v37, %v7803_v40  ;;  %v11299_v37 = vld [vmem:[%s15196_s6 + $0x7] sm:$0x1] }
0x3622   :  { %8063 = vmax.xlane.f32.xlu0 %v8062_v36  ;;  %8066 = vmax.xlane.f32.xlu2 %v8065_v41 }
0x3623   :  { %v8068_v44 = vsel %vm1214_vm3, %v14536_v61, -inf }
0x3626   :  { %v7763_v21 = vpop.f32.mrf.mxu2  ;;  %v7784_v17 = vpop.f32.mrf.mxu3 }
0x3628   :  { %v7805_v34 = vpop.f32.mrf.mxu0  ;;  %v7824_v9 = vpop.f32.mrf.mxu1 }
0x3629   :  { %v14543_v20 = vadd.f32 %v11296_v53, %v7824_v9 }
0x362a   :  { %8069 = vmax.xlane.f32.xlu0 %v8068_v44 }
0x362b   :  { %v8071_v36 = vsel %vm1214_vm3, %v14543_v20, -inf }
0x362e   :  { %v7845_v6 = vpop.f32.mrf.mxu2 }
0x362f   :  { %v14548_v30 = vadd.f32 %v11297_v32, %v7845_v6  ;;  %v7866_v24 = vpop.f32.mrf.mxu3  ;;  %v11300_v6 = vld [vmem:[%s15196_s6 + $0x8] sm:$0x1] }
0x3630   :  { %v14553_v1 = vadd.f32 %v11298_v38, %v7866_v24  ;;  %v7826_v33 = vpop.f32.mrf.mxu1  ;;  %v7887_v18 = vpop.f32.mrf.mxu0  ;;  %v11301_v38 = vld [vmem:[%s15196_s6 + $0x9] sm:$0x1] }
0x3631   :  { %v8074_v40 = vsel %vm1214_vm3, %v14548_v30, -inf  ;;  %v14564_v21 = vadd.f32 %v11299_v37, %v7887_v18 }
0x3632   :  { %8075 = vmax.xlane.f32.xlu2 %v8074_v40  ;;  %8072 = vmax.xlane.f32.xlu0 %v8071_v36  ;;  %v8077_v41 = vsel %vm1214_vm3, %v14553_v1, -inf  ;;  %v11302_v40 = vld [vmem:[%s15196_s6 + $0xa] sm:$0x1] }
0x3633   :  { %8078 = vmax.xlane.f32.xlu1 %v8077_v41  ;;  %v8080_v53 = vsel %vm1214_vm3, %v14564_v21, -inf }
0x3636   :  { %v7847_v17 = vpop.f32.mrf.mxu2 }
0x3637   :  { %v7868_v34 = vpop.f32.mrf.mxu3 }
0x3638   :  { %v7889_v9 = vpop.f32.mrf.mxu0  ;;  %v7908_v44 = vpop.f32.mrf.mxu1 }
0x3639   :  { %v14571_v32 = vadd.f32 %v11300_v6, %v7908_v44  ;;  %v11303_v44 = vld [vmem:[%s15196_s6 + $0xb] sm:$0x1] }
0x363a   :  { %8081 = vmax.xlane.f32.xlu2 %v8080_v53 }
0x363b   :  { %v8083_v17 = vsel %vm1214_vm3, %v14571_v32, -inf }
0x363e   :  { %v7929_v24 = vpop.f32.mrf.mxu2 }
0x363f   :  { %v14576_v33 = vadd.f32 %v11301_v38, %v7929_v24  ;;  %v7950_v18 = vpop.f32.mrf.mxu3 }
0x3640   :  { %v14581_v36 = vadd.f32 %v11302_v40, %v7950_v18  ;;  %v7910_v41 = vpop.f32.mrf.mxu1  ;;  %v7971_v37 = vpop.f32.mrf.mxu0 }
0x3641   :  { %v8086_v34 = vsel %vm1214_vm3, %v14576_v33, -inf  ;;  %v14592_v53 = vadd.f32 %v11303_v44, %v7971_v37  ;;  %v11305_v37 = vld [vmem:[%s15196_s6 + $0xe] sm:$0x1] }
0x3642   :  { %8084 = vmax.xlane.f32.xlu2 %v8083_v17  ;;  %v8089_v9 = vsel %vm1214_vm3, %v14581_v36, -inf  ;;  %8087 = vmax.xlane.f32.xlu1 %v8086_v34  ;;  %v11304_v17 = vld [vmem:[%s15196_s6 + $0xd] sm:$0x1] }
0x3643   :  { %8090 = vmax.xlane.f32.xlu0 %v8089_v9  ;;  %v8092_v40 = vsel %vm1214_vm3, %v14592_v53, -inf }
0x3646   :  { %v7931_v6 = vpop.f32.mrf.mxu2 }
0x3647   :  { %v7952_v24 = vpop.f32.mrf.mxu3 }
0x3648   :  { %v7973_v38 = vpop.f32.mrf.mxu0  ;;  %v7992_v18 = vpop.f32.mrf.mxu1 }
0x364a   :  { %8093 = vmax.xlane.f32.xlu1 %v8092_v40 }
0x364e   :  { %v8013_v41 = vpop.f32.mrf.mxu2 }
0x364f   :  { %v14599_v34 = vadd.f32 %v11304_v17, %v8013_v41  ;;  %v8034_v9 = vpop.f32.mrf.mxu3  ;;  %v11306_v41 = vld [vmem:[%s15196_s6 + $0xc] sm:$0x1] }
0x3650   :  { %v14604_v44 = vadd.f32 %v11305_v37, %v8034_v9  ;;  %v7994_v6 = vpop.f32.mrf.mxu1  ;;  %v8055_v24 = vpop.f32.mrf.mxu0  ;;  %v14613_v17 = vadd.f32 %v11306_v41, %v7992_v18 }
0x3651   :  { %v8098_v38 = vsel %vm1214_vm3, %v14599_v34, -inf }
0x3652   :  { %v8101_v40 = vsel %vm1214_vm3, %v14604_v44, -inf  ;;  %8099 = vmax.xlane.f32.xlu0 %v8098_v38  ;;  %v8095_v37 = vsel %vm1214_vm3, %v14613_v17, -inf }
0x3653   :  { %8102 = vmax.xlane.f32.xlu2 %v8101_v40 }
0x3656   :  { %v8015_v4 = vpop.f32.mrf.mxu2 }
0x3657   :  { %v8036_v22 = vpop.f32.mrf.mxu3 }
0x3658   :  { %v8057_v9 = vpop.f32.mrf.mxu0 }
0x365a   :  { %8096 = vmax.xlane.f32.xlu0 %v8095_v37 }
0x3675   :  { %v8061_v6 = vpop.xlane.xlu1 %8060 }
0x3676   :  { %v8107_v54 = vsub.f32 %v14515_v52, %v8061_v6 }
0x3678   :  { %v8123_v5 = vmul.f32 1.442695, %v8107_v54 }
0x367a   :  { %10948 = vpow2.f32 %v8123_v5 }
0x3680   :  { %v14618_v38 = vpop.eup %10948 }
0x3681   :  { %v8155_v40 = vsel %vm1214_vm3, %v14618_v38, 0.0 }
0x3682   :  { %8156 = vadd.xlane.f32.xlu0 %v8155_v40 }
0x3695   :  { %v8064_v18 = vpop.xlane.xlu0 %8063  ;;  %v8067_v41 = vpop.xlane.xlu2 %8066 }
0x3696   :  { %v8108_v4 = vsub.f32 %v14522_v51, %v8064_v18  ;;  %v8109_v22 = vsub.f32 %v14527_v16, %v8067_v41 }
0x3698   :  { %v8125_v9 = vmul.f32 1.442695, %v8108_v4  ;;  %v8127_v47 = vmul.f32 1.442695, %v8109_v22 }
0x369a   :  { %10950 = vpow2.f32 %v8125_v9 }
0x369b   :  { %10952 = vpow2.f32 %v8127_v47  ;;  %v11307_v47 = vld [vmem:[%s15196_s6 + $0xf] sm:$0x1] }
0x369c   :  { %v14636_v16 = vadd.f32 %v11307_v47, %v8055_v24 }
0x369d   :  { %v8070_v37 = vpop.xlane.xlu0 %8069 }
0x369e   :  { %v8110_v54 = vsub.f32 %v14536_v61, %v8070_v37 }
0x36a0   :  { %v14625_v5 = vpop.eup %10950  ;;  %v8129_v52 = vmul.f32 1.442695, %v8110_v54 }
0x36a1   :  { %v14627_v6 = vpop.eup %10952  ;;  %v8158_v40 = vsel %vm1214_vm3, %v14625_v5, 0.0 }
0x36a2   :  { %10954 = vpow2.f32 %v8129_v52  ;;  %8159 = vadd.xlane.f32.xlu1 %v8158_v40  ;;  %v8161_v51 = vsel %vm1214_vm3, %v14627_v6, 0.0 }
0x36a3   :  { %8162 = vadd.xlane.f32.xlu2 %v8161_v51  ;;  %v8104_v51 = vsel %vm1214_vm3, %v14636_v16, -inf }
0x36a5   :  { %v8073_v61 = vpop.xlane.xlu0 %8072  ;;  %v8076_v18 = vpop.xlane.xlu2 %8075 }
0x36a6   :  { %v8111_v41 = vsub.f32 %v14543_v20, %v8073_v61  ;;  %v8079_v4 = vpop.xlane.xlu1 %8078  ;;  %v8112_v22 = vsub.f32 %v14548_v30, %v8076_v18 }
0x36a7   :  { %v8113_v9 = vsub.f32 %v14553_v1, %v8079_v4 }
0x36a8   :  { %v14641_v37 = vpop.eup %10954  ;;  %v8131_v54 = vmul.f32 1.442695, %v8111_v41  ;;  %v8133_v52 = vmul.f32 1.442695, %v8112_v22 }
0x36a9   :  { %v8135_v40 = vmul.f32 1.442695, %v8113_v9  ;;  %v8164_v24 = vsel %vm1214_vm3, %v14641_v37, 0.0 }
0x36aa   :  { %10956 = vpow2.f32 %v8131_v54  ;;  %8105 = vmax.xlane.f32.xlu1 %v8104_v51 }
0x36ab   :  { %10958 = vpow2.f32 %v8135_v40  ;;  %8165 = vadd.xlane.f32.xlu2 %v8164_v24 }
0x36ac   :  { %10960 = vpow2.f32 %v8133_v52 }
0x36ad   :  { %v8082_v20 = vpop.xlane.xlu2 %8081 }
0x36ae   :  { %v8114_v30 = vsub.f32 %v14564_v21, %v8082_v20 }
0x36b0   :  { %v14648_v1 = vpop.eup %10956  ;;  %v8137_v47 = vmul.f32 1.442695, %v8114_v30 }
0x36b1   :  { %v14650_v61 = vpop.eup %10958  ;;  %v8167_v18 = vsel %vm1214_vm3, %v14648_v1, 0.0 }
0x36b2   :  { %v14654_v41 = vpop.eup %10960  ;;  %10962 = vpow2.f32 %v8137_v47  ;;  %v8173_v4 = vsel %vm1214_vm3, %v14650_v61, 0.0 }
0x36b3   :  { %8174 = vadd.xlane.f32.xlu0 %v8173_v4  ;;  %8168 = vadd.xlane.f32.xlu2 %v8167_v18  ;;  %v8170_v22 = vsel %vm1214_vm3, %v14654_v41, 0.0 }
0x36b4   :  { %8171 = vadd.xlane.f32.xlu1 %v8170_v22 }
0x36b5   :  { %v8088_v21 = vpop.xlane.xlu1 %8087  ;;  %v8085_v9 = vpop.xlane.xlu2 %8084 }
0x36b6   :  { %v8091_v54 = vpop.xlane.xlu0 %8090  ;;  %v8116_v52 = vsub.f32 %v14576_v33, %v8088_v21  ;;  %v8115_v40 = vsub.f32 %v14571_v32, %v8085_v9 }
0x36b7   :  { %v8117_v51 = vsub.f32 %v14581_v36, %v8091_v54 }
0x36b8   :  { %v14663_v24 = vpop.eup %10962  ;;  %v8141_v20 = vmul.f32 1.442695, %v8116_v52  ;;  %v8139_v30 = vmul.f32 1.442695, %v8115_v40 }
0x36b9   :  { %v8143_v47 = vmul.f32 1.442695, %v8117_v51  ;;  %v8176_v18 = vsel %vm1214_vm3, %v14663_v24, 0.0 }
0x36ba   :  { %10964 = vpow2.f32 %v8141_v20 }
0x36bb   :  { %10966 = vpow2.f32 %v8143_v47 }
0x36bc   :  { %10968 = vpow2.f32 %v8139_v30  ;;  %8177 = vadd.xlane.f32.xlu1 %v8176_v18 }
0x36bd   :  { %v8094_v4 = vpop.xlane.xlu1 %8093 }
0x36be   :  { %v8118_v22 = vsub.f32 %v14592_v53, %v8094_v4 }
0x36c0   :  { %v14668_v33 = vpop.eup %10964  ;;  %v8145_v32 = vmul.f32 1.442695, %v8118_v22 }
0x36c1   :  { %v14670_v21 = vpop.eup %10966  ;;  %v8182_v36 = vsel %vm1214_vm3, %v14668_v33, 0.0 }
0x36c2   :  { %v14674_v9 = vpop.eup %10968  ;;  %10970 = vpow2.f32 %v8145_v32  ;;  %8183 = vadd.xlane.f32.xlu0 %v8182_v36  ;;  %v8185_v54 = vsel %vm1214_vm3, %v14670_v21, 0.0 }
0x36c3   :  { %8186 = vadd.xlane.f32.xlu2 %v8185_v54  ;;  %v8179_v52 = vsel %vm1214_vm3, %v14674_v9, 0.0 }
0x36c4   :  { %8180 = vadd.xlane.f32.xlu1 %v8179_v52 }
0x36c5   :  { %v8100_v53 = vpop.xlane.xlu0 %8099 }
0x36c6   :  { %v8120_v40 = vsub.f32 %v14599_v34, %v8100_v53  ;;  %v8103_v51 = vpop.xlane.xlu2 %8102 }
0x36c7   :  { %v8121_v20 = vsub.f32 %v14604_v44, %v8103_v51 }
0x36c8   :  { %v14682_v30 = vpop.eup %10970  ;;  %v8149_v47 = vmul.f32 1.442695, %v8120_v40 }
0x36c9   :  { %v8151_v18 = vmul.f32 1.442695, %v8121_v20  ;;  %v8188_v4 = vsel %vm1214_vm3, %v14682_v30, 0.0 }
0x36ca   :  { %10972 = vpow2.f32 %v8149_v47  ;;  %8189 = vadd.xlane.f32.xlu0 %v8188_v4 }
0x36cb   :  { %10974 = vpow2.f32 %v8151_v18 }
0x36cd   :  { %v8097_v22 = vpop.xlane.xlu0 %8096 }
0x36ce   :  { %v8119_v32 = vsub.f32 %v14613_v17, %v8097_v22  ;;  %v15307_v17 = vpack.c.bf16 %v14412_v19, %v14410_v23 }
0x36d0   :  { %v14687_v36 = vpop.eup %10972  ;;  %v8147_v54 = vmul.f32 1.442695, %v8119_v32 }
0x36d1   :  { %v14689_v34 = vpop.eup %10974  ;;  %v8194_v44 = vsel %vm1214_vm3, %v14687_v36, 0.0 }
0x36d2   :  { %10976 = vpow2.f32 %v8147_v54  ;;  %8195 = vadd.xlane.f32.xlu2 %v8194_v44  ;;  %v8197_v52 = vsel %vm1214_vm3, %v14689_v34, 0.0 }
0x36d3   :  { %8198 = vadd.xlane.f32.xlu1 %v8197_v52 }
0x36d8   :  { %v14695_v53 = vpop.eup %10976 }
0x36d9   :  { %v8191_v40 = vsel %vm1214_vm3, %v14695_v53, 0.0 }
0x36da   :  { %8192 = vadd.xlane.f32.xlu0 %v8191_v40 }
0x36ee   :  { %8598 = vrot.lane.b32.xlu0 %v15307_v17, %s11536_s7 }
0x36f5   :  { %v8157_v51 = vpop.xlane.xlu0 %8156 }
0x36f6   :  { %10978 = vrcp.f32 %v8157_v51 }
0x36fc   :  { %v10979_v20 = vpop.eup %10978 }
0x36fd   :  { %v8219_v47 = vmul.f32 %v10979_v20, %v14618_v38 }
0x36ff   :  { %v8235_v18 = vpack.c.bf16 %v8219_v47, %v8219_v47 }
0x3701   :  { %10138 = vmatmul.msk.bf16.vlgmr.msrb.gmra.mxu1 %vm1407_vm5, %v8235_v18 }
0x3702   :  { %8389 = vmatpush.bf16.msrb.mxu1 %v12177_v39 }
0x3715   :  { %v8160_v4 = vpop.xlane.xlu1 %8159 }
0x3716   :  { %10980 = vrcp.f32 %v8160_v4  ;;  %v8163_v22 = vpop.xlane.xlu2 %8162 }
0x3717   :  { %10982 = vrcp.f32 %v8163_v22 }
0x371c   :  { %v10981_v32 = vpop.eup %10980 }
0x371d   :  { %v10983_v54 = vpop.eup %10982  ;;  %v8220_v44 = vmul.f32 %v10981_v32, %v14625_v5  ;;  %v8106_v23 = vpop.xlane.xlu1 %8105 }
0x371e   :  { %v8221_v19 = vmul.f32 %v10983_v54, %v14627_v6  ;;  %v8122_v52 = vsub.f32 %v14636_v16, %v8106_v23  ;;  %v8166_v40 = vpop.xlane.xlu2 %8165 }
0x371f   :  { %v8236_v38 = vpack.c.bf16 %v8220_v44, %v8220_v44  ;;  %10984 = vrcp.f32 %v8166_v40 }
0x3720   :  { %v8237_v17 = vpack.c.bf16 %v8221_v19, %v8221_v19  ;;  %v8153_v51 = vmul.f32 1.442695, %v8122_v52 }
0x3721   :  { %10139 = vmatmul.msk.bf16.vlgmr.msrb.gmra.mxu2 %vm1407_vm5, %v8236_v38 }
0x3722   :  { %10986 = vpow2.f32 %v8153_v51  ;;  %10140 = vmatmul.msk.bf16.vlgmr.msra.gmra.mxu3 %vm1407_vm5, %v8237_v17  ;;  %8405 = vmatpush.bf16.msrb.mxu2 %v12180_v58 }
0x3723   :  { %8421 = vmatpush.bf16.msra.mxu3 %v12196_v2 }
0x3725   :  { %v10985_v5 = vpop.eup %10984 }
0x3726   :  { %v8222_v20 = vmul.f32 %v10985_v5, %v14641_v37  ;;  %v8175_v6 = vpop.xlane.xlu0 %8174  ;;  %v8169_v47 = vpop.xlane.xlu2 %8168 }
0x3727   :  { %10988 = vrcp.f32 %v8175_v6  ;;  %v8172_v16 = vpop.xlane.xlu1 %8171 }
0x3728   :  { %v14714_v18 = vpop.eup %10986  ;;  %v8238_v4 = vpack.c.bf16 %v8222_v20, %v8222_v20  ;;  %10990 = vrcp.f32 %v8172_v16 }
0x3729   :  { %10992 = vrcp.f32 %v8169_v47  ;;  %v8200_v22 = vsel %vm1214_vm3, %v14714_v18, 0.0 }
0x372a   :  { %10141 = vmatmul.msk.bf16.vlgmr.msrb.gmra.mxu0 %vm1407_vm5, %v8238_v4  ;;  %8201 = vadd.xlane.f32.xlu2 %v8200_v22 }
0x372b   :  { %8437 = vmatpush.bf16.msrb.mxu0 %v12185_v10 }
0x372d   :  { %v10989_v32 = vpop.eup %10988 }
0x372e   :  { %v10991_v54 = vpop.eup %10990  ;;  %v8225_v37 = vmul.f32 %v10989_v32, %v14650_v61 }
0x372f   :  { %v10993_v44 = vpop.eup %10992  ;;  %v8224_v23 = vmul.f32 %v10991_v54, %v14654_v41  ;;  %v8178_v19 = vpop.xlane.xlu1 %8177 }
0x3730   :  { %v8241_v52 = vpack.c.bf16 %v8225_v37, %v8225_v37  ;;  %v8223_v40 = vmul.f32 %v10993_v44, %v14648_v1  ;;  %10994 = vrcp.f32 %v8178_v19 }
0x3731   :  { %v8240_v38 = vpack.c.bf16 %v8224_v23, %v8224_v23  ;;  %v11308_v23 = vld [vmem:[#allocation9 + $0x8] sm:$0xff] }
0x3732   :  { %v8239_v17 = vpack.c.bf16 %v8223_v40, %v8223_v40  ;;  %10144 = vmatmul.msk.bf16.vlgmr.msrb.gmra.mxu3 %vm1407_vm5, %v8241_v52 }
0x3733   :  { %10143 = vmatmul.msk.bf16.vlgmr.msra.gmra.mxu2 %vm1407_vm5, %v8240_v38  ;;  %8485 = vmatpush.bf16.msrb.mxu3 %v12262_v49 }
0x3734   :  { %10142 = vmatmul.msk.bf16.vlgmr.msra.gmra.mxu1 %vm1407_vm5, %v8239_v17  ;;  %8469 = vmatpush.bf16.msra.mxu2 %v12214_v50  ;;  %v11311_v17 = vld [vmem:[#allocation9] sm:$0xff] }
0x3735   :  { %v8184_v61 = vpop.xlane.xlu0 %8183  ;;  %8453 = vmatpush.bf16.msra.mxu1 %v12203_v57 }
0x3736   :  { %v10995_v41 = vpop.eup %10994  ;;  %10996 = vrcp.f32 %v8184_v61  ;;  %v8187_v51 = vpop.xlane.xlu2 %8186  ;;  %v11312_v61 = vld [vmem:[#allocation8] sm:$0xff] }
0x3737   :  { %v8226_v1 = vmul.f32 %v10995_v41, %v14663_v24  ;;  %v8181_v5 = vpop.xlane.xlu1 %8180  ;;  %10998 = vrcp.f32 %v8187_v51  ;;  %v11313_v41 = vld [vmem:[%s15205_s15 + $0x30] sm:$0xff]  ;;  %v11314_v51 = vld [vmem:[#allocation11 + $0x18] sm:$0xff] }
0x3738   :  { %11000 = vrcp.f32 %v8181_v5 }
0x3739   :  { %v8242_v20 = vpack.c.bf16 %v8226_v1, %v8226_v1 }
0x373b   :  { %10145 = vmatmul.msk.bf16.vlgmr.msra.gmra.mxu0 %vm1407_vm5, %v8242_v20  ;;  %v11315_v20 = vld [vmem:[%s15205_s15 + $0x28] sm:$0xff] }
0x373c   :  { %v10997_v6 = vpop.eup %10996  ;;  %8501 = vmatpush.bf16.msra.mxu0 %v12209_v62 }
0x373d   :  { %v10999_v47 = vpop.eup %10998  ;;  %v8228_v16 = vmul.f32 %v10997_v6, %v14668_v33  ;;  %v8190_v4 = vpop.xlane.xlu0 %8189  ;;  %v11309_v33 = vld [vmem:[#allocation8 + $0x8] sm:$0xff] }
0x373e   :  { %v11001_v22 = vpop.eup %11000  ;;  %v8229_v32 = vmul.f32 %v10999_v47, %v14670_v21  ;;  %11002 = vrcp.f32 %v8190_v4  ;;  %v11310_v21 = vld [vmem:[%s15205_s15 + $0x38] sm:$0xff] }
0x373f   :  { %v8244_v54 = vpack.c.bf16 %v8228_v16, %v8228_v16  ;;  %v8227_v24 = vmul.f32 %v11001_v22, %v14674_v9  ;;  %v11316_v22 = vld [vmem:[#allocation11 + $0x10] sm:$0xff] }
0x3740   :  { %v8245_v37 = vpack.c.bf16 %v8229_v32, %v8229_v32  ;;  %v11317_v32 = vld [vmem:[%s15205_s15 + $0x20] sm:$0xff] }
0x3741   :  { %v8243_v44 = vpack.c.bf16 %v8227_v24, %v8227_v24  ;;  %v11319_v24 = vld [vmem:[%s15205_s15 + $0x18] sm:$0xff] }
0x3742   :  { %10148 = vmatmul.msk.bf16.vlgmr.msra.gmra.mxu3 %vm1407_vm5, %v8245_v37 }
0x3743   :  { %10147 = vmatmul.msk.bf16.vlgmr.msrb.gmra.mxu2 %vm1407_vm5, %v8244_v54  ;;  %8609 = vmatpush.bf16.msra.mxu3 %v11308_v23  ;;  %v11321_v23 = vld [vmem:[%s15205_s15 + $0x10] sm:$0xff] }
0x3744   :  { %v11003_v19 = vpop.eup %11002  ;;  %10146 = vmatmul.msk.bf16.vlgmr.msrb.gmra.mxu1 %vm1407_vm5, %v8243_v44  ;;  %8588 = vmatpush.bf16.msrb.mxu2 %v11309_v33  ;;  %v11320_v44 = vld [vmem:[#allocation11] sm:$0xff] }
0x3745   :  { %v8230_v52 = vmul.f32 %v11003_v19, %v14682_v30  ;;  %8562 = vmatpush.bf16.msrb.mxu1 %v11310_v21  ;;  %v8196_v9 = vpop.xlane.xlu2 %8195 }
0x3746   :  { %v8199_v40 = vpop.xlane.xlu1 %8198  ;;  %11004 = vrcp.f32 %v8196_v9 }
0x3747   :  { %v8246_v38 = vpack.c.bf16 %v8230_v52, %v8230_v52  ;;  %11006 = vrcp.f32 %v8199_v40  ;;  %8610 = vmatpush.bf16.msra.mxu3 %v11311_v17 }
0x3748   :  { %8589 = vmatpush.bf16.msrb.mxu2 %v11312_v61 }
0x3749   :  { %8563 = vmatpush.bf16.msrb.mxu1 %v11313_v41 }
0x374b   :  { %10149 = vmatmul.msk.bf16.vlgmr.msrb.gmra.mxu0 %vm1407_vm5, %v8246_v38 }
0x374c   :  { %v11005_v30 = vpop.eup %11004  ;;  %8714 = vmatpush.bf16.msrb.mxu0 %v11314_v51 }
0x374d   :  { %v11007_v1 = vpop.eup %11006  ;;  %v8232_v5 = vmul.f32 %v11005_v30, %v14687_v36  ;;  %8564 = vmatpush.bf16.msrb.mxu1 %v11315_v20  ;;  %v8193_v6 = vpop.xlane.xlu0 %8192 }
0x374e   :  { %v8233_v47 = vmul.f32 %v11007_v1, %v14689_v34  ;;  %11008 = vrcp.f32 %v8193_v6  ;;  %v11318_v34 = vld [vmem:[#allocation11 + $0x8] sm:$0xff] }
0x374f   :  { %v8248_v16 = vpack.c.bf16 %v8232_v5, %v8232_v5 }
0x3750   :  { %v8249_v4 = vpack.c.bf16 %v8233_v47, %v8233_v47  ;;  %8715 = vmatpush.bf16.msrb.mxu0 %v11316_v22 }
0x3751   :  { %8565 = vmatpush.bf16.msrb.mxu1 %v11317_v32 }
0x3752   :  { %10152 = vmatmul.msk.bf16.vlgmr.msrb.gmra.mxu3 %vm1407_vm5, %v8249_v4 }
0x3753   :  { %10151 = vmatmul.msk.bf16.vlgmr.msra.gmra.mxu2 %vm1407_vm5, %v8248_v16  ;;  %8882 = vmatpush.bf16.xpose.msrb.mxu3 %v11813_v29 }
0x3754   :  { %v11009_v36 = vpop.eup %11008  ;;  %8861 = vmatpush.bf16.xpose.msra.mxu2 %v11803_v7  ;;  %8716 = vmatpush.bf16.msrb.mxu0 %v11318_v34  ;;  %v11322_v7 = vld [vmem:[%s15205_s15 + $0x8] sm:$0xff] }
0x3755   :  { %v8231_v54 = vmul.f32 %v11009_v36, %v14695_v53  ;;  %8566 = vmatpush.bf16.msrb.mxu1 %v11319_v24  ;;  %v11323_v53 = vld [vmem:[%s15205_s15] sm:$0xff] }
0x3757   :  { %v8247_v37 = vpack.c.bf16 %v8231_v54, %v8231_v54 }
0x3758   :  { %8717 = vmatpush.bf16.msrb.mxu0 %v11320_v44 }
0x3759   :  { %8567 = vmatpush.bf16.msrb.mxu1 %v11321_v23 }
0x375a   :  { %10150 = vmatmul.msk.bf16.vlgmr.msra.gmra.mxu1 %vm1407_vm5, %v8247_v37 }
0x375d   :  { %8568 = vmatpush.bf16.msrb.mxu1 %v11322_v7 }
0x3760   :  { %v8599_v29 = vpop.permute.xlu0 %8598 }
0x3761   :  { %8569 = vmatpush.bf16.msrb.mxu1 %v11323_v53 }
0x3762   :  { %10155 = vmatmul.msk.bf16.vlgmr.msra.gmra.mxu3 %vm215_vm0, %v8599_v29 }
0x3763   :  { %8966 = vmatpush.bf16.xpose.msra.mxu3 %v11847_v3 }
0x3765   :  { %8924 = vmatpush.bf16.xpose.msra.mxu1 %v11839_v60 }
0x377e   :  { %v8263_v19 = vpop.f32.mrf.mxu1 }
0x3786   :  { %v8265_v33 = vpop.f32.mrf.mxu1 }
0x379d   :  { %v8202_v52 = vpop.xlane.xlu2 %8201 }
0x379e   :  { %11010 = vrcp.f32 %v8202_v52 }
0x37a4   :  { %v11011_v21 = vpop.eup %11010  ;;  %v8279_v9 = vpop.f32.mrf.mxu2 }
0x37a5   :  { %v8234_v40 = vmul.f32 %v11011_v21, %v14714_v18  ;;  %v8515_v38 = vrot.slane %v8279_v9, 7  ;;  %v8295_v17 = vpop.f32.mrf.mxu3 }
0x37a6   :  { %v8517_v61 = vrot.slane %v8295_v17, 6 }
0x37a7   :  { %v8250_v41 = vpack.c.bf16 %v8234_v40, %v8234_v40  ;;  %v8516_v30 = vsel %vm1722_vm6, %v8515_v38, %v8263_v19  ;;  %v8311_v51 = vpop.f32.mrf.mxu0 }
0x37a8   :  { %v8518_v60 = vsel %vm1725_vm7, %v8517_v61, %v8516_v30  ;;  %v8519_v1 = vrot.slane %v8311_v51, 5 }
0x37a9   :  { %10153 = vmatmul.msk.bf16.vlgmr.msra.gmra.mxu0 %vm1407_vm5, %v8250_v41 }
0x37aa   :  { %v8520_v3 = vsel %vm1728_vm8, %v8519_v1, %v8518_v60  ;;  %8903 = vmatpush.bf16.xpose.msra.mxu0 %v11835_v56 }
0x37ac   :  { %v8281_v5 = vpop.f32.mrf.mxu2 }
0x37ad   :  { %v8297_v20 = vpop.f32.mrf.mxu3 }
0x37af   :  { %v8313_v6 = vpop.f32.mrf.mxu0 }
0x37b1   :  { %v8327_v18 = vpop.f32.mrf.mxu1 }
0x37b2   :  { %v8521_v47 = vrot.slane %v8327_v18, 4 }
0x37b4   :  { %v8522_v16 = vsel %vm1731_vm10, %v8521_v47, %v8520_v3 }
0x37b5   :  { %v8359_v4 = vpop.f32.mrf.mxu3 }
0x37b6   :  { %v8343_v22 = vpop.f32.mrf.mxu2  ;;  %v8525_v32 = vrot.slane %v8359_v4, 2 }
0x37b7   :  { %v8523_v36 = vrot.slane %v8343_v22, 3 }
0x37b8   :  { %v8375_v34 = vpop.f32.mrf.mxu0 }
0x37b9   :  { %v8524_v54 = vsel %vm15308_vm14, %v8523_v36, %v8522_v16  ;;  %v8329_v24 = vpop.f32.mrf.mxu1  ;;  %v8527_v37 = vrot.slane %v8375_v34, 1 }
0x37ba   :  { %v8526_v44 = vsel %vm15309_vm15, %v8525_v32, %v8524_v54 }
0x37bb   :  { %v8528_v56 = vsel %vm15310_vm1, %v8527_v37, %v8526_v44 }
0x37bd   :  { %v8361_v23 = vpop.f32.mrf.mxu3 }
0x37be   :  { %v8345_v7 = vpop.f32.mrf.mxu2 }
0x37c0   :  { %v8377_v29 = vpop.f32.mrf.mxu0 }
0x37c1   :  { %v8391_v53 = vpop.f32.mrf.mxu1 }
0x37c5   :  { %v8423_v19 = vpop.f32.mrf.mxu3 }
0x37c6   :  { %v8407_v33 = vpop.f32.mrf.mxu2  ;;  %v8543_v52 = vrot.slane %v8423_v19, 6 }
0x37c7   :  { %v8541_v21 = vrot.slane %v8407_v33, 7 }
0x37c8   :  { %v8439_v9 = vpop.f32.mrf.mxu0 }
0x37c9   :  { %v8542_v40 = vsel %vm1722_vm6, %v8541_v21, %v8391_v53  ;;  %v8393_v38 = vpop.f32.mrf.mxu1  ;;  %v8545_v17 = vrot.slane %v8439_v9, 5 }
0x37ca   :  { %v8544_v61 = vsel %vm1725_vm7, %v8543_v52, %v8542_v40  ;;  %v11324_v38 = vld [vmem:[%s15200_s10] ss:$0 sm:$0xff] }
0x37cb   :  { %v8546_v41 = vsel %vm1728_vm8, %v8545_v17, %v8544_v61  ;;  %v15315_v17 = vld [vmem:[#allocation24_spill] sm:$0xff] }
0x37cc   :  { %v255_v61 = vadd.f32 %v11324_v38, %v15315_v17 }
0x37cd   :  { %v8425_v30 = vpop.f32.mrf.mxu3 }
0x37ce   :  { %v8409_v51 = vpop.f32.mrf.mxu2 }
0x37d0   :  { %v8441_v60 = vpop.f32.mrf.mxu0 }
0x37d5   :  { %v8487_v1 = vpop.f32.mrf.mxu3 }
0x37d6   :  { %v8471_v3 = vpop.f32.mrf.mxu2  ;;  %v8551_v18 = vrot.slane %v8487_v1, 2 }
0x37d7   :  { %v8455_v5 = vpop.f32.mrf.mxu1  ;;  %v8549_v6 = vrot.slane %v8471_v3, 3 }
0x37d8   :  { %v8547_v20 = vrot.slane %v8455_v5, 4 }
0x37da   :  { %v8548_v47 = vsel %vm1731_vm10, %v8547_v20, %v8546_v41 }
0x37db   :  { %v8550_v16 = vsel %vm15311_vm2, %v8549_v6, %v8548_v47 }
0x37dc   :  { %v8552_v4 = vsel %vm15312_vm4, %v8551_v18, %v8550_v16 }
0x37dd   :  { %v8489_v22 = vpop.f32.mrf.mxu3 }
0x37de   :  { %v8473_v32 = vpop.f32.mrf.mxu2 }
0x37df   :  { %v8457_v36 = vpop.f32.mrf.mxu1 }
0x3826   :  { %v8503_v34 = vpop.f32.mrf.mxu0 }
0x3827   :  { %v8553_v54 = vrot.slane %v8503_v34, 1 }
0x3829   :  { %v8554_v24 = vsel %vm15313_vm11, %v8553_v54, %v8552_v4 }
0x382a   :  { %v10311_v37 = vpack.i.bf16 %v8554_v24, %v14442_v45 }
0x382c   :  { %10312 = vrot.lane.b32.xlu1 %v10311_v37, %s11529_s29 }
0x382e   :  { %v8505_v44 = vpop.f32.mrf.mxu0 }
0x389e   :  { %v14794_v23 = vpop.permute.xlu1 %10312 }
0x389f   :  { %v10315_v7 = vunpack.i.h.bf16 %v14794_v23  ;;  %v10314_v29 = vunpack.i.l.bf16 %v14794_v23 }
0x38a1   :  { %v8558_v53 = vsel %vm215_vm0, %v8528_v56, %v10314_v29  ;;  %v8612_v56 = vpop.f32.mrf.mxu3 }
0x38a2   :  { %v8559_v19 = vsel %vm682_vm9, %v8558_v53, %v10315_v7 }
0x38a3   :  { %v8560_v33 = vsel %vm15314_vm12, %v8559_v19, %v14451_v26 }
0x38a4   :  { %v8561_v52 = vpack.c.bf16 %v8560_v33, %v8560_v33 }
0x38a6   :  { %8570 = vmatmul.bf16.vlgmr.msrb.gmra.mxu1 %v8561_v52 }
0x38a7   :  { %9008 = vmatpush.bf16.xpose.msrb.mxu1 %v11855_v13 }
0x38a9   :  { %v8614_v30 = vpop.f32.mrf.mxu3 }
0x3923   :  { %v8571_v45 = vpop.f32.mrf.mxu1 }
0x3924   :  { %11012 = vtanh.f32 %v8571_v45 }
0x392a   :  { %v11013_v21 = vpop.eup %11012 }
0x392b   :  { %v8578_v9 = vpack.c.bf16 %v11013_v21, %v11013_v21  ;;  %9705 = vst.msk [vmem:[#allocation14 + $0x30] sm:$0xff] %vm215_vm0, %v11013_v21  ;;  %v8573_v40 = vpop.f32.mrf.mxu1 }
0x392d   :  { %10154 = vmatmul.msk.bf16.vlgmr.msrb.gmra.mxu2 %vm215_vm0, %v8578_v9 }
0x392e   :  { %8945 = vmatpush.bf16.xpose.msrb.mxu2 %v11843_v63 }
0x39b0   :  { %v8591_v41 = vpop.f32.mrf.mxu2 }
0x39b1   :  { %v8595_v13 = vadd.f32 %v8591_v41, %v255_v61 }
0x39b3   :  { %v8617_v51 = vadd.f32 %v8612_v56, %v8595_v13  ;;  %v8618_v60 = vadd.f32 %v8614_v30, %v8595_v13 }
0x39b5   :  { %11014 = vtanh.f32 %v8617_v51  ;;  %v10156_v63 = vmul.f32 -1.442695, %v8617_v51  ;;  %v10157_v47 = vmul.f32 -1.442695, %v8618_v60 }
0x39b6   :  { %11016 = vtanh.f32 %v8618_v60 }
0x39b7   :  { %11018 = vpow2.f32 %v10156_v63 }
0x39b8   :  { %v8593_v1 = vpop.f32.mrf.mxu2 }
0x39bb   :  { %v11015_v3 = vpop.eup %11014 }
0x39bc   :  { %v11017_v5 = vpop.eup %11016  ;;  %8663 = vrot.lane.b32.xlu2 %v11015_v3, %s11529_s29 }
0x39bd   :  { %8665 = vrot.lane.b32.xlu0 %v11017_v5, %s11529_s29  ;;  %v11019_v20 = vpop.eup %11018 }
0x39be   :  { %v8625_v6 = vadd.f32 1.0, %v11019_v20 }
0x39c0   :  { %11020 = vrcp.f32 %v8625_v6  ;;  %v8638_v54 = vand.u32 2147483648, %v8625_v6  ;;  %vm8632_vm14 = vweird.f32 %v8625_v6  ;;  %v8636_v24 = vand.u32 2147483647, %v8625_v6 }
0x39c1   :  { %11022 = vpow2.f32 %v10157_v47 }
0x39c2   :  { %v8639_v44 = vor.u32 1.1754944e-38, %v8638_v54  ;;  %vm8637_vm1 = vcmp.eq.f32.partialorder %v8636_v24, 8.507059e+37  ;;  %v11325_v24 = vld [vmem:[%s15202_s12] ss:$0 sm:$0xff] }
0x39c6   :  { %v11021_v18 = vpop.eup %11020 }
0x39c7   :  { %v8628_v16 = vmul.f32 %v11021_v18, %v8625_v6  ;;  %v11023_v32 = vpop.eup %11022  ;;  %vm8633_vm13 = vweird.f32 %v11021_v18 }
0x39c8   :  { %v8626_v36 = vadd.f32 1.0, %v11023_v32  ;;  %vm8634_vm15 = vmor %vm8632_vm14, %vm8633_vm13 }
0x39c9   :  { %v8629_v4 = vsub.f32 1.0, %v8628_v16 }
0x39ca   :  { %11024 = vrcp.f32 %v8626_v36  ;;  %v8653_v40 = vand.u32 2147483648, %v8626_v36  ;;  %vm8647_vm4 = vweird.f32 %v8626_v36  ;;  %v8651_v56 = vand.u32 2147483647, %v8626_v36 }
0x39cb   :  { %v8630_v22 = vmul.f32 %v11021_v18, %v8629_v4 }
0x39cc   :  { %v8654_v17 = vor.u32 1.1754944e-38, %v8653_v40  ;;  %vm8652_vm12 = vcmp.eq.f32.partialorder %v8651_v56, 8.507059e+37 }
0x39cd   :  { %v8631_v34 = vadd.f32 %v11021_v18, %v8630_v22 }
0x39cf   :  { %v8635_v37 = vsel %vm8634_vm15, %v11021_v18, %v8631_v34 }
0x39d0   :  { %v8640_v53 = vsel %vm8637_vm1, %v8639_v44, %v8635_v37  ;;  %v11025_v33 = vpop.eup %11024 }
0x39d1   :  { %v8643_v52 = vmul.f32 %v11025_v33, %v8626_v36  ;;  %vm8648_vm2 = vweird.f32 %v11025_v33  ;;  %v8659_v30 = vmul.f32 %v8640_v53, %v14399_v27 }
0x39d2   :  { %vm8649_vm11 = vmor %vm8647_vm4, %vm8648_vm2 }
0x39d3   :  { %v8644_v45 = vsub.f32 1.0, %v8643_v52 }
0x39d5   :  { %v8645_v21 = vmul.f32 %v11025_v33, %v8644_v45 }
0x39d7   :  { %v8646_v9 = vadd.f32 %v11025_v33, %v8645_v21 }
0x39d9   :  { %v8650_v38 = vsel %vm8649_vm11, %v11025_v33, %v8646_v9 }
0x39da   :  { %v8655_v41 = vsel %vm8652_vm12, %v8654_v17, %v8650_v38 }
0x39db   :  { %v8660_v60 = vmul.f32 %v8655_v41, %v14406_v11 }
0x3a16   :  { %v8664_v7 = vpop.permute.xlu2 %8663 }
0x3a17   :  { %v8669_v19 = vmul.f32 %v8664_v7, %v8640_v53 }
0x3a19   :  { %8673 = vrot.lane.b32.xlu1 %v8669_v19, %s11536_s7 }
0x3a2f   :  { %v8666_v61 = vpop.permute.xlu0 %8665 }
0x3a30   :  { %v8670_v13 = vmul.f32 %v8666_v61, %v8655_v41 }
0x3a32   :  { %8675 = vrot.lane.b32.xlu2 %v8670_v13, %s11536_s7 }
0x3a8b   :  { %v8674_v51 = vpop.permute.xlu1 %8673 }
0x3a8c   :  { %v8679_v1 = vadd.f32 %v8674_v51, %v8659_v30  ;;  %v8676_v3 = vpop.permute.xlu2 %8675 }
0x3a8d   :  { %v8680_v5 = vadd.f32 %v8676_v3, %v8660_v60 }
0x3a8e   :  { %11026 = vtanh.f32 %v8679_v1 }
0x3a8f   :  { %11028 = vtanh.f32 %v8680_v5 }
0x3a94   :  { %v11027_v63 = vpop.eup %11026 }
0x3a95   :  { %v11029_v20 = vpop.eup %11028  ;;  %8685 = vrot.lane.b32.xlu0 %v11027_v63, %s11529_s29 }
0x3a96   :  { %8687 = vrot.lane.b32.xlu1 %v11029_v20, %s11529_s29 }
0x3a9d   :  { %8701 = vrot.lane.b32.xlu0 %v14451_v26, %s11529_s29 }
0x3b07   :  { %v8686_v6 = vpop.permute.xlu0 %8685 }
0x3b08   :  { %v8691_v18 = vmul.f32 %v8686_v6, %v8640_v53  ;;  %v8688_v27 = vpop.permute.xlu1 %8687 }
0x3b09   :  { %v8692_v47 = vmul.f32 %v8688_v27, %v8655_v41 }
0x3b0b   :  { %v10316_v16 = vpack.i.bf16 %v8692_v47, %v8691_v18 }
0x3b0d   :  { %10317 = vrot.lane.b32.xlu2 %v10316_v16, %s11536_s7 }
0x3b0f   :  { %v8702_v32 = vpop.permute.xlu0 %8701 }
0x3b67   :  { %v10318_v11 = vpop.permute.xlu2 %10317 }
0x3b68   :  { %v10320_v4 = vunpack.i.h.bf16 %v10318_v11  ;;  %v10319_v22 = vunpack.i.l.bf16 %v10318_v11 }
0x3b6a   :  { %v8705_v36 = vsel %vm215_vm0, %v10320_v4, %v8702_v32  ;;  %v8704_v34 = vsel %vm215_vm0, %v10319_v22, %v10314_v29 }
0x3b6b   :  { %v8706_v54 = vpack.c.bf16 %v8705_v36, %v8704_v34 }
0x3b6d   :  { %10158 = vmatmul.msk.bf16.vlgmr.msrb.gmra.mxu0 %vm682_vm9, %v8706_v54 }
0x3b6e   :  { %8987 = vmatpush.bf16.xpose.msrb.mxu0 %v11851_v8 }
0x3bea   :  { %v8719_v26 = vpop.f32.mrf.mxu0 }
0x3beb   :  { %v8724_v37 = vadd.f32 %v11325_v24, %v8719_v26 }
0x3bed   :  { %11030 = vtanh.f32 %v8724_v37  ;;  %v10159_v33 = vmul.f32 -1.442695, %v8724_v37 }
0x3bf2   :  { %v8721_v44 = vpop.f32.mrf.mxu0 }
0x3bf3   :  { %v11031_v7 = vpop.eup %11030  ;;  %v8725_v53 = vadd.f32 %v11325_v24, %v8721_v44 }
0x3bf4   :  { %8770 = vrot.lane.b32.xlu1 %v11031_v7, %s11529_s29 }
0x3bf5   :  { %11032 = vtanh.f32 %v8725_v53  ;;  %v10160_v29 = vmul.f32 -1.442695, %v8725_v53 }
0x3bf7   :  { %11034 = vpow2.f32 %v10160_v29 }
0x3bfb   :  { %v11033_v23 = vpop.eup %11032 }
0x3bfc   :  { %8772 = vrot.lane.b32.xlu2 %v11033_v23, %s11529_s29 }
0x3bfd   :  { %v11035_v19 = vpop.eup %11034 }
0x3bfe   :  { %v8733_v8 = vadd.f32 1.0, %v11035_v19 }
0x3c00   :  { %11036 = vrcp.f32 %v8733_v8  ;;  %v8760_v61 = vand.u32 2147483648, %v8733_v8  ;;  %vm8754_vm14 = vweird.f32 %v8733_v8  ;;  %v8758_v41 = vand.u32 2147483647, %v8733_v8 }
0x3c01   :  { %11038 = vpow2.f32 %v10159_v33 }
0x3c02   :  { %v8761_v51 = vor.u32 1.1754944e-38, %v8760_v61  ;;  %vm8759_vm1 = vcmp.eq.f32.partialorder %v8758_v41, 8.507059e+37 }
0x3c06   :  { %v11037_v52 = vpop.eup %11036 }
0x3c07   :  { %v11039_v45 = vpop.eup %11038  ;;  %v8750_v21 = vmul.f32 %v11037_v52, %v8733_v8  ;;  %vm8755_vm13 = vweird.f32 %v11037_v52 }
0x3c08   :  { %v8732_v9 = vadd.f32 1.0, %v11039_v45  ;;  %vm8756_vm15 = vmor %vm8754_vm14, %vm8755_vm13  ;;  %vm15321_vm13 = vcmask 1046534   ;;  %vm15322_vm14 = vcmask 1047559  }
0x3c09   :  { %v8751_v40 = vsub.f32 1.0, %v8750_v21 }
0x3c0a   :  { %11040 = vrcp.f32 %v8732_v9  ;;  %v8745_v6 = vand.u32 2147483648, %v8732_v9  ;;  %vm8739_vm4 = vweird.f32 %v8732_v9  ;;  %v8743_v18 = vand.u32 2147483647, %v8732_v9 }
0x3c0b   :  { %v8752_v56 = vmul.f32 %v11037_v52, %v8751_v40 }
0x3c0c   :  { %v8746_v47 = vor.u32 1.1754944e-38, %v8745_v6  ;;  %vm8744_vm12 = vcmp.eq.f32.partialorder %v8743_v18, 8.507059e+37 }
0x3c0d   :  { %v8753_v38 = vadd.f32 %v11037_v52, %v8752_v56 }
0x3c0f   :  { %v8757_v13 = vsel %vm8756_vm15, %v11037_v52, %v8753_v38 }
0x3c10   :  { %v11041_v17 = vpop.eup %11040  ;;  %v8762_v1 = vsel %vm8759_vm1, %v8761_v51, %v8757_v13 }
0x3c11   :  { %v8735_v30 = vmul.f32 %v11041_v17, %v8732_v9  ;;  %vm8740_vm2 = vweird.f32 %v11041_v17  ;;  %v8767_v22 = vmul.f32 %v8762_v1, %v14438_v15 }
0x3c12   :  { %vm8741_vm11 = vmor %vm8739_vm4, %vm8740_vm2 }
0x3c13   :  { %v8736_v5 = vsub.f32 1.0, %v8735_v30 }
0x3c15   :  { %v8737_v63 = vmul.f32 %v11041_v17, %v8736_v5 }
0x3c17   :  { %v8738_v20 = vadd.f32 %v11041_v17, %v8737_v63 }
0x3c19   :  { %v8742_v27 = vsel %vm8741_vm11, %v11041_v17, %v8738_v20 }
0x3c1a   :  { %v8747_v11 = vsel %vm8744_vm12, %v8746_v47, %v8742_v27 }
0x3c1b   :  { %v8766_v54 = vmul.f32 %v8747_v11, %v14433_v55 }
0x3c56   :  { %v8773_v60 = vpop.permute.xlu2 %8772 }
0x3c57   :  { %v8777_v3 = vmul.f32 %v8773_v60, %v8762_v1 }
0x3c59   :  { %8782 = vrot.lane.b32.xlu1 %v8777_v3, %s11536_s7 }
0x3c66   :  { %v8771_v16 = vpop.permute.xlu1 %8770 }
0x3c67   :  { %v8776_v4 = vmul.f32 %v8771_v16, %v8747_v11 }
0x3c69   :  { %8780 = vrot.lane.b32.xlu0 %v8776_v4, %s11536_s7 }
0x3ccb   :  { %v8783_v32 = vpop.permute.xlu1 %8782 }
0x3ccc   :  { %v8787_v36 = vadd.f32 %v8783_v32, %v8767_v22 }
0x3cce   :  { %11042 = vtanh.f32 %v8787_v36 }
0x3cd4   :  { %v11043_v34 = vpop.eup %11042 }
0x3cd5   :  { %8794 = vrot.lane.b32.xlu0 %v11043_v34, %s11529_s29 }
0x3cdb   :  { %v8781_v26 = vpop.permute.xlu0 %8780 }
0x3cdc   :  { %v8786_v24 = vadd.f32 %v8781_v26, %v8766_v54 }
0x3cde   :  { %11044 = vtanh.f32 %v8786_v24 }
0x3ce4   :  { %v11045_v37 = vpop.eup %11044 }
0x3ce5   :  { %8792 = vrot.lane.b32.xlu2 %v11045_v37, %s11529_s29 }
0x3d3f   :  { %v8793_v44 = vpop.permute.xlu2 %8792 }
0x3d40   :  { %v14840_v7 = vmul.f32 %v8793_v44, %v8747_v11 }
0x3d42   :  { %v8830_v15 = vpack.c.bf16 %v14840_v7, %v14840_v7  ;;  %v8802_v53 = vrot.slane %v14840_v7, 1  ;;  %v8803_v23 = vrot.slane %v14840_v7, 2  ;;  %v8804_v29 = vrot.slane %v14840_v7, 3 }
0x3d43   :  { %v8805_v55 = vrot.slane %v14840_v7, 4  ;;  %v8806_v52 = vrot.slane %v14840_v7, 5  ;;  %v8807_v30 = vrot.slane %v14840_v7, 6  ;;  %v8808_v5 = vrot.slane %v14840_v7, 7 }
0x3d44   :  { %v8847_v19 = vunpack.c.l.b16 %v8830_v15  ;;  %v8831_v8 = vpack.c.bf16 %v8802_v53, %v8802_v53  ;;  %v8832_v33 = vpack.c.bf16 %v8803_v23, %v8803_v23  ;;  %v8833_v40 = vpack.c.bf16 %v8804_v29, %v8804_v29 }
0x3d45   :  { %v8834_v17 = vpack.c.bf16 %v8805_v55, %v8805_v55  ;;  %v8835_v61 = vpack.c.bf16 %v8806_v52, %v8806_v52  ;;  %v8836_v20 = vpack.c.bf16 %v8807_v30, %v8807_v30  ;;  %v8837_v27 = vpack.c.bf16 %v8808_v5, %v8808_v5 }
0x3d46   :  { %v8848_v45 = vpack.c.b16 %v8847_v19, %v8847_v19  ;;  %v8868_v21 = vunpack.c.l.b16 %v8831_v8  ;;  %v8889_v9 = vunpack.c.l.b16 %v8832_v33  ;;  %v8910_v13 = vunpack.c.l.b16 %v8833_v40 }
0x3d47   :  { %v8795_v41 = vpop.permute.xlu0 %8794  ;;  %v8931_v60 = vunpack.c.l.b16 %v8834_v17  ;;  %v8952_v3 = vunpack.c.l.b16 %v8835_v61  ;;  %v8994_v11 = vunpack.c.l.b16 %v8837_v27 }
0x3d48   :  { %8849 = vrot.lane.b32.xlu1 %v8848_v45, %s11536_s7  ;;  %v8869_v56 = vpack.c.b16 %v8868_v21, %v8868_v21  ;;  %v8890_v38 = vpack.c.b16 %v8889_v9, %v8889_v9  ;;  %v14853_v51 = vmul.f32 %v8795_v41, %v8762_v1  ;;  %v8911_v63 = vpack.c.b16 %v8910_v13, %v8910_v13 }
0x3d49   :  { %v8932_v6 = vpack.c.b16 %v8931_v60, %v8931_v60  ;;  %v8953_v18 = vpack.c.b16 %v8952_v3, %v8952_v3  ;;  %v8973_v1 = vunpack.c.l.b16 %v8836_v20  ;;  %v8995_v54 = vpack.c.b16 %v8994_v11, %v8994_v11 }
0x3d4a   :  { %8870 = vrot.lane.b32.xlu2 %v8869_v56, %s11536_s7  ;;  %8891 = vrot.lane.b32.xlu0 %v8890_v38, %s11536_s7  ;;  %v8838_v47 = vpack.c.bf16 %v14853_v51, %v14853_v51  ;;  %v8809_v16 = vrot.slane %v14853_v51, 1  ;;  %v8811_v22 = vrot.slane %v14853_v51, 3  ;;  %v8810_v32 = vrot.slane %v14853_v51, 2 }
0x3d4b   :  { %v8974_v36 = vpack.c.b16 %v8973_v1, %v8973_v1  ;;  %v8812_v15 = vrot.slane %v14853_v51, 4  ;;  %v8814_v29 = vrot.slane %v14853_v51, 6  ;;  %v8813_v55 = vrot.slane %v14853_v51, 5  ;;  %v15319_v1 = vld [vmem:[#allocation29_spill] sm:$0xff] }
0x3d4c   :  { %v9015_v4 = vunpack.c.l.b16 %v8838_v47  ;;  %v8839_v34 = vpack.c.bf16 %v8809_v16, %v8809_v16  ;;  %v8841_v24 = vpack.c.bf16 %v8811_v22, %v8811_v22  ;;  %v8840_v37 = vpack.c.bf16 %v8810_v32, %v8810_v32  ;;  %v15317_v47 = vld [vmem:[#allocation27_spill] sm:$0xff]  ;;  %v11326_v16 = vld [vmem:[%s15196_s6 + $0x1] sm:$0x1] }
0x3d4d   :  { %v8842_v8 = vpack.c.bf16 %v8812_v15, %v8812_v15  ;;  %v8844_v45 = vpack.c.bf16 %v8814_v29, %v8814_v29  ;;  %v8843_v21 = vpack.c.bf16 %v8813_v55, %v8813_v55  ;;  %v8815_v40 = vrot.slane %v14853_v51, 7 }
0x3d4e   :  { %v9016_v26 = vpack.c.b16 %v9015_v4, %v9015_v4  ;;  %v9036_v44 = vunpack.c.l.b16 %v8839_v34  ;;  %v9078_v53 = vunpack.c.l.b16 %v8841_v24  ;;  %v9057_v23 = vunpack.c.l.b16 %v8840_v37  ;;  %v11328_v24 = vld [vmem:[%s15196_s6] sm:$0x1] }
0x3d4f   :  { %v9099_v9 = vunpack.c.l.b16 %v8842_v8  ;;  %v9141_v56 = vunpack.c.l.b16 %v8844_v45  ;;  %v9120_v38 = vunpack.c.l.b16 %v8843_v21  ;;  %v8845_v61 = vpack.c.bf16 %v8815_v40, %v8815_v40  ;;  %v11331_v40 = vld [vmem:[%s15196_s6 + $0x6] sm:$0x1] }
0x3d50   :  { %8912 = vrot.lane.b32.xlu1 %v8911_v63, %s11536_s7  ;;  %v9037_v19 = vpack.c.b16 %v9036_v44, %v9036_v44  ;;  %v9079_v33 = vpack.c.b16 %v9078_v53, %v9078_v53  ;;  %v9058_v52 = vpack.c.b16 %v9057_v23, %v9057_v23  ;;  %v11329_v23 = vld [vmem:[%s15196_s6 + $0x3] sm:$0x1] }
0x3d51   :  { %v9100_v17 = vpack.c.b16 %v9099_v9, %v9099_v9  ;;  %v9142_v41 = vpack.c.b16 %v9141_v56, %v9141_v56  ;;  %v9121_v13 = vpack.c.b16 %v9120_v38, %v9120_v38  ;;  %v9162_v30 = vunpack.c.l.b16 %v8845_v61 }
0x3d52   :  { %8933 = vrot.lane.b32.xlu2 %v8932_v6, %s11536_s7  ;;  %8954 = vrot.lane.b32.xlu0 %v8953_v18, %s11536_s7 }
0x3d53   :  { %v9163_v60 = vpack.c.b16 %v9162_v30, %v9162_v30 }
0x3d58   :  { %8975 = vrot.lane.b32.xlu1 %v8974_v36, %s11536_s7  ;;  %v11327_v36 = vld [vmem:[%s15196_s6 + $0x2] sm:$0x1] }
0x3d5a   :  { %8996 = vrot.lane.b32.xlu2 %v8995_v54, %s11536_s7  ;;  %9017 = vrot.lane.b32.xlu0 %v9016_v26, %s11536_s7 }
0x3d60   :  { %9038 = vrot.lane.b32.xlu1 %v9037_v19, %s11536_s7 }
0x3d62   :  { %9080 = vrot.lane.b32.xlu0 %v9079_v33, %s11536_s7  ;;  %9059 = vrot.lane.b32.xlu2 %v9058_v52, %s11536_s7  ;;  %v11330_v33 = vld [vmem:[%s15196_s6 + $0x5] sm:$0x1] }
0x3d68   :  { %9101 = vrot.lane.b32.xlu1 %v9100_v17, %s11536_s7  ;;  %v11332_v17 = vld [vmem:[%s15196_s6 + $0x4] sm:$0x1] }
0x3d6a   :  { %9143 = vrot.lane.b32.xlu0 %v9142_v41, %s11536_s7  ;;  %9122 = vrot.lane.b32.xlu2 %v9121_v13, %s11536_s7 }
0x3d70   :  { %9164 = vrot.lane.b32.xlu1 %v9163_v60, %s11536_s7 }
0x3da4   :  { %v8871_v3 = vpop.permute.xlu2 %8870 }
0x3da5   :  { %10162 = vmatmul.msk.bf16.vlgmr.msrb.gmra.mxu3 %vm215_vm0, %v8871_v3 }
0x3da6   :  { %9050 = vmatpush.bf16.xpose.msrb.mxu3 %v11858_v14 }
0x3dac   :  { %v8934_v18 = vpop.permute.xlu2 %8933 }
0x3dba   :  { %v8850_v5 = vpop.permute.xlu1 %8849 }
0x3dbb   :  { %10161 = vmatmul.msk.bf16.vlgmr.msra.gmra.mxu2 %vm215_vm0, %v8850_v5  ;;  %v11333_v5 = vld [vmem:[%s15196_s6 + $0x7] sm:$0x1] }
0x3dbc   :  { %9029 = vmatpush.bf16.xpose.msra.mxu2 %v11864_v28  ;;  %v8892_v63 = vpop.permute.xlu0 %8891  ;;  %v8997_v28 = vpop.permute.xlu2 %8996 }
0x3dbd   :  { %10163 = vmatmul.msk.bf16.vlgmr.msra.gmra.mxu0 %vm215_vm0, %v8892_v63 }
0x3dbe   :  { %9071 = vmatpush.bf16.xpose.msra.mxu0 %v11874_v35 }
0x3dc2   :  { %v8913_v20 = vpop.permute.xlu1 %8912 }
0x3dc3   :  { %10164 = vmatmul.msk.bf16.vlgmr.msra.gmra.mxu1 %vm215_vm0, %v8913_v20 }
0x3dc4   :  { %9092 = vmatpush.bf16.xpose.msra.mxu1 %v11868_v31  ;;  %v8955_v6 = vpop.permute.xlu0 %8954 }
0x3dc5   :  { %10166 = vmatmul.msk.bf16.vlgmr.msra.gmra.mxu3 %vm215_vm0, %v8955_v6 }
0x3dc6   :  { %9134 = vmatpush.bf16.xpose.msra.mxu3 %v11884_v43  ;;  %v9060_v43 = vpop.permute.xlu2 %9059 }
0x3dca   :  { %v8976_v14 = vpop.permute.xlu1 %8975 }
0x3dcb   :  { %10165 = vmatmul.msk.bf16.vlgmr.msrb.gmra.mxu2 %vm215_vm0, %v8934_v18 }
0x3dcc   :  { %9113 = vmatpush.bf16.xpose.msrb.mxu2 %v11881_v42  ;;  %v9018_v31 = vpop.permute.xlu0 %9017 }
0x3dcd   :  { %10167 = vmatmul.msk.bf16.vlgmr.msrb.gmra.mxu0 %vm215_vm0, %v8976_v14  ;;  %v11334_v14 = vld [vmem:[%s15196_s6 + $0x9] sm:$0x1] }
0x3dce   :  { %9155 = vmatpush.bf16.xpose.msrb.mxu0 %v11898_v48  ;;  %v9123_v48 = vpop.permute.xlu2 %9122 }
0x3dd2   :  { %v9039_v35 = vpop.permute.xlu1 %9038 }
0x3dd3   :  { %10168 = vmatmul.msk.bf16.vlgmr.msrb.gmra.mxu1 %vm215_vm0, %v8997_v28 }
0x3dd4   :  { %9176 = vmatpush.bf16.xpose.msrb.mxu1 %v11891_v46  ;;  %v9081_v42 = vpop.permute.xlu0 %9080  ;;  %v15316_v46 = vld [vmem:[#allocation28_spill] sm:$0xff] }
0x3dd5   :  { %10170 = vmatmul.msk.bf16.vlgmr.msrb.gmra.mxu3 %vm215_vm0, %v9039_v35 }
0x3dd6   :  { %9400 = vmatpush.bf16.msrb.mxu3 %v12115_v25 }
0x3dda   :  { %v9102_v25 = vpop.permute.xlu1 %9101 }
0x3ddb   :  { %10169 = vmatmul.msk.bf16.vlgmr.msra.gmra.mxu2 %vm215_vm0, %v9018_v31 }
0x3ddc   :  { %9384 = vmatpush.bf16.msra.mxu2 %v12126_v12  ;;  %v9144_v27 = vpop.permute.xlu0 %9143  ;;  %v15318_v12 = vld [vmem:[#allocation30_spill] sm:$0xff] }
0x3ddd   :  { %10171 = vmatmul.msk.bf16.vlgmr.msra.gmra.mxu0 %vm215_vm0, %v9060_v43 }
0x3dde   :  { %9416 = vmatpush.bf16.msra.mxu0 %v15301_v0 }
0x3de2   :  { %v9165_v0 = vpop.permute.xlu1 %9164 }
0x3de3   :  { %10172 = vmatmul.msk.bf16.vlgmr.msra.gmra.mxu1 %vm215_vm0, %v9081_v42  ;;  %v11335_v42 = vld [vmem:[%s15196_s6 + $0xa] sm:$0x1] }
0x3de4   :  { %9432 = vmatpush.bf16.msra.mxu1 %v15302_v59 }
0x3de5   :  { %10174 = vmatmul.msk.bf16.vlgmr.msra.gmra.mxu3 %vm215_vm0, %v9123_v48 }
0x3de6   :  { %9464 = vmatpush.bf16.msra.mxu3 %v15316_v46 }
0x3deb   :  { %10173 = vmatmul.msk.bf16.vlgmr.msrb.gmra.mxu2 %vm215_vm0, %v9102_v25  ;;  %v11336_v25 = vld [vmem:[%s15196_s6 + $0x8] sm:$0x1] }
0x3dec   :  { %9448 = vmatpush.bf16.msrb.mxu2 %v15317_v47 }
0x3ded   :  { %10175 = vmatmul.msk.bf16.vlgmr.msrb.gmra.mxu0 %vm215_vm0, %v9144_v27 }
0x3dee   :  { %9480 = vmatpush.bf16.msrb.mxu0 %v15318_v12 }
0x3df3   :  { %10176 = vmatmul.msk.bf16.vlgmr.msrb.gmra.mxu1 %vm215_vm0, %v9165_v0 }
0x3df4   :  { %9496 = vmatpush.bf16.msrb.mxu1 %v15319_v1 }
0x3e28   :  { %v8884_v59 = vpop.f32.mrf.mxu3 }
0x3e29   :  { %v14913_v11 = vadd.f32 %v11326_v16, %v8884_v59  ;;  %v11337_v16 = vld [vmem:[%s15196_s6 + $0xb] sm:$0x1] }
0x3e2b   :  { %v9185_v4 = vsel %vm1214_vm3, %v14913_v11, -inf }
0x3e2c   :  { %9186 = vmax.xlane.f32.xlu0 %v9185_v4 }
0x3e30   :  { %v8886_v22 = vpop.f32.mrf.mxu3 }
0x3e3a   :  { %v8905_v32 = vpop.f32.mrf.mxu0 }
0x3e3b   :  { %v14920_v34 = vadd.f32 %v11327_v36, %v8905_v32 }
0x3e3d   :  { %v9188_v54 = vsel %vm1214_vm3, %v14920_v34, -inf }
0x3e3e   :  { %v8863_v26 = vpop.f32.mrf.mxu2  ;;  %9189 = vmax.xlane.f32.xlu1 %v9188_v54  ;;  %v11338_v54 = vld [vmem:[%s15196_s6 + $0xd] sm:$0x1] }
0x3e3f   :  { %v14927_v37 = vadd.f32 %v11328_v24, %v8863_v26 }
0x3e40   :  { %v8926_v44 = vpop.f32.mrf.mxu1 }
0x3e41   :  { %v9182_v15 = vsel %vm1214_vm3, %v14927_v37, -inf  ;;  %v14934_v29 = vadd.f32 %v11329_v23, %v8926_v44  ;;  %v11339_v23 = vld [vmem:[%s15196_s6 + $0xe] sm:$0x1] }
0x3e42   :  { %9183 = vmax.xlane.f32.xlu2 %v9182_v15  ;;  %v8907_v53 = vpop.f32.mrf.mxu0 }
0x3e43   :  { %v9191_v45 = vsel %vm1214_vm3, %v14934_v29, -inf }
0x3e46   :  { %v8865_v55 = vpop.f32.mrf.mxu2 }
0x3e48   :  { %v8928_v19 = vpop.f32.mrf.mxu1  ;;  %v8968_v8 = vpop.f32.mrf.mxu3 }
0x3e49   :  { %v14939_v52 = vadd.f32 %v11330_v33, %v8968_v8  ;;  %v11340_v19 = vld [vmem:[%s15196_s6 + $0xc] sm:$0x1] }
0x3e4a   :  { %9192 = vmax.xlane.f32.xlu2 %v9191_v45  ;;  %v8989_v21 = vpop.f32.mrf.mxu0 }
0x3e4b   :  { %v9197_v9 = vsel %vm1214_vm3, %v14939_v52, -inf  ;;  %v14948_v56 = vadd.f32 %v11331_v40, %v8989_v21 }
0x3e4c   :  { %9198 = vmax.xlane.f32.xlu1 %v9197_v9 }
0x3e4d   :  { %v9200_v60 = vsel %vm1214_vm3, %v14948_v56, -inf }
0x3e4e   :  { %v8947_v38 = vpop.f32.mrf.mxu2 }
0x3e4f   :  { %v14953_v61 = vadd.f32 %v11332_v17, %v8947_v38 }
0x3e50   :  { %v8970_v41 = vpop.f32.mrf.mxu3  ;;  %v9010_v13 = vpop.f32.mrf.mxu1 }
0x3e51   :  { %v9194_v30 = vsel %vm1214_vm3, %v14953_v61, -inf  ;;  %v14962_v63 = vadd.f32 %v11333_v5, %v9010_v13 }
0x3e52   :  { %9195 = vmax.xlane.f32.xlu0 %v9194_v30  ;;  %v8991_v3 = vpop.f32.mrf.mxu0  ;;  %9201 = vmax.xlane.f32.xlu2 %v9200_v60 }
0x3e53   :  { %v9203_v35 = vsel %vm1214_vm3, %v14962_v63, -inf }
0x3e56   :  { %v8949_v20 = vpop.f32.mrf.mxu2 }
0x3e58   :  { %v9012_v6 = vpop.f32.mrf.mxu1  ;;  %v9052_v18 = vpop.f32.mrf.mxu3 }
0x3e59   :  { %v14967_v28 = vadd.f32 %v11334_v14, %v9052_v18 }
0x3e5a   :  { %9204 = vmax.xlane.f32.xlu0 %v9203_v35  ;;  %v9073_v31 = vpop.f32.mrf.mxu0 }
0x3e5b   :  { %v9209_v43 = vsel %vm1214_vm3, %v14967_v28, -inf  ;;  %v14976_v48 = vadd.f32 %v11335_v42, %v9073_v31 }
0x3e5c   :  { %9210 = vmax.xlane.f32.xlu2 %v9209_v43 }
0x3e5d   :  { %v9212_v0 = vsel %vm1214_vm3, %v14976_v48, -inf }
0x3e5e   :  { %v9031_v46 = vpop.f32.mrf.mxu2 }
0x3e5f   :  { %v14981_v27 = vadd.f32 %v11336_v25, %v9031_v46 }
0x3e60   :  { %v9054_v47 = vpop.f32.mrf.mxu3  ;;  %v9094_v12 = vpop.f32.mrf.mxu1 }
0x3e61   :  { %v9206_v1 = vsel %vm1214_vm3, %v14981_v27, -inf  ;;  %v14990_v4 = vadd.f32 %v11337_v16, %v9094_v12 }
0x3e62   :  { %v9075_v59 = vpop.f32.mrf.mxu0  ;;  %9213 = vmax.xlane.f32.xlu0 %v9212_v0  ;;  %9207 = vmax.xlane.f32.xlu1 %v9206_v1  ;;  %v11341_v0 = vld [vmem:[%s15196_s6 + $0xf] sm:$0x1] }
0x3e63   :  { %v9215_v24 = vsel %vm1214_vm3, %v14990_v4, -inf }
0x3e66   :  { %v9033_v22 = vpop.f32.mrf.mxu2 }
0x3e68   :  { %v9096_v32 = vpop.f32.mrf.mxu1  ;;  %v9136_v36 = vpop.f32.mrf.mxu3 }
0x3e69   :  { %v14995_v26 = vadd.f32 %v11338_v54, %v9136_v36 }
0x3e6a   :  { %9216 = vmax.xlane.f32.xlu1 %v9215_v24  ;;  %v9157_v44 = vpop.f32.mrf.mxu0 }
0x3e6b   :  { %v9221_v15 = vsel %vm1214_vm3, %v14995_v26, -inf  ;;  %v15004_v55 = vadd.f32 %v11339_v23, %v9157_v44 }
0x3e6c   :  { %9222 = vmax.xlane.f32.xlu0 %v9221_v15 }
0x3e6d   :  { %v9224_v40 = vsel %vm1214_vm3, %v15004_v55, -inf }
0x3e6e   :  { %v9115_v53 = vpop.f32.mrf.mxu2 }
0x3e6f   :  { %v15009_v8 = vadd.f32 %v11340_v19, %v9115_v53 }
0x3e70   :  { %v9138_v33 = vpop.f32.mrf.mxu3  ;;  %v9178_v45 = vpop.f32.mrf.mxu1 }
0x3e71   :  { %v9218_v21 = vsel %vm1214_vm3, %v15009_v8, -inf  ;;  %v15035_v1 = vadd.f32 %v11341_v0, %v9178_v45 }
0x3e72   :  { %9219 = vmax.xlane.f32.xlu2 %v9218_v21  ;;  %v9159_v9 = vpop.f32.mrf.mxu0 }
0x3e73   :  { %v9227_v54 = vsel %vm1214_vm3, %v15035_v1, -inf }
0x3e74   :  { %9225 = vmax.xlane.f32.xlu0 %v9224_v40 }
0x3e76   :  { %v9117_v38 = vpop.f32.mrf.mxu2 }
0x3e78   :  { %v9180_v17 = vpop.f32.mrf.mxu1 }
0x3e9f   :  { %v9187_v41 = vpop.xlane.xlu0 %9186 }
0x3ea0   :  { %v9231_v13 = vsub.f32 %v14913_v11, %v9187_v41 }
0x3ea2   :  { %v9248_v30 = vmul.f32 1.442695, %v9231_v13 }
0x3ea4   :  { %11046 = vpow2.f32 %v9248_v30 }
0x3eaa   :  { %v15016_v60 = vpop.eup %11046 }
0x3eab   :  { %v9281_v3 = vsel %vm1214_vm3, %v15016_v60, 0.0 }
0x3eac   :  { %9282 = vadd.xlane.f32.xlu2 %v9281_v3 }
0x3eb1   :  { %v9190_v5 = vpop.xlane.xlu1 %9189 }
0x3eb2   :  { %v9232_v20 = vsub.f32 %v14920_v34, %v9190_v5 }
0x3eb4   :  { %v9250_v6 = vmul.f32 1.442695, %v9232_v20 }
0x3eb5   :  { %v9184_v18 = vpop.xlane.xlu2 %9183 }
0x3eb6   :  { %11048 = vpow2.f32 %v9250_v6  ;;  %v9230_v14 = vsub.f32 %v14927_v37, %v9184_v18 }
0x3eb8   :  { %v9246_v35 = vmul.f32 1.442695, %v9230_v14 }
0x3eba   :  { %11050 = vpow2.f32 %v9246_v35 }
0x3ebc   :  { %v15022_v31 = vpop.eup %11048 }
0x3ebd   :  { %v9193_v11 = vpop.xlane.xlu2 %9192  ;;  %v9284_v43 = vsel %vm1214_vm3, %v15022_v31, 0.0 }
0x3ebe   :  { %v9233_v42 = vsub.f32 %v14934_v29, %v9193_v11  ;;  %9285 = vadd.xlane.f32.xlu2 %v9284_v43 }
0x3ebf   :  { %v9199_v46 = vpop.xlane.xlu1 %9198 }
0x3ec0   :  { %v15027_v25 = vpop.eup %11050  ;;  %v9252_v34 = vmul.f32 1.442695, %v9233_v42  ;;  %v9235_v47 = vsub.f32 %v14939_v52, %v9199_v46 }
0x3ec1   :  { %v9278_v37 = vsel %vm1214_vm3, %v15027_v25, 0.0 }
0x3ec2   :  { %11052 = vpow2.f32 %v9252_v34  ;;  %v9256_v12 = vmul.f32 1.442695, %v9235_v47  ;;  %9279 = vadd.xlane.f32.xlu1 %v9278_v37 }
0x3ec4   :  { %11054 = vpow2.f32 %v9256_v12 }
0x3ec5   :  { %v9202_v29 = vpop.xlane.xlu2 %9201  ;;  %v9196_v59 = vpop.xlane.xlu0 %9195 }
0x3ec6   :  { %v9236_v16 = vsub.f32 %v14948_v56, %v9202_v29  ;;  %v9234_v22 = vsub.f32 %v14953_v61, %v9196_v59 }
0x3ec8   :  { %v15039_v52 = vpop.eup %11052  ;;  %v9258_v32 = vmul.f32 1.442695, %v9236_v16  ;;  %v9254_v36 = vmul.f32 1.442695, %v9234_v22 }
0x3ec9   :  { %v9287_v24 = vsel %vm1214_vm3, %v15039_v52, 0.0 }
0x3eca   :  { %v15045_v44 = vpop.eup %11054  ;;  %11056 = vpow2.f32 %v9258_v32  ;;  %9228 = vmax.xlane.f32.xlu1 %v9227_v54  ;;  %9288 = vadd.xlane.f32.xlu0 %v9287_v24 }
0x3ecb   :  { %11058 = vpow2.f32 %v9254_v36  ;;  %v9293_v56 = vsel %vm1214_vm3, %v15045_v44, 0.0 }
0x3ecc   :  { %9294 = vadd.xlane.f32.xlu2 %v9293_v56 }
0x3ecd   :  { %v9205_v61 = vpop.xlane.xlu0 %9204 }
0x3ece   :  { %v9237_v15 = vsub.f32 %v14962_v63, %v9205_v61 }
0x3ecf   :  { %v9211_v53 = vpop.xlane.xlu2 %9210 }
0x3ed0   :  { %v15050_v23 = vpop.eup %11056  ;;  %v9260_v19 = vmul.f32 1.442695, %v9237_v15  ;;  %v9239_v33 = vsub.f32 %v14967_v28, %v9211_v53 }
0x3ed1   :  { %v15053_v45 = vpop.eup %11058  ;;  %v9296_v21 = vsel %vm1214_vm3, %v15050_v23, 0.0 }
0x3ed2   :  { %11060 = vpow2.f32 %v9260_v19  ;;  %v9264_v9 = vmul.f32 1.442695, %v9239_v33  ;;  %9297 = vadd.xlane.f32.xlu0 %v9296_v21  ;;  %v9290_v40 = vsel %vm1214_vm3, %v15053_v45, 0.0 }
0x3ed3   :  { %9291 = vadd.xlane.f32.xlu1 %v9290_v40 }
0x3ed4   :  { %11062 = vpow2.f32 %v9264_v9 }
0x3ed5   :  { %v9208_v63 = vpop.xlane.xlu1 %9207  ;;  %v9214_v38 = vpop.xlane.xlu0 %9213 }
0x3ed6   :  { %v9238_v17 = vsub.f32 %v14981_v27, %v9208_v63  ;;  %v9240_v41 = vsub.f32 %v14976_v48, %v9214_v38 }
0x3ed8   :  { %v15061_v28 = vpop.eup %11060  ;;  %v9262_v13 = vmul.f32 1.442695, %v9238_v17  ;;  %v9266_v30 = vmul.f32 1.442695, %v9240_v41 }
0x3ed9   :  { %v9299_v3 = vsel %vm1214_vm3, %v15061_v28, 0.0 }
0x3eda   :  { %v15065_v5 = vpop.eup %11062  ;;  %11064 = vpow2.f32 %v9262_v13 }
0x3edb   :  { %11066 = vpow2.f32 %v9266_v30  ;;  %9300 = vadd.xlane.f32.xlu1 %v9299_v3  ;;  %v9305_v20 = vsel %vm1214_vm3, %v15065_v5, 0.0 }
0x3edc   :  { %9306 = vadd.xlane.f32.xlu0 %v9305_v20 }
0x3edd   :  { %v9217_v6 = vpop.xlane.xlu1 %9216 }
0x3ede   :  { %v9241_v27 = vsub.f32 %v14990_v4, %v9217_v6 }
0x3edf   :  { %v9223_v48 = vpop.xlane.xlu0 %9222 }
0x3ee0   :  { %v15070_v18 = vpop.eup %11064  ;;  %v9268_v14 = vmul.f32 1.442695, %v9241_v27  ;;  %v9243_v35 = vsub.f32 %v14995_v26, %v9223_v48 }
0x3ee1   :  { %v15073_v11 = vpop.eup %11066  ;;  %v9302_v43 = vsel %vm1214_vm3, %v15070_v18, 0.0 }
0x3ee2   :  { %11068 = vpow2.f32 %v9268_v14  ;;  %v9272_v42 = vmul.f32 1.442695, %v9243_v35  ;;  %9303 = vadd.xlane.f32.xlu2 %v9302_v43  ;;  %v9308_v46 = vsel %vm1214_vm3, %v15073_v11, 0.0 }
0x3ee3   :  { %9309 = vadd.xlane.f32.xlu1 %v9308_v46 }
0x3ee4   :  { %11070 = vpow2.f32 %v9272_v42 }
0x3ee5   :  { %v9220_v4 = vpop.xlane.xlu2 %9219 }
0x3ee6   :  { %v9242_v34 = vsub.f32 %v15009_v8, %v9220_v4 }
0x3ee7   :  { %v9226_v47 = vpop.xlane.xlu0 %9225 }
0x3ee8   :  { %v15080_v37 = vpop.eup %11068  ;;  %v9270_v26 = vmul.f32 1.442695, %v9242_v34  ;;  %v9244_v12 = vsub.f32 %v15004_v55, %v9226_v47 }
0x3ee9   :  { %v9311_v0 = vsel %vm1214_vm3, %v15080_v37, 0.0 }
0x3eea   :  { %v15085_v29 = vpop.eup %11070  ;;  %11072 = vpow2.f32 %v9270_v26  ;;  %v9274_v59 = vmul.f32 1.442695, %v9244_v12  ;;  %9312 = vadd.xlane.f32.xlu2 %v9311_v0 }
0x3eeb   :  { %v9317_v16 = vsel %vm1214_vm3, %v15085_v29, 0.0 }
0x3eec   :  { %11074 = vpow2.f32 %v9274_v59  ;;  %9318 = vadd.xlane.f32.xlu1 %v9317_v16 }
0x3ef0   :  { %v15089_v8 = vpop.eup %11072 }
0x3ef1   :  { %v9314_v22 = vsel %vm1214_vm3, %v15089_v8, 0.0 }
0x3ef2   :  { %v15093_v32 = vpop.eup %11074  ;;  %9315 = vadd.xlane.f32.xlu0 %v9314_v22 }
0x3ef3   :  { %v9320_v55 = vsel %vm1214_vm3, %v15093_v32, 0.0 }
0x3ef4   :  { %9321 = vadd.xlane.f32.xlu2 %v9320_v55 }
0x3f1f   :  { %v9283_v36 = vpop.xlane.xlu2 %9282 }
0x3f20   :  { %11076 = vrcp.f32 %v9283_v36 }
0x3f26   :  { %v11077_v54 = vpop.eup %11076 }
0x3f27   :  { %v9343_v24 = vmul.f32 %v11077_v54, %v15016_v60  ;;  %v11343_v54 = vld [vmem:[%s15205_s15 + $0x30] sm:$0xff] }
0x3f29   :  { %v9359_v56 = vpack.c.bf16 %v9343_v24, %v9343_v24 }
0x3f2b   :  { %10178 = vmatmul.msk.bf16.vlgmr.msrb.gmra.mxu3 %vm1407_vm5, %v9359_v56 }
0x3f2c   :  { %9528 = vmatpush.bf16.msrb.mxu3 %v12180_v58 }
0x3f31   :  { %v9286_v61 = vpop.xlane.xlu2 %9285 }
0x3f32   :  { %11078 = vrcp.f32 %v9286_v61 }
0x3f35   :  { %v9280_v15 = vpop.xlane.xlu1 %9279 }
0x3f36   :  { %11080 = vrcp.f32 %v9280_v15 }
0x3f38   :  { %v11079_v53 = vpop.eup %11078 }
0x3f39   :  { %v9344_v19 = vmul.f32 %v11079_v53, %v15022_v31 }
0x3f3b   :  { %v9360_v33 = vpack.c.bf16 %v9344_v19, %v9344_v19  ;;  %v11345_v19 = vld [vmem:[%s15205_s15 + $0x20] sm:$0xff] }
0x3f3c   :  { %v11081_v21 = vpop.eup %11080 }
0x3f3d   :  { %v9342_v9 = vmul.f32 %v11081_v21, %v15027_v25  ;;  %v9229_v40 = vpop.xlane.xlu1 %9228  ;;  %10179 = vmatmul.msk.bf16.vlgmr.msra.gmra.mxu0 %vm1407_vm5, %v9360_v33  ;;  %v9289_v60 = vpop.xlane.xlu0 %9288  ;;  %v11346_v21 = vld [vmem:[%s15205_s15 + $0x18] sm:$0xff] }
0x3f3e   :  { %v9245_v63 = vsub.f32 %v15035_v1, %v9229_v40  ;;  %11082 = vrcp.f32 %v9289_v60  ;;  %9544 = vmatpush.bf16.msra.mxu0 %v12196_v2 }
0x3f3f   :  { %v9358_v58 = vpack.c.bf16 %v9342_v9, %v9342_v9  ;;  %v9295_v38 = vpop.xlane.xlu2 %9294  ;;  %v11349_v9 = vld [vmem:[%s15205_s15] sm:$0xff] }
0x3f40   :  { %v9276_v17 = vmul.f32 1.442695, %v9245_v63  ;;  %11084 = vrcp.f32 %v9295_v38 }
0x3f41   :  { %10177 = vmatmul.msk.bf16.vlgmr.msra.gmra.mxu2 %vm1407_vm5, %v9358_v58 }
0x3f42   :  { %11086 = vpow2.f32 %v9276_v17  ;;  %9512 = vmatpush.bf16.msra.mxu2 %v12177_v39 }
0x3f44   :  { %v11083_v31 = vpop.eup %11082 }
0x3f45   :  { %v9345_v25 = vmul.f32 %v11083_v31, %v15039_v52  ;;  %v9298_v41 = vpop.xlane.xlu0 %9297 }
0x3f46   :  { %v11085_v13 = vpop.eup %11084  ;;  %v9292_v30 = vpop.xlane.xlu1 %9291  ;;  %11088 = vrcp.f32 %v9298_v41 }
0x3f47   :  { %v9361_v1 = vpack.c.bf16 %v9345_v25, %v9345_v25  ;;  %v9347_v3 = vmul.f32 %v11085_v13, %v15045_v44  ;;  %11090 = vrcp.f32 %v9292_v30 }
0x3f48   :  { %v15109_v2 = vpop.eup %11086 }
0x3f49   :  { %v9363_v20 = vpack.c.bf16 %v9347_v3, %v9347_v3  ;;  %10180 = vmatmul.msk.bf16.vlgmr.msra.gmra.mxu1 %vm1407_vm5, %v9361_v1  ;;  %v9323_v6 = vsel %vm1214_vm3, %v15109_v2, 0.0  ;;  %vm15320_vm3 = vcmask 1045509  }
0x3f4a   :  { %9324 = vadd.xlane.f32.xlu0 %v9323_v6  ;;  %9560 = vmatpush.bf16.msra.mxu1 %v12185_v10 }
0x3f4b   :  { %10182 = vmatmul.msk.bf16.vlgmr.msra.gmra.mxu3 %vm1407_vm5, %v9363_v20 }
0x3f4c   :  { %v11089_v39 = vpop.eup %11088  ;;  %9592 = vmatpush.bf16.msra.mxu3 %v12214_v50 }
0x3f4d   :  { %v11091_v52 = vpop.eup %11090  ;;  %v9348_v44 = vmul.f32 %v11089_v39, %v15050_v23 }
0x3f4e   :  { %v9346_v27 = vmul.f32 %v11091_v52, %v15053_v45  ;;  %v9301_v48 = vpop.xlane.xlu1 %9300 }
0x3f4f   :  { %v9364_v14 = vpack.c.bf16 %v9348_v44, %v9348_v44  ;;  %11092 = vrcp.f32 %v9301_v48  ;;  %v9307_v35 = vpop.xlane.xlu0 %9306 }
0x3f50   :  { %v9362_v43 = vpack.c.bf16 %v9346_v27, %v9346_v27  ;;  %11094 = vrcp.f32 %v9307_v35 }
0x3f51   :  { %10183 = vmatmul.msk.bf16.vlgmr.msrb.gmra.mxu0 %vm1407_vm5, %v9364_v14 }
0x3f52   :  { %10181 = vmatmul.msk.bf16.vlgmr.msrb.gmra.mxu2 %vm1407_vm5, %v9362_v43  ;;  %9608 = vmatpush.bf16.msrb.mxu0 %v12262_v49 }
0x3f53   :  { %9576 = vmatpush.bf16.msrb.mxu2 %v12203_v57 }
0x3f55   :  { %v11093_v10 = vpop.eup %11092  ;;  %v9304_v50 = vpop.xlane.xlu2 %9303 }
0x3f56   :  { %v11095_v42 = vpop.eup %11094  ;;  %v9349_v23 = vmul.f32 %v11093_v10, %v15061_v28  ;;  %11096 = vrcp.f32 %v9304_v50  ;;  %v9310_v45 = vpop.xlane.xlu1 %9309 }
0x3f57   :  { %v9351_v46 = vmul.f32 %v11095_v42, %v15065_v5  ;;  %11098 = vrcp.f32 %v9310_v45 }
0x3f58   :  { %v9365_v4 = vpack.c.bf16 %v9349_v23, %v9349_v23 }
0x3f59   :  { %v9367_v34 = vpack.c.bf16 %v9351_v46, %v9351_v46 }
0x3f5a   :  { %10184 = vmatmul.msk.bf16.vlgmr.msrb.gmra.mxu1 %vm1407_vm5, %v9365_v4 }
0x3f5b   :  { %10186 = vmatmul.msk.bf16.vlgmr.msrb.gmra.mxu3 %vm1407_vm5, %v9367_v34  ;;  %9624 = vmatpush.bf16.msrb.mxu1 %v12209_v62  ;;  %v11342_v62 = vld [vmem:[%s15205_s15 + $0x38] sm:$0xff] }
0x3f5c   :  { %v11097_v49 = vpop.eup %11096 }
0x3f5d   :  { %v11099_v57 = vpop.eup %11098  ;;  %v9350_v47 = vmul.f32 %v11097_v49, %v15070_v18  ;;  %v9313_v26 = vpop.xlane.xlu2 %9312 }
0x3f5e   :  { %v9352_v28 = vmul.f32 %v11099_v57, %v15073_v11  ;;  %11100 = vrcp.f32 %v9313_v26 }
0x3f5f   :  { %v9366_v12 = vpack.c.bf16 %v9350_v47, %v9350_v47  ;;  %v9319_v0 = vpop.xlane.xlu1 %9318 }
0x3f60   :  { %v9368_v5 = vpack.c.bf16 %v9352_v28, %v9352_v28  ;;  %11102 = vrcp.f32 %v9319_v0 }
0x3f62   :  { %10185 = vmatmul.msk.bf16.vlgmr.msra.gmra.mxu2 %vm1407_vm5, %v9366_v12  ;;  %10187 = vmatmul.msk.bf16.vlgmr.msra.gmra.mxu0 %vm1407_vm5, %v9368_v5 }
0x3f63   :  { %9685 = vmatpush.bf16.msra.mxu2 %v11342_v62 }
0x3f64   :  { %v11101_v59 = vpop.eup %11100 }
0x3f65   :  { %v9353_v18 = vmul.f32 %v11101_v59, %v15080_v37  ;;  %v9316_v16 = vpop.xlane.xlu0 %9315  ;;  %v11344_v37 = vld [vmem:[%s15205_s15 + $0x28] sm:$0xff] }
0x3f66   :  { %v11103_v22 = vpop.eup %11102  ;;  %11104 = vrcp.f32 %v9316_v16 }
0x3f67   :  { %v9369_v11 = vpack.c.bf16 %v9353_v18, %v9353_v18  ;;  %v9355_v55 = vmul.f32 %v11103_v22, %v15085_v29  ;;  %v9322_v36 = vpop.xlane.xlu2 %9321  ;;  %9686 = vmatpush.bf16.msra.mxu2 %v11343_v54 }
0x3f68   :  { %11106 = vrcp.f32 %v9322_v36 }
0x3f69   :  { %v9371_v24 = vpack.c.bf16 %v9355_v55, %v9355_v55 }
0x3f6a   :  { %10188 = vmatmul.msk.bf16.vlgmr.msra.gmra.mxu1 %vm1407_vm5, %v9369_v11 }
0x3f6b   :  { %10190 = vmatmul.msk.bf16.vlgmr.msra.gmra.mxu3 %vm1407_vm5, %v9371_v24  ;;  %9687 = vmatpush.bf16.msra.mxu2 %v11344_v37 }
0x3f6c   :  { %v11105_v56 = vpop.eup %11104 }
0x3f6d   :  { %v9354_v29 = vmul.f32 %v11105_v56, %v15089_v8  ;;  %v11347_v8 = vld [vmem:[%s15205_s15 + $0x10] sm:$0xff] }
0x3f6e   :  { %v11107_v61 = vpop.eup %11106 }
0x3f6f   :  { %v9370_v15 = vpack.c.bf16 %v9354_v29, %v9354_v29  ;;  %v9356_v53 = vmul.f32 %v11107_v61, %v15093_v32  ;;  %9688 = vmatpush.bf16.msra.mxu2 %v11345_v19  ;;  %v11348_v32 = vld [vmem:[%s15205_s15 + $0x8] sm:$0xff]  ;;  %s11537_s15 = smov [#allocation14]  }
0x3f70   :  { %s9711_s0 = sshll.u32 %s11537_s15, 4  ;;  %s9712_s0 = int_to_ptr.vmem [resolvable:$true] %s9711_s0 }
0x3f71   :  { %v9372_v33 = vpack.c.bf16 %v9356_v53, %v9356_v53 }
0x3f72   :  { %10189 = vmatmul.msk.bf16.vlgmr.msrb.gmra.mxu2 %vm1407_vm5, %v9370_v15 }
0x3f73   :  { %10191 = vmatmul.msk.bf16.vlgmr.msrb.gmra.mxu0 %vm1407_vm5, %v9372_v33  ;;  %9689 = vmatpush.bf16.msra.mxu2 %v11346_v21 }
0x3f77   :  { %9690 = vmatpush.bf16.msra.mxu2 %v11347_v8 }
0x3f7b   :  { %9691 = vmatpush.bf16.msra.mxu2 %v11348_v32 }
0x3f7f   :  { %9692 = vmatpush.bf16.msra.mxu2 %v11349_v9 }
0x3fae   :  { %v9402_v40 = vpop.f32.mrf.mxu3 }
0x3faf   :  { %v9638_v17 = vrot.slane %v9402_v40, 7 }
0x3fb6   :  { %v9404_v60 = vpop.f32.mrf.mxu3 }
0x3fba   :  { %v9418_v63 = vpop.f32.mrf.mxu0 }
0x3fbb   :  { %v9640_v25 = vrot.slane %v9418_v63, 6 }
0x3fbd   :  { %v9325_v58 = vpop.xlane.xlu0 %9324 }
0x3fbe   :  { %11108 = vrcp.f32 %v9325_v58 }
0x3fc2   :  { %v9420_v38 = vpop.f32.mrf.mxu0 }
0x3fc4   :  { %v11109_v31 = vpop.eup %11108  ;;  %v9386_v41 = vpop.f32.mrf.mxu2 }
0x3fc5   :  { %v9357_v13 = vmul.f32 %v11109_v31, %v15109_v2  ;;  %v9639_v30 = vsel %vm1722_vm6, %v9638_v17, %v9386_v41 }
0x3fc6   :  { %v9641_v1 = vsel %vm1725_vm7, %v9640_v25, %v9639_v30  ;;  %v9434_v3 = vpop.f32.mrf.mxu1 }
0x3fc7   :  { %v9373_v20 = vpack.c.bf16 %v9357_v13, %v9357_v13  ;;  %v9642_v6 = vrot.slane %v9434_v3, 5 }
0x3fc9   :  { %v9643_v39 = vsel %vm1728_vm8, %v9642_v6, %v9641_v1  ;;  %10192 = vmatmul.msk.bf16.vlgmr.msrb.gmra.mxu1 %vm1407_vm5, %v9373_v20  ;;  %vm15323_vm5 = vmmov %vm15320_vm3 }
0x3fcc   :  { %v9388_v52 = vpop.f32.mrf.mxu2 }
0x3fce   :  { %v9436_v44 = vpop.f32.mrf.mxu1  ;;  %v9466_v27 = vpop.f32.mrf.mxu3 }
0x3fcf   :  { %v9482_v48 = vpop.f32.mrf.mxu0  ;;  %v9646_v10 = vrot.slane %v9466_v27, 3 }
0x3fd0   :  { %v9648_v42 = vrot.slane %v9482_v48, 2 }
0x3fd5   :  { %v9450_v14 = vpop.f32.mrf.mxu2 }
0x3fd6   :  { %v9644_v35 = vrot.slane %v9450_v14, 4  ;;  %v9468_v43 = vpop.f32.mrf.mxu3 }
0x3fd7   :  { %v9484_v2 = vpop.f32.mrf.mxu0  ;;  %v9498_v50 = vpop.f32.mrf.mxu1 }
0x3fd8   :  { %v9645_v23 = vsel %vm1731_vm10, %v9644_v35, %v9643_v39  ;;  %v9650_v45 = vrot.slane %v9498_v50, 1 }
0x3fd9   :  { %v9647_v46 = vsel %vm15320_vm3, %v9646_v10, %v9645_v23 }
0x3fda   :  { %v9649_v4 = vsel %vm15321_vm13, %v9648_v42, %v9647_v46 }
0x3fdb   :  { %v9651_v34 = vsel %vm15322_vm14, %v9650_v45, %v9649_v4 }
0x3fdd   :  { %v9452_v49 = vpop.f32.mrf.mxu2 }
0x3fde   :  { %v9530_v57 = vpop.f32.mrf.mxu3 }
0x3fdf   :  { %v9500_v47 = vpop.f32.mrf.mxu1  ;;  %v9546_v26 = vpop.f32.mrf.mxu0  ;;  %v9664_v28 = vrot.slane %v9530_v57, 7 }
0x3fe0   :  { %v9666_v12 = vrot.slane %v9546_v26, 6 }
0x3fe5   :  { %v9514_v0 = vpop.f32.mrf.mxu2 }
0x3fe6   :  { %v9665_v5 = vsel %vm1722_vm6, %v9664_v28, %v9514_v0  ;;  %v9532_v62 = vpop.f32.mrf.mxu3  ;;  %vm15324_vm6 = vmmov %vm15321_vm13 }
0x3fe7   :  { %v9667_v59 = vsel %vm1725_vm7, %v9666_v12, %v9665_v5  ;;  %v9548_v18 = vpop.f32.mrf.mxu0  ;;  %v9562_v16 = vpop.f32.mrf.mxu1  ;;  %vm15325_vm7 = vmmov %vm15322_vm14 }
0x3fe8   :  { %v9668_v22 = vrot.slane %v9562_v16, 5 }
0x3fea   :  { %v9669_v11 = vsel %vm1728_vm8, %v9668_v22, %v9667_v59  ;;  %vm15326_vm8 = vcmask 785408  }
0x3fed   :  { %v9516_v55 = vpop.f32.mrf.mxu2 }
0x3fee   :  { %v9594_v36 = vpop.f32.mrf.mxu3 }
0x3fef   :  { %v9564_v54 = vpop.f32.mrf.mxu1  ;;  %v9672_v61 = vrot.slane %v9594_v36, 3 }
0x3ff0   :  { %v9610_v24 = vpop.f32.mrf.mxu0 }
0x3ff1   :  { %v9674_v15 = vrot.slane %v9610_v24, 2 }
0x3ff5   :  { %v9578_v37 = vpop.f32.mrf.mxu2 }
0x3ff6   :  { %v9670_v56 = vrot.slane %v9578_v37, 4  ;;  %v9596_v29 = vpop.f32.mrf.mxu3 }
0x3ff8   :  { %v9671_v53 = vsel %vm1731_vm10, %v9670_v56, %v9669_v11  ;;  %v9612_v19 = vpop.f32.mrf.mxu0 }
0x3ff9   :  { %v9673_v33 = vsel %vm15323_vm5, %v9672_v61, %v9671_v53 }
0x3ffa   :  { %v9675_v21 = vsel %vm15324_vm6, %v9674_v15, %v9673_v33 }
0x3ffd   :  { %v9580_v8 = vpop.f32.mrf.mxu2 }
0x4046   :  { %v9626_v32 = vpop.f32.mrf.mxu1 }
0x4047   :  { %v9676_v9 = vrot.slane %v9626_v32, 1 }
0x4049   :  { %v9677_v40 = vsel %vm15325_vm7, %v9676_v9, %v9675_v21 }
0x404a   :  { %v10321_v60 = vpack.i.bf16 %v9677_v40, %v14840_v7 }
0x404c   :  { %10322 = vrot.lane.b32.xlu1 %v10321_v60, %s11529_s29  ;;  %s9713_s29 = sshll.u32 %s15206_s16, 4  ;;  %s9714_s29 = int_to_ptr.hbm [resolvable:$true] %s9713_s29 }
0x404e   :  { %v9628_v63 = vpop.f32.mrf.mxu1 }
0x40be   :  { %v10323_v58 = vpop.permute.xlu1 %10322 }
0x40bf   :  { %v10325_v38 = vunpack.i.h.bf16 %v10323_v58  ;;  %v10324_v17 = vunpack.i.l.bf16 %v10323_v58 }
0x40c1   :  { %v9681_v31 = vsel %vm215_vm0, %v9651_v34, %v10324_v17 }
0x40c2   :  { %v9682_v25 = vsel %vm682_vm9, %v9681_v31, %v10325_v38 }
0x40c3   :  { %v9683_v41 = vsel %vm15326_vm8, %v9682_v25, %v14853_v51 }
0x40c4   :  { %v9684_v13 = vpack.c.bf16 %v9683_v41, %v9683_v41 }
0x40c6   :  { %9693 = vmatmul.bf16.vlgmr.msra.gmra.mxu2 %v9684_v13 }
0x4149   :  { %v9694_v30 = vpop.f32.mrf.mxu2 }
0x414a   :  { %11110 = vtanh.f32 %v9694_v30 }
0x4150   :  { %v11111_v7 = vpop.eup %11110 }
0x4151   :  { %9706 = vst.msk [vmem:[#allocation14 + $0x38] sm:$0xff] %vm215_vm0, %v11111_v7  ;;  %v9696_v1 = vpop.f32.mrf.mxu2 }
0x4152   :  { %9719 = dma.vmem_to_hbm [thread:$0]  %s9712_s0, 1024, %s9714_s29, [#allocation5], %s11538_s18, %s11538_s18, %s11539_s5  }
0x4153   :  { %11526 = dma.done.wait [#allocation5], 1024  }
0x4154   :  { %11527 = vsyncadd [#allocation5], 4294966272 }
0x4155   :  { %9724 = vsyncpa [#allocation4], 1 }
0x4156   :  { %9725 = vsyncpa [#allocation7], 1 }
0x4157   :  { %9726 = vsyncpa [#allocation10], 1 }
0x4158   :  { %9727 = vsyncpa [#allocation13], 1 }
0x4159   :  { %9728 = vsyncpa [#allocation5], 1 }

</bundles_post_ra>
